<compile_context>
chip_gen: v5e
topology: v5e:2x2
jax: 0.10.0
libtpu: 0.0.40
codegen_flags: <defaults>
</compile_context>

<pallas_src>
import functools

import jax
import jax.numpy as jnp
from jax import lax
from jax.experimental import pallas as pl
from jax.experimental.pallas import tpu as pltpu

PATCH_NUMBER = 3               # path_postion has 18 = 2*3*3 entries -> 3 patches
C_IN, C_OUT = 512, 1024
HID = 256
NT = 2 * 3 * PATCH_NUMBER
PATH_POSITION = [1, 0, 0, 0, 1 / 3, -13 / 20,
                 3 / 4, 0, 0, 0, 1 / 4, -1 / 10,
                 1, 0, 0, 0, 1 / 3, 5 / 10]


# ---------------------------------------------------------------------------
# Kernel 1: conv3x3 as streamed tap matmuls (bf16 in / f32 acc) + BN partial
# statistics (sum, sum of squares) per output-row block.
# x_rows layout: (H, B*W (+pad), C_IN); tap (kh, kw) contribution to output row
# `oh` is x_rows[oh+kh, kw : kw+B*W, :] @ W[kh, kw].
# ---------------------------------------------------------------------------
def conv_stats_kernel(x_ref, w_ref, out_ref, stats_ref, acc_ref, *, bw, ow, w_img):
    kh = pl.program_id(1)

    @pl.when(kh == 0)
    def _():
        acc_ref[...] = jnp.zeros_like(acc_ref)

    for kw in range(3):                                   # static kw taps
        lhs = x_ref[kw:kw + bw, :]                        # (B*W, C_IN) bf16
        acc_ref[...] += jnp.dot(lhs, w_ref[3 * kh + kw],  # (C_IN, C_OUT) bf16
                                preferred_element_type=jnp.float32)

    @pl.when(kh == pl.num_programs(1) - 1)
    def _():
        acc = acc_ref[...]                                # (B*W, C_OUT) f32
        out_ref[...] = acc
        # Columns with (i mod W) >= OW are garbage (window spills into the next
        # batch image / zero pad); mask them out of the BN statistics.
        col = lax.broadcasted_iota(jnp.int32, (bw, 1), 0)
        valid = ((col % w_img) < ow).astype(jnp.float32)  # (B*W, 1)
        av = acc * valid
        stats_ref[0:1, :] = jnp.sum(av, axis=0, keepdims=True)
        stats_ref[1:2, :] = jnp.sum(av * av, axis=0, keepdims=True)


# ---------------------------------------------------------------------------
# Kernel 2: BN(affine, precomputed scale/shift) + ReLU + MaxPool2d(3,2,1) +
# adaptive_avg_pool2d(1,1) + fc_loc, fused per batch element.
# ---------------------------------------------------------------------------
def bn_pool_fc_kernel(y_ref, scale_ref, shift_ref, w1_ref, b1_ref, w2_ref, b2_ref,
                      theta_ref, pooled_ref, *, oh, ow):
    b = pl.program_id(0)

    y = y_ref[...][:, :ow, :]                             # crop garbage cols -> (OH, OW, C)
    y = jnp.maximum(y * scale_ref[0] + shift_ref[0], 0.0)

    ph = (oh - 1) // 2 + 1                                # MaxPool2d(3, 2, 1) output size
    pw = (ow - 1) // 2 + 1
    c = y.shape[-1]
    acc = jnp.zeros((1, c), jnp.float32)
    # TODO(synk): vectorize the stride-2 horizontal window max with strided ref
    # loads for large OH/OW; at small spatial sizes the unrolled form is cheap.
    for py in range(ph):
        r0, r1 = max(0, 2 * py - 1), min(oh, 2 * py + 2)
        row_max = jnp.max(y[r0:r1], axis=0)               # (OW, C) vertical slab max
        for px in range(pw):
            c0, c1 = max(0, 2 * px - 1), min(ow, 2 * px + 2)
            acc = acc + jnp.max(row_max[c0:c1], axis=0, keepdims=True)
    pooled_ref[pl.ds(b, 1), :] = acc * (1.0 / float(ph * pw))

    @pl.when(b == pl.num_programs(0) - 1)
    def _():
        pooled = pooled_ref[...]                          # (B, C_OUT)
        h = jnp.maximum(
            jnp.dot(pooled, w1_ref[...], preferred_element_type=jnp.float32)
            + b1_ref[...], 0.0)
        theta_ref[...] = (jnp.dot(h, w2_ref[...], preferred_element_type=jnp.float32)
                          + b2_ref[...])


# ---------------------------------------------------------------------------
# Kernel 3: bilinear grid_sample as a lane-dense matmul per batch element:
#   out[P*HW, C] = M[P*HW, HW] @ x[HW, C]
# ---------------------------------------------------------------------------
def grid_sample_kernel(m_ref, xt_ref, o_ref):
    o_ref[...] = jnp.dot(m_ref[...], xt_ref[...], preferred_element_type=jnp.float32)


# ---------------------------------------------------------------------------
# Glue: bilinear sampling weight matrix from one (2,3) theta (affine_grid +
# grid_sample index math, align_corners=False, padding_mode='zeros').
# Returns M of shape (H*W_out, H*W_in): out[p, c] = sum_q M[p, q] * x[q, c].
# TODO(synk): for large H*W, replace this dense HWxHW matrix with a separable /
# 4-tap gather formulation (O(HW*(H+W)) memory instead of O(HW^2)).
# ---------------------------------------------------------------------------
def build_sample_matrix(th, H, W):
    xs = (2.0 * jnp.arange(W, dtype=jnp.float32) + 1.0) / W - 1.0
    ys = (2.0 * jnp.arange(H, dtype=jnp.float32) + 1.0) / H - 1.0
    gx = th[0, 0] * xs[None, :] + th[0, 1] * ys[:, None] + th[0, 2]   # (H, W)
    gy = th[1, 0] * xs[None, :] + th[1, 1] * ys[:, None] + th[1, 2]
    ix = ((gx + 1.0) * W - 1.0) * 0.5
    iy = ((gy + 1.0) * H - 1.0) * 0.5
    x0 = jnp.floor(ix); x1 = x0 + 1.0
    y0 = jnp.floor(iy); y1 = y0 + 1.0
    wx1 = ix - x0; wx0 = 1.0 - wx1
    wy1 = iy - y0; wy0 = 1.0 - wy1

    def one_hot_valid(idx, n):
        valid = ((idx >= 0) & (idx <= n - 1)).astype(jnp.float32)
        o = jax.nn.one_hot(jnp.clip(idx, 0, n - 1).astype(jnp.int32), n,
                           dtype=jnp.float32)
        return o * valid[..., None]

    ohx0, ohx1 = one_hot_valid(x0, W), one_hot_valid(x1, W)   # (H, W, W_in)
    ohy0, ohy1 = one_hot_valid(y0, H), one_hot_valid(y1, H)   # (H, W, H_in)
    M = (wy0[..., None, None] * wx0[..., None, None] * ohy0[..., :, None] * ohx0[..., None, :]
         + wy0[..., None, None] * wx1[..., None, None] * ohy0[..., :, None] * ohx1[..., None, :]
         + wy1[..., None, None] * wx0[..., None, None] * ohy1[..., :, None] * ohx0[..., None, :]
         + wy1[..., None, None] * wx1[..., None, None] * ohy1[..., :, None] * ohx1[..., None, :])
    return M.reshape(H * W, H * W)       # rows: output pixel, cols: input pixel


# ---------------------------------------------------------------------------
# Forward pass
# ---------------------------------------------------------------------------
def patch_generator_forward(x, params):
    B, C, H, W = x.shape
    assert C == C_IN
    assert W % 8 == 0, "wrapper assumes W is a multiple of 8 (sublane tiling)"
    OH, OW = H - 2, W - 2                       # conv 3x3, no padding
    P = PATCH_NUMBER
    BW = B * W
    BWP = BW + 8                                # zero pad so kw-shifted slices stay in range

    # ---- layout glue (no im2col: each conv tap streams a shifted row view) ----
    x_nhwc = jnp.transpose(x, (0, 2, 3, 1))                               # (B, H, W, C)
    x_rows = jnp.transpose(x_nhwc, (1, 0, 2, 3)).reshape(H, BW, C_IN)     # (H, B*W, C)
    x_rows = jnp.pad(x_rows, ((0, 0), (0, BWP - BW), (0, 0))).astype(jnp.bfloat16)
    # conv weights: torch (C_OUT, C_IN, 3, 3) -> (9 taps, C_IN, C_OUT), bf16 for MXU
    w_taps = jnp.transpose(params["conv_w"], (2, 3, 1, 0)).reshape(9, C_IN, C_OUT)
    w_taps = w_taps.astype(jnp.bfloat16)

    # ---- K1: conv pre-activation + BN partial statistics ----
    conv_out, stats = pl.pallas_call(
        functools.partial(conv_stats_kernel, bw=BW, ow=OW, w_img=W),
        out_shape=(jax.ShapeDtypeStruct((OH, BW, C_OUT), jnp.float32),
                   jax.ShapeDtypeStruct((OH, 2, C_OUT), jnp.float32)),
        grid=(OH, 3),
        in_specs=[
            pl.BlockSpec((None, BWP, C_IN), lambda oh, kh: (oh + kh, 0, 0)),
            pl.BlockSpec((9, C_IN, C_OUT), lambda oh, kh: (0, 0, 0)),   # resident weights
        ],
        out_specs=(
            pl.BlockSpec((None, BW, C_OUT), lambda oh, kh: (oh, 0, 0)),
            pl.BlockSpec((None, 2, C_OUT), lambda oh, kh: (oh, 0, 0)),
        ),
        scratch_shapes=[pltpu.VMEM((BW, C_OUT), jnp.float32)],
        compiler_params=pltpu.CompilerParams(
            dimension_semantics=("parallel", "arbitrary"),
            vmem_limit_bytes=32 * 1024 * 1024),
    )(x_rows, w_taps)

    # ---- two-pass BatchNorm batch statistics (tiny reduction in glue) ----
    count = float(B * OH * OW)
    ssum = jnp.sum(stats[:, 0, :], axis=0)
    ssq = jnp.sum(stats[:, 1, :], axis=0)
    mean = ssum / count
    var = jnp.maximum(ssq / count - mean * mean, 0.0)
    inv_std = lax.rsqrt(var + 1e-5)
    scale = (params["bn_gamma"] * inv_std).reshape(1, C_OUT)
    shift = (params["bn_beta"] - mean * params["bn_gamma"] * inv_std).reshape(1, C_OUT)

    # ---- K2: BN + ReLU + maxpool + avgpool + fc_loc ----
    theta = pl.pallas_call(
        functools.partial(bn_pool_fc_kernel, oh=OH, ow=OW),
        out_shape=jax.ShapeDtypeStruct((B, NT), jnp.float32),
        grid=(B,),
        in_specs=[
            pl.BlockSpec((OH, W, C_OUT), lambda b: (0, b, 0)),
            pl.BlockSpec((1, C_OUT), lambda b: (0, 0)),
            pl.BlockSpec((1, C_OUT), lambda b: (0, 0)),
            pl.BlockSpec((C_OUT, HID), lambda b: (0, 0)),
            pl.BlockSpec((1, HID), lambda b: (0, 0)),
            pl.BlockSpec((HID, NT), lambda b: (0, 0)),
            pl.BlockSpec((1, NT), lambda b: (0, 0)),
        ],
        out_specs=pl.BlockSpec((B, NT), lambda b: (0, 0)),
        scratch_shapes=[pltpu.VMEM((B, C_OUT), jnp.float32)],
        compiler_params=pltpu.CompilerParams(dimension_semantics=("arbitrary",)),
    )(conv_out, scale, shift,
      params["w1"], params["b1"].reshape(1, HID),
      params["w2"], params["b2"].reshape(1, NT))

    theta_p = theta.reshape(B, P, 2, 3)

    # ---- K3: affine_grid + grid_sample, all 3 patches batched per image ----
    HW = H * W
    build = jax.vmap(jax.vmap(lambda th: build_sample_matrix(th, H, W)))
    Ms = build(theta_p).reshape(B, P * HW, HW)            # (B, P*HW, HW) f32
    x_seq = x_nhwc.reshape(B, HW, C_IN)                   # (B, HW, C)   f32

    sampled = pl.pallas_call(
        grid_sample_kernel,
        out_shape=jax.ShapeDtypeStruct((B, P * HW, C_IN), jnp.float32),
        grid=(B,),
        in_specs=[
            pl.BlockSpec((None, P * HW, HW), lambda b: (b, 0, 0)),
            pl.BlockSpec((None, HW, C_IN), lambda b: (b, 0, 0)),
        ],
        out_specs=pl.BlockSpec((None, P * HW, C_IN), lambda b: (b, 0, 0)),
        compiler_params=pltpu.CompilerParams(dimension_semantics=("parallel",)),
    )(Ms, x_seq)

    out = sampled.reshape(B, P, H, W, C_IN)
    out = jnp.transpose(out, (1, 0, 4, 2, 3))             # (P, B, C, H, W)
    return [out[i] for i in range(P)]


# ---------------------------------------------------------------------------
# Deterministic synthetic parameters (mirrors the module's shapes and the exact
# zero-weight / path_position-bias init of fc_loc[2]).  The Conv2d bias is not
# created: with batch-statistic BatchNorm it is mathematically cancelled.
# ---------------------------------------------------------------------------
def init_params(key):
    kw_, kw1, kb1 = jax.random.split(key, 3)
    fan_out = C_OUT * 9
    conv_w = jax.random.normal(kw_, (C_OUT, C_IN, 3, 3), jnp.float32) * jnp.sqrt(2.0 / fan_out)
    bound1 = 1.0 / jnp.sqrt(float(C_OUT))
    w1 = jax.random.uniform(kw1, (C_OUT, HID), jnp.float32, -bound1, bound1)
    b1 = jax.random.uniform(kb1, (HID,), jnp.float32, -bound1, bound1)
    return {
        "conv_w": conv_w,
        "bn_gamma": jnp.ones((C_OUT,), jnp.float32),
        "bn_beta": jnp.zeros((C_OUT,), jnp.float32),
        "w1": w1,                                   # stored (in, out); torch is (out, in)
        "b1": b1,
        "w2": jnp.zeros((HID, NT), jnp.float32),
        "b2": jnp.asarray(PATH_POSITION, jnp.float32),
    }


if __name__ == "__main__":
    key = jax.random.PRNGKey(0)
    kx, kp = jax.random.split(key)
    B, H, W = 2, 8, 8                 # small spatial size; channels fixed by the module
    x = jax.random.normal(kx, (B, C_IN, H, W), jnp.float32)
    params = init_params(kp)

    fwd = jax.jit(patch_generator_forward)
    outs = fwd(x, params)
    outs = [jax.block_until_ready(o) for o in outs]

    assert len(outs) == PATCH_NUMBER
    assert all(o.shape == (B, C_IN, H, W) for o in outs)
    assert all(bool(jnp.all(jnp.isfinite(o))) for o in outs)
    print("KERNEL_OK")
</pallas_src>

<mosaic_0001>
module attributes {stable_mosaic.version = 11 : i64} {
  func.func @conv_stats_kernel(%arg0: i32, %arg1: i32, %arg2: memref<1x24x512xbf16, #tpu.memory_space<vmem>>, %arg3: memref<9x512x1024xbf16, #tpu.memory_space<vmem>>, %arg4: memref<1x16x1024xf32, #tpu.memory_space<vmem>>, %arg5: memref<1x2x1024xf32, #tpu.memory_space<vmem>>, %arg6: memref<16x1024xf32, #tpu.memory_space<vmem>>) attributes {dimension_semantics = [#tpu.dimension_semantics<parallel>, #tpu.dimension_semantics<arbitrary>], iteration_bounds = array<i64: 6, 3>, scalar_prefetch = 0 : i64, scratch_operands = 1 : i64, tpu.core_type = #tpu.core_type<tc>, window_params = [{transform_indices = @transform_0, window_bounds = array<i64: 1, 24, 512>}, {pipeline_mode = #tpu.pipeline_mode<synchronous>, transform_indices = @transform_1, window_bounds = array<i64: 9, 512, 1024>}, {transform_indices = @transform_2, window_bounds = array<i64: 1, 16, 1024>}, {transform_indices = @transform_3, window_bounds = array<i64: 1, 2, 1024>}]} {
    %c0_i32 = arith.constant 0 : i32
    %0 = arith.cmpi eq, %arg1, %c0_i32 : i32
    %1 = arith.extui %0 : i1 to i32
    %c0_i32_0 = arith.constant 0 : i32
    %2 = arith.cmpi ne, %1, %c0_i32_0 : i32
    scf.if %2 {
      %cst_32 = arith.constant 0.000000e+00 : f32
      %39 = vector.broadcast %cst_32 : f32 to vector<16x1024xf32>
      %c0_33 = arith.constant 0 : index
      %c0_34 = arith.constant 0 : index
      %40 = vector.load %arg6[%c0_33, %c0_34] : memref<16x1024xf32, #tpu.memory_space<vmem>>, vector<16x1024xf32>
      tpu.vector_store %arg6[%c0_33, %c0_34], %39 {strides = array<i32>} : memref<16x1024xf32, #tpu.memory_space<vmem>>, vector<16x1024xf32>,
    } else {
    }
    %c0 = arith.constant 0 : index
    %c0_1 = arith.constant 0 : index
    %c0_2 = arith.constant 0 : index
    %3 = vector.load %arg2[%c0, %c0_1, %c0_2] : memref<1x24x512xbf16, #tpu.memory_space<vmem>>, vector<1x16x512xbf16>
    %4 = vector.shape_cast %3 : vector<1x16x512xbf16> to vector<16x512xbf16>
    %c0_3 = arith.constant 0 : index
    %c0_4 = arith.constant 0 : index
    %5 = vector.load %arg6[%c0_3, %c0_4] : memref<16x1024xf32, #tpu.memory_space<vmem>>, vector<16x1024xf32>
    %c3_i32 = arith.constant 3 : i32
    %6 = arith.muli %c3_i32, %arg1 : i32
    %c0_i32_5 = arith.constant 0 : i32
    %7 = arith.addi %6, %c0_i32_5 : i32
    %8 = arith.index_cast %7 : i32 to index
    %c0_6 = arith.constant 0 : index
    %c0_7 = arith.constant 0 : index
    %9 = vector.load %arg3[%8, %c0_6, %c0_7] : memref<9x512x1024xbf16, #tpu.memory_space<vmem>>, vector<1x512x1024xbf16>
    %10 = vector.shape_cast %9 : vector<1x512x1024xbf16> to vector<512x1024xbf16>
    %cst = arith.constant dense<0.000000e+00> : vector<16x1024xf32>
    %11 = tpu.matmul %4, %10, %cst {dimension_numbers = #tpu.dot_dimension_numbers<[1], [0], [0], [1], [0, 0, 1, 1], [], []>} : vector<16x512xbf16>, vector<512x1024xbf16>, vector<16x1024xf32> -> vector<16x1024xf32>
    %12 = arith.addf %5, %11 : vector<16x1024xf32>
    %c0_8 = arith.constant 0 : index
    %c0_9 = arith.constant 0 : index
    %13 = vector.load %arg6[%c0_8, %c0_9] : memref<16x1024xf32, #tpu.memory_space<vmem>>, vector<16x1024xf32>
    tpu.vector_store %arg6[%c0_8, %c0_9], %12 {strides = array<i32>} : memref<16x1024xf32, #tpu.memory_space<vmem>>, vector<16x1024xf32>,
    %c0_10 = arith.constant 0 : index
    %c1 = arith.constant 1 : index
    %c0_11 = arith.constant 0 : index
    %14 = vector.load %arg2[%c0_10, %c1, %c0_11] : memref<1x24x512xbf16, #tpu.memory_space<vmem>>, vector<1x16x512xbf16>
    %15 = vector.shape_cast %14 : vector<1x16x512xbf16> to vector<16x512xbf16>
    %c0_12 = arith.constant 0 : index
    %c0_13 = arith.constant 0 : index
    %16 = vector.load %arg6[%c0_12, %c0_13] : memref<16x1024xf32, #tpu.memory_space<vmem>>, vector<16x1024xf32>
    %c3_i32_14 = arith.constant 3 : i32
    %17 = arith.muli %c3_i32_14, %arg1 : i32
    %c1_i32 = arith.constant 1 : i32
    %18 = arith.addi %17, %c1_i32 : i32
    %19 = arith.index_cast %18 : i32 to index
    %c0_15 = arith.constant 0 : index
    %c0_16 = arith.constant 0 : index
    %20 = vector.load %arg3[%19, %c0_15, %c0_16] : memref<9x512x1024xbf16, #tpu.memory_space<vmem>>, vector<1x512x1024xbf16>
    %21 = vector.shape_cast %20 : vector<1x512x1024xbf16> to vector<512x1024xbf16>
    %cst_17 = arith.constant dense<0.000000e+00> : vector<16x1024xf32>
    %22 = tpu.matmul %15, %21, %cst_17 {dimension_numbers = #tpu.dot_dimension_numbers<[1], [0], [0], [1], [0, 0, 1, 1], [], []>} : vector<16x512xbf16>, vector<512x1024xbf16>, vector<16x1024xf32> -> vector<16x1024xf32>
    %23 = arith.addf %16, %22 : vector<16x1024xf32>
    %c0_18 = arith.constant 0 : index
    %c0_19 = arith.constant 0 : index
    %24 = vector.load %arg6[%c0_18, %c0_19] : memref<16x1024xf32, #tpu.memory_space<vmem>>, vector<16x1024xf32>
    tpu.vector_store %arg6[%c0_18, %c0_19], %23 {strides = array<i32>} : memref<16x1024xf32, #tpu.memory_space<vmem>>, vector<16x1024xf32>,
    %c0_20 = arith.constant 0 : index
    %c2 = arith.constant 2 : index
    %c0_21 = arith.constant 0 : index
    %25 = vector.load %arg2[%c0_20, %c2, %c0_21] : memref<1x24x512xbf16, #tpu.memory_space<vmem>>, vector<1x16x512xbf16>
    %26 = vector.shape_cast %25 : vector<1x16x512xbf16> to vector<16x512xbf16>
    %c0_22 = arith.constant 0 : index
    %c0_23 = arith.constant 0 : index
    %27 = vector.load %arg6[%c0_22, %c0_23] : memref<16x1024xf32, #tpu.memory_space<vmem>>, vector<16x1024xf32>
    %c3_i32_24 = arith.constant 3 : i32
    %28 = arith.muli %c3_i32_24, %arg1 : i32
    %c2_i32 = arith.constant 2 : i32
    %29 = arith.addi %28, %c2_i32 : i32
    %30 = arith.index_cast %29 : i32 to index
    %c0_25 = arith.constant 0 : index
    %c0_26 = arith.constant 0 : index
    %31 = vector.load %arg3[%30, %c0_25, %c0_26] : memref<9x512x1024xbf16, #tpu.memory_space<vmem>>, vector<1x512x1024xbf16>
    %32 = vector.shape_cast %31 : vector<1x512x1024xbf16> to vector<512x1024xbf16>
    %cst_27 = arith.constant dense<0.000000e+00> : vector<16x1024xf32>
    %33 = tpu.matmul %26, %32, %cst_27 {dimension_numbers = #tpu.dot_dimension_numbers<[1], [0], [0], [1], [0, 0, 1, 1], [], []>} : vector<16x512xbf16>, vector<512x1024xbf16>, vector<16x1024xf32> -> vector<16x1024xf32>
    %34 = arith.addf %27, %33 : vector<16x1024xf32>
    %c0_28 = arith.constant 0 : index
    %c0_29 = arith.constant 0 : index
    %35 = vector.load %arg6[%c0_28, %c0_29] : memref<16x1024xf32, #tpu.memory_space<vmem>>, vector<16x1024xf32>
    tpu.vector_store %arg6[%c0_28, %c0_29], %34 {strides = array<i32>} : memref<16x1024xf32, #tpu.memory_space<vmem>>, vector<16x1024xf32>,
    %c2_i32_30 = arith.constant 2 : i32
    %36 = arith.cmpi eq, %arg1, %c2_i32_30 : i32
    %37 = arith.extui %36 : i1 to i32
    %c0_i32_31 = arith.constant 0 : i32
    %38 = arith.cmpi ne, %37, %c0_i32_31 : i32
    scf.if %38 {
      %c0_32 = arith.constant 0 : index
      %c0_33 = arith.constant 0 : index
      %39 = vector.load %arg6[%c0_32, %c0_33] : memref<16x1024xf32, #tpu.memory_space<vmem>>, vector<16x1024xf32>
      %c0_34 = arith.constant 0 : index
      %c0_35 = arith.constant 0 : index
      %c0_36 = arith.constant 0 : index
      %40 = vector.load %arg4[%c0_34, %c0_35, %c0_36] : memref<1x16x1024xf32, #tpu.memory_space<vmem>>, vector<1x16x1024xf32>
      %41 = vector.shape_cast %40 : vector<1x16x1024xf32> to vector<16x1024xf32>
      %42 = vector.shape_cast %39 : vector<16x1024xf32> to vector<1x16x1024xf32>
      tpu.vector_store %arg4[%c0_34, %c0_35, %c0_36], %42 {strides = array<i32>} : memref<1x16x1024xf32, #tpu.memory_space<vmem>>, vector<1x16x1024xf32>,
      %43 = tpu.iota {dimensions = array<i32: 0>} : vector<16x1xi32>
      %c8_i32 = arith.constant 8 : i32
      %c0_i32_37 = arith.constant 0 : i32
      %44 = arith.cmpi eq, %c8_i32, %c0_i32_37 : i32
      %c1_i32_38 = arith.constant 1 : i32
      %45 = arith.select %44, %c1_i32_38, %c8_i32 : i32
      %46 = vector.broadcast %45 : i32 to vector<16x1xi32>
      %47 = arith.remsi %43, %46 : vector<16x1xi32>
      %c0_i32_39 = arith.constant 0 : i32
      %48 = vector.broadcast %c0_i32_39 : i32 to vector<16x1xi32>
      %49 = arith.cmpi ne, %47, %48 : vector<16x1xi32>
      %c0_i32_40 = arith.constant 0 : i32
      %50 = vector.broadcast %c0_i32_40 : i32 to vector<16x1xi32>
      %51 = arith.cmpi slt, %47, %50 : vector<16x1xi32>
      %c0_i32_41 = arith.constant 0 : i32
      %52 = arith.cmpi slt, %45, %c0_i32_41 : i32
      %53 = vector.broadcast %52 : i1 to vector<16x1xi1>
      %54 = vector.broadcast %53 : vector<16x1xi1> to vector<16x1xi1>
      %55 = arith.xori %51, %54 : vector<16x1xi1>
      %56 = arith.andi %55, %49 : vector<16x1xi1>
      %57 = vector.broadcast %45 : i32 to vector<16x1xi32>
      %58 = arith.addi %47, %57 : vector<16x1xi32>
      %59 = arith.select %56, %58, %47 : vector<16x1xi1>, vector<16x1xi32>
      %c6_i32 = arith.constant 6 : i32
      %60 = vector.broadcast %c6_i32 : i32 to vector<16x1xi32>
      %61 = arith.cmpi slt, %59, %60 : vector<16x1xi32>
      %62 = arith.extui %61 : vector<16x1xi1> to vector<16x1xi32>
      %63 = arith.sitofp %62 : vector<16x1xi32> to vector<16x1xf32>
      %64 = vector.broadcast %63 : vector<16x1xf32> to vector<16x1024xf32>
      %65 = arith.mulf %39, %64 : vector<16x1024xf32>
      %cst_42 = arith.constant dense<0.000000e+00> : vector<1024xf32>
      %66 = vector.multi_reduction <add>, %65, %cst_42 [0] : vector<16x1024xf32> to vector<1024xf32>
      %67 = vector.shape_cast %66 : vector<1024xf32> to vector<1x1024xf32>
      %c0_43 = arith.constant 0 : index
      %c0_44 = arith.constant 0 : index
      %c0_45 = arith.constant 0 : index
      %68 = vector.load %arg5[%c0_43, %c0_44, %c0_45] : memref<1x2x1024xf32, #tpu.memory_space<vmem>>, vector<1x1x1024xf32>
      %69 = vector.shape_cast %68 : vector<1x1x1024xf32> to vector<1x1024xf32>
      %70 = vector.shape_cast %67 : vector<1x1024xf32> to vector<1x1x1024xf32>
      tpu.vector_store %arg5[%c0_43, %c0_44, %c0_45], %70 {strides = array<i32>} : memref<1x2x1024xf32, #tpu.memory_space<vmem>>, vector<1x1x1024xf32>,
      %71 = arith.mulf %65, %65 : vector<16x1024xf32>
      %cst_46 = arith.constant dense<0.000000e+00> : vector<1024xf32>
      %72 = vector.multi_reduction <add>, %71, %cst_46 [0] : vector<16x1024xf32> to vector<1024xf32>
      %73 = vector.shape_cast %72 : vector<1024xf32> to vector<1x1024xf32>
      %c0_47 = arith.constant 0 : index
      %c1_48 = arith.constant 1 : index
      %c0_49 = arith.constant 0 : index
      %74 = vector.load %arg5[%c0_47, %c1_48, %c0_49] : memref<1x2x1024xf32, #tpu.memory_space<vmem>>, vector<1x1x1024xf32>
      %75 = vector.shape_cast %74 : vector<1x1x1024xf32> to vector<1x1024xf32>
      %76 = vector.shape_cast %73 : vector<1x1024xf32> to vector<1x1x1024xf32>
      tpu.vector_store %arg5[%c0_47, %c1_48, %c0_49], %76 {strides = array<i32>} : memref<1x2x1024xf32, #tpu.memory_space<vmem>>, vector<1x1x1024xf32>,
    } else {
    }
    return
  }
  func.func @transform_0(%arg0: i32, %arg1: i32) -> (i32, i32, i32) {
    %0 = arith.addi %arg0, %arg1 : i32
    %c0_i32 = arith.constant 0 : i32
    %c0_i32_0 = arith.constant 0 : i32
    %c0_i32_1 = arith.constant 0 : i32
    return %0, %c0_i32, %c0_i32_0 : i32, i32, i32
  }
  func.func @transform_1(%arg0: i32, %arg1: i32) -> (i32, i32, i32) {
    %c0_i32 = arith.constant 0 : i32
    %c0_i32_0 = arith.constant 0 : i32
    %c0_i32_1 = arith.constant 0 : i32
    %c0_i32_2 = arith.constant 0 : i32
    return %c0_i32, %c0_i32_0, %c0_i32_1 : i32, i32, i32
  }
  func.func @transform_2(%arg0: i32, %arg1: i32) -> (i32, i32, i32) {
    %c0_i32 = arith.constant 0 : i32
    %c0_i32_0 = arith.constant 0 : i32
    %c0_i32_1 = arith.constant 0 : i32
    return %arg0, %c0_i32, %c0_i32_0 : i32, i32, i32
  }
  func.func @transform_3(%arg0: i32, %arg1: i32) -> (i32, i32, i32) {
    %c0_i32 = arith.constant 0 : i32
    %c0_i32_0 = arith.constant 0 : i32
    %c0_i32_1 = arith.constant 0 : i32
    return %arg0, %c0_i32, %c0_i32_0 : i32, i32, i32
  }
}

module attributes {stable_mosaic.version = 11 : i64} {
  func.func @bn_pool_fc_kernel(%arg0: i32, %arg1: memref<6x8x1024xf32, #tpu.memory_space<vmem>>, %arg2: memref<1x1024xf32, #tpu.memory_space<vmem>>, %arg3: memref<1x1024xf32, #tpu.memory_space<vmem>>, %arg4: memref<1024x256xf32, #tpu.memory_space<vmem>>, %arg5: memref<1x256xf32, #tpu.memory_space<vmem>>, %arg6: memref<256x18xf32, #tpu.memory_space<vmem>>, %arg7: memref<1x18xf32, #tpu.memory_space<vmem>>, %arg8: memref<2x18xf32, #tpu.memory_space<vmem>>, %arg9: memref<2x1024xf32, #tpu.memory_space<vmem>>) attributes {dimension_semantics = [#tpu.dimension_semantics<arbitrary>], iteration_bounds = array<i64: 2>, scalar_prefetch = 0 : i64, scratch_operands = 1 : i64, tpu.core_type = #tpu.core_type<tc>, window_params = [{transform_indices = @transform_0, window_bounds = array<i64: 6, 8, 1024>}, {pipeline_mode = #tpu.pipeline_mode<synchronous>, transform_indices = @transform_1, window_bounds = array<i64: 1, 1024>}, {pipeline_mode = #tpu.pipeline_mode<synchronous>, transform_indices = @transform_2, window_bounds = array<i64: 1, 1024>}, {pipeline_mode = #tpu.pipeline_mode<synchronous>, transform_indices = @transform_3, window_bounds = array<i64: 1024, 256>}, {pipeline_mode = #tpu.pipeline_mode<synchronous>, transform_indices = @transform_4, window_bounds = array<i64: 1, 256>}, {pipeline_mode = #tpu.pipeline_mode<synchronous>, transform_indices = @transform_5, window_bounds = array<i64: 256, 18>}, {pipeline_mode = #tpu.pipeline_mode<synchronous>, transform_indices = @transform_6, window_bounds = array<i64: 1, 18>}, {pipeline_mode = #tpu.pipeline_mode<synchronous>, transform_indices = @transform_7, window_bounds = array<i64: 2, 18>}]} {
    %c0 = arith.constant 0 : index
    %c0_0 = arith.constant 0 : index
    %c0_1 = arith.constant 0 : index
    %0 = vector.load %arg1[%c0, %c0_0, %c0_1] : memref<6x8x1024xf32, #tpu.memory_space<vmem>>, vector<6x8x1024xf32>
    %1 = vector.extract_strided_slice %0 {offsets = [0, 0, 0], sizes = [6, 6, 1024], strides = [1, 1, 1]} : vector<6x8x1024xf32> to vector<6x6x1024xf32>
    %c0_2 = arith.constant 0 : index
    %c0_3 = arith.constant 0 : index
    %2 = vector.load %arg2[%c0_2, %c0_3] : memref<1x1024xf32, #tpu.memory_space<vmem>>, vector<1x1024xf32>
    %3 = vector.shape_cast %2 : vector<1x1024xf32> to vector<1024xf32>
    %4 = vector.shape_cast %3 : vector<1024xf32> to vector<1x1x1024xf32>
    %5 = vector.broadcast %4 : vector<1x1x1024xf32> to vector<6x6x1024xf32>
    %6 = arith.mulf %1, %5 : vector<6x6x1024xf32>
    %c0_4 = arith.constant 0 : index
    %c0_5 = arith.constant 0 : index
    %7 = vector.load %arg3[%c0_4, %c0_5] : memref<1x1024xf32, #tpu.memory_space<vmem>>, vector<1x1024xf32>
    %8 = vector.shape_cast %7 : vector<1x1024xf32> to vector<1024xf32>
    %9 = vector.shape_cast %8 : vector<1024xf32> to vector<1x1x1024xf32>
    %10 = vector.broadcast %9 : vector<1x1x1024xf32> to vector<6x6x1024xf32>
    %11 = arith.addf %6, %10 : vector<6x6x1024xf32>
    %cst = arith.constant 0.000000e+00 : f32
    %12 = vector.broadcast %cst : f32 to vector<6x6x1024xf32>
    %13 = arith.maximumf %11, %12 : vector<6x6x1024xf32>
    %cst_6 = arith.constant 0.000000e+00 : f32
    %14 = vector.broadcast %cst_6 : f32 to vector<1x1024xf32>
    %15 = vector.extract_strided_slice %13 {offsets = [0, 0, 0], sizes = [2, 6, 1024], strides = [1, 1, 1]} : vector<6x6x1024xf32> to vector<2x6x1024xf32>
    %cst_7 = arith.constant dense<0xFF800000> : vector<6x1024xf32>
    %16 = vector.multi_reduction <maximumf>, %15, %cst_7 [0] : vector<2x6x1024xf32> to vector<6x1024xf32>
    %17 = vector.extract_strided_slice %16 {offsets = [0, 0], sizes = [2, 1024], strides = [1, 1]} : vector<6x1024xf32> to vector<2x1024xf32>
    %cst_8 = arith.constant dense<0xFF800000> : vector<1024xf32>
    %18 = vector.multi_reduction <maximumf>, %17, %cst_8 [0] : vector<2x1024xf32> to vector<1024xf32>
    %19 = vector.shape_cast %18 : vector<1024xf32> to vector<1x1024xf32>
    %20 = arith.addf %14, %19 : vector<1x1024xf32>
    %21 = vector.extract_strided_slice %16 {offsets = [1, 0], sizes = [3, 1024], strides = [1, 1]} : vector<6x1024xf32> to vector<3x1024xf32>
    %cst_9 = arith.constant dense<0xFF800000> : vector<1024xf32>
    %22 = vector.multi_reduction <maximumf>, %21, %cst_9 [0] : vector<3x1024xf32> to vector<1024xf32>
    %23 = vector.shape_cast %22 : vector<1024xf32> to vector<1x1024xf32>
    %24 = arith.addf %20, %23 : vector<1x1024xf32>
    %25 = vector.extract_strided_slice %16 {offsets = [3, 0], sizes = [3, 1024], strides = [1, 1]} : vector<6x1024xf32> to vector<3x1024xf32>
    %cst_10 = arith.constant dense<0xFF800000> : vector<1024xf32>
    %26 = vector.multi_reduction <maximumf>, %25, %cst_10 [0] : vector<3x1024xf32> to vector<1024xf32>
    %27 = vector.shape_cast %26 : vector<1024xf32> to vector<1x1024xf32>
    %28 = arith.addf %24, %27 : vector<1x1024xf32>
    %29 = vector.extract_strided_slice %13 {offsets = [1, 0, 0], sizes = [3, 6, 1024], strides = [1, 1, 1]} : vector<6x6x1024xf32> to vector<3x6x1024xf32>
    %cst_11 = arith.constant dense<0xFF800000> : vector<6x1024xf32>
    %30 = vector.multi_reduction <maximumf>, %29, %cst_11 [0] : vector<3x6x1024xf32> to vector<6x1024xf32>
    %31 = vector.extract_strided_slice %30 {offsets = [0, 0], sizes = [2, 1024], strides = [1, 1]} : vector<6x1024xf32> to vector<2x1024xf32>
    %cst_12 = arith.constant dense<0xFF800000> : vector<1024xf32>
    %32 = vector.multi_reduction <maximumf>, %31, %cst_12 [0] : vector<2x1024xf32> to vector<1024xf32>
    %33 = vector.shape_cast %32 : vector<1024xf32> to vector<1x1024xf32>
    %34 = arith.addf %28, %33 : vector<1x1024xf32>
    %35 = vector.extract_strided_slice %30 {offsets = [1, 0], sizes = [3, 1024], strides = [1, 1]} : vector<6x1024xf32> to vector<3x1024xf32>
    %cst_13 = arith.constant dense<0xFF800000> : vector<1024xf32>
    %36 = vector.multi_reduction <maximumf>, %35, %cst_13 [0] : vector<3x1024xf32> to vector<1024xf32>
    %37 = vector.shape_cast %36 : vector<1024xf32> to vector<1x1024xf32>
    %38 = arith.addf %34, %37 : vector<1x1024xf32>
    %39 = vector.extract_strided_slice %30 {offsets = [3, 0], sizes = [3, 1024], strides = [1, 1]} : vector<6x1024xf32> to vector<3x1024xf32>
    %cst_14 = arith.constant dense<0xFF800000> : vector<1024xf32>
    %40 = vector.multi_reduction <maximumf>, %39, %cst_14 [0] : vector<3x1024xf32> to vector<1024xf32>
    %41 = vector.shape_cast %40 : vector<1024xf32> to vector<1x1024xf32>
    %42 = arith.addf %38, %41 : vector<1x1024xf32>
    %43 = vector.extract_strided_slice %13 {offsets = [3, 0, 0], sizes = [3, 6, 1024], strides = [1, 1, 1]} : vector<6x6x1024xf32> to vector<3x6x1024xf32>
    %cst_15 = arith.constant dense<0xFF800000> : vector<6x1024xf32>
    %44 = vector.multi_reduction <maximumf>, %43, %cst_15 [0] : vector<3x6x1024xf32> to vector<6x1024xf32>
    %45 = vector.extract_strided_slice %44 {offsets = [0, 0], sizes = [2, 1024], strides = [1, 1]} : vector<6x1024xf32> to vector<2x1024xf32>
    %cst_16 = arith.constant dense<0xFF800000> : vector<1024xf32>
    %46 = vector.multi_reduction <maximumf>, %45, %cst_16 [0] : vector<2x1024xf32> to vector<1024xf32>
    %47 = vector.shape_cast %46 : vector<1024xf32> to vector<1x1024xf32>
    %48 = arith.addf %42, %47 : vector<1x1024xf32>
    %49 = vector.extract_strided_slice %44 {offsets = [1, 0], sizes = [3, 1024], strides = [1, 1]} : vector<6x1024xf32> to vector<3x1024xf32>
    %cst_17 = arith.constant dense<0xFF800000> : vector<1024xf32>
    %50 = vector.multi_reduction <maximumf>, %49, %cst_17 [0] : vector<3x1024xf32> to vector<1024xf32>
    %51 = vector.shape_cast %50 : vector<1024xf32> to vector<1x1024xf32>
    %52 = arith.addf %48, %51 : vector<1x1024xf32>
    %53 = vector.extract_strided_slice %44 {offsets = [3, 0], sizes = [3, 1024], strides = [1, 1]} : vector<6x1024xf32> to vector<3x1024xf32>
    %cst_18 = arith.constant dense<0xFF800000> : vector<1024xf32>
    %54 = vector.multi_reduction <maximumf>, %53, %cst_18 [0] : vector<3x1024xf32> to vector<1024xf32>
    %55 = vector.shape_cast %54 : vector<1024xf32> to vector<1x1024xf32>
    %56 = arith.addf %52, %55 : vector<1x1024xf32>
    %cst_19 = arith.constant 0.111111112 : f32
    %57 = vector.broadcast %cst_19 : f32 to vector<1x1024xf32>
    %58 = arith.mulf %56, %57 : vector<1x1024xf32>
    %59 = arith.index_cast %arg0 : i32 to index
    %c0_20 = arith.constant 0 : index
    %60 = vector.load %arg9[%59, %c0_20] : memref<2x1024xf32, #tpu.memory_space<vmem>>, vector<1x1024xf32>
    tpu.vector_store %arg9[%59, %c0_20], %58 {strides = array<i32>} : memref<2x1024xf32, #tpu.memory_space<vmem>>, vector<1x1024xf32>,
    %c1_i32 = arith.constant 1 : i32
    %61 = arith.cmpi eq, %arg0, %c1_i32 : i32
    %62 = arith.extui %61 : i1 to i32
    %c0_i32 = arith.constant 0 : i32
    %63 = arith.cmpi ne, %62, %c0_i32 : i32
    scf.if %63 {
      %c0_21 = arith.constant 0 : index
      %c0_22 = arith.constant 0 : index
      %64 = vector.load %arg9[%c0_21, %c0_22] : memref<2x1024xf32, #tpu.memory_space<vmem>>, vector<2x1024xf32>
      %c0_23 = arith.constant 0 : index
      %c0_24 = arith.constant 0 : index
      %65 = vector.load %arg4[%c0_23, %c0_24] : memref<1024x256xf32, #tpu.memory_space<vmem>>, vector<1024x256xf32>
      %cst_25 = arith.constant dense<0.000000e+00> : vector<2x256xf32>
      %66 = tpu.matmul %64, %65, %cst_25 {dimension_numbers = #tpu.dot_dimension_numbers<[1], [0], [0], [1], [0, 0, 1, 1], [], []>} : vector<2x1024xf32>, vector<1024x256xf32>, vector<2x256xf32> -> vector<2x256xf32>
      %c0_26 = arith.constant 0 : index
      %c0_27 = arith.constant 0 : index
      %67 = vector.load %arg5[%c0_26, %c0_27] : memref<1x256xf32, #tpu.memory_space<vmem>>, vector<1x256xf32>
      %68 = vector.broadcast %67 : vector<1x256xf32> to vector<2x256xf32>
      %69 = arith.addf %66, %68 : vector<2x256xf32>
      %cst_28 = arith.constant 0.000000e+00 : f32
      %70 = vector.broadcast %cst_28 : f32 to vector<2x256xf32>
      %71 = arith.maximumf %69, %70 : vector<2x256xf32>
      %c0_29 = arith.constant 0 : index
      %c0_30 = arith.constant 0 : index
      %72 = vector.load %arg6[%c0_29, %c0_30] : memref<256x18xf32, #tpu.memory_space<vmem>>, vector<256x18xf32>
      %cst_31 = arith.constant dense<0.000000e+00> : vector<2x18xf32>
      %73 = tpu.matmul %71, %72, %cst_31 {dimension_numbers = #tpu.dot_dimension_numbers<[1], [0], [0], [1], [0, 0, 1, 1], [], []>} : vector<2x256xf32>, vector<256x18xf32>, vector<2x18xf32> -> vector<2x18xf32>
      %c0_32 = arith.constant 0 : index
      %c0_33 = arith.constant 0 : index
      %74 = vector.load %arg7[%c0_32, %c0_33] : memref<1x18xf32, #tpu.memory_space<vmem>>, vector<1x18xf32>
      %75 = vector.broadcast %74 : vector<1x18xf32> to vector<2x18xf32>
      %76 = arith.addf %73, %75 : vector<2x18xf32>
      %c0_34 = arith.constant 0 : index
      %c0_35 = arith.constant 0 : index
      %77 = vector.load %arg8[%c0_34, %c0_35] : memref<2x18xf32, #tpu.memory_space<vmem>>, vector<2x18xf32>
      tpu.vector_store %arg8[%c0_34, %c0_35], %76 {strides = array<i32>} : memref<2x18xf32, #tpu.memory_space<vmem>>, vector<2x18xf32>,
    } else {
    }
    return
  }
  func.func @transform_0(%arg0: i32) -> (i32, i32, i32) {
    %c0_i32 = arith.constant 0 : i32
    %c0_i32_0 = arith.constant 0 : i32
    %c0_i32_1 = arith.constant 0 : i32
    return %c0_i32, %arg0, %c0_i32_0 : i32, i32, i32
  }
  func.func @transform_1(%arg0: i32) -> (i32, i32) {
    %c0_i32 = arith.constant 0 : i32
    %c0_i32_0 = arith.constant 0 : i32
    %c0_i32_1 = arith.constant 0 : i32
    return %c0_i32, %c0_i32_0 : i32, i32
  }
  func.func @transform_2(%arg0: i32) -> (i32, i32) {
    %c0_i32 = arith.constant 0 : i32
    %c0_i32_0 = arith.constant 0 : i32
    %c0_i32_1 = arith.constant 0 : i32
    return %c0_i32, %c0_i32_0 : i32, i32
  }
  func.func @transform_3(%arg0: i32) -> (i32, i32) {
    %c0_i32 = arith.constant 0 : i32
    %c0_i32_0 = arith.constant 0 : i32
    %c0_i32_1 = arith.constant 0 : i32
    return %c0_i32, %c0_i32_0 : i32, i32
  }
  func.func @transform_4(%arg0: i32) -> (i32, i32) {
    %c0_i32 = arith.constant 0 : i32
    %c0_i32_0 = arith.constant 0 : i32
    %c0_i32_1 = arith.constant 0 : i32
    return %c0_i32, %c0_i32_0 : i32, i32
  }
  func.func @transform_5(%arg0: i32) -> (i32, i32) {
    %c0_i32 = arith.constant 0 : i32
    %c0_i32_0 = arith.constant 0 : i32
    %c0_i32_1 = arith.constant 0 : i32
    return %c0_i32, %c0_i32_0 : i32, i32
  }
  func.func @transform_6(%arg0: i32) -> (i32, i32) {
    %c0_i32 = arith.constant 0 : i32
    %c0_i32_0 = arith.constant 0 : i32
    %c0_i32_1 = arith.constant 0 : i32
    return %c0_i32, %c0_i32_0 : i32, i32
  }
  func.func @transform_7(%arg0: i32) -> (i32, i32) {
    %c0_i32 = arith.constant 0 : i32
    %c0_i32_0 = arith.constant 0 : i32
    %c0_i32_1 = arith.constant 0 : i32
    return %c0_i32, %c0_i32_0 : i32, i32
  }
}

module attributes {stable_mosaic.version = 11 : i64} {
  func.func @grid_sample_kernel(%arg0: i32, %arg1: memref<1x192x64xf32, #tpu.memory_space<vmem>>, %arg2: memref<1x64x512xf32, #tpu.memory_space<vmem>>, %arg3: memref<1x192x512xf32, #tpu.memory_space<vmem>>) attributes {dimension_semantics = [#tpu.dimension_semantics<parallel>], iteration_bounds = array<i64: 2>, scalar_prefetch = 0 : i64, scratch_operands = 0 : i64, tpu.core_type = #tpu.core_type<tc>, window_params = [{transform_indices = @transform_0, window_bounds = array<i64: 1, 192, 64>}, {transform_indices = @transform_1, window_bounds = array<i64: 1, 64, 512>}, {transform_indices = @transform_2, window_bounds = array<i64: 1, 192, 512>}]} {
    %c0 = arith.constant 0 : index
    %c0_0 = arith.constant 0 : index
    %c0_1 = arith.constant 0 : index
    %0 = vector.load %arg1[%c0, %c0_0, %c0_1] : memref<1x192x64xf32, #tpu.memory_space<vmem>>, vector<1x192x64xf32>
    %1 = vector.shape_cast %0 : vector<1x192x64xf32> to vector<192x64xf32>
    %c0_2 = arith.constant 0 : index
    %c0_3 = arith.constant 0 : index
    %c0_4 = arith.constant 0 : index
    %2 = vector.load %arg2[%c0_2, %c0_3, %c0_4] : memref<1x64x512xf32, #tpu.memory_space<vmem>>, vector<1x64x512xf32>
    %3 = vector.shape_cast %2 : vector<1x64x512xf32> to vector<64x512xf32>
    %cst = arith.constant dense<0.000000e+00> : vector<192x512xf32>
    %4 = tpu.matmul %1, %3, %cst {dimension_numbers = #tpu.dot_dimension_numbers<[1], [0], [0], [1], [0, 0, 1, 1], [], []>} : vector<192x64xf32>, vector<64x512xf32>, vector<192x512xf32> -> vector<192x512xf32>
    %c0_5 = arith.constant 0 : index
    %c0_6 = arith.constant 0 : index
    %c0_7 = arith.constant 0 : index
    %5 = vector.load %arg3[%c0_5, %c0_6, %c0_7] : memref<1x192x512xf32, #tpu.memory_space<vmem>>, vector<1x192x512xf32>
    %6 = vector.shape_cast %5 : vector<1x192x512xf32> to vector<192x512xf32>
    %7 = vector.shape_cast %4 : vector<192x512xf32> to vector<1x192x512xf32>
    tpu.vector_store %arg3[%c0_5, %c0_6, %c0_7], %7 {strides = array<i32>} : memref<1x192x512xf32, #tpu.memory_space<vmem>>, vector<1x192x512xf32>,
    return
  }
  func.func @transform_0(%arg0: i32) -> (i32, i32, i32) {
    %c0_i32 = arith.constant 0 : i32
    %c0_i32_0 = arith.constant 0 : i32
    %c0_i32_1 = arith.constant 0 : i32
    return %arg0, %c0_i32, %c0_i32_0 : i32, i32, i32
  }
  func.func @transform_1(%arg0: i32) -> (i32, i32, i32) {
    %c0_i32 = arith.constant 0 : i32
    %c0_i32_0 = arith.constant 0 : i32
    %c0_i32_1 = arith.constant 0 : i32
    return %arg0, %c0_i32, %c0_i32_0 : i32, i32, i32
  }
  func.func @transform_2(%arg0: i32) -> (i32, i32, i32) {
    %c0_i32 = arith.constant 0 : i32
    %c0_i32_0 = arith.constant 0 : i32
    %c0_i32_1 = arith.constant 0 : i32
    return %arg0, %c0_i32, %c0_i32_0 : i32, i32, i32
  }
}

</mosaic_0001>

<bundles_post_ra>
// kernel: patch_generator_forward.4
= control target key start
LH: loop header
LB: loop body
LE: loop exit
PB: predicated region body
PF: predicated region fallthrough
CT: control target
= control target key end

     0   :  { %s2150_s24 = smov 0   ;;  %s2152_s25 = smov 0   ;;  %s4116_s0 = inlined_call_operand.vmem [shape: f32[6,16,1024], index: 0, kind: input, shape index: {}]   ;;  %s4117_s1 = inlined_call_operand.vmem [shape: f32[1,1024], index: 1, kind: input, shape index: {}]   ;;  %s4118_s2 = inlined_call_operand.vmem [shape: f32[1,1024], index: 2, kind: input, shape index: {}]   ;;  %s4119_s3 = inlined_call_operand.vmem [shape: f32[1024,256], index: 3, kind: input, shape index: {}]   ;;  %s4120_s4 = inlined_call_operand.vmem [shape: f32[1,256], index: 4, kind: input, shape index: {}]   ;;  %s4121_s5 = inlined_call_operand.vmem [shape: f32[256,18], index: 5, kind: input, shape index: {}]   ;;  %s4122_s6 = inlined_call_operand.vmem [shape: f32[1,18], index: 6, kind: input, shape index: {}]   ;;  %s4123_s7 = inlined_call_operand.vmem [shape: f32[2,18], index: 7, kind: output, shape index: {}]  }
   0x1   :  { %s2154_s26 = smov 0  }
   0x2 LB: > { %s2166_s27 = sadd.s32 4294967295, %s2108_s26   ;;  %s2169_s28 = sadd.s32 1, %s2108_s26   ;;  %s2108_s26 = sphi %s2154_s26, %s4264_s26   ;;  %s2104_s25 = sphi %s2152_s25, %s4263_s25   ;;  %s2100_s24 = sphi %s2150_s24, %s4262_s24  }
   0x3   : > { %s21_s29 = ssub.s32 %s2108_s26, %s2169_s28  ;;  %s24_s30 = sadd.s32 1, %s2104_s25 }
   0x4   : > { %p22_p0 = scmp.eq.s32.totalorder %s21_s29, 0  ;;  %p31_p1 = scmp.ne.s32.totalorder %s2104_s25, %s2100_s24 }
   0x5   : > { %p32_p2 = scmp.eq.s32.totalorder %s2108_s26, 0  ;;  %p2048_p4 = scmp.ge.s32.totalorder %s2108_s26, 2 }
   0x6   : > { %s2178_s8 = scalar_select %p22_p0, %s2104_s25, %s24_s30  }
   0x7   : > { %p33_p3 = por %p32_p2, %p31_p1  ;;  %222 = sbr.rel (%p2048_p4) target bundleno = 64 (0x40), region = 40 }
   0xc   : > { %225 = sbr.rel (!%p33_p3) target bundleno = 64 (0x40), region = 44  ;;  %s227_s9 = sand.u32 (%p33_p3), 1, %s2104_s25  }
   0xd   : > { %s2057_s10 = sshll.u32 (%p33_p3), %s2108_s26, 6  ;;  %s2059_s11 = smul.u32 (%p33_p3), 384, %s227_s9 }
   0xe   : > { %s2186_s14 = scalar_lea.vmem (%p33_p3), %s4116_s0, %s2057_s10 }
   0xf   : > { %v245_v0 = vld [vmem:[%s2186_s14] sm:$0xff] (%p33_p3)  ;;  %v247_v1 = vld [vmem:[%s2186_s14 + $0x8] sm:$0xff] (%p33_p3)  ;;  %v249_v2 = vld [vmem:[%s2186_s14 + $0x10] sm:$0xff] (%p33_p3)  ;;  %s2191_s15 = scalar_lea.vmem (%p33_p3), [#allocation3], %s2059_s11 }
  0x10   : > { %246 = vst [vmem:[%s2191_s15] sm:$0xff] (%p33_p3), %v245_v0  ;;  %v251_v3 = vld [vmem:[%s2186_s14 + $0x18] sm:$0xff] (%p33_p3)  ;;  %v253_v4 = vld [vmem:[%s2186_s14 + $0x20] sm:$0xff] (%p33_p3)  ;;  %v255_v5 = vld [vmem:[%s2186_s14 + $0x28] sm:$0xff] (%p33_p3) }
  0x11   : > { %248 = vst [vmem:[%s2191_s15 + $0x8] sm:$0xff] %v247_v1  ;;  %v257_v6 = vld [vmem:[%s2186_s14 + $0x30] sm:$0xff]  ;;  %v259_v7 = vld [vmem:[%s2186_s14 + $0x38] sm:$0xff]  ;;  %v261_v8 = vld [vmem:[%s2186_s14 + $0x80] sm:$0xff] }
  0x12   : > { %250 = vst [vmem:[%s2191_s15 + $0x10] sm:$0xff] %v249_v2  ;;  %v263_v9 = vld [vmem:[%s2186_s14 + $0x88] sm:$0xff]  ;;  %v265_v10 = vld [vmem:[%s2186_s14 + $0x90] sm:$0xff]  ;;  %v267_v11 = vld [vmem:[%s2186_s14 + $0x98] sm:$0xff] }
  0x13   : > { %252 = vst [vmem:[%s2191_s15 + $0x18] sm:$0xff] %v251_v3  ;;  %v269_v12 = vld [vmem:[%s2186_s14 + $0xa0] sm:$0xff]  ;;  %v271_v13 = vld [vmem:[%s2186_s14 + $0xa8] sm:$0xff]  ;;  %v273_v14 = vld [vmem:[%s2186_s14 + $0xb0] sm:$0xff] }
  0x14   : > { %254 = vst [vmem:[%s2191_s15 + $0x20] sm:$0xff] %v253_v4  ;;  %v275_v15 = vld [vmem:[%s2186_s14 + $0xb8] sm:$0xff]  ;;  %v277_v16 = vld [vmem:[%s2186_s14 + $0x100] sm:$0xff]  ;;  %v279_v17 = vld [vmem:[%s2186_s14 + $0x108] sm:$0xff] }
  0x15   : > { %256 = vst [vmem:[%s2191_s15 + $0x28] sm:$0xff] %v255_v5  ;;  %v281_v18 = vld [vmem:[%s2186_s14 + $0x110] sm:$0xff]  ;;  %v283_v19 = vld [vmem:[%s2186_s14 + $0x118] sm:$0xff]  ;;  %v285_v20 = vld [vmem:[%s2186_s14 + $0x120] sm:$0xff] }
  0x16   : > { %258 = vst [vmem:[%s2191_s15 + $0x30] sm:$0xff] %v257_v6  ;;  %v287_v21 = vld [vmem:[%s2186_s14 + $0x128] sm:$0xff]  ;;  %v289_v22 = vld [vmem:[%s2186_s14 + $0x130] sm:$0xff]  ;;  %v291_v23 = vld [vmem:[%s2186_s14 + $0x138] sm:$0xff] }
  0x17   : > { %260 = vst [vmem:[%s2191_s15 + $0x38] sm:$0xff] %v259_v7  ;;  %v293_v24 = vld [vmem:[%s2186_s14 + $0x180] sm:$0xff]  ;;  %v295_v25 = vld [vmem:[%s2186_s14 + $0x188] sm:$0xff]  ;;  %v297_v26 = vld [vmem:[%s2186_s14 + $0x190] sm:$0xff] }
  0x18   : > { %262 = vst [vmem:[%s2191_s15 + $0x40] sm:$0xff] %v261_v8  ;;  %v299_v27 = vld [vmem:[%s2186_s14 + $0x198] sm:$0xff]  ;;  %v301_v28 = vld [vmem:[%s2186_s14 + $0x1a0] sm:$0xff]  ;;  %v303_v29 = vld [vmem:[%s2186_s14 + $0x1a8] sm:$0xff] }
  0x19   : > { %264 = vst [vmem:[%s2191_s15 + $0x48] sm:$0xff] %v263_v9  ;;  %v305_v30 = vld [vmem:[%s2186_s14 + $0x1b0] sm:$0xff]  ;;  %v307_v31 = vld [vmem:[%s2186_s14 + $0x1b8] sm:$0xff]  ;;  %v309_v32 = vld [vmem:[%s2186_s14 + $0x200] sm:$0xff] }
  0x1a   : > { %266 = vst [vmem:[%s2191_s15 + $0x50] sm:$0xff] %v265_v10  ;;  %v311_v33 = vld [vmem:[%s2186_s14 + $0x208] sm:$0xff]  ;;  %v313_v34 = vld [vmem:[%s2186_s14 + $0x210] sm:$0xff]  ;;  %v315_v35 = vld [vmem:[%s2186_s14 + $0x218] sm:$0xff] }
  0x1b   : > { %268 = vst [vmem:[%s2191_s15 + $0x58] sm:$0xff] %v267_v11  ;;  %v317_v36 = vld [vmem:[%s2186_s14 + $0x220] sm:$0xff]  ;;  %v319_v37 = vld [vmem:[%s2186_s14 + $0x228] sm:$0xff]  ;;  %v321_v38 = vld [vmem:[%s2186_s14 + $0x230] sm:$0xff] }
  0x1c   : > { %270 = vst [vmem:[%s2191_s15 + $0x60] sm:$0xff] %v269_v12  ;;  %v323_v39 = vld [vmem:[%s2186_s14 + $0x238] sm:$0xff]  ;;  %v325_v40 = vld [vmem:[%s2186_s14 + $0x280] sm:$0xff]  ;;  %v327_v41 = vld [vmem:[%s2186_s14 + $0x288] sm:$0xff] }
  0x1d   : > { %272 = vst [vmem:[%s2191_s15 + $0x68] sm:$0xff] %v271_v13  ;;  %v329_v42 = vld [vmem:[%s2186_s14 + $0x290] sm:$0xff]  ;;  %v331_v43 = vld [vmem:[%s2186_s14 + $0x298] sm:$0xff]  ;;  %v333_v44 = vld [vmem:[%s2186_s14 + $0x2a0] sm:$0xff] }
  0x1e   : > { %274 = vst [vmem:[%s2191_s15 + $0x70] sm:$0xff] %v273_v14  ;;  %v335_v45 = vld [vmem:[%s2186_s14 + $0x2a8] sm:$0xff]  ;;  %v337_v46 = vld [vmem:[%s2186_s14 + $0x2b0] sm:$0xff]  ;;  %v339_v47 = vld [vmem:[%s2186_s14 + $0x2b8] sm:$0xff] }
  0x1f   : > { %276 = vst [vmem:[%s2191_s15 + $0x78] sm:$0xff] %v275_v15 }
  0x20   : > { %278 = vst [vmem:[%s2191_s15 + $0x80] sm:$0xff] %v277_v16 }
  0x21   : > { %280 = vst [vmem:[%s2191_s15 + $0x88] sm:$0xff] %v279_v17 }
  0x22   : > { %282 = vst [vmem:[%s2191_s15 + $0x90] sm:$0xff] %v281_v18 }
  0x23   : > { %284 = vst [vmem:[%s2191_s15 + $0x98] sm:$0xff] %v283_v19 }
  0x24   : > { %286 = vst [vmem:[%s2191_s15 + $0xa0] sm:$0xff] %v285_v20 }
  0x25   : > { %288 = vst [vmem:[%s2191_s15 + $0xa8] sm:$0xff] %v287_v21 }
  0x26   : > { %290 = vst [vmem:[%s2191_s15 + $0xb0] sm:$0xff] %v289_v22 }
  0x27   : > { %292 = vst [vmem:[%s2191_s15 + $0xb8] sm:$0xff] %v291_v23 }
  0x28   : > { %294 = vst [vmem:[%s2191_s15 + $0xc0] sm:$0xff] %v293_v24 }
  0x29   : > { %296 = vst [vmem:[%s2191_s15 + $0xc8] sm:$0xff] %v295_v25 }
  0x2a   : > { %298 = vst [vmem:[%s2191_s15 + $0xd0] sm:$0xff] %v297_v26 }
  0x2b   : > { %300 = vst [vmem:[%s2191_s15 + $0xd8] sm:$0xff] %v299_v27 }
  0x2c   : > { %302 = vst [vmem:[%s2191_s15 + $0xe0] sm:$0xff] %v301_v28 }
  0x2d   : > { %304 = vst [vmem:[%s2191_s15 + $0xe8] sm:$0xff] %v303_v29 }
  0x2e   : > { %306 = vst [vmem:[%s2191_s15 + $0xf0] sm:$0xff] %v305_v30 }
  0x2f   : > { %308 = vst [vmem:[%s2191_s15 + $0xf8] sm:$0xff] %v307_v31 }
  0x30   : > { %310 = vst [vmem:[%s2191_s15 + $0x100] sm:$0xff] %v309_v32 }
  0x31   : > { %312 = vst [vmem:[%s2191_s15 + $0x108] sm:$0xff] %v311_v33 }
  0x32   : > { %314 = vst [vmem:[%s2191_s15 + $0x110] sm:$0xff] %v313_v34 }
  0x33   : > { %316 = vst [vmem:[%s2191_s15 + $0x118] sm:$0xff] %v315_v35 }
  0x34   : > { %318 = vst [vmem:[%s2191_s15 + $0x120] sm:$0xff] %v317_v36 }
  0x35   : > { %320 = vst [vmem:[%s2191_s15 + $0x128] sm:$0xff] %v319_v37 }
  0x36   : > { %322 = vst [vmem:[%s2191_s15 + $0x130] sm:$0xff] %v321_v38 }
  0x37   : > { %324 = vst [vmem:[%s2191_s15 + $0x138] sm:$0xff] %v323_v39 }
  0x38   : > { %326 = vst [vmem:[%s2191_s15 + $0x140] sm:$0xff] %v325_v40 }
  0x39   : > { %328 = vst [vmem:[%s2191_s15 + $0x148] sm:$0xff] %v327_v41 }
  0x3a   : > { %330 = vst [vmem:[%s2191_s15 + $0x150] sm:$0xff] %v329_v42 }
  0x3b   : > { %332 = vst [vmem:[%s2191_s15 + $0x158] sm:$0xff] %v331_v43 }
  0x3c   : > { %334 = vst [vmem:[%s2191_s15 + $0x160] sm:$0xff] %v333_v44 }
  0x3d   : > { %336 = vst [vmem:[%s2191_s15 + $0x168] sm:$0xff] %v335_v45 }
  0x3e   : > { %338 = vst [vmem:[%s2191_s15 + $0x170] sm:$0xff] %v337_v46 }
  0x3f   : > { %340 = vst [vmem:[%s2191_s15 + $0x178] sm:$0xff] %v339_v47 }
  0x40 PF: > { %p2051_p5 = scmp.ge.s32.totalorder %s2108_s26, 1  ;;  %p345_p6 = scmp.lt.s32.totalorder %s2108_s26, 3 }
  0x42   : > { %p346_p7 = pnand %p2051_p5, %p345_p6 }
  0x44   : > { %349 = sbr.rel (%p346_p7) target bundleno = 693 (0x2b5), region = 67 }
  0x49   : > { %s352_s16 = sand.u32 1, %s2100_s24   ;;  %v426_v48 = vld [vmem:[%s4117_s1] sm:$0xff]  ;;  %vm606_vm0 = vcmask 1045504   ;;  %vm631_vm1 = vcmask 1041408   ;;  %vm696_vm2 = vcmask 1043457   ;;  %vm761_vm3 = vcmask 1045507  }
  0x4a   : > { %s2060_s19 = smul.u32 384, %s352_s16  ;;  %v2292_v49 = vperm.slane %v426_v48, 0  ;;  %v2294_v50 = vperm.slane %v426_v48, 1  ;;  %v492_v51 = vld [vmem:[%s4118_s2] sm:$0xff]  ;;  %v2299_v52 = vperm.slane %v426_v48, 2  ;;  %v2301_v53 = vperm.slane %v426_v48, 3 }
  0x4b   : > { %v2303_v54 = vperm.slane %v426_v48, 4  ;;  %v2305_v55 = vperm.slane %v426_v48, 5  ;;  %v2307_v56 = vperm.slane %v426_v48, 6  ;;  %v2309_v57 = vperm.slane %v426_v48, 7  ;;  %s1311_s23 = sshra.s32 %s2166_s27, 1  ;;  %s1314_s24 = sand.u32 1, %s2166_s27 }
  0x4c   : > { %s2311_s22 = scalar_lea.vmem [#allocation3], %s2060_s19  ;;  %v2316_v61 = vperm.slane %v492_v51, 0  ;;  %v2318_v62 = vperm.slane %v492_v51, 1  ;;  %v2320_v63 = vperm.slane %v492_v51, 2  ;;  %v2327_v5 = vperm.slane %v492_v51, 3  ;;  %s2058_s26 = sshll.u32 %s1311_s23, 4 }
  0x4d   : > { %v378_v58 = vld [vmem:[%s2311_s22] sm:$0xff]  ;;  %v379_v59 = vld [vmem:[%s2311_s22 + $0x8] sm:$0xff]  ;;  %v380_v60 = vld [vmem:[%s2311_s22 + $0x10] sm:$0xff]  ;;  %v2329_v6 = vperm.slane %v492_v51, 4  ;;  %v2335_v11 = vperm.slane %v492_v51, 5  ;;  %v2337_v12 = vperm.slane %v492_v51, 6  ;;  %s1317_s29 = sadd.s32 %s2058_s26, %s1314_s24 }
  0x4e   : > { %v381_v0 = vld [vmem:[%s2311_s22 + $0x18] sm:$0xff]  ;;  %v382_v1 = vld [vmem:[%s2311_s22 + $0x20] sm:$0xff]  ;;  %v383_v2 = vld [vmem:[%s2311_s22 + $0x28] sm:$0xff]  ;;  %v444_v3 = vmul.f32 %v2292_v49, %v378_v58  ;;  %v445_v4 = vmul.f32 %v2294_v50, %v379_v59  ;;  %v446_v10 = vmul.f32 %v2299_v52, %v380_v60  ;;  %v2339_v13 = vperm.slane %v492_v51, 7  ;;  %s1318_s30 = scalar_lea.vmem [#allocation2], %s1317_s29  ;;  %p2054_p8 = scmp.ne.s32.totalorder %s2166_s27, 1 }
  0x4f   : > { %v384_v7 = vld [vmem:[%s2311_s22 + $0x30] sm:$0xff]  ;;  %v385_v8 = vld [vmem:[%s2311_s22 + $0x38] sm:$0xff]  ;;  %v386_v9 = vld [vmem:[%s2311_s22 + $0x40] sm:$0xff]  ;;  %v447_v17 = vmul.f32 %v2301_v53, %v381_v0  ;;  %v448_v18 = vmul.f32 %v2303_v54, %v382_v1  ;;  %v449_v19 = vmul.f32 %v2305_v55, %v383_v2  ;;  %vm1297_vm4 = vcmask 1040384  }
  0x50   : > { %v387_v14 = vld [vmem:[%s2311_s22 + $0x48] sm:$0xff]  ;;  %v388_v15 = vld [vmem:[%s2311_s22 + $0x50] sm:$0xff]  ;;  %v389_v16 = vld [vmem:[%s2311_s22 + $0x58] sm:$0xff]  ;;  %v450_v20 = vmul.f32 %v2307_v56, %v384_v7  ;;  %v451_v24 = vmul.f32 %v2309_v57, %v385_v8  ;;  %v452_v25 = vmul.f32 %v2292_v49, %v386_v9  ;;  %v2357_v27 = vadd.f32 %v2316_v61, %v444_v3 }
  0x51   : > { %v390_v21 = vld [vmem:[%s2311_s22 + $0x60] sm:$0xff]  ;;  %v391_v22 = vld [vmem:[%s2311_s22 + $0x68] sm:$0xff]  ;;  %v392_v23 = vld [vmem:[%s2311_s22 + $0x70] sm:$0xff]  ;;  %v2354_v26 = vmul.f32 %v2294_v50, %v387_v14  ;;  %v2363_v31 = vmul.f32 %v2299_v52, %v388_v15  ;;  %v2366_v32 = vmul.f32 %v2301_v53, %v389_v16  ;;  %v2372_v34 = vadd.f32 %v2318_v62, %v445_v4 }
  0x52   : > { %v393_v28 = vld [vmem:[%s2311_s22 + $0x78] sm:$0xff]  ;;  %v394_v29 = vld [vmem:[%s2311_s22 + $0x80] sm:$0xff]  ;;  %v395_v30 = vld [vmem:[%s2311_s22 + $0x88] sm:$0xff]  ;;  %v2369_v33 = vmul.f32 %v2303_v54, %v390_v21  ;;  %v2378_v38 = vmul.f32 %v2305_v55, %v391_v22  ;;  %v2381_v39 = vmul.f32 %v2307_v56, %v392_v23  ;;  %v2387_v41 = vadd.f32 %v2320_v63, %v446_v10 }
  0x53   : > { %v396_v35 = vld [vmem:[%s2311_s22 + $0x90] sm:$0xff]  ;;  %v397_v36 = vld [vmem:[%s2311_s22 + $0x98] sm:$0xff]  ;;  %v398_v37 = vld [vmem:[%s2311_s22 + $0xa0] sm:$0xff]  ;;  %v2384_v40 = vmul.f32 %v2309_v57, %v393_v28  ;;  %v2393_v45 = vmul.f32 %v2292_v49, %v394_v29  ;;  %v2396_v46 = vmul.f32 %v2294_v50, %v395_v30  ;;  %v2402_v48 = vadd.f32 %v2327_v5, %v447_v17 }
  0x54   : > { %v399_v42 = vld [vmem:[%s2311_s22 + $0xa8] sm:$0xff]  ;;  %v400_v43 = vld [vmem:[%s2311_s22 + $0xb0] sm:$0xff]  ;;  %v401_v44 = vld [vmem:[%s2311_s22 + $0xb8] sm:$0xff]  ;;  %v2399_v47 = vmul.f32 %v2299_v52, %v396_v35  ;;  %v2408_v60 = vmul.f32 %v2301_v53, %v397_v36  ;;  %v2411_v0 = vmul.f32 %v2303_v54, %v398_v37  ;;  %v2417_v2 = vadd.f32 %v2329_v6, %v448_v18 }
  0x55   : > { %4154 = vst [vmem:[#allocation4_spill] sm:$0xff] %v2402_v48  ;;  %v402_v51 = vld [vmem:[%s2311_s22 + $0xc0] sm:$0xff]  ;;  %v403_v58 = vld [vmem:[%s2311_s22 + $0xc8] sm:$0xff]  ;;  %v404_v59 = vld [vmem:[%s2311_s22 + $0xd0] sm:$0xff]  ;;  %v2414_v1 = vmul.f32 %v2305_v55, %v399_v42  ;;  %v466_v8 = vmul.f32 %v2307_v56, %v400_v43  ;;  %v467_v9 = vmul.f32 %v2309_v57, %v401_v44  ;;  %v2426_v14 = vadd.f32 %v2335_v11, %v449_v19 }
  0x56   : > { %4155 = vst [vmem:[#allocation5_spill] sm:$0xff] %v2417_v2  ;;  %v405_v3 = vld [vmem:[%s2311_s22 + $0xd8] sm:$0xff]  ;;  %v406_v4 = vld [vmem:[%s2311_s22 + $0xe0] sm:$0xff]  ;;  %v407_v7 = vld [vmem:[%s2311_s22 + $0xe8] sm:$0xff]  ;;  %v468_v10 = vmul.f32 %v2292_v49, %v402_v51  ;;  %v469_v18 = vmul.f32 %v2294_v50, %v403_v58  ;;  %v470_v21 = vmul.f32 %v2299_v52, %v404_v59  ;;  %v2435_v23 = vadd.f32 %v2337_v12, %v450_v20 }
  0x57   : > { %4156 = vst [vmem:[#allocation6_spill] sm:$0xff] %v2426_v14  ;;  %v408_v15 = vld [vmem:[%s2311_s22 + $0xf0] sm:$0xff]  ;;  %v409_v16 = vld [vmem:[%s2311_s22 + $0xf8] sm:$0xff]  ;;  %v410_v17 = vld [vmem:[%s2311_s22 + $0x100] sm:$0xff]  ;;  %v471_v22 = vmul.f32 %v2301_v53, %v405_v3  ;;  %v472_v30 = vmul.f32 %v2303_v54, %v406_v4  ;;  %v473_v35 = vmul.f32 %v2305_v55, %v407_v7  ;;  %v2444_v37 = vadd.f32 %v2339_v13, %v451_v24 }
  0x58   : > { %4157 = vst [vmem:[#allocation7_spill] sm:$0xff] %v2435_v23  ;;  %v411_v28 = vld [vmem:[%s2311_s22 + $0x108] sm:$0xff]  ;;  %v412_v19 = vld [vmem:[%s2311_s22 + $0x110] sm:$0xff]  ;;  %v413_v29 = vld [vmem:[%s2311_s22 + $0x118] sm:$0xff]  ;;  %v474_v36 = vmul.f32 %v2307_v56, %v408_v15  ;;  %v475_v44 = vmul.f32 %v2309_v57, %v409_v16  ;;  %v476_v51 = vmul.f32 %v2292_v49, %v410_v17  ;;  %v2453_v59 = vadd.f32 %v2316_v61, %v452_v25 }
  0x59   : > { %4158 = vst [vmem:[#allocation8_spill] sm:$0xff] %v2444_v37  ;;  %v414_v42 = vld [vmem:[%s2311_s22 + $0x120] sm:$0xff]  ;;  %v415_v20 = vld [vmem:[%s2311_s22 + $0x128] sm:$0xff]  ;;  %v416_v43 = vld [vmem:[%s2311_s22 + $0x130] sm:$0xff]  ;;  %v477_v58 = vmul.f32 %v2294_v50, %v411_v28  ;;  %v478_v7 = vmul.f32 %v2299_v52, %v412_v19  ;;  %v479_v15 = vmul.f32 %v2301_v53, %v413_v29  ;;  %v2463_v16 = vadd.f32 %v2318_v62, %v2354_v26 }
  0x5a   : > { %4159 = vst [vmem:[#allocation9_spill] sm:$0xff] %v2453_v59  ;;  %v417_v3 = vld [vmem:[%s2311_s22 + $0x138] sm:$0xff]  ;;  %v418_v24 = vld [vmem:[%s2311_s22 + $0x140] sm:$0xff]  ;;  %v419_v4 = vld [vmem:[%s2311_s22 + $0x148] sm:$0xff]  ;;  %v480_v37 = vmul.f32 %v2303_v54, %v414_v42  ;;  %v481_v25 = vmul.f32 %v2305_v55, %v415_v20  ;;  %v482_v59 = vmul.f32 %v2307_v56, %v416_v43  ;;  %v2473_v19 = vadd.f32 %v2320_v63, %v2363_v31 }
  0x5b   : > { %4160 = vst [vmem:[#allocation10_spill] sm:$0xff] %v2463_v16  ;;  %v420_v17 = vld [vmem:[%s2311_s22 + $0x150] sm:$0xff]  ;;  %v421_v28 = vld [vmem:[%s2311_s22 + $0x158] sm:$0xff]  ;;  %v422_v23 = vld [vmem:[%s2311_s22 + $0x160] sm:$0xff]  ;;  %v483_v14 = vmul.f32 %v2309_v57, %v417_v3  ;;  %v484_v48 = vmul.f32 %v2292_v49, %v418_v24  ;;  %v485_v26 = vmul.f32 %v2294_v50, %v419_v4  ;;  %v2483_v20 = vadd.f32 %v2327_v5, %v2366_v32 }
  0x5c   : > { %4161 = vst [vmem:[#allocation11_spill] sm:$0xff] %v2473_v19  ;;  %v423_v29 = vld [vmem:[%s2311_s22 + $0x168] sm:$0xff]  ;;  %v424_v2 = vld [vmem:[%s2311_s22 + $0x170] sm:$0xff]  ;;  %v425_v42 = vld [vmem:[%s2311_s22 + $0x178] sm:$0xff]  ;;  %v486_v16 = vmul.f32 %v2299_v52, %v420_v17  ;;  %v487_v43 = vmul.f32 %v2301_v53, %v421_v28  ;;  %v488_v3 = vmul.f32 %v2303_v54, %v422_v23  ;;  %v2490_v19 = vadd.f32 %v2329_v6, %v2369_v33 }
  0x5d   : > { %v489_v31 = vmul.f32 %v2305_v55, %v423_v29  ;;  %v490_v49 = vmul.f32 %v2307_v56, %v424_v2  ;;  %v491_v50 = vmul.f32 %v2309_v57, %v425_v42  ;;  %v2496_v52 = vadd.f32 %v2335_v11, %v2378_v38  ;;  %v4188_v4 = vld [vmem:[#allocation5_spill] sm:$0xff] }
  0x5e   : > { %v2500_v32 = vadd.f32 %v2337_v12, %v2381_v39  ;;  %v2504_v53 = vadd.f32 %v2339_v13, %v2384_v40  ;;  %v2508_v54 = vadd.f32 %v2316_v61, %v2393_v45  ;;  %v2512_v55 = vadd.f32 %v2318_v62, %v2396_v46 }
  0x5f   : > { %v2516_v56 = vadd.f32 %v2320_v63, %v2399_v47  ;;  %v2520_v57 = vadd.f32 %v2327_v5, %v2408_v60  ;;  %v2524_v33 = vadd.f32 %v2329_v6, %v2411_v0  ;;  %v2528_v38 = vadd.f32 %v2335_v11, %v2414_v1 }
  0x60   : > { %v2531_v39 = vadd.f32 %v2337_v12, %v466_v8  ;;  %v2534_v40 = vadd.f32 %v2339_v13, %v467_v9  ;;  %v2537_v45 = vadd.f32 %v2316_v61, %v468_v10  ;;  %v2540_v46 = vadd.f32 %v2318_v62, %v469_v18 }
  0x61   : > { %4162 = vst [vmem:[#allocation12_spill] sm:$0xff] %v2524_v33  ;;  %v2543_v47 = vadd.f32 %v2320_v63, %v470_v21  ;;  %v2546_v60 = vadd.f32 %v2327_v5, %v471_v22  ;;  %v2549_v0 = vadd.f32 %v2329_v6, %v472_v30  ;;  %v2552_v1 = vadd.f32 %v2335_v11, %v473_v35  ;;  %v4192_v28 = vld [vmem:[#allocation9_spill] sm:$0xff] }
  0x62   : > { %4163 = vst [vmem:[#allocation13_spill] sm:$0xff] %v2528_v38  ;;  %v2555_v2 = vadd.f32 %v2337_v12, %v474_v36  ;;  %v2558_v8 = vadd.f32 %v2339_v13, %v475_v44  ;;  %v2561_v9 = vadd.f32 %v2316_v61, %v476_v51  ;;  %v2564_v10 = vadd.f32 %v2318_v62, %v477_v58 }
  0x63   : > { %4164 = vst [vmem:[#allocation14_spill] sm:$0xff] %v2531_v39  ;;  %v2567_v18 = vadd.f32 %v2320_v63, %v478_v7  ;;  %v2570_v21 = vadd.f32 %v2327_v5, %v479_v15  ;;  %v2573_v22 = vadd.f32 %v2329_v6, %v480_v37  ;;  %v2576_v23 = vadd.f32 %v2335_v11, %v481_v25  ;;  %v4189_v7 = vld [vmem:[#allocation6_spill] sm:$0xff] }
  0x64   : > { %4165 = vst [vmem:[#allocation15_spill] sm:$0xff] %v2534_v40  ;;  %v2579_v30 = vadd.f32 %v2337_v12, %v482_v59  ;;  %v2582_v35 = vadd.f32 %v2339_v13, %v483_v14  ;;  %v2585_v36 = vadd.f32 %v2316_v61, %v484_v48  ;;  %v2588_v44 = vadd.f32 %v2318_v62, %v485_v26  ;;  %v4193_v25 = vld [vmem:[#allocation10_spill] sm:$0xff] }
  0x65   : > { %4166 = vst [vmem:[#allocation16_spill] sm:$0xff] %v2546_v60  ;;  %v2591_v51 = vadd.f32 %v2320_v63, %v486_v16  ;;  %v2594_v37 = vadd.f32 %v2327_v5, %v487_v43  ;;  %v2597_v58 = vadd.f32 %v2329_v6, %v488_v3  ;;  %v2600_v59 = vadd.f32 %v2335_v11, %v489_v31  ;;  %v4187_v5 = vld [vmem:[#allocation4_spill] sm:$0xff]  ;;  %v4190_v11 = vld [vmem:[#allocation7_spill] sm:$0xff] }
  0x66   : > { %4167 = vst [vmem:[#allocation17_spill] sm:$0xff] %v2549_v0  ;;  %v2603_v14 = vadd.f32 %v2337_v12, %v490_v49  ;;  %v2606_v61 = vadd.f32 %v2339_v13, %v491_v50  ;;  %v558_v62 = vmax.f32 %v2357_v27, 0.0  ;;  %v559_v63 = vmax.f32 %v2372_v34, 0.0  ;;  %v4191_v12 = vld [vmem:[#allocation8_spill] sm:$0xff]  ;;  %v4194_v27 = vld [vmem:[#allocation11_spill] sm:$0xff] }
  0x67   : > { %4168 = vst [vmem:[#allocation18_spill] sm:$0xff] %v2552_v1  ;;  %v560_v48 = vmax.f32 %v2387_v41, 0.0  ;;  %v561_v24 = vmax.f32 %v4187_v5, 0.0  ;;  %v562_v6 = vmax.f32 %v4188_v4, 0.0  ;;  %v563_v15 = vmax.f32 %v4189_v7, 0.0 }
  0x68   : > { %4169 = vst [vmem:[#allocation19_spill] sm:$0xff] %v2555_v2  ;;  %v564_v16 = vmax.f32 %v4190_v11, 0.0  ;;  %v565_v17 = vmax.f32 %v4191_v12, 0.0  ;;  %v566_v13 = vmax.f32 %v4192_v28, 0.0  ;;  %v567_v29 = vmax.f32 %v4193_v25, 0.0 }
  0x69   : > { %4170 = vst [vmem:[#allocation20_spill] sm:$0xff] %v2558_v8  ;;  %v568_v42 = vmax.f32 %v4194_v27, 0.0  ;;  %v569_v34 = vmax.f32 %v2483_v20, 0.0  ;;  %v570_v41 = vmax.f32 %v2490_v19, 0.0  ;;  %v571_v26 = vmax.f32 %v2496_v52, 0.0 }
  0x6a   : > { %4171 = vst [vmem:[#allocation21_spill] sm:$0xff] %v2561_v9  ;;  %v572_v43 = vmax.f32 %v2500_v32, 0.0  ;;  %v573_v3 = vmax.f32 %v2504_v53, 0.0  ;;  %v607_v4 = vsel %vm606_vm0, %v558_v62, -inf  ;;  %v2655_v5 = vsel %vm606_vm0, %v566_v13, -inf }
  0x6b   : > { %4172 = vst [vmem:[#allocation22_spill] sm:$0xff] %v2564_v10  ;;  %v2658_v11 = vmax.f32 %v607_v4, %v2655_v5  ;;  %v610_v28 = vsel %vm606_vm0, %v559_v63, -inf  ;;  %v2662_v12 = vsel %vm606_vm0, %v567_v29, -inf  ;;  %v613_v27 = vsel %vm606_vm0, %v560_v48, -inf }
  0x6c   : > { %4173 = vst [vmem:[#allocation23_spill] sm:$0xff] %v2567_v18  ;;  %v2666_v19 = vmax.f32 %v610_v28, %v2662_v12  ;;  %v2669_v20 = vsel %vm606_vm0, %v568_v42, -inf  ;;  %v616_v62 = vsel %vm606_vm0, %v561_v24, -inf  ;;  %v2673_v13 = vsel %vm606_vm0, %v569_v34, -inf }
  0x6d   : > { %4174 = vst [vmem:[#allocation24_spill] sm:$0xff] %v2570_v21  ;;  %v2676_v4 = vmax.f32 %v613_v27, %v2669_v20  ;;  %v2679_v63 = vmax.f32 %v616_v62, %v2673_v13  ;;  %v619_v29 = vsel %vm606_vm0, %v562_v6, -inf  ;;  %v2683_v48 = vsel %vm606_vm0, %v570_v41, -inf }
  0x6e   : > { %4175 = vst [vmem:[#allocation25_spill] sm:$0xff] %v2573_v22  ;;  %v2686_v28 = vmax.f32 %v619_v29, %v2683_v48  ;;  %v622_v42 = vsel %vm606_vm0, %v563_v15, -inf  ;;  %v2690_v24 = vsel %vm606_vm0, %v571_v26, -inf  ;;  %v625_v34 = vsel %vm606_vm0, %v564_v16, -inf }
  0x6f   : > { %4176 = vst [vmem:[#allocation26_spill] sm:$0xff] %v2576_v23  ;;  %v2694_v27 = vmax.f32 %v622_v42, %v2690_v24  ;;  %v2697_v62 = vsel %vm606_vm0, %v572_v43, -inf  ;;  %v628_v6 = vsel %vm606_vm0, %v565_v17, -inf  ;;  %v2701_v41 = vsel %vm606_vm0, %v573_v3, -inf }
  0x70   : > { %4177 = vst [vmem:[#allocation27_spill] sm:$0xff] %v2579_v30  ;;  %v2705_v15 = vmax.f32 %v625_v34, %v2697_v62  ;;  %v2708_v26 = vmax.f32 %v628_v6, %v2701_v41  ;;  %v632_v16 = vsel %vm631_vm1, %v2658_v11, -inf  ;;  %v639_v43 = vsel %vm631_vm1, %v2666_v19, -inf }
  0x71   : > { %4178 = vst [vmem:[#allocation28_spill] sm:$0xff] %v2582_v35  ;;  %v646_v17 = vsel %vm631_vm1, %v2676_v4, -inf  ;;  %v653_v3 = vsel %vm631_vm1, %v2679_v63, -inf  ;;  %v633_v42 = vrot.slane %v632_v16, 4  ;;  %v640_v29 = vrot.slane %v639_v43, 4 }
  0x72   : > { %4179 = vst [vmem:[#allocation29_spill] sm:$0xff] %v2585_v36  ;;  %v647_v34 = vrot.slane %v646_v17, 4  ;;  %v654_v52 = vrot.slane %v653_v3, 4  ;;  %v660_v6 = vsel %vm631_vm1, %v2686_v28, -inf  ;;  %v667_v25 = vsel %vm631_vm1, %v2694_v27, -inf }
  0x73   : > { %4180 = vst [vmem:[#allocation30_spill] sm:$0xff] %v2588_v44  ;;  %v674_v7 = vsel %vm631_vm1, %v2705_v15, -inf  ;;  %v681_v50 = vsel %vm631_vm1, %v2708_v26, -inf  ;;  %v634_v53 = vmax.f32 %v632_v16, %v633_v42  ;;  %v641_v49 = vmax.f32 %v639_v43, %v640_v29 }
  0x74   : > { %4181 = vst [vmem:[#allocation31_spill] sm:$0xff] %v2591_v51  ;;  %v648_v32 = vmax.f32 %v646_v17, %v647_v34  ;;  %v655_v31 = vmax.f32 %v653_v3, %v654_v52  ;;  %v661_v35 = vrot.slane %v660_v6, 4  ;;  %v668_v30 = vrot.slane %v667_v25, 4 }
  0x75   : > { %4182 = vst [vmem:[#allocation32_spill] sm:$0xff] %v2594_v37  ;;  %v682_v23 = vrot.slane %v681_v50, 4  ;;  %v642_v22 = vrot.slane %v641_v49, 2  ;;  %vm1299_vm5 = vcmask 1042434   ;;  %vm1302_vm6 = vcmask 1044484  }
  0x76   : > { %4183 = vst [vmem:[#allocation33_spill] sm:$0xff] %v2597_v58  ;;  %v635_v58 = vrot.slane %v634_v53, 2  ;;  %v649_v37 = vrot.slane %v648_v32, 2  ;;  %v656_v21 = vrot.slane %v655_v31, 2  ;;  %v662_v51 = vmax.f32 %v660_v6, %v661_v35 }
  0x77   : > { %4184 = vst [vmem:[#allocation34_spill] sm:$0xff] %v2600_v59  ;;  %v675_v59 = vrot.slane %v674_v7, 4  ;;  %v669_v18 = vmax.f32 %v667_v25, %v668_v30  ;;  %v683_v10 = vmax.f32 %v681_v50, %v682_v23  ;;  %v643_v9 = vmax.f32 %v641_v49, %v642_v22 }
  0x78   : > { %4185 = vst [vmem:[#allocation35_spill] sm:$0xff] %v2603_v14  ;;  %v636_v36 = vmax.f32 %v634_v53, %v635_v58  ;;  %v650_v8 = vmax.f32 %v648_v32, %v649_v37  ;;  %v663_v16 = vrot.slane %v662_v51, 2  ;;  %v725_v25 = vsel %vm696_vm2, %v2686_v28, -inf }
  0x79   : > { %4186 = vst [vmem:[#allocation36_spill] sm:$0xff] %v2606_v61  ;;  %v676_v44 = vmax.f32 %v674_v7, %v675_v59  ;;  %v670_v29 = vrot.slane %v669_v18, 2  ;;  %v684_v52 = vrot.slane %v683_v10, 2  ;;  %v644_v3 = vrot.slane %v643_v9, 1 }
  0x7a   : > { %4195 = vst [vmem:[#allocation4_spill] sm:$0xff] %v2673_v13  ;;  %v637_v17 = vrot.slane %v636_v36, 1  ;;  %v651_v42 = vrot.slane %v650_v8, 1  ;;  %v664_v40 = vmax.f32 %v662_v51, %v663_v16  ;;  %vm1304_vm7 = vcmask 1046534  }
  0x7b   : > { %4196 = vst [vmem:[#allocation5_spill] sm:$0xff] %v2683_v48  ;;  %v677_v43 = vrot.slane %v676_v44, 2  ;;  %v2728_v35 = vmax.f32 %v683_v10, %v684_v52  ;;  %v704_v10 = vsel %vm696_vm2, %v2666_v19, -inf  ;;  %v726_v52 = vrot.slane %v725_v25, 4 }
  0x7c   : > { %4197 = vst [vmem:[#allocation6_spill] sm:$0xff] %v2690_v24  ;;  %v2732_v30 = vmax.f32 %v636_v36, %v637_v17  ;;  %v2736_v37 = vmax.f32 %v650_v8, %v651_v42  ;;  %v665_v59 = vrot.slane %v664_v40, 1  ;;  %v718_v36 = vsel %vm696_vm2, %v2679_v63, -inf }
  0x7d   : > { %4198 = vst [vmem:[#allocation7_spill] sm:$0xff] %v2697_v62  ;;  %v671_v62 = vmax.f32 %v669_v18, %v670_v29  ;;  %v2726_v2 = vmax.f32 %v676_v44, %v677_v43  ;;  %v697_v18 = vsel %vm696_vm2, %v2658_v11, -inf  ;;  %v711_v44 = vsel %vm696_vm2, %v2676_v4, -inf }
  0x7e   : > { %4199 = vst [vmem:[#allocation8_spill] sm:$0xff] %v2701_v41  ;;  %v657_v41 = vmax.f32 %v655_v31, %v656_v21  ;;  %v2734_v21 = vmax.f32 %v643_v9, %v644_v3  ;;  %v2748_v9 = vmax.f32 %v664_v40, %v665_v59  ;;  %v686_v49 = vrot.slane %v2728_v35, 1 }
  0x7f   : > { %v672_v31 = vrot.slane %v671_v62, 1  ;;  %v679_v51 = vrot.slane %v2726_v2, 1  ;;  %v698_v50 = vrot.slane %v697_v18, 4  ;;  %v705_v32 = vrot.slane %v704_v10, 4 }
  0x80   : > { %v658_v34 = vrot.slane %v657_v41, 1  ;;  %v712_v53 = vrot.slane %v711_v44, 4  ;;  %v719_v7 = vrot.slane %v718_v36, 4  ;;  %v739_v40 = vsel %vm696_vm2, %v2705_v15, -inf }
  0x81   : > { %v2750_v8 = vmax.f32 %v671_v62, %v672_v31  ;;  %v746_v62 = vsel %vm696_vm2, %v2708_v26, -inf  ;;  %v699_v6 = vmax.f32 %v697_v18, %v698_v50  ;;  %v706_v16 = vmax.f32 %v704_v10, %v705_v32 }
  0x82   : > { %v2738_v58 = vmax.f32 %v657_v41, %v658_v34  ;;  %v732_v41 = vsel %vm696_vm2, %v2694_v27, -inf  ;;  %v713_v29 = vmax.f32 %v711_v44, %v712_v53  ;;  %v720_v43 = vmax.f32 %v718_v36, %v719_v7 }
  0x83   : > { %v733_v17 = vrot.slane %v732_v41, 4  ;;  %v740_v3 = vrot.slane %v739_v40, 4  ;;  %v747_v42 = vrot.slane %v746_v62, 4  ;;  %v700_v34 = vrot.slane %v699_v6, 2 }
  0x84   : > { %v707_v59 = vrot.slane %v706_v16, 2  ;;  %v714_v31 = vrot.slane %v713_v29, 2  ;;  %v721_v22 = vrot.slane %v720_v43, 2  ;;  %v727_v23 = vmax.f32 %v725_v25, %v726_v52 }
  0x85   : > { %v734_v61 = vmax.f32 %v732_v41, %v733_v17  ;;  %v741_v14 = vmax.f32 %v739_v40, %v740_v3  ;;  %v748_v39 = vmax.f32 %v746_v62, %v747_v42  ;;  %v701_v1 = vmax.f32 %v699_v6, %v700_v34 }
  0x86   : > { %v708_v24 = vmax.f32 %v706_v16, %v707_v59  ;;  %v715_v38 = vmax.f32 %v713_v29, %v714_v31  ;;  %v722_v48 = vmax.f32 %v720_v43, %v721_v22  ;;  %v728_v18 = vrot.slane %v727_v23, 2 }
  0x87   : > { %v735_v10 = vrot.slane %v734_v61, 2  ;;  %v742_v44 = vrot.slane %v741_v14, 2  ;;  %v749_v36 = vrot.slane %v748_v39, 2  ;;  %v702_v50 = vrot.slane %v701_v1, 1 }
  0x88   : > { %v709_v32 = vrot.slane %v708_v24, 1  ;;  %v716_v53 = vrot.slane %v715_v38, 1  ;;  %v723_v7 = vrot.slane %v722_v48, 1  ;;  %v729_v13 = vmax.f32 %v727_v23, %v728_v18 }
  0x89   : > { %v736_v0 = vmax.f32 %v734_v61, %v735_v10  ;;  %v743_v33 = vmax.f32 %v741_v14, %v742_v44  ;;  %v750_v60 = vmax.f32 %v748_v39, %v749_v36  ;;  %v703_v25 = vmax.f32 %v701_v1, %v702_v50 }
  0x8a   : > { %v710_v41 = vmax.f32 %v708_v24, %v709_v32  ;;  %v717_v40 = vmax.f32 %v715_v38, %v716_v53  ;;  %v724_v62 = vmax.f32 %v722_v48, %v723_v7  ;;  %v730_v6 = vrot.slane %v729_v13, 1 }
  0x8b   : > { %v737_v16 = vrot.slane %v736_v0, 1  ;;  %v744_v29 = vrot.slane %v743_v33, 1  ;;  %v751_v22 = vrot.slane %v750_v60, 1  ;;  %v2763_v43 = vmax.f32 %v2726_v2, %v679_v51 }
  0x8c   : > { %v2766_v52 = vmax.f32 %v2728_v35, %v686_v49  ;;  %v2769_v17 = vadd.f32 %v703_v25, %v2732_v30  ;;  %v2772_v14 = vadd.f32 %v710_v41, %v2734_v21  ;;  %v731_v39 = vmax.f32 %v729_v13, %v730_v6 }
  0x8d   : > { %v738_v1 = vmax.f32 %v736_v0, %v737_v16  ;;  %v2775_v38 = vadd.f32 %v717_v40, %v2736_v37  ;;  %v2778_v61 = vadd.f32 %v724_v62, %v2738_v58  ;;  %v745_v48 = vmax.f32 %v743_v33, %v744_v29 }
  0x8e   : > { %v752_v2 = vmax.f32 %v750_v60, %v751_v22  ;;  %v4200_v24 = vmax.f32 %v2508_v54, 0.0  ;;  %v2786_v23 = vadd.f32 %v731_v39, %v2748_v9  ;;  %v4201_v0 = vmax.f32 %v2537_v45, 0.0 }
  0x8f   : > { %v2789_v13 = vadd.f32 %v738_v1, %v2750_v8  ;;  %v4202_v33 = vmax.f32 %v2512_v55, 0.0  ;;  %v762_v54 = vsel %vm761_vm3, %v2658_v11, -inf  ;;  %v769_v21 = vsel %vm761_vm3, %v2666_v19, -inf }
  0x90   : > { %v2783_v35 = vsel %vm606_vm0, %v4200_v24, -inf  ;;  %v2794_v30 = vsel %vm606_vm0, %v4201_v0, -inf  ;;  %v776_v37 = vsel %vm761_vm3, %v2676_v4, -inf  ;;  %v783_v45 = vsel %vm761_vm3, %v2679_v63, -inf }
  0x91   : > { %v2799_v60 = vsel %vm606_vm0, %v4202_v33, -inf  ;;  %v763_v58 = vrot.slane %v762_v54, 4  ;;  %v770_v9 = vrot.slane %v769_v21, 4  ;;  %v777_v8 = vrot.slane %v776_v37, 4 }
  0x92   : > { %v784_v51 = vrot.slane %v783_v45, 4  ;;  %v790_v55 = vsel %vm761_vm3, %v2686_v28, -inf  ;;  %v797_v49 = vsel %vm761_vm3, %v2694_v27, -inf  ;;  %v804_v11 = vsel %vm761_vm3, %v2705_v15, -inf }
  0x93   : > { %v811_v19 = vsel %vm761_vm3, %v2708_v26, -inf  ;;  %v764_v4 = vmax.f32 %v762_v54, %v763_v58  ;;  %v771_v3 = vmax.f32 %v769_v21, %v770_v9  ;;  %v778_v42 = vmax.f32 %v776_v37, %v777_v8 }
  0x94   : > { %v785_v63 = vmax.f32 %v783_v45, %v784_v51  ;;  %v791_v34 = vrot.slane %v790_v55, 4  ;;  %v798_v59 = vrot.slane %v797_v49, 4  ;;  %v805_v31 = vrot.slane %v804_v11, 4 }
  0x95   : > { %v812_v18 = vrot.slane %v811_v19, 4  ;;  %v765_v10 = vrot.slane %v764_v4, 2  ;;  %v772_v44 = vrot.slane %v771_v3, 2  ;;  %v779_v28 = vrot.slane %v778_v42, 2 }
  0x96   : > { %v786_v36 = vrot.slane %v785_v63, 2  ;;  %v792_v50 = vmax.f32 %v790_v55, %v791_v34  ;;  %v799_v27 = vmax.f32 %v797_v49, %v798_v59  ;;  %v806_v32 = vmax.f32 %v804_v11, %v805_v31  ;;  %v4207_v31 = vld [vmem:[#allocation16_spill] sm:$0xff] }
  0x97   : > { %v813_v53 = vmax.f32 %v811_v19, %v812_v18  ;;  %v766_v15 = vmax.f32 %v764_v4, %v765_v10  ;;  %v773_v7 = vmax.f32 %v771_v3, %v772_v44  ;;  %v780_v25 = vmax.f32 %v778_v42, %v779_v28  ;;  %v4209_v10 = vld [vmem:[#allocation12_spill] sm:$0xff] }
  0x98   : > { %v787_v26 = vmax.f32 %v785_v63, %v786_v36  ;;  %v793_v41 = vrot.slane %v792_v50, 2  ;;  %v800_v40 = vrot.slane %v799_v27, 2  ;;  %v807_v62 = vrot.slane %v806_v32, 2  ;;  %v4211_v36 = vld [vmem:[#allocation17_spill] sm:$0xff] }
  0x99   : > { %v814_v6 = vrot.slane %v813_v53, 2  ;;  %v767_v16 = vrot.slane %v766_v15, 1  ;;  %v774_v29 = vrot.slane %v773_v7, 1  ;;  %v781_v22 = vrot.slane %v780_v25, 1 }
  0x9a   : > { %v788_v39 = vrot.slane %v787_v26, 1  ;;  %v794_v1 = vmax.f32 %v792_v50, %v793_v41  ;;  %v801_v24 = vmax.f32 %v799_v27, %v800_v40  ;;  %v808_v0 = vmax.f32 %v806_v32, %v807_v62  ;;  %v4214_v32 = vld [vmem:[#allocation5_spill] sm:$0xff]  ;;  %v4218_v40 = vld [vmem:[#allocation18_spill] sm:$0xff] }
  0x9b   : > { %v815_v33 = vmax.f32 %v813_v53, %v814_v6  ;;  %v768_v54 = vmax.f32 %v766_v15, %v767_v16  ;;  %v775_v21 = vmax.f32 %v773_v7, %v774_v29  ;;  %v782_v37 = vmax.f32 %v780_v25, %v781_v22  ;;  %v4215_v15 = vld [vmem:[#allocation13_spill] sm:$0xff]  ;;  %v4220_v16 = vld [vmem:[#allocation14_spill] sm:$0xff] }
  0x9c   : > { %v789_v45 = vmax.f32 %v787_v26, %v788_v39  ;;  %v795_v58 = vrot.slane %v794_v1, 1  ;;  %v802_v9 = vrot.slane %v801_v24, 1  ;;  %v809_v8 = vrot.slane %v808_v0, 1  ;;  %v4217_v26 = vld [vmem:[#allocation6_spill] sm:$0xff]  ;;  %v4222_v39 = vld [vmem:[#allocation19_spill] sm:$0xff] }
  0x9d   : > { %v816_v51 = vrot.slane %v815_v33, 1  ;;  %v2818_v55 = vadd.f32 %v745_v48, %v2763_v43  ;;  %v2821_v49 = vadd.f32 %v752_v2, %v2766_v52  ;;  %v2824_v11 = vadd.f32 %v768_v54, %v2769_v17  ;;  %v4224_v54 = vld [vmem:[#allocation7_spill] sm:$0xff] }
  0x9e   : > { %v2827_v19 = vadd.f32 %v775_v21, %v2772_v14  ;;  %v796_v4 = vmax.f32 %v794_v1, %v795_v58  ;;  %v803_v3 = vmax.f32 %v801_v24, %v802_v9  ;;  %v2830_v42 = vadd.f32 %v782_v37, %v2775_v38  ;;  %v4225_v37 = vld [vmem:[#allocation15_spill] sm:$0xff] }
  0x9f   : > { %v2833_v63 = vadd.f32 %v789_v45, %v2778_v61  ;;  %v827_v43 = vmax.f32 %v2655_v5, %v2783_v35  ;;  %v831_v52 = vmax.f32 %v2662_v12, %v2799_v60  ;;  %v4203_v17 = vmax.f32 %v2540_v46, 0.0 }
  0xa0   : > { %v4204_v14 = vmax.f32 %v2516_v56, 0.0  ;;  %v2847_v38 = vmax.f32 %v808_v0, %v809_v8  ;;  %v2849_v34 = vmax.f32 %v815_v33, %v816_v51  ;;  %v2852_v61 = vadd.f32 %v796_v4, %v2786_v23  ;;  %v4227_v8 = vld [vmem:[#allocation8_spill] sm:$0xff] }
  0xa1   : > { %v2842_v48 = vsel %vm606_vm0, %v4203_v17, -inf  ;;  %v2855_v5 = vadd.f32 %v803_v3, %v2789_v13  ;;  %v2858_v12 = vmax.f32 %v827_v43, %v2794_v30  ;;  %v4205_v35 = vmax.f32 %v2543_v47, 0.0  ;;  %v4228_v4 = vld [vmem:[#allocation20_spill] sm:$0xff] }
  0xa2   : > { %v834_v2 = vsel %vm606_vm0, %v4204_v14, -inf  ;;  %v2861_v46 = vmax.f32 %v831_v52, %v2842_v48  ;;  %v4206_v59 = vmax.f32 %v2520_v57, 0.0  ;;  %v4208_v13 = vmax.f32 %v4207_v31, 0.0  ;;  %v4213_v57 = vld [vmem:[#allocation4_spill] sm:$0xff] }
  0xa3   : > { %v835_v56 = vmax.f32 %v2669_v20, %v834_v2  ;;  %v2867_v60 = vsel %vm606_vm0, %v4205_v35, -inf  ;;  %v4210_v44 = vmax.f32 %v4209_v10, 0.0  ;;  %v4212_v20 = vmax.f32 %v4211_v36, 0.0 }
  0xa4   : > { %v838_v23 = vsel %vm606_vm0, %v4206_v59, -inf  ;;  %v2875_v18 = vsel %vm606_vm0, %v4208_v13, -inf  ;;  %v4216_v7 = vmax.f32 %v4215_v15, 0.0  ;;  %v4219_v62 = vmax.f32 %v4218_v40, 0.0 }
  0xa5   : > { %v842_v28 = vsel %vm606_vm0, %v4210_v44, -inf  ;;  %v2883_v47 = vsel %vm606_vm0, %v4212_v20, -inf  ;;  %v2886_v50 = vmax.f32 %v835_v56, %v2867_v60  ;;  %v839_v27 = vmax.f32 %v4213_v57, %v838_v23 }
  0xa6   : > { %v843_v53 = vmax.f32 %v4214_v32, %v842_v28  ;;  %v846_v25 = vsel %vm606_vm0, %v4216_v7, -inf  ;;  %v2897_v6 = vsel %vm606_vm0, %v4219_v62, -inf  ;;  %v4221_v29 = vmax.f32 %v4220_v16, 0.0 }
  0xa7   : > { %v847_v41 = vmax.f32 %v4217_v26, %v846_v25  ;;  %v4223_v1 = vmax.f32 %v4222_v39, 0.0  ;;  %v2908_v0 = vmax.f32 %v839_v27, %v2875_v18  ;;  %v4226_v45 = vmax.f32 %v4225_v37, 0.0 }
  0xa8   : > { %v850_v22 = vsel %vm606_vm0, %v4221_v29, -inf  ;;  %v2911_v33 = vmax.f32 %v843_v53, %v2883_v47  ;;  %v4229_v3 = vmax.f32 %v4228_v4, 0.0  ;;  %v858_v52 = vsel %vm631_vm1, %v2858_v12, -inf }
  0xa9   : > { %v2905_v24 = vsel %vm606_vm0, %v4223_v1, -inf  ;;  %v851_v21 = vmax.f32 %v4224_v54, %v850_v22  ;;  %v854_v58 = vsel %vm606_vm0, %v4226_v45, -inf  ;;  %v2918_v9 = vmax.f32 %v847_v41, %v2897_v6 }
  0xaa   : > { %v855_v51 = vmax.f32 %v4227_v8, %v854_v58  ;;  %v2924_v43 = vsel %vm606_vm0, %v4229_v3, -inf  ;;  %v859_v14 = vrot.slane %v858_v52, 4  ;;  %v865_v2 = vsel %vm631_vm1, %v2861_v46, -inf }
  0xab   : > { %v2929_v17 = vmax.f32 %v851_v21, %v2905_v24  ;;  %v872_v56 = vsel %vm631_vm1, %v2886_v50, -inf  ;;  %v866_v59 = vrot.slane %v865_v2, 4  ;;  %v879_v31 = vsel %vm631_vm1, %v2908_v0, -inf }
  0xac   : > { %v2936_v35 = vmax.f32 %v855_v51, %v2924_v43  ;;  %v873_v23 = vrot.slane %v872_v56, 4  ;;  %v860_v13 = vmax.f32 %v858_v52, %v859_v14  ;;  %v880_v10 = vrot.slane %v879_v31, 4 }
  0xad   : > { %v886_v44 = vsel %vm631_vm1, %v2911_v33, -inf  ;;  %v893_v28 = vsel %vm631_vm1, %v2918_v9, -inf  ;;  %v867_v36 = vmax.f32 %v865_v2, %v866_v59  ;;  %v900_v15 = vsel %vm631_vm1, %v2929_v17, -inf }
  0xae   : > { %v874_v20 = vmax.f32 %v872_v56, %v873_v23  ;;  %v887_v57 = vrot.slane %v886_v44, 4  ;;  %v894_v27 = vrot.slane %v893_v28, 4  ;;  %v861_v32 = vrot.slane %v860_v13, 2 }
  0xaf   : > { %v881_v53 = vmax.f32 %v879_v31, %v880_v10  ;;  %v907_v7 = vsel %vm631_vm1, %v2936_v35, -inf  ;;  %v868_v25 = vrot.slane %v867_v36, 2  ;;  %v901_v29 = vrot.slane %v900_v15, 4 }
  0xb0   : > { %v875_v26 = vrot.slane %v874_v20, 2  ;;  %v888_v41 = vmax.f32 %v886_v44, %v887_v57  ;;  %v895_v40 = vmax.f32 %v893_v28, %v894_v27  ;;  %v862_v62 = vmax.f32 %v860_v13, %v861_v32 }
  0xb1   : > { %v882_v16 = vrot.slane %v881_v53, 2  ;;  %v908_v22 = vrot.slane %v907_v7, 4  ;;  %v869_v39 = vmax.f32 %v867_v36, %v868_v25  ;;  %v902_v58 = vmax.f32 %v900_v15, %v901_v29 }
  0xb2   : > { %v876_v1 = vmax.f32 %v874_v20, %v875_v26  ;;  %v889_v54 = vrot.slane %v888_v41, 2  ;;  %v896_v21 = vrot.slane %v895_v40, 2  ;;  %v863_v37 = vrot.slane %v862_v62, 1 }
  0xb3   : > { %v883_v45 = vmax.f32 %v881_v53, %v882_v16  ;;  %v909_v8 = vmax.f32 %v907_v7, %v908_v22  ;;  %v870_v51 = vrot.slane %v869_v39, 1  ;;  %v903_v56 = vrot.slane %v902_v58, 2 }
  0xb4   : > { %v877_v4 = vrot.slane %v876_v1, 1  ;;  %v890_v3 = vmax.f32 %v888_v41, %v889_v54  ;;  %v897_v52 = vmax.f32 %v895_v40, %v896_v21  ;;  %v864_v14 = vmax.f32 %v862_v62, %v863_v37 }
  0xb5   : > { %v884_v2 = vrot.slane %v883_v45, 1  ;;  %v910_v59 = vrot.slane %v909_v8, 2  ;;  %v871_v23 = vmax.f32 %v869_v39, %v870_v51  ;;  %v824_v44 = vadd.f32 %v2847_v38, %v2818_v55 }
  0xb6   : > { %v878_v31 = vmax.f32 %v876_v1, %v877_v4  ;;  %v891_v13 = vrot.slane %v890_v3, 1  ;;  %v898_v10 = vrot.slane %v897_v52, 1  ;;  %v904_v36 = vmax.f32 %v902_v58, %v903_v56 }
  0xb7   : > { %v885_v28 = vmax.f32 %v883_v45, %v884_v2  ;;  %v911_v20 = vmax.f32 %v909_v8, %v910_v59  ;;  %v825_v57 = vadd.f32 %v2849_v34, %v2821_v49  ;;  %v2953_v53 = vadd.f32 %v864_v14, %v2824_v11 }
  0xb8   : > { %v892_v27 = vmax.f32 %v890_v3, %v891_v13  ;;  %v899_v32 = vmax.f32 %v897_v52, %v898_v10  ;;  %v905_v15 = vrot.slane %v904_v36, 1  ;;  %v2956_v25 = vadd.f32 %v871_v23, %v2827_v19 }
  0xb9   : > { %v912_v7 = vrot.slane %v911_v20, 1  ;;  %v922_v26 = vsel %vm696_vm2, %v2858_v12, -inf  ;;  %v2961_v55 = vadd.f32 %v878_v31, %v2830_v42  ;;  %v2964_v38 = vadd.f32 %v885_v28, %v2833_v63 }
  0xba   : > { %v923_v49 = vrot.slane %v922_v26, 4  ;;  %v929_v34 = vsel %vm696_vm2, %v2861_v46, -inf  ;;  %v2969_v11 = vadd.f32 %v892_v27, %v2852_v61  ;;  %v2972_v41 = vadd.f32 %v899_v32, %v2855_v5 }
  0xbb   : > { %v930_v19 = vrot.slane %v929_v34, 4  ;;  %v936_v40 = vsel %vm696_vm2, %v2886_v50, -inf  ;;  %v943_v63 = vsel %vm696_vm2, %v2908_v0, -inf  ;;  %v950_v16 = vsel %vm696_vm2, %v2911_v33, -inf }
  0xbc   : > { %v924_v62 = vmax.f32 %v922_v26, %v923_v49  ;;  %v937_v42 = vrot.slane %v936_v40, 4  ;;  %v906_v29 = vmax.f32 %v904_v36, %v905_v15  ;;  %v913_v22 = vmax.f32 %v911_v20, %v912_v7 }
  0xbd   : > { %v931_v39 = vmax.f32 %v929_v34, %v930_v19  ;;  %v944_v61 = vrot.slane %v943_v63, 4  ;;  %v951_v5 = vrot.slane %v950_v16, 4  ;;  %v957_v21 = vsel %vm696_vm2, %v2918_v9, -inf }
  0xbe   : > { %v925_v1 = vrot.slane %v924_v62, 2  ;;  %v938_v54 = vmax.f32 %v936_v40, %v937_v42  ;;  %v958_v58 = vrot.slane %v957_v21, 4  ;;  %v964_v8 = vsel %vm696_vm2, %v2929_v17, -inf }
  0xbf   : > { %v932_v37 = vrot.slane %v931_v39, 2  ;;  %v945_v45 = vmax.f32 %v943_v63, %v944_v61  ;;  %v952_v3 = vmax.f32 %v950_v16, %v951_v5  ;;  %v965_v52 = vrot.slane %v964_v8, 4 }
  0xc0   : > { %v926_v51 = vmax.f32 %v924_v62, %v925_v1  ;;  %v939_v4 = vrot.slane %v938_v54, 2  ;;  %v959_v56 = vmax.f32 %v957_v21, %v958_v58  ;;  %v971_v59 = vsel %vm696_vm2, %v2936_v35, -inf }
  0xc1   : > { %v933_v14 = vmax.f32 %v931_v39, %v932_v37  ;;  %v946_v2 = vrot.slane %v945_v45, 2  ;;  %v953_v13 = vrot.slane %v952_v3, 2  ;;  %v966_v10 = vmax.f32 %v964_v8, %v965_v52 }
  0xc2   : > { %v927_v23 = vrot.slane %v926_v51, 1  ;;  %v940_v31 = vmax.f32 %v938_v54, %v939_v4  ;;  %v960_v20 = vrot.slane %v959_v56, 2  ;;  %v972_v27 = vrot.slane %v971_v59, 4 }
  0xc3   : > { %v934_v28 = vrot.slane %v933_v14, 1  ;;  %v947_v36 = vmax.f32 %v945_v45, %v946_v2  ;;  %v954_v7 = vmax.f32 %v952_v3, %v953_v13  ;;  %v967_v26 = vrot.slane %v966_v10, 2 }
  0xc4   : > { %v928_v32 = vmax.f32 %v926_v51, %v927_v23  ;;  %v941_v15 = vrot.slane %v940_v31, 1  ;;  %v961_v19 = vmax.f32 %v959_v56, %v960_v20  ;;  %v973_v40 = vmax.f32 %v971_v59, %v972_v27 }
  0xc5   : > { %v935_v49 = vmax.f32 %v933_v14, %v934_v28  ;;  %v948_v34 = vrot.slane %v947_v36, 1  ;;  %v920_v62 = vadd.f32 %v906_v29, %v824_v44  ;;  %v955_v63 = vrot.slane %v954_v7, 1 }
  0xc6   : > { %v942_v42 = vmax.f32 %v940_v31, %v941_v15  ;;  %v968_v16 = vmax.f32 %v966_v10, %v967_v26  ;;  %v2986_v39 = vadd.f32 %v913_v22, %v825_v57  ;;  %v962_v1 = vrot.slane %v961_v19, 1 }
  0xc7   : > { %v949_v61 = vmax.f32 %v947_v36, %v948_v34  ;;  %v974_v54 = vrot.slane %v973_v40, 2  ;;  %v956_v5 = vmax.f32 %v954_v7, %v955_v63  ;;  %v2989_v37 = vadd.f32 %v928_v32, %v2953_v53 }
  0xc8   : > { %v969_v21 = vrot.slane %v968_v16, 1  ;;  %v986_v45 = vsel %vm761_vm3, %v2858_v12, -inf  ;;  %v963_v58 = vmax.f32 %v961_v19, %v962_v1  ;;  %v2994_v44 = vadd.f32 %v935_v49, %v2956_v25 }
  0xc9   : > { %v975_v8 = vmax.f32 %v973_v40, %v974_v54  ;;  %v987_v29 = vrot.slane %v986_v45, 4  ;;  %v2997_v57 = vadd.f32 %v942_v42, %v2961_v55  ;;  %v3000_v22 = vadd.f32 %v949_v61, %v2964_v38 }
  0xca   : > { %v993_v51 = vsel %vm761_vm3, %v2861_v46, -inf  ;;  %v1000_v53 = vsel %vm761_vm3, %v2886_v50, -inf  ;;  %v970_v4 = vmax.f32 %v968_v16, %v969_v21  ;;  %v982_v25 = vadd.f32 %v956_v5, %v2969_v11 }
  0xcb   : > { %v976_v12 = vrot.slane %v975_v8, 1  ;;  %v988_v3 = vmax.f32 %v986_v45, %v987_v29  ;;  %v994_v52 = vrot.slane %v993_v51, 4  ;;  %v1001_v14 = vrot.slane %v1000_v53, 4 }
  0xcc   : > { %v1007_v55 = vsel %vm761_vm3, %v2908_v0, -inf  ;;  %v1014_v38 = vsel %vm761_vm3, %v2911_v33, -inf  ;;  %v3012_v2 = vadd.f32 %v963_v58, %v2972_v41  ;;  %v1021_v31 = vsel %vm761_vm3, %v2918_v9, -inf }
  0xcd   : > { %v989_v46 = vrot.slane %v988_v3, 2  ;;  %v995_v56 = vmax.f32 %v993_v51, %v994_v52  ;;  %v1008_v59 = vrot.slane %v1007_v55, 4  ;;  %v1002_v50 = vmax.f32 %v1000_v53, %v1001_v14 }
  0xce   : > { %v1015_v23 = vrot.slane %v1014_v38, 4  ;;  %v1028_v11 = vsel %vm761_vm3, %v2929_v17, -inf  ;;  %v977_v13 = vmax.f32 %v975_v8, %v976_v12  ;;  %v1022_v20 = vrot.slane %v1021_v31, 4 }
  0xcf   : > { %v990_v10 = vmax.f32 %v988_v3, %v989_v46  ;;  %v996_v0 = vrot.slane %v995_v56, 2  ;;  %v1009_v28 = vmax.f32 %v1007_v55, %v1008_v59  ;;  %v1003_v36 = vrot.slane %v1002_v50, 2  ;;  %v4230_v3 = vld [vmem:[#allocation21_spill] sm:$0xff] }
  0xd0   : > { %v1016_v33 = vmax.f32 %v1014_v38, %v1015_v23  ;;  %v1029_v41 = vrot.slane %v1028_v11, 4  ;;  %v1035_v7 = vsel %vm761_vm3, %v2936_v35, -inf  ;;  %v1023_v9 = vmax.f32 %v1021_v31, %v1022_v20  ;;  %v4236_v20 = vld [vmem:[#allocation30_spill] sm:$0xff] }
  0xd1   : > { %v991_v27 = vrot.slane %v990_v10, 1  ;;  %v997_v32 = vmax.f32 %v995_v56, %v996_v0  ;;  %v1010_v15 = vrot.slane %v1009_v28, 2  ;;  %v1004_v26 = vmax.f32 %v1002_v50, %v1003_v36 }
  0xd2   : > { %v1017_v49 = vrot.slane %v1016_v33, 2  ;;  %v1030_v34 = vmax.f32 %v1028_v11, %v1029_v41  ;;  %v1036_v42 = vrot.slane %v1035_v7, 4  ;;  %v1024_v61 = vrot.slane %v1023_v9, 2 }
  0xd3   : > { %v992_v19 = vmax.f32 %v990_v10, %v991_v27  ;;  %v998_v17 = vrot.slane %v997_v32, 1  ;;  %v1011_v40 = vmax.f32 %v1009_v28, %v1010_v15  ;;  %v1005_v63 = vrot.slane %v1004_v26, 1  ;;  %v4234_v10 = vld [vmem:[#allocation22_spill] sm:$0xff]  ;;  %v4238_v27 = vld [vmem:[#allocation23_spill] sm:$0xff] }
  0xd4   : > { %v1018_v16 = vmax.f32 %v1016_v33, %v1017_v49  ;;  %v1031_v1 = vrot.slane %v1030_v34, 2  ;;  %v3020_v54 = vadd.f32 %v970_v4, %v920_v62  ;;  %v1037_v45 = vmax.f32 %v1035_v7, %v1036_v42  ;;  %v4240_v15 = vld [vmem:[#allocation31_spill] sm:$0xff] }
  0xd5   : > { %v999_v5 = vmax.f32 %v997_v32, %v998_v17  ;;  %v1012_v21 = vrot.slane %v1011_v40, 1  ;;  %v1006_v58 = vmax.f32 %v1004_v26, %v1005_v63  ;;  %v1025_v35 = vmax.f32 %v1023_v9, %v1024_v61  ;;  %v4242_v9 = vld [vmem:[#allocation24_spill] sm:$0xff] }
  0xd6   : > { %v1019_v8 = vrot.slane %v1018_v16, 1  ;;  %v1032_v29 = vmax.f32 %v1030_v34, %v1031_v1  ;;  %v3023_v51 = vadd.f32 %v977_v13, %v2986_v39  ;;  %v1038_v12 = vrot.slane %v1037_v45, 2  ;;  %v4232_v39 = vld [vmem:[#allocation29_spill] sm:$0xff] }
  0xd7   : > { %v1013_v53 = vmax.f32 %v1011_v40, %v1012_v21  ;;  %v4231_v52 = vmax.f32 %v4230_v3, 0.0  ;;  %v1026_v38 = vrot.slane %v1025_v35, 1  ;;  %v3029_v4 = vadd.f32 %v992_v19, %v2989_v37  ;;  %v4244_v40 = vld [vmem:[#allocation32_spill] sm:$0xff] }
  0xd8   : > { %v1020_v55 = vmax.f32 %v1018_v16, %v1019_v8  ;;  %v1033_v62 = vrot.slane %v1032_v29, 1  ;;  %v1039_v46 = vmax.f32 %v1037_v45, %v1038_v12  ;;  %v3032_v56 = vadd.f32 %v999_v5, %v2994_v44  ;;  %v4246_v16 = vld [vmem:[#allocation25_spill] sm:$0xff]  ;;  %v4250_v8 = vld [vmem:[#allocation26_spill] sm:$0xff] }
  0xd9   : > { %v1050_v14 = vsel %vm606_vm0, %v4231_v52, -inf  ;;  %v4233_v50 = vmax.f32 %v4232_v39, 0.0  ;;  %v1027_v31 = vmax.f32 %v1025_v35, %v1026_v38  ;;  %v3039_v11 = vadd.f32 %v1006_v58, %v2997_v57  ;;  %v4248_v5 = vld [vmem:[#allocation33_spill] sm:$0xff]  ;;  %v4252_v12 = vld [vmem:[#allocation34_spill] sm:$0xff] }
  0xda   : > { %v1051_v59 = vmax.f32 %v2794_v30, %v1050_v14  ;;  %v3042_v13 = vadd.f32 %v1013_v53, %v3000_v22  ;;  %v4235_v37 = vmax.f32 %v4234_v10, 0.0  ;;  %v3047_v28 = vmax.f32 %v1032_v29, %v1033_v62  ;;  %v4254_v14 = vld [vmem:[#allocation27_spill] sm:$0xff] }
  0xdb   : > { %v1052_v23 = vsel %vm606_vm0, %v4233_v50, -inf  ;;  %v1040_v44 = vrot.slane %v1039_v46, 1  ;;  %v3049_v36 = vadd.f32 %v1020_v55, %v982_v25  ;;  %v4237_v41 = vmax.f32 %v4236_v20, 0.0  ;;  %v4258_v50 = vld [vmem:[#allocation28_spill] sm:$0xff] }
  0xdc   : > { %v1054_v0 = vsel %vm606_vm0, %v4235_v37, -inf  ;;  %v3052_v33 = vmax.f32 %v1051_v59, %v1052_v23  ;;  %v4239_v22 = vmax.f32 %v4238_v27, 0.0  ;;  %v4241_v7 = vmax.f32 %v4240_v15, 0.0  ;;  %v4260_v37 = vld [vmem:[#allocation36_spill] sm:$0xff] }
  0xdd   : > { %v1055_v30 = vmax.f32 %v2842_v48, %v1054_v0  ;;  %v1056_v57 = vsel %vm606_vm0, %v4237_v41, -inf  ;;  %v3063_v49 = vmax.f32 %v1039_v46, %v1040_v44  ;;  %v3066_v25 = vadd.f32 %v1027_v31, %v3012_v2  ;;  %v4256_v46 = vld [vmem:[#allocation35_spill] sm:$0xff] }
  0xde   : > { %v1058_v32 = vsel %vm606_vm0, %v4239_v22, -inf  ;;  %v1060_v26 = vsel %vm606_vm0, %v4241_v7, -inf  ;;  %v4243_v34 = vmax.f32 %v4242_v9, 0.0  ;;  %v4245_v42 = vmax.f32 %v4244_v40, 0.0 }
  0xdf   : > { %v1059_v48 = vmax.f32 %v2867_v60, %v1058_v32  ;;  %v4247_v61 = vmax.f32 %v4246_v16, 0.0  ;;  %v4249_v21 = vmax.f32 %v4248_v5, 0.0  ;;  %v3082_v45 = vmax.f32 %v1055_v30, %v1056_v57 }
  0xe0   : > { %v1062_v19 = vsel %vm606_vm0, %v4243_v34, -inf  ;;  %v1064_v63 = vsel %vm606_vm0, %v4245_v42, -inf  ;;  %v4253_v3 = vmax.f32 %v4252_v12, 0.0  ;;  %v4255_v55 = vmax.f32 %v4254_v14, 0.0 }
  0xe1   : > { %v1063_v17 = vmax.f32 %v2875_v18, %v1062_v19  ;;  %v1066_v1 = vsel %vm606_vm0, %v4247_v61, -inf  ;;  %v1068_v2 = vsel %vm606_vm0, %v4249_v21, -inf  ;;  %v3084_v60 = vmax.f32 %v1059_v48, %v1060_v26 }
  0xe2   : > { %v1067_v58 = vmax.f32 %v2883_v47, %v1066_v1  ;;  %v4251_v18 = vmax.f32 %v4250_v8, 0.0  ;;  %v1072_v52 = vsel %vm606_vm0, %v4253_v3, -inf  ;;  %v1074_v38 = vsel %vm606_vm0, %v4255_v55, -inf }
  0xe3   : > { %v3090_v29 = vmax.f32 %v1063_v17, %v1064_v63  ;;  %v1075_v47 = vmax.f32 %v2905_v24, %v1074_v38  ;;  %v4257_v59 = vmax.f32 %v4256_v46, 0.0  ;;  %v4259_v23 = vmax.f32 %v4258_v50, 0.0 }
  0xe4   : > { %v1070_v35 = vsel %vm606_vm0, %v4251_v18, -inf  ;;  %v3099_v62 = vmax.f32 %v1067_v58, %v1068_v2  ;;  %v4261_v0 = vmax.f32 %v4260_v37, 0.0  ;;  %v1082_v30 = vsel %vm631_vm1, %v3052_v33, -inf }
  0xe5   : > { %v1071_v53 = vmax.f32 %v2897_v6, %v1070_v35  ;;  %v1076_v39 = vsel %vm606_vm0, %v4257_v59, -inf  ;;  %v1078_v6 = vsel %vm606_vm0, %v4259_v23, -inf  ;;  %v1083_v20 = vrot.slane %v1082_v30, 4 }
  0xe6   : > { %v1079_v10 = vmax.f32 %v2924_v43, %v1078_v6  ;;  %v1080_v44 = vsel %vm606_vm0, %v4261_v0, -inf  ;;  %v3116_v24 = vmax.f32 %v1075_v47, %v1076_v39  ;;  %v1089_v41 = vsel %vm631_vm1, %v3082_v45, -inf }
  0xe7   : > { %v3108_v31 = vmax.f32 %v1071_v53, %v1072_v52  ;;  %v1096_v57 = vsel %vm631_vm1, %v3084_v60, -inf  ;;  %v1090_v22 = vrot.slane %v1089_v41, 4  ;;  %v1103_v32 = vsel %vm631_vm1, %v3090_v29, -inf }
  0xe8   : > { %v3122_v27 = vmax.f32 %v1079_v10, %v1080_v44  ;;  %v1097_v43 = vrot.slane %v1096_v57, 4  ;;  %v1084_v15 = vmax.f32 %v1082_v30, %v1083_v20  ;;  %v1104_v7 = vrot.slane %v1103_v32, 4 }
  0xe9   : > { %v1110_v26 = vsel %vm631_vm1, %v3099_v62, -inf  ;;  %v1117_v48 = vsel %vm631_vm1, %v3108_v31, -inf  ;;  %v1091_v9 = vmax.f32 %v1089_v41, %v1090_v22  ;;  %v1124_v63 = vsel %vm631_vm1, %v3116_v24, -inf }
  0xea   : > { %v1098_v34 = vmax.f32 %v1096_v57, %v1097_v43  ;;  %v1111_v19 = vrot.slane %v1110_v26, 4  ;;  %v1118_v17 = vrot.slane %v1117_v48, 4  ;;  %v1085_v40 = vrot.slane %v1084_v15, 2 }
  0xeb   : > { %v1105_v42 = vmax.f32 %v1103_v32, %v1104_v7  ;;  %v1131_v16 = vsel %vm631_vm1, %v3122_v27, -inf  ;;  %v1092_v61 = vrot.slane %v1091_v9, 2  ;;  %v1125_v8 = vrot.slane %v1124_v63, 4 }
  0xec   : > { %v1099_v1 = vrot.slane %v1098_v34, 2  ;;  %v1112_v5 = vmax.f32 %v1110_v26, %v1111_v19  ;;  %v1119_v21 = vmax.f32 %v1117_v48, %v1118_v17  ;;  %v1086_v2 = vmax.f32 %v1084_v15, %v1085_v40 }
  0xed   : > { %v1106_v58 = vrot.slane %v1105_v42, 2  ;;  %v1132_v18 = vrot.slane %v1131_v16, 4  ;;  %v1093_v35 = vmax.f32 %v1091_v9, %v1092_v61  ;;  %v1126_v55 = vmax.f32 %v1124_v63, %v1125_v8 }
  0xee   : > { %v1100_v53 = vmax.f32 %v1098_v34, %v1099_v1  ;;  %v1113_v12 = vrot.slane %v1112_v5, 2  ;;  %v1120_v3 = vrot.slane %v1119_v21, 2  ;;  %v1087_v52 = vrot.slane %v1086_v2, 1 }
  0xef   : > { %v1107_v14 = vmax.f32 %v1105_v42, %v1106_v58  ;;  %v1133_v38 = vmax.f32 %v1131_v16, %v1132_v18  ;;  %v1094_v47 = vrot.slane %v1093_v35, 1  ;;  %v1127_v6 = vrot.slane %v1126_v55, 2 }
  0xf0   : > { %v1101_v46 = vrot.slane %v1100_v53, 1  ;;  %v1114_v59 = vmax.f32 %v1112_v5, %v1113_v12  ;;  %v1121_v39 = vmax.f32 %v1119_v21, %v1120_v3  ;;  %v1088_v50 = vmax.f32 %v1086_v2, %v1087_v52 }
  0xf1   : > { %v1108_v23 = vrot.slane %v1107_v14, 1  ;;  %v1134_v10 = vrot.slane %v1133_v38, 2  ;;  %v1095_v37 = vmax.f32 %v1093_v35, %v1094_v47  ;;  %v1048_v20 = vadd.f32 %v3047_v28, %v3020_v54 }
  0xf2   : > { %v1102_v0 = vmax.f32 %v1100_v53, %v1101_v46  ;;  %v1115_v44 = vrot.slane %v1114_v59, 1  ;;  %v1122_v30 = vrot.slane %v1121_v39, 1  ;;  %v1128_v57 = vmax.f32 %v1126_v55, %v1127_v6 }
  0xf3   : > { %v1109_v41 = vmax.f32 %v1107_v14, %v1108_v23  ;;  %v1135_v22 = vmax.f32 %v1133_v38, %v1134_v10  ;;  %v1049_v43 = vadd.f32 %v3063_v49, %v3023_v51  ;;  %v3139_v7 = vadd.f32 %v1088_v50, %v3029_v4 }
  0xf4   : > { %v1116_v32 = vmax.f32 %v1114_v59, %v1115_v44  ;;  %v1123_v15 = vmax.f32 %v1121_v39, %v1122_v30  ;;  %v1129_v26 = vrot.slane %v1128_v57, 1  ;;  %v3142_v9 = vadd.f32 %v1095_v37, %v3032_v56 }
  0xf5   : > { %v1136_v48 = vrot.slane %v1135_v22, 1  ;;  %v1146_v34 = vsel %vm696_vm2, %v3052_v33, -inf  ;;  %v3147_v54 = vadd.f32 %v1102_v0, %v3039_v11  ;;  %v3150_v28 = vadd.f32 %v1109_v41, %v3042_v13 }
  0xf6   : > { %v1147_v51 = vrot.slane %v1146_v34, 4  ;;  %v1153_v49 = vsel %vm696_vm2, %v3082_v45, -inf  ;;  %v3155_v4 = vadd.f32 %v1116_v32, %v3049_v36  ;;  %v3158_v19 = vadd.f32 %v1123_v15, %v3066_v25 }
  0xf7   : > { %v1154_v56 = vrot.slane %v1153_v49, 4  ;;  %v1160_v17 = vsel %vm696_vm2, %v3084_v60, -inf  ;;  %v1167_v13 = vsel %vm696_vm2, %v3090_v29, -inf  ;;  %v1174_v42 = vsel %vm696_vm2, %v3099_v62, -inf }
  0xf8   : > { %v1148_v40 = vmax.f32 %v1146_v34, %v1147_v51  ;;  %v1161_v11 = vrot.slane %v1160_v17, 4  ;;  %v1130_v63 = vmax.f32 %v1128_v57, %v1129_v26  ;;  %v1137_v16 = vmax.f32 %v1135_v22, %v1136_v48 }
  0xf9   : > { %v1155_v61 = vmax.f32 %v1153_v49, %v1154_v56  ;;  %v1168_v36 = vrot.slane %v1167_v13, 4  ;;  %v1175_v25 = vrot.slane %v1174_v42, 4  ;;  %v1181_v21 = vsel %vm696_vm2, %v3108_v31, -inf }
  0xfa   : > { %v1149_v1 = vrot.slane %v1148_v40, 2  ;;  %v1162_v5 = vmax.f32 %v1160_v17, %v1161_v11  ;;  %v1182_v8 = vrot.slane %v1181_v21, 4  ;;  %v1188_v18 = vsel %vm696_vm2, %v3116_v24, -inf }
  0xfb   : > { %v1156_v2 = vrot.slane %v1155_v61, 2  ;;  %v1169_v58 = vmax.f32 %v1167_v13, %v1168_v36  ;;  %v1176_v12 = vmax.f32 %v1174_v42, %v1175_v25  ;;  %v1189_v3 = vrot.slane %v1188_v18, 4 }
  0xfc   : > { %v1150_v35 = vmax.f32 %v1148_v40, %v1149_v1  ;;  %v1163_v53 = vrot.slane %v1162_v5, 2  ;;  %v1183_v55 = vmax.f32 %v1181_v21, %v1182_v8  ;;  %v1195_v38 = vsel %vm696_vm2, %v3122_v27, -inf }
  0xfd   : > { %v1157_v52 = vmax.f32 %v1155_v61, %v1156_v2  ;;  %v1170_v14 = vrot.slane %v1169_v58, 2  ;;  %v1177_v59 = vrot.slane %v1176_v12, 2  ;;  %v1190_v39 = vmax.f32 %v1188_v18, %v1189_v3 }
  0xfe   : > { %v1151_v47 = vrot.slane %v1150_v35, 1  ;;  %v1164_v46 = vmax.f32 %v1162_v5, %v1163_v53  ;;  %v1184_v6 = vrot.slane %v1183_v55, 2  ;;  %v1196_v10 = vrot.slane %v1195_v38, 4 }
  0xff   : > { %v1158_v50 = vrot.slane %v1157_v52, 1  ;;  %v1171_v23 = vmax.f32 %v1169_v58, %v1170_v14  ;;  %v1178_v44 = vmax.f32 %v1176_v12, %v1177_v59  ;;  %v1191_v30 = vrot.slane %v1190_v39, 2 }
 0x100   : > { %v1152_v37 = vmax.f32 %v1150_v35, %v1151_v47  ;;  %v1165_v0 = vrot.slane %v1164_v46, 1  ;;  %v1185_v22 = vmax.f32 %v1183_v55, %v1184_v6  ;;  %v1197_v32 = vmax.f32 %v1195_v38, %v1196_v10 }
 0x101   : > { %v1159_v41 = vmax.f32 %v1157_v52, %v1158_v50  ;;  %v1172_v57 = vrot.slane %v1171_v23, 1  ;;  %v1144_v15 = vadd.f32 %v1130_v63, %v1048_v20  ;;  %v1179_v48 = vrot.slane %v1178_v44, 1 }
 0x102   : > { %v1166_v26 = vmax.f32 %v1164_v46, %v1165_v0  ;;  %v1192_v34 = vmax.f32 %v1190_v39, %v1191_v30  ;;  %v3172_v51 = vadd.f32 %v1137_v16, %v1049_v43  ;;  %v1186_v56 = vrot.slane %v1185_v22, 1 }
 0x103   : > { %v1173_v49 = vmax.f32 %v1171_v23, %v1172_v57  ;;  %v1198_v17 = vrot.slane %v1197_v32, 2  ;;  %v1180_v40 = vmax.f32 %v1178_v44, %v1179_v48  ;;  %v1202_v13 = vadd.f32 %v1152_v37, %v3139_v7 }
 0x104   : > { %v1193_v11 = vrot.slane %v1192_v34, 1  ;;  %v1210_v42 = vsel %vm761_vm3, %v3052_v33, -inf  ;;  %v1187_v61 = vmax.f32 %v1185_v22, %v1186_v56  ;;  %v1203_v1 = vadd.f32 %v1159_v41, %v3142_v9 }
 0x105   : > { %v1199_v36 = vmax.f32 %v1197_v32, %v1198_v17  ;;  %v1211_v20 = vrot.slane %v1210_v42, 4  ;;  %v1204_v63 = vadd.f32 %v1166_v26, %v3147_v54  ;;  %v1205_v43 = vadd.f32 %v1173_v49, %v3150_v28 }
 0x106   : > { %v1217_v16 = vsel %vm761_vm3, %v3082_v45, -inf  ;;  %v1224_v5 = vsel %vm761_vm3, %v3084_v60, -inf  ;;  %v1194_v25 = vmax.f32 %v1192_v34, %v1193_v11  ;;  %v1206_v7 = vadd.f32 %v1180_v40, %v3155_v4 }
 0x107   : > { %v1212_v21 = vmax.f32 %v1210_v42, %v1211_v20  ;;  %v1218_v33 = vrot.slane %v1217_v16, 4  ;;  %v1200_v2 = vrot.slane %v1199_v36, 1  ;;  %v1225_v58 = vrot.slane %v1224_v5, 4 }
 0x108   : > { %v1231_v9 = vsel %vm761_vm3, %v3090_v29, -inf  ;;  %v1238_v54 = vsel %vm761_vm3, %v3099_v62, -inf  ;;  %v1207_v28 = vadd.f32 %v1187_v61, %v3158_v19  ;;  %v1245_v4 = vsel %vm761_vm3, %v3108_v31, -inf }
 0x109   : > { %v1213_v8 = vrot.slane %v1212_v21, 2  ;;  %v1219_v45 = vmax.f32 %v1217_v16, %v1218_v33  ;;  %v1232_v18 = vrot.slane %v1231_v9, 4  ;;  %v1226_v35 = vmax.f32 %v1224_v5, %v1225_v58 }
 0x10a   : > { %v1239_v60 = vrot.slane %v1238_v54, 4  ;;  %v1252_v53 = vsel %vm761_vm3, %v3116_v24, -inf  ;;  %v1208_v12 = vadd.f32 %v1194_v25, %v1144_v15  ;;  %v1246_v62 = vrot.slane %v1245_v4, 4 }
 0x10b   : > { %v1214_v3 = vmax.f32 %v1212_v21, %v1213_v8  ;;  %v1220_v52 = vrot.slane %v1219_v45, 2  ;;  %v1233_v29 = vmax.f32 %v1231_v9, %v1232_v18  ;;  %v1227_v14 = vrot.slane %v1226_v35, 2 }
 0x10c   : > { %v1240_v55 = vmax.f32 %v1238_v54, %v1239_v60  ;;  %v1253_v38 = vrot.slane %v1252_v53, 4  ;;  %v1259_v59 = vsel %vm761_vm3, %v3122_v27, -inf  ;;  %v1247_v31 = vmax.f32 %v1245_v4, %v1246_v62 }
 0x10d   : > { %v1215_v19 = vrot.slane %v1214_v3, 1  ;;  %v1221_v47 = vmax.f32 %v1219_v45, %v1220_v52  ;;  %v1234_v46 = vrot.slane %v1233_v29, 2  ;;  %v1228_v39 = vmax.f32 %v1226_v35, %v1227_v14 }
 0x10e   : > { %v1241_v50 = vrot.slane %v1240_v55, 2  ;;  %v1254_v23 = vmax.f32 %v1252_v53, %v1253_v38  ;;  %v1260_v37 = vrot.slane %v1259_v59, 4  ;;  %v1248_v30 = vrot.slane %v1247_v31, 2 }
 0x10f   : > { %v1216_v6 = vmax.f32 %v1214_v3, %v1215_v19  ;;  %v1222_v24 = vrot.slane %v1221_v47, 1  ;;  %v1235_v10 = vmax.f32 %v1233_v29, %v1234_v46  ;;  %v1229_v0 = vrot.slane %v1228_v39, 1 }
 0x110   : > { %v1242_v44 = vmax.f32 %v1240_v55, %v1241_v50  ;;  %v1255_v41 = vrot.slane %v1254_v23, 2  ;;  %v1201_v57 = vmax.f32 %v1199_v36, %v1200_v2  ;;  %v1261_v15 = vmax.f32 %v1259_v59, %v1260_v37 }
 0x111   : > { %v1223_v22 = vmax.f32 %v1221_v47, %v1222_v24  ;;  %v1236_v32 = vrot.slane %v1235_v10, 1  ;;  %v1230_v26 = vmax.f32 %v1228_v39, %v1229_v0  ;;  %v1249_v34 = vmax.f32 %v1247_v31, %v1248_v30 }
 0x112   : > { %v1243_v48 = vrot.slane %v1242_v44, 1  ;;  %v1256_v27 = vmax.f32 %v1254_v23, %v1255_v41  ;;  %v1262_v56 = vrot.slane %v1261_v15, 2  ;;  %v1266_v17 = vadd.f32 %v1216_v6, %v1202_v13 }
 0x113   : > { %v1237_v49 = vmax.f32 %v1235_v10, %v1236_v32  ;;  %v1267_v40 = vadd.f32 %v1223_v22, %v1203_v1  ;;  %v1250_v42 = vrot.slane %v1249_v34, 1  ;;  %v1268_v20 = vadd.f32 %v1230_v26, %v1204_v63 }
 0x114   : > { %v1244_v11 = vmax.f32 %v1242_v44, %v1243_v48  ;;  %v1257_v61 = vrot.slane %v1256_v27, 1  ;;  %v1263_v16 = vmax.f32 %v1261_v15, %v1262_v56  ;;  %v1209_v58 = vadd.f32 %v1201_v57, %v3172_v51 }
 0x115   : > { %v1269_v5 = vadd.f32 %v1237_v49, %v1205_v43  ;;  %v1275_v25 = vmul.f32 0.11111111, %v1267_v40  ;;  %v1251_v36 = vmax.f32 %v1249_v34, %v1250_v42  ;;  %v1276_v2 = vmul.f32 0.11111111, %v1268_v20 }
 0x116   : > { %v1258_v21 = vmax.f32 %v1256_v27, %v1257_v61  ;;  %v1270_v33 = vadd.f32 %v1244_v11, %v1206_v7  ;;  %v1264_v9 = vrot.slane %v1263_v16, 1  ;;  %v1274_v1 = vmul.f32 0.11111111, %v1266_v17 }
 0x117   : > { %v1277_v54 = vmul.f32 0.11111111, %v1269_v5  ;;  %v1271_v8 = vadd.f32 %v1251_v36, %v1207_v28  ;;  %v1290_v35 = vrot.slane %v1275_v25, 7  ;;  %v1291_v63 = vrot.slane %v1276_v2, 6 }
 0x118   : > { %v1272_v13 = vadd.f32 %v1258_v21, %v1208_v12  ;;  %v1278_v45 = vmul.f32 0.11111111, %v1270_v33  ;;  %v1265_v18 = vmax.f32 %v1263_v16, %v1264_v9  ;;  %vm1306_vm8 = vcmask 1045508  }
 0x119   : > { %v1292_v60 = vrot.slane %v1277_v54, 5  ;;  %v1279_v43 = vmul.f32 0.11111111, %v1271_v8  ;;  %v1298_v12 = vsel %vm1297_vm4, %v1274_v1, %v1290_v35  ;;  %vm1308_vm9 = vcmask 1043456  }
 0x11a   : > { %v1280_v4 = vmul.f32 0.11111111, %v1272_v13  ;;  %v1273_v7 = vadd.f32 %v1265_v18, %v1209_v58  ;;  %v1293_v53 = vrot.slane %v1278_v45, 4 }
 0x11b   : > { %v1294_v51 = vrot.slane %v1279_v43, 3  ;;  %v1300_v52 = vsel %vm1299_vm5, %v1291_v63, %v1292_v60 }
 0x11c   : > { %v1281_v3 = vmul.f32 0.11111111, %v1273_v7  ;;  %v1295_v28 = vrot.slane %v1280_v4, 2  ;;  %v1301_v55 = vsel %vm631_vm1, %v1298_v12, %v1300_v52 }
 0x11d   : > { %v1303_v14 = vsel %vm1302_vm6, %v1293_v53, %v1294_v51 }
 0x11e   : > { %v1296_v29 = vrot.slane %v1281_v3, 1 }
 0x11f   : > { %1323 = sbr.rel (%p2054_p8) target bundleno = 693 (0x2b5), region = 75 }
 0x120   : > { %v1305_v62 = vsel %vm1304_vm7, %v1295_v28, %v1296_v29 }
 0x121   : > { %v1307_v38 = vsel %vm1306_vm8, %v1303_v14, %v1305_v62 }
 0x122   : > { %v1309_v19 = vsel %vm1308_vm9, %v1301_v55, %v1307_v38 }
 0x123   : > { %1319 = vst [vmem:[%s1318_s30] ss:$2 sm:$0xff] %v1309_v19 }
 0x124   : > { %v1420_v47 = vld [vmem:[%s4119_s3 + $0x2f0] sm:$0xff]  ;;  %v1418_v59 = vld [vmem:[%s4119_s3 + $0x2e0] sm:$0xff]  ;;  %vm2007_vm10 = vcmask 140288  }
 0x125   : > { %v1356_v46 = vld [vmem:[%s4119_s3 + $0xf0] sm:$0xff]  ;;  %1649 = vmatpush.msra.mxu2 %v1420_v47  ;;  %v1354_v50 = vld [vmem:[%s4119_s3 + $0xe0] sm:$0xff] }
 0x126   : > { %1609 = vmatpush.msra.mxu0 %v1356_v46  ;;  %v1452_v39 = vld [vmem:[%s4119_s3 + $0x3f0] sm:$0xff]  ;;  %v1450_v6 = vld [vmem:[%s4119_s3 + $0x3e0] sm:$0xff] }
 0x127   : > { %v1388_v31 = vld [vmem:[%s4119_s3 + $0x1f0] sm:$0xff]  ;;  %1669 = vmatpush.msra.mxu3 %v1452_v39  ;;  %1650 = vmatpush.msra.mxu2 %v1418_v59  ;;  %v1386_v10 = vld [vmem:[%s4119_s3 + $0x1e0] sm:$0xff] }
 0x128   : > { %1629 = vmatpush.msra.mxu1 %v1388_v31  ;;  %v1416_v23 = vld [vmem:[%s4119_s3 + $0x2d0] sm:$0xff]  ;;  %1610 = vmatpush.msra.mxu0 %v1354_v50  ;;  %v1414_v0 = vld [vmem:[%s4119_s3 + $0x2c0] sm:$0xff] }
 0x129   : > { %v1352_v24 = vld [vmem:[%s4119_s3 + $0xd0] sm:$0xff]  ;;  %1670 = vmatpush.msra.mxu3 %v1450_v6  ;;  %v1350_v44 = vld [vmem:[%s4119_s3 + $0xc0] sm:$0xff]  ;;  %1651 = vmatpush.msra.mxu2 %v1416_v23 }
 0x12a   : > { %v1448_v37 = vld [vmem:[%s4119_s3 + $0x3d0] sm:$0xff]  ;;  %1630 = vmatpush.msra.mxu1 %v1386_v10  ;;  %1611 = vmatpush.msra.mxu0 %v1352_v24  ;;  %v1446_v41 = vld [vmem:[%s4119_s3 + $0x3c0] sm:$0xff] }
 0x12b   : > { %v1384_v30 = vld [vmem:[%s4119_s3 + $0x1d0] sm:$0xff]  ;;  %v1382_v57 = vld [vmem:[%s4119_s3 + $0x1c0] sm:$0xff]  ;;  %1671 = vmatpush.msra.mxu3 %v1448_v37  ;;  %1652 = vmatpush.msra.mxu2 %v1414_v0 }
 0x12c   : > { %1631 = vmatpush.msra.mxu1 %v1384_v30  ;;  %v1412_v22 = vld [vmem:[%s4119_s3 + $0x2b0] sm:$0xff]  ;;  %1612 = vmatpush.msra.mxu0 %v1350_v44  ;;  %v1410_v48 = vld [vmem:[%s4119_s3 + $0x2a0] sm:$0xff] }
 0x12d   : > { %v1348_v32 = vld [vmem:[%s4119_s3 + $0xb0] sm:$0xff]  ;;  %1672 = vmatpush.msra.mxu3 %v1446_v41  ;;  %v1346_v34 = vld [vmem:[%s4119_s3 + $0xa0] sm:$0xff]  ;;  %1653 = vmatpush.msra.mxu2 %v1412_v22 }
 0x12e   : > { %v1444_v15 = vld [vmem:[%s4119_s3 + $0x3b0] sm:$0xff]  ;;  %1632 = vmatpush.msra.mxu1 %v1382_v57  ;;  %1613 = vmatpush.msra.mxu0 %v1348_v32  ;;  %v1442_v27 = vld [vmem:[%s4119_s3 + $0x3a0] sm:$0xff] }
 0x12f   : > { %v1380_v26 = vld [vmem:[%s4119_s3 + $0x1b0] sm:$0xff]  ;;  %v1378_v49 = vld [vmem:[%s4119_s3 + $0x1a0] sm:$0xff]  ;;  %1673 = vmatpush.msra.mxu3 %v1444_v15  ;;  %1654 = vmatpush.msra.mxu2 %v1410_v48 }
 0x130   : > { %1633 = vmatpush.msra.mxu1 %v1380_v26  ;;  %v1408_v56 = vld [vmem:[%s4119_s3 + $0x290] sm:$0xff]  ;;  %1614 = vmatpush.msra.mxu0 %v1346_v34  ;;  %v1406_v42 = vld [vmem:[%s4119_s3 + $0x280] sm:$0xff] }
 0x131   : > { %v1344_v17 = vld [vmem:[%s4119_s3 + $0x90] sm:$0xff]  ;;  %1674 = vmatpush.msra.mxu3 %v1442_v27  ;;  %v1342_v61 = vld [vmem:[%s4119_s3 + $0x80] sm:$0xff]  ;;  %1655 = vmatpush.msra.mxu2 %v1408_v56  ;;  %v1324_v56 = vld [vmem:[#allocation2] sm:$0xff] }
 0x132   : > { %v1440_v40 = vld [vmem:[%s4119_s3 + $0x390] sm:$0xff]  ;;  %1634 = vmatpush.msra.mxu1 %v1378_v49  ;;  %1615 = vmatpush.msra.mxu0 %v1344_v17  ;;  %v1438_v20 = vld [vmem:[%s4119_s3 + $0x380] sm:$0xff]  ;;  %1590 = vst [vmem:[#allocation1] ss:$4 sm:$0xff] %v1324_v56 }
 0x133   : > { %v1376_v11 = vld [vmem:[%s4119_s3 + $0x190] sm:$0xff]  ;;  %v1374_v16 = vld [vmem:[%s4119_s3 + $0x180] sm:$0xff]  ;;  %1675 = vmatpush.msra.mxu3 %v1440_v40  ;;  %1656 = vmatpush.msra.mxu2 %v1406_v42 }
 0x134   : > { %1635 = vmatpush.msra.mxu1 %v1376_v11  ;;  %v1404_v5 = vld [vmem:[%s4119_s3 + $0x270] sm:$0xff]  ;;  %1616 = vmatpush.msra.mxu0 %v1342_v61  ;;  %v1402_v33 = vld [vmem:[%s4119_s3 + $0x260] sm:$0xff] }
 0x135   : > { %v1340_v25 = vld [vmem:[%s4119_s3 + $0x70] sm:$0xff]  ;;  %1676 = vmatpush.msra.mxu3 %v1438_v20  ;;  %v1338_v2 = vld [vmem:[%s4119_s3 + $0x60] sm:$0xff]  ;;  %1657 = vmatpush.msra.mxu2 %v1404_v5 }
 0x136   : > { %v1436_v36 = vld [vmem:[%s4119_s3 + $0x370] sm:$0xff]  ;;  %1636 = vmatpush.msra.mxu1 %v1374_v16  ;;  %1617 = vmatpush.msra.mxu0 %v1340_v25  ;;  %v1434_v58 = vld [vmem:[%s4119_s3 + $0x360] sm:$0xff] }
 0x137   : > { %v1372_v21 = vld [vmem:[%s4119_s3 + $0x170] sm:$0xff]  ;;  %v1370_v9 = vld [vmem:[%s4119_s3 + $0x160] sm:$0xff]  ;;  %1677 = vmatpush.msra.mxu3 %v1436_v36  ;;  %1658 = vmatpush.msra.mxu2 %v1402_v33 }
 0x138   : > { %1637 = vmatpush.msra.mxu1 %v1372_v21  ;;  %v1400_v54 = vld [vmem:[%s4119_s3 + $0x250] sm:$0xff]  ;;  %1618 = vmatpush.msra.mxu0 %v1338_v2  ;;  %v1398_v45 = vld [vmem:[%s4119_s3 + $0x240] sm:$0xff] }
 0x139   : > { %v1336_v8 = vld [vmem:[%s4119_s3 + $0x50] sm:$0xff]  ;;  %1678 = vmatpush.msra.mxu3 %v1434_v58  ;;  %v1334_v18 = vld [vmem:[%s4119_s3 + $0x40] sm:$0xff]  ;;  %1659 = vmatpush.msra.mxu2 %v1400_v54 }
 0x13a   : > { %v1432_v13 = vld [vmem:[%s4119_s3 + $0x350] sm:$0xff]  ;;  %1638 = vmatpush.msra.mxu1 %v1370_v9  ;;  %1619 = vmatpush.msra.mxu0 %v1336_v8  ;;  %v1430_v35 = vld [vmem:[%s4119_s3 + $0x340] sm:$0xff] }
 0x13b   : > { %v1368_v1 = vld [vmem:[%s4119_s3 + $0x150] sm:$0xff]  ;;  %v1366_v63 = vld [vmem:[%s4119_s3 + $0x140] sm:$0xff]  ;;  %1679 = vmatpush.msra.mxu3 %v1432_v13  ;;  %1660 = vmatpush.msra.mxu2 %v1398_v45 }
 0x13c   : > { %1639 = vmatpush.msra.mxu1 %v1368_v1  ;;  %v1396_v60 = vld [vmem:[%s4119_s3 + $0x230] sm:$0xff]  ;;  %1620 = vmatpush.msra.mxu0 %v1334_v18  ;;  %v1394_v53 = vld [vmem:[%s4119_s3 + $0x220] sm:$0xff] }
 0x13d   : > { %v1332_v43 = vld [vmem:[%s4119_s3 + $0x30] sm:$0xff]  ;;  %1680 = vmatpush.msra.mxu3 %v1430_v35  ;;  %v1330_v51 = vld [vmem:[%s4119_s3 + $0x20] sm:$0xff]  ;;  %1661 = vmatpush.msra.mxu2 %v1396_v60 }
 0x13e   : > { %v1428_v4 = vld [vmem:[%s4119_s3 + $0x330] sm:$0xff]  ;;  %1640 = vmatpush.msra.mxu1 %v1366_v63  ;;  %1621 = vmatpush.msra.mxu0 %v1332_v43  ;;  %v1426_v3 = vld [vmem:[%s4119_s3 + $0x320] sm:$0xff] }
 0x13f   : > { %v1364_v7 = vld [vmem:[%s4119_s3 + $0x130] sm:$0xff]  ;;  %v1362_v28 = vld [vmem:[%s4119_s3 + $0x120] sm:$0xff]  ;;  %1681 = vmatpush.msra.mxu3 %v1428_v4  ;;  %1662 = vmatpush.msra.mxu2 %v1394_v53 }
 0x140   : > { %1641 = vmatpush.msra.mxu1 %v1364_v7  ;;  %v1392_v12 = vld [vmem:[%s4119_s3 + $0x210] sm:$0xff]  ;;  %1622 = vmatpush.msra.mxu0 %v1330_v51  ;;  %v1390_v55 = vld [vmem:[%s4119_s3 + $0x200] sm:$0xff] }
 0x141   : > { %v1328_v52 = vld [vmem:[%s4119_s3 + $0x10] sm:$0xff]  ;;  %1682 = vmatpush.msra.mxu3 %v1426_v3  ;;  %v1326_v62 = vld [vmem:[%s4119_s3] sm:$0xff]  ;;  %1663 = vmatpush.msra.mxu2 %v1392_v12 }
 0x142   : > { %v1424_v29 = vld [vmem:[%s4119_s3 + $0x310] sm:$0xff]  ;;  %1642 = vmatpush.msra.mxu1 %v1362_v28  ;;  %1623 = vmatpush.msra.mxu0 %v1328_v52  ;;  %v1422_v19 = vld [vmem:[%s4119_s3 + $0x300] sm:$0xff] }
 0x143   : > { %v1360_v14 = vld [vmem:[%s4119_s3 + $0x110] sm:$0xff]  ;;  %1683 = vmatpush.msra.mxu3 %v1424_v29  ;;  %1664 = vmatpush.msra.mxu2 %v1390_v55  ;;  %v1546_v59 = vld [vmem:[%s4119_s3 + $0x6e0] sm:$0xff] }
 0x144   : > { %v1548_v38 = vld [vmem:[%s4119_s3 + $0x6f0] sm:$0xff]  ;;  %1643 = vmatpush.msra.mxu1 %v1360_v14  ;;  %1624 = vmatpush.msra.mxu0 %v1326_v62  ;;  %v1358_v39 = vld [vmem:[%s4119_s3 + $0x100] sm:$0xff] }
 0x145   : > { %v1484_v47 = vld [vmem:[%s4119_s3 + $0x4f0] sm:$0xff]  ;;  %1729 = vmatpush.msrb.mxu2 %v1548_v38  ;;  %1684 = vmatpush.msra.mxu3 %v1422_v19  ;;  %v1482_v50 = vld [vmem:[%s4119_s3 + $0x4e0] sm:$0xff] }
 0x146   : > { %v1580_v46 = vld [vmem:[%s4119_s3 + $0x7f0] sm:$0xff]  ;;  %1689 = vmatpush.msrb.mxu0 %v1484_v47  ;;  %v1578_v6 = vld [vmem:[%s4119_s3 + $0x7e0] sm:$0xff]  ;;  %1644 = vmatpush.msra.mxu1 %v1358_v39  ;;  %v1421_v47 = vld [vmem:[%s4119_s3 + $0x2f8] sm:$0xff] }
 0x147   : > { %v1516_v31 = vld [vmem:[%s4119_s3 + $0x5f0] sm:$0xff]  ;;  %1749 = vmatpush.msrb.mxu3 %v1580_v46  ;;  %1730 = vmatpush.msrb.mxu2 %v1546_v59  ;;  %v1514_v10 = vld [vmem:[%s4119_s3 + $0x5e0] sm:$0xff] }
 0x148   : > { %v1544_v23 = vld [vmem:[%s4119_s3 + $0x6d0] sm:$0xff]  ;;  %1690 = vmatpush.msrb.mxu0 %v1482_v50  ;;  %1709 = vmatpush.msrb.mxu1 %v1516_v31  ;;  %v1542_v37 = vld [vmem:[%s4119_s3 + $0x6c0] sm:$0xff]  ;;  %v3590_v50 = vld.sshfl [vmem:[#allocation1 + $0x18] sm:$0xff pattern:$0x73625140] }
 0x149   : > { %v1480_v24 = vld [vmem:[%s4119_s3 + $0x4d0] sm:$0xff]  ;;  %1731 = vmatpush.msrb.mxu2 %v1544_v23  ;;  %1750 = vmatpush.msrb.mxu3 %v1578_v6  ;;  %v1478_v44 = vld [vmem:[%s4119_s3 + $0x4c0] sm:$0xff]  ;;  %v1357_v31 = vld [vmem:[%s4119_s3 + $0xf8] sm:$0xff] }
 0x14a   : > { %v1576_v0 = vld [vmem:[%s4119_s3 + $0x7d0] sm:$0xff]  ;;  %1691 = vmatpush.msrb.mxu0 %v1480_v24  ;;  %1710 = vmatpush.msrb.mxu1 %v1514_v10  ;;  %v1574_v57 = vld [vmem:[%s4119_s3 + $0x7c0] sm:$0xff]  ;;  %v1419_v23 = vld [vmem:[%s4119_s3 + $0x2e8] sm:$0xff] }
 0x14b   : > { %v1512_v30 = vld [vmem:[%s4119_s3 + $0x5d0] sm:$0xff]  ;;  %1732 = vmatpush.msrb.mxu2 %v1542_v37  ;;  %1751 = vmatpush.msrb.mxu3 %v1576_v0  ;;  %v1510_v32 = vld [vmem:[%s4119_s3 + $0x5c0] sm:$0xff]  ;;  %v1453_v6 = vld [vmem:[%s4119_s3 + $0x3f8] sm:$0xff] }
 0x14c   : > { %v1540_v41 = vld [vmem:[%s4119_s3 + $0x6b0] sm:$0xff]  ;;  %1692 = vmatpush.msrb.mxu0 %v1478_v44  ;;  %1711 = vmatpush.msrb.mxu1 %v1512_v30  ;;  %v1538_v15 = vld [vmem:[%s4119_s3 + $0x6a0] sm:$0xff]  ;;  %v1355_v10 = vld [vmem:[%s4119_s3 + $0xe8] sm:$0xff] }
 0x14d   : > { %v1476_v22 = vld [vmem:[%s4119_s3 + $0x4b0] sm:$0xff]  ;;  %1733 = vmatpush.msrb.mxu2 %v1540_v41  ;;  %1752 = vmatpush.msrb.mxu3 %v1574_v57  ;;  %v1474_v48 = vld [vmem:[%s4119_s3 + $0x4a0] sm:$0xff]  ;;  %v3609_v37 = vld.sshfl [vmem:[#allocation1 + $0x8] sm:$0xff pattern:$0x73625140] }
 0x14e   : > { %v1572_v26 = vld [vmem:[%s4119_s3 + $0x7b0] sm:$0xff]  ;;  %1693 = vmatpush.msrb.mxu0 %v1476_v22  ;;  %1712 = vmatpush.msrb.mxu1 %v1510_v32  ;;  %v1570_v49 = vld [vmem:[%s4119_s3 + $0x7a0] sm:$0xff]  ;;  %v1417_v0 = vld [vmem:[%s4119_s3 + $0x2d8] sm:$0xff] }
 0x14f   : > { %v1508_v34 = vld [vmem:[%s4119_s3 + $0x5b0] sm:$0xff]  ;;  %1734 = vmatpush.msrb.mxu2 %v1538_v15  ;;  %1753 = vmatpush.msrb.mxu3 %v1572_v26  ;;  %v1506_v40 = vld [vmem:[%s4119_s3 + $0x5a0] sm:$0xff]  ;;  %v1389_v44 = vld [vmem:[%s4119_s3 + $0x1f8] sm:$0xff] }
 0x150   : > { %v1536_v27 = vld [vmem:[%s4119_s3 + $0x690] sm:$0xff]  ;;  %1694 = vmatpush.msrb.mxu0 %v1474_v48  ;;  %1713 = vmatpush.msrb.mxu1 %v1508_v34  ;;  %v1534_v11 = vld [vmem:[%s4119_s3 + $0x680] sm:$0xff]  ;;  %v1451_v30 = vld [vmem:[%s4119_s3 + $0x3e8] sm:$0xff] }
 0x151   : > { %v1472_v17 = vld [vmem:[%s4119_s3 + $0x490] sm:$0xff]  ;;  %1735 = vmatpush.msrb.mxu2 %v1536_v27  ;;  %1754 = vmatpush.msrb.mxu3 %v1570_v49  ;;  %v1470_v61 = vld [vmem:[%s4119_s3 + $0x480] sm:$0xff]  ;;  %v1353_v41 = vld [vmem:[%s4119_s3 + $0xd8] sm:$0xff] }
 0x152   : > { %v1568_v42 = vld [vmem:[%s4119_s3 + $0x790] sm:$0xff]  ;;  %1695 = vmatpush.msrb.mxu0 %v1472_v17  ;;  %1714 = vmatpush.msrb.mxu1 %v1506_v40  ;;  %v1566_v5 = vld [vmem:[%s4119_s3 + $0x780] sm:$0xff]  ;;  %v1415_v57 = vld [vmem:[%s4119_s3 + $0x2c8] sm:$0xff] }
 0x153   : > { %v1504_v20 = vld [vmem:[%s4119_s3 + $0x590] sm:$0xff]  ;;  %1736 = vmatpush.msrb.mxu2 %v1534_v11  ;;  %1755 = vmatpush.msrb.mxu3 %v1568_v42  ;;  %v1502_v36 = vld [vmem:[%s4119_s3 + $0x580] sm:$0xff]  ;;  %v1387_v22 = vld [vmem:[%s4119_s3 + $0x1e8] sm:$0xff] }
 0x154   : > { %v1532_v16 = vld [vmem:[%s4119_s3 + $0x670] sm:$0xff]  ;;  %1696 = vmatpush.msrb.mxu0 %v1470_v61  ;;  %1715 = vmatpush.msrb.mxu1 %v1504_v20  ;;  %v1530_v21 = vld [vmem:[%s4119_s3 + $0x660] sm:$0xff]  ;;  %v1449_v32 = vld [vmem:[%s4119_s3 + $0x3d8] sm:$0xff] }
 0x155   : > { %v1468_v25 = vld [vmem:[%s4119_s3 + $0x470] sm:$0xff]  ;;  %1737 = vmatpush.msrb.mxu2 %v1532_v16  ;;  %1756 = vmatpush.msrb.mxu3 %v1566_v5  ;;  %v1466_v58 = vld [vmem:[%s4119_s3 + $0x460] sm:$0xff]  ;;  %v1351_v26 = vld [vmem:[%s4119_s3 + $0xc8] sm:$0xff] }
 0x156   : > { %v1564_v33 = vld [vmem:[%s4119_s3 + $0x770] sm:$0xff]  ;;  %1697 = vmatpush.msrb.mxu0 %v1468_v25  ;;  %1716 = vmatpush.msrb.mxu1 %v1502_v36  ;;  %v1562_v8 = vld [vmem:[%s4119_s3 + $0x760] sm:$0xff]  ;;  %v1385_v48 = vld [vmem:[%s4119_s3 + $0x1d8] sm:$0xff] }
 0x157   : > { %v1325_v2 = vld [vmem:[#allocation2 + $0x8] sm:$0xff]  ;;  %1738 = vmatpush.msrb.mxu2 %v1530_v21  ;;  %1757 = vmatpush.msrb.mxu3 %v1564_v33  ;;  %v1498_v1 = vld [vmem:[%s4119_s3 + $0x560] sm:$0xff]  ;;  %v1413_v34 = vld [vmem:[%s4119_s3 + $0x2b8] sm:$0xff] }
 0x158   : > { %v1500_v9 = vld [vmem:[%s4119_s3 + $0x570] sm:$0xff]  ;;  %1592 = vst [vmem:[#allocation1 + $0x20] ss:$4 sm:$0xff] %v1325_v2  ;;  %1698 = vmatpush.msrb.mxu0 %v1466_v58  ;;  %v1526_v45 = vld [vmem:[%s4119_s3 + $0x640] sm:$0xff]  ;;  %1685 = vmatmul.f32.vlgmr.msra.gmra.mxu3 %v3590_v50  ;;  %v1447_v27 = vld [vmem:[%s4119_s3 + $0x3c8] sm:$0xff] }
 0x159   : > { %v1528_v54 = vld [vmem:[%s4119_s3 + $0x650] sm:$0xff]  ;;  %1717 = vmatpush.msrb.mxu1 %v1500_v9  ;;  %1758 = vmatpush.msrb.mxu3 %v1562_v8  ;;  %v1462_v35 = vld [vmem:[%s4119_s3 + $0x440] sm:$0xff]  ;;  %v1349_v17 = vld [vmem:[%s4119_s3 + $0xb8] sm:$0xff] }
 0x15a   : > { %v1464_v13 = vld [vmem:[%s4119_s3 + $0x450] sm:$0xff]  ;;  %1739 = vmatpush.msrb.mxu2 %v1528_v54  ;;  %v1558_v43 = vld [vmem:[%s4119_s3 + $0x740] sm:$0xff]  ;;  %1645 = vmatmul.f32.vlgmr.msra.gmra.mxu1 %v3609_v37  ;;  %v1383_v40 = vld [vmem:[%s4119_s3 + $0x1c8] sm:$0xff] }
 0x15b   : > { %v1560_v18 = vld [vmem:[%s4119_s3 + $0x750] sm:$0xff]  ;;  %1699 = vmatpush.msrb.mxu0 %v1464_v13  ;;  %1718 = vmatpush.msrb.mxu1 %v1498_v1  ;;  %v1494_v7 = vld [vmem:[%s4119_s3 + $0x540] sm:$0xff]  ;;  %v1411_v11 = vld [vmem:[%s4119_s3 + $0x2a8] sm:$0xff] }
 0x15c   : > { %v1496_v63 = vld [vmem:[%s4119_s3 + $0x550] sm:$0xff]  ;;  %1740 = vmatpush.msrb.mxu2 %v1526_v45  ;;  %1759 = vmatpush.msrb.mxu3 %v1560_v18  ;;  %v1522_v53 = vld [vmem:[%s4119_s3 + $0x620] sm:$0xff]  ;;  %v1445_v42 = vld [vmem:[%s4119_s3 + $0x3b8] sm:$0xff] }
 0x15d   : > { %v1524_v60 = vld [vmem:[%s4119_s3 + $0x630] sm:$0xff]  ;;  %1700 = vmatpush.msrb.mxu0 %v1462_v35  ;;  %1719 = vmatpush.msrb.mxu1 %v1496_v63  ;;  %v1458_v3 = vld [vmem:[%s4119_s3 + $0x420] sm:$0xff]  ;;  %v1347_v20 = vld [vmem:[%s4119_s3 + $0xa8] sm:$0xff] }
 0x15e   : > { %v1460_v4 = vld [vmem:[%s4119_s3 + $0x430] sm:$0xff]  ;;  %1741 = vmatpush.msrb.mxu2 %v1524_v60  ;;  %1760 = vmatpush.msrb.mxu3 %v1558_v43  ;;  %v1554_v52 = vld [vmem:[%s4119_s3 + $0x720] sm:$0xff]  ;;  %v1381_v16 = vld [vmem:[%s4119_s3 + $0x1b8] sm:$0xff] }
 0x15f   : > { %v1556_v51 = vld [vmem:[%s4119_s3 + $0x730] sm:$0xff]  ;;  %1701 = vmatpush.msrb.mxu0 %v1460_v4  ;;  %1720 = vmatpush.msrb.mxu1 %v1494_v7  ;;  %v1490_v14 = vld [vmem:[%s4119_s3 + $0x520] sm:$0xff]  ;;  %v3650_v56 = vld.sshfl [vmem:[#allocation1 + $0x38] sm:$0xff pattern:$0x73625140] }
 0x160   : > { %v1492_v28 = vld [vmem:[%s4119_s3 + $0x530] sm:$0xff]  ;;  %1742 = vmatpush.msrb.mxu2 %v1522_v53  ;;  %1761 = vmatpush.msrb.mxu3 %v1556_v51  ;;  %v1518_v55 = vld [vmem:[%s4119_s3 + $0x600] sm:$0xff]  ;;  %v3665_v61 = vld.sshfl [vmem:[#allocation1 + $0x28] sm:$0xff pattern:$0x73625140] }
 0x161   : > { %v1520_v12 = vld [vmem:[%s4119_s3 + $0x610] sm:$0xff]  ;;  %1702 = vmatpush.msrb.mxu0 %v1458_v3  ;;  %1721 = vmatpush.msrb.mxu1 %v1492_v28  ;;  %v1454_v19 = vld [vmem:[%s4119_s3 + $0x400] sm:$0xff]  ;;  %v1409_v5 = vld [vmem:[%s4119_s3 + $0x298] sm:$0xff] }
 0x162   : > { %v1456_v29 = vld [vmem:[%s4119_s3 + $0x410] sm:$0xff]  ;;  %1743 = vmatpush.msrb.mxu2 %v1520_v12  ;;  %1762 = vmatpush.msrb.mxu3 %v1554_v52  ;;  %v1550_v59 = vld [vmem:[%s4119_s3 + $0x700] sm:$0xff]  ;;  %v1443_v25 = vld [vmem:[%s4119_s3 + $0x3a8] sm:$0xff] }
 0x163   : > { %v1552_v62 = vld [vmem:[%s4119_s3 + $0x710] sm:$0xff]  ;;  %1703 = vmatpush.msrb.mxu0 %v1456_v29  ;;  %1722 = vmatpush.msrb.mxu1 %v1490_v14  ;;  %v3587_v39 = vld.sshfl [vmem:[#allocation1] sm:$0xff pattern:$0x73625140]  ;;  %v1345_v36 = vld [vmem:[%s4119_s3 + $0x98] sm:$0xff] }
 0x164   : > { %v3573_v38 = vld.sshfl [vmem:[#allocation1 + $0x10] sm:$0xff pattern:$0x73625140]  ;;  %1744 = vmatpush.msrb.mxu2 %v1518_v55  ;;  %1763 = vmatpush.msrb.mxu3 %v1552_v62  ;;  %v1486_v24 = vld [vmem:[%s4119_s3 + $0x500] sm:$0xff]  ;;  %v1379_v21 = vld [vmem:[%s4119_s3 + $0x1a8] sm:$0xff] }
 0x165   : > { %v1488_v46 = vld [vmem:[%s4119_s3 + $0x510] sm:$0xff]  ;;  %1665 = vmatmul.f32.vlgmr.msra.gmra.mxu2 %v3573_v38  ;;  %1704 = vmatpush.msrb.mxu0 %v1454_v19  ;;  %v3647_v49 = vld.sshfl [vmem:[#allocation1 + $0x20] sm:$0xff pattern:$0x73625140]  ;;  %v1407_v33 = vld [vmem:[%s4119_s3 + $0x288] sm:$0xff] }
 0x166   : > { %1809 = vmatpush.msra.mxu2 %v1421_v47  ;;  %1723 = vmatpush.msrb.mxu1 %v1488_v46  ;;  %v3633_v15 = vld.sshfl [vmem:[#allocation1 + $0x30] sm:$0xff pattern:$0x73625140]  ;;  %v1441_v2 = vld [vmem:[%s4119_s3 + $0x398] sm:$0xff]  ;;  %v1343_v58 = vld [vmem:[%s4119_s3 + $0x88] sm:$0xff] }
 0x167   : > { %1764 = vmatpush.msrb.mxu3 %v1550_v59  ;;  %1625 = vmatmul.f32.vlgmr.msra.gmra.mxu0 %v3587_v39  ;;  %v1377_v9 = vld [vmem:[%s4119_s3 + $0x198] sm:$0xff]  ;;  %v1439_v8 = vld [vmem:[%s4119_s3 + $0x388] sm:$0xff] }
 0x168   : > { %1769 = vmatpush.msra.mxu0 %v1357_v31  ;;  %1810 = vmatpush.msra.mxu2 %v1419_v23  ;;  %v1405_v54 = vld [vmem:[%s4119_s3 + $0x278] sm:$0xff]  ;;  %v1375_v1 = vld [vmem:[%s4119_s3 + $0x188] sm:$0xff] }
 0x169   : > { %1829 = vmatpush.msra.mxu3 %v1453_v6  ;;  %1724 = vmatpush.msrb.mxu1 %v1486_v24  ;;  %v1341_v13 = vld [vmem:[%s4119_s3 + $0x78] sm:$0xff]  ;;  %v1403_v45 = vld [vmem:[%s4119_s3 + $0x268] sm:$0xff] }
 0x16a   : > { %1770 = vmatpush.msra.mxu0 %v1355_v10  ;;  %1811 = vmatpush.msra.mxu2 %v1417_v0  ;;  %v1437_v18 = vld [vmem:[%s4119_s3 + $0x378] sm:$0xff]  ;;  %v1339_v35 = vld [vmem:[%s4119_s3 + $0x68] sm:$0xff] }
 0x16b   : > { %1789 = vmatpush.msra.mxu1 %v1389_v44  ;;  %1830 = vmatpush.msra.mxu3 %v1451_v30  ;;  %v1373_v63 = vld [vmem:[%s4119_s3 + $0x178] sm:$0xff]  ;;  %v1435_v43 = vld [vmem:[%s4119_s3 + $0x368] sm:$0xff] }
 0x16c   : > { %1771 = vmatpush.msra.mxu0 %v1353_v41  ;;  %1812 = vmatpush.msra.mxu2 %v1415_v57  ;;  %v1401_v60 = vld [vmem:[%s4119_s3 + $0x258] sm:$0xff]  ;;  %v1371_v7 = vld [vmem:[%s4119_s3 + $0x168] sm:$0xff] }
 0x16d   : > { %1790 = vmatpush.msra.mxu1 %v1387_v22  ;;  %1831 = vmatpush.msra.mxu3 %v1449_v32  ;;  %v1337_v4 = vld [vmem:[%s4119_s3 + $0x58] sm:$0xff]  ;;  %v1399_v53 = vld [vmem:[%s4119_s3 + $0x248] sm:$0xff] }
 0x16e   : > { %1745 = vmatmul.f32.vlgmr.msrb.gmra.mxu2 %v3633_v15  ;;  %1772 = vmatpush.msra.mxu0 %v1351_v26  ;;  %v1433_v51 = vld [vmem:[%s4119_s3 + $0x358] sm:$0xff]  ;;  %v1335_v3 = vld [vmem:[%s4119_s3 + $0x48] sm:$0xff] }
 0x16f   : > { %1791 = vmatpush.msra.mxu1 %v1385_v48  ;;  %1813 = vmatpush.msra.mxu2 %v1413_v34  ;;  %v1369_v28 = vld [vmem:[%s4119_s3 + $0x158] sm:$0xff]  ;;  %v1431_v52 = vld [vmem:[%s4119_s3 + $0x348] sm:$0xff] }
 0x170   : > { %1832 = vmatpush.msra.mxu3 %v1447_v27  ;;  %1705 = vmatmul.f32.vlgmr.msrb.gmra.mxu0 %v3647_v49  ;;  %v1397_v12 = vld [vmem:[%s4119_s3 + $0x238] sm:$0xff]  ;;  %v1367_v14 = vld [vmem:[%s4119_s3 + $0x148] sm:$0xff] }
 0x171   : > { %1765 = vmatmul.f32.vlgmr.msrb.gmra.mxu3 %v3650_v56  ;;  %1773 = vmatpush.msra.mxu0 %v1349_v17  ;;  %v1333_v29 = vld [vmem:[%s4119_s3 + $0x38] sm:$0xff]  ;;  %v1395_v55 = vld [vmem:[%s4119_s3 + $0x228] sm:$0xff] }
 0x172   : > { %1792 = vmatpush.msra.mxu1 %v1383_v40  ;;  %1814 = vmatpush.msra.mxu2 %v1411_v11  ;;  %v1429_v62 = vld [vmem:[%s4119_s3 + $0x338] sm:$0xff]  ;;  %v1331_v19 = vld [vmem:[%s4119_s3 + $0x28] sm:$0xff] }
 0x173   : > { %1833 = vmatpush.msra.mxu3 %v1445_v42  ;;  %1725 = vmatmul.f32.vlgmr.msrb.gmra.mxu1 %v3665_v61  ;;  %v1365_v47 = vld [vmem:[%s4119_s3 + $0x138] sm:$0xff]  ;;  %v1427_v59 = vld [vmem:[%s4119_s3 + $0x328] sm:$0xff] }
 0x174   : > { %1774 = vmatpush.msra.mxu0 %v1347_v20  ;;  %1793 = vmatpush.msra.mxu1 %v1381_v16  ;;  %v1393_v46 = vld [vmem:[%s4119_s3 + $0x218] sm:$0xff]  ;;  %v1363_v23 = vld [vmem:[%s4119_s3 + $0x128] sm:$0xff] }
 0x175   : > { %1815 = vmatpush.msra.mxu2 %v1409_v5  ;;  %1834 = vmatpush.msra.mxu3 %v1443_v25  ;;  %v1329_v31 = vld [vmem:[%s4119_s3 + $0x18] sm:$0xff]  ;;  %v1391_v6 = vld [vmem:[%s4119_s3 + $0x208] sm:$0xff] }
 0x176   : > { %1775 = vmatpush.msra.mxu0 %v1345_v36  ;;  %1794 = vmatpush.msra.mxu1 %v1379_v21  ;;  %v1425_v24 = vld [vmem:[%s4119_s3 + $0x318] sm:$0xff]  ;;  %v1327_v0 = vld [vmem:[%s4119_s3 + $0x8] sm:$0xff] }
 0x177   : > { %1816 = vmatpush.msra.mxu2 %v1407_v33  ;;  %1835 = vmatpush.msra.mxu3 %v1441_v2  ;;  %v1549_v10 = vld [vmem:[%s4119_s3 + $0x6f8] sm:$0xff]  ;;  %v1423_v30 = vld [vmem:[%s4119_s3 + $0x308] sm:$0xff] }
 0x178   : > { %1776 = vmatpush.msra.mxu0 %v1343_v58  ;;  %1795 = vmatpush.msra.mxu1 %v1377_v9  ;;  %v1361_v44 = vld [vmem:[%s4119_s3 + $0x118] sm:$0xff]  ;;  %v1547_v57 = vld [vmem:[%s4119_s3 + $0x6e8] sm:$0xff] }
 0x179   : > { %1817 = vmatpush.msra.mxu2 %v1405_v54  ;;  %1836 = vmatpush.msra.mxu3 %v1439_v8  ;;  %v1485_v41 = vld [vmem:[%s4119_s3 + $0x4f8] sm:$0xff]  ;;  %v1359_v32 = vld [vmem:[%s4119_s3 + $0x108] sm:$0xff] }
 0x17a   : > { %1777 = vmatpush.msra.mxu0 %v1341_v13  ;;  %1796 = vmatpush.msra.mxu1 %v1375_v1  ;;  %v1581_v22 = vld [vmem:[%s4119_s3 + $0x7f8] sm:$0xff]  ;;  %v1483_v26 = vld [vmem:[%s4119_s3 + $0x4e8] sm:$0xff] }
 0x17b   : > { %1818 = vmatpush.msra.mxu2 %v1403_v45  ;;  %1837 = vmatpush.msra.mxu3 %v1437_v18  ;;  %v1517_v48 = vld [vmem:[%s4119_s3 + $0x5f8] sm:$0xff]  ;;  %v1579_v27 = vld [vmem:[%s4119_s3 + $0x7e8] sm:$0xff] }
 0x17c   : > { %1778 = vmatpush.msra.mxu0 %v1339_v35  ;;  %1797 = vmatpush.msra.mxu1 %v1373_v63  ;;  %v1545_v34 = vld [vmem:[%s4119_s3 + $0x6d8] sm:$0xff]  ;;  %v1515_v40 = vld [vmem:[%s4119_s3 + $0x5e8] sm:$0xff] }
 0x17d   : > { %1819 = vmatpush.msra.mxu2 %v1401_v60  ;;  %1838 = vmatpush.msra.mxu3 %v1435_v43  ;;  %v1481_v17 = vld [vmem:[%s4119_s3 + $0x4d8] sm:$0xff]  ;;  %v1543_v11 = vld [vmem:[%s4119_s3 + $0x6c8] sm:$0xff] }
 0x17e   : > { %1779 = vmatpush.msra.mxu0 %v1337_v4  ;;  %1798 = vmatpush.msra.mxu1 %v1371_v7  ;;  %v1577_v42 = vld [vmem:[%s4119_s3 + $0x7d8] sm:$0xff]  ;;  %v1479_v20 = vld [vmem:[%s4119_s3 + $0x4c8] sm:$0xff] }
 0x17f   : > { %1820 = vmatpush.msra.mxu2 %v1399_v53  ;;  %1839 = vmatpush.msra.mxu3 %v1433_v51  ;;  %v1513_v16 = vld [vmem:[%s4119_s3 + $0x5d8] sm:$0xff]  ;;  %v1575_v25 = vld [vmem:[%s4119_s3 + $0x7c8] sm:$0xff] }
 0x180   : > { %1780 = vmatpush.msra.mxu0 %v1335_v3  ;;  %1799 = vmatpush.msra.mxu1 %v1369_v28  ;;  %v1541_v5 = vld [vmem:[%s4119_s3 + $0x6b8] sm:$0xff]  ;;  %v1511_v21 = vld [vmem:[%s4119_s3 + $0x5c8] sm:$0xff] }
 0x181   : > { %1821 = vmatpush.msra.mxu2 %v1397_v12  ;;  %1840 = vmatpush.msra.mxu3 %v1431_v52  ;;  %v1477_v36 = vld [vmem:[%s4119_s3 + $0x4b8] sm:$0xff]  ;;  %v1539_v33 = vld [vmem:[%s4119_s3 + $0x6a8] sm:$0xff] }
 0x182   : > { %1781 = vmatpush.msra.mxu0 %v1333_v29  ;;  %1800 = vmatpush.msra.mxu1 %v1367_v14  ;;  %v1573_v2 = vld [vmem:[%s4119_s3 + $0x7b8] sm:$0xff]  ;;  %v1475_v58 = vld [vmem:[%s4119_s3 + $0x4a8] sm:$0xff] }
 0x183   : > { %1822 = vmatpush.msra.mxu2 %v1395_v55  ;;  %1841 = vmatpush.msra.mxu3 %v1429_v62  ;;  %v1509_v9 = vld [vmem:[%s4119_s3 + $0x5b8] sm:$0xff]  ;;  %v1571_v8 = vld [vmem:[%s4119_s3 + $0x7a8] sm:$0xff] }
 0x184   : > { %1782 = vmatpush.msra.mxu0 %v1331_v19  ;;  %1801 = vmatpush.msra.mxu1 %v1365_v47  ;;  %v1537_v54 = vld [vmem:[%s4119_s3 + $0x698] sm:$0xff]  ;;  %v1507_v1 = vld [vmem:[%s4119_s3 + $0x5a8] sm:$0xff] }
 0x185   : > { %1823 = vmatpush.msra.mxu2 %v1393_v46  ;;  %1842 = vmatpush.msra.mxu3 %v1427_v59  ;;  %v1473_v13 = vld [vmem:[%s4119_s3 + $0x498] sm:$0xff]  ;;  %v1535_v45 = vld [vmem:[%s4119_s3 + $0x688] sm:$0xff] }
 0x186   : > { %1783 = vmatpush.msra.mxu0 %v1329_v31  ;;  %1802 = vmatpush.msra.mxu1 %v1363_v23  ;;  %v1569_v18 = vld [vmem:[%s4119_s3 + $0x798] sm:$0xff]  ;;  %v1471_v35 = vld [vmem:[%s4119_s3 + $0x488] sm:$0xff] }
 0x187   : > { %1824 = vmatpush.msra.mxu2 %v1391_v6  ;;  %1843 = vmatpush.msra.mxu3 %v1425_v24  ;;  %v1505_v63 = vld [vmem:[%s4119_s3 + $0x598] sm:$0xff]  ;;  %v1567_v43 = vld [vmem:[%s4119_s3 + $0x788] sm:$0xff] }
 0x188   : > { %1784 = vmatpush.msra.mxu0 %v1327_v0  ;;  %1803 = vmatpush.msra.mxu1 %v1361_v44  ;;  %v1533_v60 = vld [vmem:[%s4119_s3 + $0x678] sm:$0xff]  ;;  %v1503_v7 = vld [vmem:[%s4119_s3 + $0x588] sm:$0xff] }
 0x189   : > { %1889 = vmatpush.msrb.mxu2 %v1549_v10  ;;  %1844 = vmatpush.msra.mxu3 %v1423_v30  ;;  %v1469_v4 = vld [vmem:[%s4119_s3 + $0x478] sm:$0xff]  ;;  %v1531_v53 = vld [vmem:[%s4119_s3 + $0x668] sm:$0xff] }
 0x18a   : > { %1849 = vmatpush.msrb.mxu0 %v1485_v41  ;;  %1804 = vmatpush.msra.mxu1 %v1359_v32  ;;  %v1565_v51 = vld [vmem:[%s4119_s3 + $0x778] sm:$0xff]  ;;  %v1467_v3 = vld [vmem:[%s4119_s3 + $0x468] sm:$0xff] }
 0x18b   : > { %1890 = vmatpush.msrb.mxu2 %v1547_v57  ;;  %1909 = vmatpush.msrb.mxu3 %v1581_v22  ;;  %v1501_v28 = vld [vmem:[%s4119_s3 + $0x578] sm:$0xff]  ;;  %v1563_v52 = vld [vmem:[%s4119_s3 + $0x768] sm:$0xff] }
 0x18c   : > { %1850 = vmatpush.msrb.mxu0 %v1483_v26  ;;  %1869 = vmatpush.msrb.mxu1 %v1517_v48  ;;  %v1529_v12 = vld [vmem:[%s4119_s3 + $0x658] sm:$0xff]  ;;  %v1499_v14 = vld [vmem:[%s4119_s3 + $0x568] sm:$0xff]  ;;  %v1945_v48 = vld [vmem:[%s4121_s5 + $0x70] sm:$0xff] }
 0x18d   : > { %1891 = vmatpush.msrb.mxu2 %v1545_v34  ;;  %1910 = vmatpush.msrb.mxu3 %v1579_v27  ;;  %v1465_v29 = vld [vmem:[%s4119_s3 + $0x458] sm:$0xff]  ;;  %v1527_v55 = vld [vmem:[%s4119_s3 + $0x648] sm:$0xff]  ;;  %v1943_v34 = vld [vmem:[%s4121_s5 + $0x60] sm:$0xff] }
 0x18e   : > { %1851 = vmatpush.msrb.mxu0 %v1481_v17  ;;  %1870 = vmatpush.msrb.mxu1 %v1515_v40  ;;  %v1561_v62 = vld [vmem:[%s4119_s3 + $0x758] sm:$0xff]  ;;  %v1463_v19 = vld [vmem:[%s4119_s3 + $0x448] sm:$0xff]  ;;  %v1939_v27 = vld [vmem:[%s4121_s5 + $0x40] sm:$0xff] }
 0x18f   : > { %1892 = vmatpush.msrb.mxu2 %v1543_v11  ;;  %1911 = vmatpush.msrb.mxu3 %v1577_v42  ;;  %v1497_v47 = vld [vmem:[%s4119_s3 + $0x558] sm:$0xff]  ;;  %v1559_v59 = vld [vmem:[%s4119_s3 + $0x748] sm:$0xff]  ;;  %v1937_v40 = vld [vmem:[%s4121_s5 + $0x30] sm:$0xff] }
 0x190   : > { %1852 = vmatpush.msrb.mxu0 %v1479_v20  ;;  %1871 = vmatpush.msrb.mxu1 %v1513_v16  ;;  %v1525_v46 = vld [vmem:[%s4119_s3 + $0x638] sm:$0xff]  ;;  %v1495_v23 = vld [vmem:[%s4119_s3 + $0x548] sm:$0xff]  ;;  %v1935_v42 = vld [vmem:[%s4121_s5 + $0x20] sm:$0xff] }
 0x191   : > { %1893 = vmatpush.msrb.mxu2 %v1541_v5  ;;  %1912 = vmatpush.msrb.mxu3 %v1575_v25  ;;  %v1461_v31 = vld [vmem:[%s4119_s3 + $0x438] sm:$0xff]  ;;  %v1523_v6 = vld [vmem:[%s4119_s3 + $0x628] sm:$0xff]  ;;  %v1933_v16 = vld [vmem:[%s4121_s5 + $0x10] sm:$0xff] }
 0x192   : > { %1853 = vmatpush.msrb.mxu0 %v1477_v36  ;;  %1872 = vmatpush.msrb.mxu1 %v1511_v21  ;;  %v1459_v24 = vld [vmem:[%s4119_s3 + $0x428] sm:$0xff]  ;;  %v1493_v10 = vld [vmem:[%s4119_s3 + $0x538] sm:$0xff]  ;;  %v1931_v25 = vld [vmem:[%s4121_s5] sm:$0xff] }
 0x193   : > { %1894 = vmatpush.msrb.mxu2 %v1539_v33  ;;  %1913 = vmatpush.msrb.mxu3 %v1573_v2  ;;  %v1555_v0 = vld [vmem:[%s4119_s3 + $0x728] sm:$0xff]  ;;  %v1553_v41 = vld [vmem:[%s4119_s3 + $0x718] sm:$0xff]  ;;  %v1961_v21 = vld [vmem:[%s4121_s5 + $0xf0] sm:$0xff] }
 0x194   : > { %1854 = vmatpush.msrb.mxu0 %v1475_v58  ;;  %1873 = vmatpush.msrb.mxu1 %v1509_v9  ;;  %v1491_v44 = vld [vmem:[%s4119_s3 + $0x528] sm:$0xff]  ;;  %v1489_v57 = vld [vmem:[%s4119_s3 + $0x518] sm:$0xff]  ;;  %v1582_v2 = vld [vmem:[%s4120_s4] sm:$0x3] }
 0x195   : > { %1895 = vmatpush.msrb.mxu2 %v1537_v54  ;;  %1914 = vmatpush.msrb.mxu3 %v1571_v8  ;;  %v1519_v30 = vld [vmem:[%s4119_s3 + $0x608] sm:$0xff]  ;;  %v1946_v26 = vld [vmem:[%s4121_s5 + $0x78] sm:$0xff]  ;;  %v1959_v58 = vld [vmem:[%s4121_s5 + $0xe0] sm:$0xff]  ;;  %v1584_v54 = vperm.slane %v1582_v2, 0 }
 0x196   : > { %1855 = vmatpush.msrb.mxu0 %v1473_v13  ;;  %1874 = vmatpush.msrb.mxu1 %v1507_v1  ;;  %v1551_v22 = vld [vmem:[%s4119_s3 + $0x708] sm:$0xff]  ;;  %v1938_v17 = vld [vmem:[%s4121_s5 + $0x38] sm:$0xff]  ;;  %v1957_v8 = vld [vmem:[%s4121_s5 + $0xd0] sm:$0xff] }
 0x197   : > { %1896 = vmatpush.msrb.mxu2 %v1535_v45  ;;  %1915 = vmatpush.msrb.mxu3 %v1569_v18  ;;  %v1487_v32 = vld [vmem:[%s4119_s3 + $0x508] sm:$0xff]  ;;  %v1934_v20 = vld [vmem:[%s4121_s5 + $0x18] sm:$0xff] }
 0x198   : > { %1856 = vmatpush.msrb.mxu0 %v1471_v35  ;;  %1875 = vmatpush.msrb.mxu1 %v1505_v63  ;;  %v1936_v11 = vld [vmem:[%s4121_s5 + $0x28] sm:$0xff]  ;;  %v1962_v36 = vld [vmem:[%s4121_s5 + $0xf8] sm:$0xff] }
 0x199   : > { %1897 = vmatpush.msrb.mxu2 %v1533_v60  ;;  %1916 = vmatpush.msrb.mxu3 %v1567_v43  ;;  %v1932_v5 = vld [vmem:[%s4121_s5 + $0x8] sm:$0xff]  ;;  %v1958_v9 = vld [vmem:[%s4121_s5 + $0xd8] sm:$0xff] }
 0x19a   : > { %1857 = vmatpush.msrb.mxu0 %v1469_v4  ;;  %1876 = vmatpush.msrb.mxu1 %v1503_v7  ;;  %v1960_v33 = vld [vmem:[%s4121_s5 + $0xe8] sm:$0xff] }
 0x19b   : > { %1898 = vmatpush.msrb.mxu2 %v1531_v53  ;;  %1917 = vmatpush.msrb.mxu3 %v1565_v51 }
 0x19c   : > { %1858 = vmatpush.msrb.mxu0 %v1467_v3  ;;  %1877 = vmatpush.msrb.mxu1 %v1501_v28 }
 0x19d   : > { %1899 = vmatpush.msrb.mxu2 %v1529_v12  ;;  %1918 = vmatpush.msrb.mxu3 %v1563_v52 }
 0x19e   : > { %1859 = vmatpush.msrb.mxu0 %v1465_v29  ;;  %1878 = vmatpush.msrb.mxu1 %v1499_v14  ;;  %v1956_v14 = vld [vmem:[%s4121_s5 + $0xc8] sm:$0xff] }
 0x19f   : > { %1900 = vmatpush.msrb.mxu2 %v1527_v55  ;;  %1919 = vmatpush.msrb.mxu3 %v1561_v62  ;;  %v1955_v55 = vld [vmem:[%s4121_s5 + $0xc0] sm:$0xff]  ;;  %v1954_v62 = vld [vmem:[%s4121_s5 + $0xb8] sm:$0xff] }
 0x1a0   : > { %1825 = vmatmul.f32.vlgmr.msra.gmra.mxu2 %v3573_v38  ;;  %1860 = vmatpush.msrb.mxu0 %v1463_v19  ;;  %v1557_v38 = vld [vmem:[%s4119_s3 + $0x738] sm:$0xff]  ;;  %v1953_v19 = vld [vmem:[%s4121_s5 + $0xb0] sm:$0xff] }
 0x1a1   : > { %1879 = vmatpush.msrb.mxu1 %v1497_v47  ;;  %1901 = vmatpush.msrb.mxu2 %v1525_v46  ;;  %v1952_v47 = vld [vmem:[%s4121_s5 + $0xa8] sm:$0xff]  ;;  %v1951_v46 = vld [vmem:[%s4121_s5 + $0xa0] sm:$0xff] }
 0x1a2   : > { %1920 = vmatpush.msrb.mxu3 %v1559_v59  ;;  %1785 = vmatmul.f32.vlgmr.msra.gmra.mxu0 %v3587_v39  ;;  %v1521_v39 = vld [vmem:[%s4119_s3 + $0x618] sm:$0xff] }
 0x1a3   : > { %1845 = vmatmul.f32.vlgmr.msra.gmra.mxu3 %v3590_v50  ;;  %1861 = vmatpush.msrb.mxu0 %v1461_v31  ;;  %v1457_v50 = vld [vmem:[%s4119_s3 + $0x418] sm:$0xff]  ;;  %v1949_v31 = vld [vmem:[%s4121_s5 + $0x90] sm:$0xff] }
 0x1a4   : > { %1880 = vmatpush.msrb.mxu1 %v1495_v23  ;;  %1902 = vmatpush.msrb.mxu2 %v1523_v6  ;;  %v1950_v59 = vld [vmem:[%s4121_s5 + $0x98] sm:$0xff]  ;;  %v1948_v23 = vld [vmem:[%s4121_s5 + $0x88] sm:$0xff]  ;;  %v1947_v6 = vld [vmem:[%s4121_s5 + $0x80] sm:$0xff] }
 0x1a5   : > { %1921 = vmatpush.msrb.mxu3 %v1557_v38  ;;  %1805 = vmatmul.f32.vlgmr.msra.gmra.mxu1 %v3609_v37  ;;  %v1455_v37 = vld [vmem:[%s4119_s3 + $0x408] sm:$0xff]  ;;  %v1585_v38 = vperm.slane %v1582_v2, 1 }
 0x1a6   : > { %1862 = vmatpush.msrb.mxu0 %v1459_v24  ;;  %1881 = vmatpush.msrb.mxu1 %v1493_v10 }
 0x1a7   : > { %1903 = vmatpush.msrb.mxu2 %v1521_v39  ;;  %1922 = vmatpush.msrb.mxu3 %v1555_v0 }
 0x1a8   : > { %1863 = vmatpush.msrb.mxu0 %v1457_v50  ;;  %1882 = vmatpush.msrb.mxu1 %v1491_v44 }
 0x1a9   : > { %1904 = vmatpush.msrb.mxu2 %v1519_v30  ;;  %1923 = vmatpush.msrb.mxu3 %v1553_v41 }
 0x1aa   : > { %1905 = vmatmul.f32.vlgmr.msrb.gmra.mxu2 %v3633_v15  ;;  %1864 = vmatpush.msrb.mxu0 %v1455_v37  ;;  %v1944_v15 = vld [vmem:[%s4121_s5 + $0x68] sm:$0xff] }
 0x1ab   : > { %1883 = vmatpush.msrb.mxu1 %v1489_v57  ;;  %1924 = vmatpush.msrb.mxu3 %v1551_v22 }
 0x1ac   : > { %1865 = vmatmul.f32.vlgmr.msrb.gmra.mxu0 %v3647_v49  ;;  %1925 = vmatmul.f32.vlgmr.msrb.gmra.mxu3 %v3650_v56  ;;  %v1942_v49 = vld [vmem:[%s4121_s5 + $0x58] sm:$0xff]  ;;  %v1941_v56 = vld [vmem:[%s4121_s5 + $0x50] sm:$0xff] }
 0x1ad   : > { %1884 = vmatpush.msrb.mxu1 %v1487_v32  ;;  %1967 = vmatpush.msra.mxu0 %v1946_v26 }
 0x1ae   : > { %1885 = vmatmul.f32.vlgmr.msrb.gmra.mxu1 %v3665_v61  ;;  %v1940_v61 = vld [vmem:[%s4121_s5 + $0x48] sm:$0xff] }
 0x1af   : > { %1968 = vmatpush.msra.mxu0 %v1945_v48  ;;  %1987 = vmatpush.msra.mxu1 %v1962_v36 }
 0x1b1   : > { %1969 = vmatpush.msra.mxu0 %v1944_v15  ;;  %1988 = vmatpush.msra.mxu1 %v1961_v21 }
 0x1b3   : > { %1970 = vmatpush.msra.mxu0 %v1943_v34  ;;  %1989 = vmatpush.msra.mxu1 %v1960_v33 }
 0x1b5   : > { %1971 = vmatpush.msra.mxu0 %v1942_v49  ;;  %1990 = vmatpush.msra.mxu1 %v1959_v58 }
 0x1b7   : > { %1972 = vmatpush.msra.mxu0 %v1941_v56  ;;  %1991 = vmatpush.msra.mxu1 %v1958_v9  ;;  %v2085_v56 = vld [vmem:[%s4122_s6] ss:$0 sm:$0xff] }
 0x1b9   : > { %1973 = vmatpush.msra.mxu0 %v1940_v61  ;;  %1992 = vmatpush.msra.mxu1 %v1957_v8 }
 0x1bb   : > { %1974 = vmatpush.msra.mxu0 %v1939_v27  ;;  %1993 = vmatpush.msra.mxu1 %v1956_v14 }
 0x1bd   : > { %1975 = vmatpush.msra.mxu0 %v1938_v17  ;;  %1994 = vmatpush.msra.mxu1 %v1955_v55 }
 0x1bf   : > { %1976 = vmatpush.msra.mxu0 %v1937_v40  ;;  %1995 = vmatpush.msra.mxu1 %v1954_v62 }
 0x1c1   : > { %1977 = vmatpush.msra.mxu0 %v1936_v11  ;;  %1996 = vmatpush.msra.mxu1 %v1953_v19 }
 0x1c3   : > { %1978 = vmatpush.msra.mxu0 %v1935_v42  ;;  %1997 = vmatpush.msra.mxu1 %v1952_v47 }
 0x1c5   : > { %1979 = vmatpush.msra.mxu0 %v1934_v20  ;;  %1998 = vmatpush.msra.mxu1 %v1951_v46 }
 0x1c7   : > { %1980 = vmatpush.msra.mxu0 %v1933_v16  ;;  %1999 = vmatpush.msra.mxu1 %v1950_v59 }
 0x1c9   : > { %1981 = vmatpush.msra.mxu0 %v1932_v5  ;;  %2000 = vmatpush.msra.mxu1 %v1949_v31 }
 0x1cb   : > { %1982 = vmatpush.msra.mxu0 %v1931_v25  ;;  %2001 = vmatpush.msra.mxu1 %v1948_v23 }
 0x1cd   : > { %2002 = vmatpush.msra.mxu1 %v1947_v6 }
 0x1d7   : > { %v1646_v45 = vpop.f32.mrf.mxu1 }
 0x1db   : > { %v1686_v60 = vpop.f32.mrf.mxu3 }
 0x1e4   : > { %v1626_v13 = vpop.f32.mrf.mxu0 }
 0x1e5   : > { %v1627_v1 = vadd.f32 %v1626_v13, %v1584_v54 }
 0x1e7   : > { %v1647_v35 = vadd.f32 %v1646_v45, %v1627_v1 }
 0x1e8   : > { %v1666_v18 = vpop.f32.mrf.mxu2 }
 0x1e9   : > { %v1667_v63 = vadd.f32 %v1666_v18, %v1647_v35 }
 0x1eb   : > { %v1687_v43 = vadd.f32 %v1686_v60, %v1667_v63 }
 0x1ed   : > { %v1706_v4 = vpop.f32.mrf.mxu0 }
 0x1ee   : > { %v1707_v7 = vadd.f32 %v1706_v4, %v1687_v43 }
 0x1f0   : > { %v1726_v53 = vpop.f32.mrf.mxu1 }
 0x1f1   : > { %v1727_v51 = vadd.f32 %v1726_v53, %v1707_v7  ;;  %v1746_v3 = vpop.f32.mrf.mxu2 }
 0x1f3   : > { %v1747_v28 = vadd.f32 %v1746_v3, %v1727_v51 }
 0x1f4   : > { %v1766_v12 = vpop.f32.mrf.mxu3 }
 0x1f5   : > { %v1767_v52 = vadd.f32 %v1766_v12, %v1747_v28 }
 0x1f7   : > { %v1929_v29 = vmax.f32 %v1767_v52, 0.0 }
 0x1f9   : > { %1983 = vmatmul.f32.vlgmr.msra.gmra.mxu0 %v1929_v29 }
 0x21f   : > { %v1786_v24 = vpop.f32.mrf.mxu0 }
 0x220   : > { %v1787_v10 = vadd.f32 %v1786_v24, %v1585_v38 }
 0x222   : > { %v1806_v39 = vpop.f32.mrf.mxu1 }
 0x223   : > { %v1807_v0 = vadd.f32 %v1806_v39, %v1787_v10  ;;  %v1826_v50 = vpop.f32.mrf.mxu2 }
 0x225   : > { %v1827_v44 = vadd.f32 %v1826_v50, %v1807_v0 }
 0x226   : > { %v1846_v30 = vpop.f32.mrf.mxu3 }
 0x227   : > { %v1847_v41 = vadd.f32 %v1846_v30, %v1827_v44 }
 0x229   : > { %v1866_v37 = vpop.f32.mrf.mxu0 }
 0x22a   : > { %v1867_v57 = vadd.f32 %v1866_v37, %v1847_v41 }
 0x22b   : > { %v1886_v22 = vpop.f32.mrf.mxu1 }
 0x22c   : > { %v1887_v32 = vadd.f32 %v1886_v22, %v1867_v57 }
 0x22d   : > { %v1906_v26 = vpop.f32.mrf.mxu2 }
 0x22e   : > { %v1907_v48 = vadd.f32 %v1906_v26, %v1887_v32 }
 0x22f   : > { %v1926_v15 = vpop.f32.mrf.mxu3 }
 0x230   : > { %v1927_v34 = vadd.f32 %v1926_v15, %v1907_v48 }
 0x232   : > { %v1930_v49 = vmax.f32 %v1927_v34, 0.0 }
 0x234   : > { %2003 = vmatmul.f32.vlgmr.msra.gmra.mxu1 %v1930_v49 }
 0x276   : > { %v1984_v61 = vpop.f32.mrf.mxu0 }
 0x277   : > { %v1985_v27 = vadd.f32 %v2085_v56, %v1984_v61 }
 0x2b1   : > { %v2004_v17 = vpop.f32.mrf.mxu1 }
 0x2b2   : > { %v2005_v40 = vadd.f32 %v2004_v17, %v1985_v27 }
 0x2b4   : > { %2008 = vst.msk [vmem:[%s4123_s7] sm:$0x3] %vm2007_vm10, %v2005_v40 }
 0x2b5 PF: > { %p14_p9 = scmp.ge.s32.totalorder %s2169_s28, 4   ;;  %s4262_s24 = smov %s2104_s25 }
 0x2b6   : > { %s4263_s25 = smov %s2178_s8  ;;  %s4264_s26 = smov %s2169_s28 }
 0x2b7   :  { %16 = sbr.rel (!%p14_p9) target bundleno = 2 (0x2), region = 108 }

// kernel: patch_generator_forward.3
= control target key start
LH: loop header
LB: loop body
LE: loop exit
PB: predicated region body
PF: predicated region fallthrough
CT: control target
= control target key end

     0   :  { %s11408_s12 = smov 0   ;;  %s11410_s13 = smov 0   ;;  %s13445_s0 = inlined_call_operand.vmem [shape: bf16[8,24,512], index: 0, kind: input, shape index: {}]   ;;  %s13446_s1 = inlined_call_operand.vmem [shape: bf16[9,512,1024], index: 1, kind: input, shape index: {}]   ;;  %s13447_s2 = inlined_call_operand.vmem [shape: f32[6,16,1024], index: 2, kind: output, shape index: {0}]   ;;  %s13448_s3 = inlined_call_operand.vmem [shape: f32[6,2,1024], index: 3, kind: output, shape index: {1}]  }
   0x1   :  { %s11412_s14 = smov 0   ;;  %s11414_s15 = smov 0  }
   0x2   :  { %s11416_s16 = smov 0  }
   0x3 LB: > { %s23_s17 = sadd.s32 1, %s11376_s14  ;;  %s26_s18 = sadd.s32 1, %s11380_s15  ;;  %s11384_s16 = sphi %s11416_s16, %s14_s16   ;;  %s11380_s15 = sphi %s11414_s15, %s13452_s15   ;;  %s11376_s14 = sphi %s11412_s14, %s13451_s14   ;;  %s11372_s13 = sphi %s11410_s13, %s13450_s13   ;;  %s11368_s12 = sphi %s11408_s12, %s13449_s12  }
   0x4   : > { %p24_p0 = scmp.ge.s32.totalorder %s23_s17, 3  ;;  %p6871_p1 = scmp.ge.s32.totalorder %s11384_s16, 1 }
   0x5   : > { %p156_p2 = scmp.lt.s32.totalorder %s11384_s16, 19 }
   0x6   : > { %s13454_s17 = smov (%p24_p0, %s23_s17), 0  ;;  %s13456_s18 = smov (!%p24_p0, %s26_s18), %s11380_s15 }
   0x7   : > { %p157_p3 = pnand %p6871_p1, %p156_p2  ;;  %p28_p4 = scmp.ge.s32.totalorder %s13456_s18, 6 }
   0x8   : > { %s186_s19 = sadd.s32 (!%p157_p3), %s11368_s12, %s11372_s13  ;;  %p193_p5 = scmp.lt.s32.totalorder (!%p157_p3), %s11372_s13, 5 }
   0x9   : > { %s13458_s18 = smov (%p28_p4, %s13456_s18), 0  ;;  %160 = sbr.rel (%p157_p3) target bundleno = 1093 (0x445), region = 28 }
   0xa   : > { %p187_p6 = scmp.lt.s32.totalorder (!%p157_p3), %s186_s19, 7  ;;  %p6877_p7 = scmp.ne.s32.totalorder (!%p157_p3), %s11368_s12, 0 }
   0xe   : > { %s13460_s13 = smov (!%p193_p5, %s11372_s13), 5  ;;  %s13462_s19 = smov (!%p187_p6, %s186_s19), 7 }
   0xf   : > { %s10520_s20 = sshll.u32 %s13460_s13, 7  ;;  %s10521_s21 = sshll.u32 %s13460_s13, 4 }
  0x10   : > { %s11303_s22 = smul.u32 48, %s13462_s19  ;;  %s11444_s25 = scalar_lea.vmem %s13447_s2, %s10520_s20 }
  0x11   : > { %s11449_s28 = scalar_lea.vmem %s13448_s3, %s10521_s21  ;;  %206 = sbr.rel (%p6877_p7) target bundleno = 39 (0x27), region = 32 }
  0x12   : > { %s11454_s4 = scalar_lea.vmem %s13445_s0, %s11303_s22 }
  0x16   : > { %v11386_v0 = vmov 0.0  }
  0x17   : > { %207 = vst [vmem:[#allocation2 + $0x30] sm:$0xff] %v11386_v0 }
  0x18   : > { %208 = vst [vmem:[#allocation2] sm:$0xff] %v11386_v0 }
  0x19   : > { %209 = vst [vmem:[#allocation2 + $0x58] sm:$0xff] %v11386_v0 }
  0x1a   : > { %210 = vst [vmem:[#allocation2 + $0x18] sm:$0xff] %v11386_v0 }
  0x1b   : > { %211 = vst [vmem:[#allocation2 + $0x50] sm:$0xff] %v11386_v0 }
  0x1c   : > { %212 = vst [vmem:[#allocation2 + $0x68] sm:$0xff] %v11386_v0 }
  0x1d   : > { %213 = vst [vmem:[#allocation2 + $0x8] sm:$0xff] %v11386_v0 }
  0x1e   : > { %214 = vst [vmem:[#allocation2 + $0x48] sm:$0xff] %v11386_v0 }
  0x1f   : > { %215 = vst [vmem:[#allocation2 + $0x40] sm:$0xff] %v11386_v0 }
  0x20   : > { %216 = vst [vmem:[#allocation2 + $0x20] sm:$0xff] %v11386_v0 }
  0x21   : > { %217 = vst [vmem:[#allocation2 + $0x10] sm:$0xff] %v11386_v0 }
  0x22   : > { %218 = vst [vmem:[#allocation2 + $0x38] sm:$0xff] %v11386_v0 }
  0x23   : > { %219 = vst [vmem:[#allocation2 + $0x60] sm:$0xff] %v11386_v0 }
  0x24   : > { %220 = vst [vmem:[#allocation2 + $0x70] sm:$0xff] %v11386_v0 }
  0x25   : > { %221 = vst [vmem:[#allocation2 + $0x78] sm:$0xff] %v11386_v0 }
  0x26   : > { %222 = vst [vmem:[#allocation2 + $0x28] sm:$0xff] %v11386_v0 }
  0x27 PF: > { %s10526_s5 = smul.u32 6144, %s11368_s12  ;;  %vm2591_vm0 = vsmask.f32 7424  ;;  %vm4712_vm1 = vcmask 1046528   ;;  %p10514_p8 = scmp.ne.s32.totalorder %s11368_s12, 2 }
  0x29   : > { %s11461_s8 = scalar_lea.vmem %s13446_s1, %s10526_s5 }
  0x2a   : > { %v7122_v1 = vld [vmem:[%s11461_s8 + $0x1c0] sm:$0xf] }
  0x2b   : > { %v10587_v2 = vld [vmem:[%s11461_s8 + $0x1dc] sm:$0xf0] }
  0x2c   : > { %v7378_v3 = vld [vmem:[%s11461_s8 + $0x3c0] sm:$0xf]  ;;  %v7123_v4 = vor.u32 %v10587_v2, %v7122_v1 }
  0x2d   : > { %v10651_v5 = vld [vmem:[%s11461_s8 + $0x3dc] sm:$0xf0] }
  0x2e   : > { %v7634_v6 = vld [vmem:[%s11461_s8 + $0x5c0] sm:$0xf]  ;;  %v7379_v8 = vor.u32 %v10651_v5, %v7378_v3  ;;  %1803 = vmatpush.bf16.msra.mxu0 %v7123_v4 }
  0x2f   : > { %v10715_v7 = vld [vmem:[%s11461_s8 + $0x5dc] sm:$0xf0] }
  0x30   : > { %v7635_v9 = vor.u32 %v10715_v7, %v7634_v6  ;;  %v7890_v10 = vld [vmem:[%s11461_s8 + $0x7c0] sm:$0xf]  ;;  %1817 = vmatpush.bf16.msra.mxu1 %v7379_v8 }
  0x31   : > { %v10779_v11 = vld [vmem:[%s11461_s8 + $0x7dc] sm:$0xf0] }
  0x32   : > { %v7090_v12 = vld [vmem:[%s11461_s8 + $0x180] sm:$0xf]  ;;  %v7891_v13 = vor.u32 %v10779_v11, %v7890_v10  ;;  %1831 = vmatpush.bf16.msra.mxu2 %v7635_v9 }
  0x33   : > { %v10579_v14 = vld [vmem:[%s11461_s8 + $0x19c] sm:$0xf0] }
  0x34   : > { %v7346_v15 = vld [vmem:[%s11461_s8 + $0x380] sm:$0xf]  ;;  %v7091_v17 = vor.u32 %v10579_v14, %v7090_v12  ;;  %1845 = vmatpush.bf16.msra.mxu3 %v7891_v13 }
  0x35   : > { %v10643_v16 = vld [vmem:[%s11461_s8 + $0x39c] sm:$0xf0] }
  0x36   : > { %v7347_v18 = vor.u32 %v10643_v16, %v7346_v15  ;;  %v7602_v19 = vld [vmem:[%s11461_s8 + $0x580] sm:$0xf]  ;;  %1804 = vmatpush.bf16.msra.mxu0 %v7091_v17 }
  0x37   : > { %v10707_v20 = vld [vmem:[%s11461_s8 + $0x59c] sm:$0xf0] }
  0x38   : > { %v7858_v21 = vld [vmem:[%s11461_s8 + $0x780] sm:$0xf]  ;;  %v7603_v22 = vor.u32 %v10707_v20, %v7602_v19  ;;  %1818 = vmatpush.bf16.msra.mxu1 %v7347_v18 }
  0x39   : > { %v10771_v23 = vld [vmem:[%s11461_s8 + $0x79c] sm:$0xf0] }
  0x3a   : > { %v7058_v24 = vld [vmem:[%s11461_s8 + $0x140] sm:$0xf]  ;;  %v7859_v26 = vor.u32 %v10771_v23, %v7858_v21  ;;  %1832 = vmatpush.bf16.msra.mxu2 %v7603_v22 }
  0x3b   : > { %v10571_v25 = vld [vmem:[%s11461_s8 + $0x15c] sm:$0xf0] }
  0x3c   : > { %v7314_v27 = vld [vmem:[%s11461_s8 + $0x340] sm:$0xf]  ;;  %v7059_v30 = vor.u32 %v10571_v25, %v7058_v24  ;;  %1846 = vmatpush.bf16.msra.mxu3 %v7859_v26 }
  0x3d   : > { %v10635_v28 = vld [vmem:[%s11461_s8 + $0x35c] sm:$0xf0] }
  0x3e   : > { %v7570_v29 = vld [vmem:[%s11461_s8 + $0x540] sm:$0xf]  ;;  %v7315_v34 = vor.u32 %v10635_v28, %v7314_v27  ;;  %1805 = vmatpush.bf16.msra.mxu0 %v7059_v30  ;;  %v7124_v30 = vld [vmem:[%s11461_s8 + $0x1e0] sm:$0xf0] }
  0x3f   : > { %v10699_v31 = vld [vmem:[%s11461_s8 + $0x55c] sm:$0xf0] }
  0x40   : > { %v7826_v32 = vld [vmem:[%s11461_s8 + $0x740] sm:$0xf]  ;;  %v7571_v35 = vor.u32 %v10699_v31, %v7570_v29  ;;  %1819 = vmatpush.bf16.msra.mxu1 %v7315_v34  ;;  %v10583_v29 = vld [vmem:[%s11461_s8 + $0x1c4] sm:$0xf] }
  0x41   : > { %v10763_v33 = vld [vmem:[%s11461_s8 + $0x75c] sm:$0xf0]  ;;  %v10647_v31 = vld [vmem:[%s11461_s8 + $0x3c4] sm:$0xf] }
  0x42   : > { %v7026_v36 = vld [vmem:[%s11461_s8 + $0x100] sm:$0xf]  ;;  %v7827_v39 = vor.u32 %v10763_v33, %v7826_v32  ;;  %1833 = vmatpush.bf16.msra.mxu2 %v7571_v35  ;;  %v7380_v33 = vld [vmem:[%s11461_s8 + $0x3e0] sm:$0xf0] }
  0x43   : > { %v10563_v37 = vld [vmem:[%s11461_s8 + $0x11c] sm:$0xf0]  ;;  %v10711_v34 = vld [vmem:[%s11461_s8 + $0x5c4] sm:$0xf] }
  0x44   : > { %v7282_v38 = vld [vmem:[%s11461_s8 + $0x300] sm:$0xf]  ;;  %v7027_v45 = vor.u32 %v10563_v37, %v7026_v36  ;;  %1847 = vmatpush.bf16.msra.mxu3 %v7827_v39  ;;  %v7636_v35 = vld [vmem:[%s11461_s8 + $0x5e0] sm:$0xf0] }
  0x45   : > { %v10627_v40 = vld [vmem:[%s11461_s8 + $0x31c] sm:$0xf0]  ;;  %v7892_v39 = vld [vmem:[%s11461_s8 + $0x7e0] sm:$0xf0] }
  0x46   : > { %v7538_v41 = vld [vmem:[%s11461_s8 + $0x500] sm:$0xf]  ;;  %v7283_v46 = vor.u32 %v10627_v40, %v7282_v38  ;;  %1806 = vmatpush.bf16.msra.mxu0 %v7027_v45  ;;  %v10775_v38 = vld [vmem:[%s11461_s8 + $0x7c4] sm:$0xf] }
  0x47   : > { %v10691_v42 = vld [vmem:[%s11461_s8 + $0x51c] sm:$0xf0]  ;;  %v7092_v45 = vld [vmem:[%s11461_s8 + $0x1a0] sm:$0xf0] }
  0x48   : > { %v7794_v43 = vld [vmem:[%s11461_s8 + $0x700] sm:$0xf]  ;;  %v7539_v47 = vor.u32 %v10691_v42, %v7538_v41  ;;  %1820 = vmatpush.bf16.msra.mxu1 %v7283_v46  ;;  %v7127_v41 = vor.u32 %v10583_v29, %v7124_v30  ;;  %v7383_v42 = vor.u32 %v10647_v31, %v7380_v33  ;;  %v10639_v46 = vld [vmem:[%s11461_s8 + $0x384] sm:$0xf]  ;;  %v6884_v29 = vld [vmem:[%s11454_s4 + $0x10] sm:$0xf0] }
  0x49   : > { %v10755_v44 = vld [vmem:[%s11461_s8 + $0x71c] sm:$0xf0]  ;;  %v7252_v31 = vld [vmem:[%s11461_s8 + $0x2e0] sm:$0xf0] }
  0x4a   : > { %v6994_v48 = vld [vmem:[%s11461_s8 + $0xc0] sm:$0xf]  ;;  %v7795_v51 = vor.u32 %v10755_v44, %v7794_v43  ;;  %1834 = vmatpush.bf16.msra.mxu2 %v7539_v47  ;;  %v7639_v43 = vor.u32 %v10711_v34, %v7636_v35  ;;  %v10575_v44 = vld [vmem:[%s11461_s8 + $0x184] sm:$0xf]  ;;  %v7895_v47 = vor.u32 %v10775_v38, %v7892_v39 }
  0x4b   : > { %v10555_v49 = vld [vmem:[%s11461_s8 + $0xdc] sm:$0xf0]  ;;  %v7508_v33 = vld [vmem:[%s11461_s8 + $0x4e0] sm:$0xf0] }
  0x4c   : > { %v7250_v50 = vld [vmem:[%s11461_s8 + $0x2c0] sm:$0xf]  ;;  %v6995_v57 = vor.u32 %v10555_v49, %v6994_v48  ;;  %1848 = vmatpush.bf16.msra.mxu3 %v7795_v51  ;;  %v7348_v48 = vld [vmem:[%s11461_s8 + $0x3a0] sm:$0xf0] }
  0x4d   : > { %v10619_v52 = vld [vmem:[%s11461_s8 + $0x2dc] sm:$0xf0]  ;;  %v10703_v49 = vld [vmem:[%s11461_s8 + $0x584] sm:$0xf] }
  0x4e   : > { %v7506_v53 = vld [vmem:[%s11461_s8 + $0x4c0] sm:$0xf]  ;;  %v7251_v58 = vor.u32 %v10619_v52, %v7250_v50  ;;  %1807 = vmatpush.bf16.msra.mxu0 %v6995_v57  ;;  %v7604_v50 = vld [vmem:[%s11461_s8 + $0x5a0] sm:$0xf0] }
  0x4f   : > { %v10683_v54 = vld [vmem:[%s11461_s8 + $0x4dc] sm:$0xf0]  ;;  %v10767_v51 = vld [vmem:[%s11461_s8 + $0x784] sm:$0xf] }
  0x50   : > { %v7762_v55 = vld [vmem:[%s11461_s8 + $0x6c0] sm:$0xf]  ;;  %v7507_v59 = vor.u32 %v10683_v54, %v7506_v53  ;;  %1821 = vmatpush.bf16.msra.mxu1 %v7251_v58  ;;  %v7860_v52 = vld [vmem:[%s11461_s8 + $0x7a0] sm:$0xf0]  ;;  %v7095_v53 = vor.u32 %v10575_v44, %v7092_v45  ;;  %v7351_v54 = vor.u32 %v10639_v46, %v7348_v48 }
  0x51   : > { %v10747_v56 = vld [vmem:[%s11461_s8 + $0x6dc] sm:$0xf0]  ;;  %v7060_v57 = vld [vmem:[%s11461_s8 + $0x160] sm:$0xf0] }
  0x52   : > { %v6962_v60 = vld [vmem:[%s11461_s8 + $0x80] sm:$0xf]  ;;  %v7763_v63 = vor.u32 %v10747_v56, %v7762_v55  ;;  %1835 = vmatpush.bf16.msra.mxu2 %v7507_v59  ;;  %v7607_v55 = vor.u32 %v10703_v49, %v7604_v50  ;;  %v10567_v56 = vld [vmem:[%s11461_s8 + $0x144] sm:$0xf]  ;;  %v7863_v59 = vor.u32 %v10767_v51, %v7860_v52 }
  0x53   : > { %v10547_v61 = vld [vmem:[%s11461_s8 + $0x9c] sm:$0xf0]  ;;  %v10631_v58 = vld [vmem:[%s11461_s8 + $0x344] sm:$0xf] }
  0x54   : > { %v7218_v62 = vld [vmem:[%s11461_s8 + $0x280] sm:$0xf]  ;;  %v6963_v5 = vor.u32 %v10547_v61, %v6962_v60  ;;  %1849 = vmatpush.bf16.msra.mxu3 %v7763_v63  ;;  %v7316_v60 = vld [vmem:[%s11461_s8 + $0x360] sm:$0xf0] }
  0x55   : > { %v10611_v0 = vld [vmem:[%s11461_s8 + $0x29c] sm:$0xf0]  ;;  %v10695_v61 = vld [vmem:[%s11461_s8 + $0x544] sm:$0xf] }
  0x56   : > { %v7474_v1 = vld [vmem:[%s11461_s8 + $0x480] sm:$0xf]  ;;  %v7219_v6 = vor.u32 %v10611_v0, %v7218_v62  ;;  %1808 = vmatpush.bf16.msra.mxu0 %v6963_v5  ;;  %v7572_v62 = vld [vmem:[%s11461_s8 + $0x560] sm:$0xf0]  ;;  %v10525_v5 = vld [vmem:[%s11454_s4 + $0x14] sm:$0xf0] }
  0x57   : > { %v10675_v2 = vld [vmem:[%s11461_s8 + $0x49c] sm:$0xf0]  ;;  %v10759_v63 = vld [vmem:[%s11461_s8 + $0x744] sm:$0xf] }
  0x58   : > { %v7730_v3 = vld [vmem:[%s11461_s8 + $0x680] sm:$0xf]  ;;  %v7475_v7 = vor.u32 %v10675_v2, %v7474_v1  ;;  %1822 = vmatpush.bf16.msra.mxu1 %v7219_v6  ;;  %v7828_v0 = vld [vmem:[%s11461_s8 + $0x760] sm:$0xf0]  ;;  %v7063_v2 = vor.u32 %v10567_v56, %v7060_v57  ;;  %v7319_v6 = vor.u32 %v10631_v58, %v7316_v60 }
  0x59   : > { %v10739_v4 = vld [vmem:[%s11461_s8 + $0x69c] sm:$0xf0]  ;;  %v10559_v1 = vld [vmem:[%s11461_s8 + $0x104] sm:$0xf] }
  0x5a   : > { %v6930_v8 = vld [vmem:[%s11461_s8 + $0x40] sm:$0xf]  ;;  %v7731_v11 = vor.u32 %v10739_v4, %v7730_v3  ;;  %1836 = vmatpush.bf16.msra.mxu2 %v7475_v7  ;;  %v7028_v3 = vld [vmem:[%s11461_s8 + $0x120] sm:$0xf0]  ;;  %v6890_v4 = vld [vmem:[%s11454_s4 + $0x8] sm:$0xf]  ;;  %v7575_v7 = vor.u32 %v10695_v61, %v7572_v62 }
  0x5b   : > { %v10539_v9 = vld [vmem:[%s11461_s8 + $0x5c] sm:$0xf0]  ;;  %v10743_v35 = vld [vmem:[%s11461_s8 + $0x6c4] sm:$0xf] }
  0x5c   : > { %v7186_v10 = vld [vmem:[%s11461_s8 + $0x240] sm:$0xf]  ;;  %v6931_v17 = vor.u32 %v10539_v9, %v6930_v8  ;;  %1850 = vmatpush.bf16.msra.mxu3 %v7731_v11  ;;  %v10623_v8 = vld [vmem:[%s11461_s8 + $0x304] sm:$0xf]  ;;  %v11556_v9 = vor.u32 %v10525_v5, %v6890_v4  ;;  %v6892_v11 = vld [vmem:[%s11454_s4 + $0x18] sm:$0xf0] }
  0x5d   : > { %v10603_v12 = vld [vmem:[%s11461_s8 + $0x25c] sm:$0xf0]  ;;  %v7220_v44 = vld [vmem:[%s11461_s8 + $0x2a0] sm:$0xf0] }
  0x5e   : > { %v7442_v13 = vld [vmem:[%s11461_s8 + $0x440] sm:$0xf]  ;;  %v7187_v20 = vor.u32 %v10603_v12, %v7186_v10  ;;  %1809 = vmatpush.bf16.msra.mxu0 %v6931_v17  ;;  %v10523_v10 = vld [vmem:[%s11454_s4 + $0xc] sm:$0xf]  ;;  %v7831_v12 = vor.u32 %v10759_v63, %v7828_v0  ;;  %v10751_v17 = vld [vmem:[%s11461_s8 + $0x704] sm:$0xf] }
  0x5f   : > { %v10667_v14 = vld [vmem:[%s11461_s8 + $0x45c] sm:$0xf0]  ;;  %v10671_v45 = vld [vmem:[%s11461_s8 + $0x484] sm:$0xf] }
  0x60   : > { %v7698_v15 = vld [vmem:[%s11461_s8 + $0x640] sm:$0xf]  ;;  %v7443_v21 = vor.u32 %v10667_v14, %v7442_v13  ;;  %1823 = vmatpush.bf16.msra.mxu1 %v7187_v20  ;;  %v7284_v13 = vld [vmem:[%s11461_s8 + $0x320] sm:$0xf0]  ;;  %v7031_v20 = vor.u32 %v10559_v1, %v7028_v3 }
  0x61   : > { %v10731_v16 = vld [vmem:[%s11461_s8 + $0x65c] sm:$0xf0]  ;;  %v10687_v14 = vld [vmem:[%s11461_s8 + $0x504] sm:$0xf] }
  0x62   : > { %v6898_v18 = vld [vmem:[%s11461_s8] sm:$0xf]  ;;  %v7699_v25 = vor.u32 %v10731_v16, %v7698_v15  ;;  %1837 = vmatpush.bf16.msra.mxu2 %v7443_v21  ;;  %v7540_v15 = vld [vmem:[%s11461_s8 + $0x520] sm:$0xf0]  ;;  %v11563_v16 = vor.u32 %v10523_v10, %v6892_v11  ;;  %v7130_v10 = vld [vmem:[%s11461_s8 + $0x1c8] sm:$0xf] }
  0x63   : > { %v10531_v19 = vld [vmem:[%s11461_s8 + $0x1c] sm:$0xf0]  ;;  %v6996_v21 = vld [vmem:[%s11461_s8 + $0xe0] sm:$0xf0]  ;;  %v10588_v11 = vld [vmem:[%s11461_s8 + $0x1e4] sm:$0xf0] }
  0x64   : > { %v7154_v22 = vld [vmem:[%s11461_s8 + $0x200] sm:$0xf]  ;;  %v6899_v32 = vor.u32 %v10531_v19, %v6898_v18  ;;  %1851 = vmatpush.bf16.msra.mxu3 %v7699_v25  ;;  %v7796_v18 = vld [vmem:[%s11461_s8 + $0x720] sm:$0xf0]  ;;  %v7543_v25 = vor.u32 %v10687_v14, %v7540_v15  ;;  %v10652_v14 = vld [vmem:[%s11461_s8 + $0x3e4] sm:$0xf0] }
  0x65   : > { %v10595_v23 = vld [vmem:[%s11461_s8 + $0x21c] sm:$0xf0]  ;;  %v10551_v19 = vld [vmem:[%s11461_s8 + $0xc4] sm:$0xf]  ;;  %v7799_v30 = vor.u32 %v10751_v17, %v7796_v18  ;;  %v7642_v15 = vld [vmem:[%s11461_s8 + $0x5c8] sm:$0xf] }
  0x66   : > { %v7410_v24 = vld [vmem:[%s11461_s8 + $0x400] sm:$0xf]  ;;  %v7155_v36 = vor.u32 %v10595_v23, %v7154_v22  ;;  %1810 = vmatpush.bf16.msra.mxu0 %v6899_v32  ;;  %v10524_v23 = vld [vmem:[%s11454_s4 + $0xc] sm:$0xf0]  ;;  %v10679_v32 = vld [vmem:[%s11461_s8 + $0x4c4] sm:$0xf] }
  0x67   : > { %v10659_v26 = vld [vmem:[%s11461_s8 + $0x41c] sm:$0xf0]  ;;  %v7511_v39 = vor.u32 %v10679_v32, %v7508_v33  ;;  %v7476_v46 = vld [vmem:[%s11461_s8 + $0x4a0] sm:$0xf0]  ;;  %v10716_v17 = vld [vmem:[%s11461_s8 + $0x5e4] sm:$0xf0] }
  0x68   : > { %v7666_v27 = vld [vmem:[%s11461_s8 + $0x600] sm:$0xf]  ;;  %v7411_v37 = vor.u32 %v10659_v26, %v7410_v24  ;;  %1824 = vmatpush.bf16.msra.mxu1 %v7155_v36  ;;  %v7287_v24 = vor.u32 %v10623_v8, %v7284_v13  ;;  %v10615_v26 = vld [vmem:[%s11461_s8 + $0x2c4] sm:$0xf]  ;;  %v7479_v51 = vor.u32 %v10671_v45, %v7476_v46  ;;  %v7610_v32 = vld [vmem:[%s11461_s8 + $0x588] sm:$0xf] }
  0x69   : > { %v10723_v28 = vld [vmem:[%s11461_s8 + $0x61c] sm:$0xf0]  ;;  %v7764_v36 = vld [vmem:[%s11461_s8 + $0x6e0] sm:$0xf0]  ;;  %v7255_v38 = vor.u32 %v10615_v26, %v7252_v31  ;;  %v7098_v26 = vld [vmem:[%s11461_s8 + $0x188] sm:$0xf] }
  0x6a   : > { %v7667_v40 = vor.u32 %v10723_v28, %v7666_v27  ;;  %1838 = vmatpush.bf16.msra.mxu2 %v7411_v37  ;;  %1859 = vmatpush.bf16.msrb.mxu0 %v7127_v41  ;;  %v6882_v22 = vld [vmem:[%s11454_s4] sm:$0xf]  ;;  %v10522_v28 = vld [vmem:[%s11454_s4 + $0x4] sm:$0xf]  ;;  %v6999_v37 = vor.u32 %v10551_v19, %v6996_v21  ;;  %v10780_v21 = vld [vmem:[%s11461_s8 + $0x7e4] sm:$0xf0] }
  0x6b   : > { %v11574_v27 = vor.u32 %v10524_v23, %v6882_v22  ;;  %v11581_v34 = vor.u32 %v10522_v28, %v6884_v29  ;;  %v6964_v41 = vld [vmem:[%s11461_s8 + $0xa0] sm:$0xf0]  ;;  %v7131_v23 = vor.u32 %v10588_v11, %v7130_v10  ;;  %v10580_v28 = vld [vmem:[%s11461_s8 + $0x1a4] sm:$0xf0] }
  0x6c   : > { %1852 = vmatpush.bf16.msra.mxu3 %v7667_v40  ;;  %1873 = vmatpush.bf16.msrb.mxu1 %v7383_v42  ;;  %v10543_v40 = vld [vmem:[%s11461_s8 + $0x84] sm:$0xf]  ;;  %v7354_v29 = vld [vmem:[%s11461_s8 + $0x388] sm:$0xf] }
  0x6d   : > { %1839 = vmatmul.bf16.vlgmr.msra.gmra.mxu2 %v11556_v9  ;;  %1811 = vmatmul.bf16.vlgmr.msra.gmra.mxu0 %v11574_v27  ;;  %v10607_v42 = vld [vmem:[%s11461_s8 + $0x284] sm:$0xf]  ;;  %v6967_v49 = vor.u32 %v10543_v40, %v6964_v41  ;;  %v10644_v31 = vld [vmem:[%s11461_s8 + $0x3a4] sm:$0xf0] }
  0x6e   : > { %1887 = vmatpush.bf16.msrb.mxu2 %v7639_v43  ;;  %1860 = vmatpush.bf16.msrb.mxu0 %v7095_v53  ;;  %v7767_v43 = vor.u32 %v10743_v35, %v7764_v36  ;;  %v7732_v48 = vld [vmem:[%s11461_s8 + $0x6a0] sm:$0xf0]  ;;  %v7223_v50 = vor.u32 %v10607_v42, %v7220_v44  ;;  %v10708_v33 = vld [vmem:[%s11461_s8 + $0x5a4] sm:$0xf0] }
  0x6f   : > { %1853 = vmatmul.bf16.vlgmr.msra.gmra.mxu3 %v11563_v16  ;;  %1825 = vmatmul.bf16.vlgmr.msra.gmra.mxu1 %v11581_v34  ;;  %v10535_v52 = vld [vmem:[%s11461_s8 + $0x44] sm:$0xf]  ;;  %v7866_v35 = vld [vmem:[%s11461_s8 + $0x788] sm:$0xf] }
  0x70   : > { %1901 = vmatpush.bf16.msrb.mxu3 %v7895_v47  ;;  %1874 = vmatpush.bf16.msrb.mxu1 %v7351_v54  ;;  %v10735_v47 = vld [vmem:[%s11461_s8 + $0x684] sm:$0xf]  ;;  %v10772_v36 = vld [vmem:[%s11461_s8 + $0x7a4] sm:$0xf0] }
  0x71   : > { %v6932_v53 = vld [vmem:[%s11461_s8 + $0x60] sm:$0xf0]  ;;  %v7066_v40 = vld [vmem:[%s11461_s8 + $0x148] sm:$0xf] }
  0x72   : > { %1888 = vmatpush.bf16.msrb.mxu2 %v7607_v55  ;;  %1861 = vmatpush.bf16.msrb.mxu0 %v7063_v2  ;;  %v10599_v54 = vld [vmem:[%s11461_s8 + $0x244] sm:$0xf]  ;;  %v7735_v55 = vor.u32 %v10735_v47, %v7732_v48  ;;  %v6935_v61 = vor.u32 %v10535_v52, %v6932_v53  ;;  %v10572_v41 = vld [vmem:[%s11461_s8 + $0x164] sm:$0xf0] }
  0x73   : > { %v7188_v56 = vld [vmem:[%s11461_s8 + $0x260] sm:$0xf0]  ;;  %v7322_v42 = vld [vmem:[%s11461_s8 + $0x348] sm:$0xf] }
  0x74   : > { %1902 = vmatpush.bf16.msrb.mxu3 %v7863_v59  ;;  %1875 = vmatpush.bf16.msrb.mxu1 %v7319_v6  ;;  %v10663_v57 = vld [vmem:[%s11461_s8 + $0x444] sm:$0xf]  ;;  %v7191_v0 = vor.u32 %v10599_v54, %v7188_v56  ;;  %v10636_v44 = vld [vmem:[%s11461_s8 + $0x364] sm:$0xf0] }
  0x75   : > { %v7444_v58 = vld [vmem:[%s11461_s8 + $0x460] sm:$0xf0]  ;;  %v7578_v45 = vld [vmem:[%s11461_s8 + $0x548] sm:$0xf] }
  0x76   : > { %1889 = vmatpush.bf16.msrb.mxu2 %v7575_v7  ;;  %1862 = vmatpush.bf16.msrb.mxu0 %v7031_v20  ;;  %v10727_v59 = vld [vmem:[%s11461_s8 + $0x644] sm:$0xf]  ;;  %v7447_v1 = vor.u32 %v10663_v57, %v7444_v58  ;;  %v7898_v20 = vld [vmem:[%s11461_s8 + $0x7c8] sm:$0xf] }
  0x77   : > { %v7700_v60 = vld [vmem:[%s11461_s8 + $0x660] sm:$0xf0]  ;;  %v10700_v46 = vld [vmem:[%s11461_s8 + $0x564] sm:$0xf0] }
  0x78   : > { %1903 = vmatpush.bf16.msrb.mxu3 %v7831_v12  ;;  %1876 = vmatpush.bf16.msrb.mxu1 %v7287_v24  ;;  %v10527_v62 = vld [vmem:[%s11461_s8 + $0x4] sm:$0xf]  ;;  %v7703_v5 = vor.u32 %v10727_v59, %v7700_v60  ;;  %v7386_v12 = vld [vmem:[%s11461_s8 + $0x3c8] sm:$0xf] }
  0x79   : > { %v6900_v63 = vld [vmem:[%s11461_s8 + $0x20] sm:$0xf0]  ;;  %v7387_v24 = vor.u32 %v10652_v14, %v7386_v12  ;;  %v7834_v47 = vld [vmem:[%s11461_s8 + $0x748] sm:$0xf] }
  0x7a   : > { %1890 = vmatpush.bf16.msrb.mxu2 %v7543_v25  ;;  %1863 = vmatpush.bf16.msrb.mxu0 %v6999_v37  ;;  %v10591_v2 = vld [vmem:[%s11461_s8 + $0x204] sm:$0xf]  ;;  %v6903_v13 = vor.u32 %v10527_v62, %v6900_v63  ;;  %v7643_v25 = vor.u32 %v10716_v17, %v7642_v15  ;;  %v7099_v37 = vor.u32 %v10580_v28, %v7098_v26  ;;  %v10764_v48 = vld [vmem:[%s11461_s8 + $0x764] sm:$0xf0] }
  0x7b   : > { %v7156_v3 = vld [vmem:[%s11461_s8 + $0x220] sm:$0xf0]  ;;  %v7034_v52 = vld [vmem:[%s11461_s8 + $0x108] sm:$0xf] }
  0x7c   : > { %1904 = vmatpush.bf16.msrb.mxu3 %v7799_v30  ;;  %1877 = vmatpush.bf16.msrb.mxu1 %v7255_v38  ;;  %v10655_v4 = vld [vmem:[%s11461_s8 + $0x404] sm:$0xf]  ;;  %v7159_v18 = vor.u32 %v10591_v2, %v7156_v3  ;;  %v7899_v30 = vor.u32 %v10780_v21, %v7898_v20  ;;  %v7355_v38 = vor.u32 %v10644_v31, %v7354_v29  ;;  %v10564_v53 = vld [vmem:[%s11461_s8 + $0x124] sm:$0xf0] }
  0x7d   : > { %v7412_v6 = vld [vmem:[%s11461_s8 + $0x420] sm:$0xf0]  ;;  %v7290_v54 = vld [vmem:[%s11461_s8 + $0x308] sm:$0xf] }
  0x7e   : > { %1891 = vmatpush.bf16.msrb.mxu2 %v7511_v39  ;;  %1864 = vmatpush.bf16.msrb.mxu0 %v6967_v49  ;;  %v10719_v7 = vld [vmem:[%s11461_s8 + $0x604] sm:$0xf]  ;;  %v7415_v19 = vor.u32 %v10655_v4, %v7412_v6  ;;  %v7611_v39 = vor.u32 %v10708_v33, %v7610_v32  ;;  %v7067_v49 = vor.u32 %v10572_v41, %v7066_v40  ;;  %v10628_v56 = vld [vmem:[%s11461_s8 + $0x324] sm:$0xf0] }
  0x7f   : > { %v7668_v8 = vld [vmem:[%s11461_s8 + $0x620] sm:$0xf0]  ;;  %v7546_v57 = vld [vmem:[%s11461_s8 + $0x508] sm:$0xf]  ;;  %v7291_v62 = vor.u32 %v10628_v56, %v7290_v54  ;;  %v10712_v54 = vld [vmem:[%s11461_s8 + $0x5cc] sm:$0xf] }
  0x80   : > { %1905 = vmatpush.bf16.msrb.mxu3 %v7767_v43  ;;  %1878 = vmatpush.bf16.msrb.mxu1 %v7223_v50  ;;  %v7671_v22 = vor.u32 %v10719_v7, %v7668_v8  ;;  %v7867_v43 = vor.u32 %v10772_v36, %v7866_v35  ;;  %v7323_v50 = vor.u32 %v10636_v44, %v7322_v42  ;;  %v10692_v58 = vld [vmem:[%s11461_s8 + $0x524] sm:$0xf0] }
  0x81   : > { %v7802_v59 = vld [vmem:[%s11461_s8 + $0x708] sm:$0xf]  ;;  %v7547_v63 = vor.u32 %v10692_v58, %v7546_v57  ;;  %v10776_v58 = vld [vmem:[%s11461_s8 + $0x7cc] sm:$0xf] }
  0x82   : > { %1892 = vmatpush.bf16.msrb.mxu2 %v7479_v51  ;;  %1865 = vmatpush.bf16.msrb.mxu0 %v6935_v61  ;;  %v7579_v51 = vor.u32 %v10700_v46, %v7578_v45  ;;  %v10756_v60 = vld [vmem:[%s11461_s8 + $0x724] sm:$0xf0]  ;;  %v7035_v61 = vor.u32 %v10564_v53, %v7034_v52  ;;  %v7388_v53 = vld [vmem:[%s11461_s8 + $0x3e8] sm:$0xf0] }
  0x83   : > { %v7258_v2 = vld [vmem:[%s11461_s8 + $0x2c8] sm:$0xf]  ;;  %v7803_v3 = vor.u32 %v10756_v60, %v7802_v59  ;;  %v7900_v59 = vld [vmem:[%s11461_s8 + $0x7e8] sm:$0xf0] }
  0x84   : > { %1906 = vmatpush.bf16.msrb.mxu3 %v7735_v55  ;;  %1879 = vmatpush.bf16.msrb.mxu1 %v7191_v0  ;;  %v7835_v55 = vor.u32 %v10764_v48, %v7834_v47  ;;  %v7002_v0 = vld [vmem:[%s11461_s8 + $0xc8] sm:$0xf] }
  0x85   : > { %v10620_v4 = vld [vmem:[%s11461_s8 + $0x2e4] sm:$0xf0] }
  0x86   : > { %1893 = vmatpush.bf16.msrb.mxu2 %v7447_v1  ;;  %1866 = vmatpush.bf16.msrb.mxu0 %v6903_v13  ;;  %v10556_v1 = vld [vmem:[%s11461_s8 + $0xe4] sm:$0xf0]  ;;  %v7259_v11 = vor.u32 %v10620_v4, %v7258_v2  ;;  %v10640_v2 = vld [vmem:[%s11461_s8 + $0x38c] sm:$0xf] }
  0x87   : > { %v10684_v6 = vld [vmem:[%s11461_s8 + $0x4e4] sm:$0xf0]  ;;  %v7003_v10 = vor.u32 %v10556_v1, %v7002_v0  ;;  %v10576_v0 = vld [vmem:[%s11461_s8 + $0x18c] sm:$0xf] }
  0x88   : > { %1907 = vmatpush.bf16.msrb.mxu3 %v7703_v5  ;;  %1880 = vmatpush.bf16.msrb.mxu1 %v7159_v18  ;;  %v7514_v5 = vld [vmem:[%s11461_s8 + $0x4c8] sm:$0xf]  ;;  %v7100_v1 = vld [vmem:[%s11461_s8 + $0x1a8] sm:$0xf0] }
  0x89   : > { %1867 = vmatmul.bf16.vlgmr.msrb.gmra.mxu0 %v11574_v27  ;;  %v7770_v7 = vld [vmem:[%s11461_s8 + $0x6c8] sm:$0xf]  ;;  %v7515_v12 = vor.u32 %v10684_v6, %v7514_v5  ;;  %v7356_v4 = vld [vmem:[%s11461_s8 + $0x3a8] sm:$0xf0] }
  0x8a   : > { %1894 = vmatpush.bf16.msrb.mxu2 %v7415_v19  ;;  %1915 = vmatpush.bf16.msra.mxu0 %v7131_v23  ;;  %v10748_v8 = vld [vmem:[%s11461_s8 + $0x6e4] sm:$0xf0]  ;;  %v10704_v5 = vld [vmem:[%s11461_s8 + $0x58c] sm:$0xf] }
  0x8b   : > { %1881 = vmatmul.bf16.vlgmr.msrb.gmra.mxu1 %v11581_v34  ;;  %v6970_v13 = vld [vmem:[%s11461_s8 + $0x88] sm:$0xf]  ;;  %v7771_v17 = vor.u32 %v10748_v8, %v7770_v7  ;;  %v7612_v6 = vld [vmem:[%s11461_s8 + $0x5a8] sm:$0xf0] }
  0x8c   : > { %1908 = vmatpush.bf16.msrb.mxu3 %v7671_v22  ;;  %1929 = vmatpush.bf16.msra.mxu1 %v7387_v24  ;;  %v10548_v14 = vld [vmem:[%s11461_s8 + $0xa4] sm:$0xf0]  ;;  %v10768_v7 = vld [vmem:[%s11461_s8 + $0x78c] sm:$0xf] }
  0x8d   : > { %1895 = vmatmul.bf16.vlgmr.msrb.gmra.mxu2 %v11556_v9  ;;  %v7226_v15 = vld [vmem:[%s11461_s8 + $0x288] sm:$0xf]  ;;  %v6971_v23 = vor.u32 %v10548_v14, %v6970_v13  ;;  %v7868_v8 = vld [vmem:[%s11461_s8 + $0x7a8] sm:$0xf0] }
  0x8e   : > { %1943 = vmatpush.bf16.msra.mxu2 %v7643_v25  ;;  %1916 = vmatpush.bf16.msra.mxu0 %v7099_v37  ;;  %v10612_v18 = vld [vmem:[%s11461_s8 + $0x2a4] sm:$0xf0]  ;;  %v10568_v13 = vld [vmem:[%s11461_s8 + $0x14c] sm:$0xf] }
  0x8f   : > { %1909 = vmatmul.bf16.vlgmr.msrb.gmra.mxu3 %v11563_v16  ;;  %v7482_v19 = vld [vmem:[%s11461_s8 + $0x488] sm:$0xf]  ;;  %v7227_v24 = vor.u32 %v10612_v18, %v7226_v15  ;;  %v7068_v14 = vld [vmem:[%s11461_s8 + $0x168] sm:$0xf0] }
  0x90   : > { %1957 = vmatpush.bf16.msra.mxu3 %v7899_v30  ;;  %1930 = vmatpush.bf16.msra.mxu1 %v7355_v38  ;;  %v10676_v20 = vld [vmem:[%s11461_s8 + $0x4a4] sm:$0xf0]  ;;  %v10632_v15 = vld [vmem:[%s11461_s8 + $0x34c] sm:$0xf] }
  0x91   : > { %v7738_v21 = vld [vmem:[%s11461_s8 + $0x688] sm:$0xf]  ;;  %v7483_v25 = vor.u32 %v10676_v20, %v7482_v19  ;;  %v7324_v18 = vld [vmem:[%s11461_s8 + $0x368] sm:$0xf0] }
  0x92   : > { %1944 = vmatpush.bf16.msra.mxu2 %v7611_v39  ;;  %1917 = vmatpush.bf16.msra.mxu0 %v7067_v49  ;;  %v10740_v22 = vld [vmem:[%s11461_s8 + $0x6a4] sm:$0xf0]  ;;  %v10584_v49 = vld [vmem:[%s11461_s8 + $0x1cc] sm:$0xf] }
  0x93   : > { %v6938_v26 = vld [vmem:[%s11461_s8 + $0x48] sm:$0xf]  ;;  %v7739_v30 = vor.u32 %v10740_v22, %v7738_v21  ;;  %v10696_v19 = vld [vmem:[%s11461_s8 + $0x54c] sm:$0xf] }
  0x94   : > { %1958 = vmatpush.bf16.msra.mxu3 %v7867_v43  ;;  %1931 = vmatpush.bf16.msra.mxu1 %v7323_v50  ;;  %v10540_v28 = vld [vmem:[%s11461_s8 + $0x64] sm:$0xf0]  ;;  %v7132_v50 = vld [vmem:[%s11461_s8 + $0x1e8] sm:$0xf0] }
  0x95   : > { %v7194_v29 = vld [vmem:[%s11461_s8 + $0x248] sm:$0xf]  ;;  %v6939_v37 = vor.u32 %v10540_v28, %v6938_v26  ;;  %v7580_v20 = vld [vmem:[%s11461_s8 + $0x568] sm:$0xf0] }
  0x96   : > { %1945 = vmatpush.bf16.msra.mxu2 %v7579_v51  ;;  %1918 = vmatpush.bf16.msra.mxu0 %v7035_v61  ;;  %v10604_v31 = vld [vmem:[%s11461_s8 + $0x264] sm:$0xf0]  ;;  %v10648_v51 = vld [vmem:[%s11461_s8 + $0x3cc] sm:$0xf]  ;;  %v7135_v61 = vor.u32 %v10584_v49, %v7132_v50 }
  0x97   : > { %v7450_v32 = vld [vmem:[%s11461_s8 + $0x448] sm:$0xf]  ;;  %v7195_v40 = vor.u32 %v10604_v31, %v7194_v29  ;;  %v10760_v21 = vld [vmem:[%s11461_s8 + $0x74c] sm:$0xf] }
  0x98   : > { %1959 = vmatpush.bf16.msra.mxu3 %v7835_v55  ;;  %1932 = vmatpush.bf16.msra.mxu1 %v7291_v62  ;;  %v10668_v33 = vld [vmem:[%s11461_s8 + $0x464] sm:$0xf0]  ;;  %v7644_v55 = vld [vmem:[%s11461_s8 + $0x5e8] sm:$0xf0]  ;;  %v7391_v62 = vor.u32 %v10648_v51, %v7388_v53 }
  0x99   : > { %v7706_v35 = vld [vmem:[%s11461_s8 + $0x648] sm:$0xf]  ;;  %v7451_v41 = vor.u32 %v10668_v33, %v7450_v32  ;;  %v7836_v22 = vld [vmem:[%s11461_s8 + $0x768] sm:$0xf0] }
  0x9a   : > { %1946 = vmatpush.bf16.msra.mxu2 %v7547_v63  ;;  %1919 = vmatpush.bf16.msra.mxu0 %v7003_v10  ;;  %v10732_v36 = vld [vmem:[%s11461_s8 + $0x664] sm:$0xf0]  ;;  %v7647_v63 = vor.u32 %v10712_v54, %v7644_v55  ;;  %v7103_v10 = vor.u32 %v10576_v0, %v7100_v1  ;;  %v10560_v26 = vld [vmem:[%s11461_s8 + $0x10c] sm:$0xf] }
  0x9b   : > { %v6906_v38 = vld [vmem:[%s11461_s8 + $0x8] sm:$0xf]  ;;  %v7707_v45 = vor.u32 %v10732_v36, %v7706_v35  ;;  %v7036_v28 = vld [vmem:[%s11461_s8 + $0x128] sm:$0xf0] }
  0x9c   : > { %1960 = vmatpush.bf16.msra.mxu3 %v7803_v3  ;;  %1933 = vmatpush.bf16.msra.mxu1 %v7259_v11  ;;  %v10532_v39 = vld [vmem:[%s11461_s8 + $0x24] sm:$0xf0]  ;;  %v7903_v3 = vor.u32 %v10776_v58, %v7900_v59  ;;  %v7359_v11 = vor.u32 %v10640_v2, %v7356_v4  ;;  %v10624_v29 = vld [vmem:[%s11461_s8 + $0x30c] sm:$0xf] }
  0x9d   : > { %v7162_v42 = vld [vmem:[%s11461_s8 + $0x208] sm:$0xf]  ;;  %v6907_v52 = vor.u32 %v10532_v39, %v6906_v38  ;;  %v7292_v31 = vld [vmem:[%s11461_s8 + $0x328] sm:$0xf0] }
  0x9e   : > { %1947 = vmatpush.bf16.msra.mxu2 %v7515_v12  ;;  %1920 = vmatpush.bf16.msra.mxu0 %v6971_v23  ;;  %v10596_v43 = vld [vmem:[%s11461_s8 + $0x224] sm:$0xf0]  ;;  %v7615_v12 = vor.u32 %v10704_v5, %v7612_v6  ;;  %v7071_v23 = vor.u32 %v10568_v13, %v7068_v14  ;;  %v10688_v32 = vld [vmem:[%s11461_s8 + $0x50c] sm:$0xf]  ;;  %v7295_v38 = vor.u32 %v10624_v29, %v7292_v31  ;;  %v7650_v29 = vld [vmem:[%s11461_s8 + $0x5d0] sm:$0xf] }
  0x9f   : > { %v7418_v44 = vld [vmem:[%s11461_s8 + $0x408] sm:$0xf]  ;;  %v7163_v56 = vor.u32 %v10596_v43, %v7162_v42  ;;  %v7548_v33 = vld [vmem:[%s11461_s8 + $0x528] sm:$0xf0] }
  0xa0   : > { %1961 = vmatpush.bf16.msra.mxu3 %v7771_v17  ;;  %1934 = vmatpush.bf16.msra.mxu1 %v7227_v24  ;;  %v10660_v46 = vld [vmem:[%s11461_s8 + $0x424] sm:$0xf0]  ;;  %v7871_v17 = vor.u32 %v10768_v7, %v7868_v8  ;;  %v7327_v24 = vor.u32 %v10632_v15, %v7324_v18  ;;  %v10752_v35 = vld [vmem:[%s11461_s8 + $0x70c] sm:$0xf]  ;;  %v7551_v39 = vor.u32 %v10688_v32, %v7548_v33  ;;  %v7906_v33 = vld [vmem:[%s11461_s8 + $0x7d0] sm:$0xf] }
  0xa1   : > { %v7674_v47 = vld [vmem:[%s11461_s8 + $0x608] sm:$0xf]  ;;  %v7419_v57 = vor.u32 %v10660_v46, %v7418_v44  ;;  %v7804_v36 = vld [vmem:[%s11461_s8 + $0x728] sm:$0xf0] }
  0xa2   : > { %1948 = vmatpush.bf16.msra.mxu2 %v7483_v25  ;;  %v10724_v48 = vld [vmem:[%s11461_s8 + $0x624] sm:$0xf0]  ;;  %1921 = vmatpush.bf16.msra.mxu0 %v6939_v37  ;;  %v7583_v25 = vor.u32 %v10696_v19, %v7580_v20  ;;  %v7039_v37 = vor.u32 %v10560_v26, %v7036_v28  ;;  %v10616_v42 = vld [vmem:[%s11461_s8 + $0x2cc] sm:$0xf]  ;;  %v7807_v43 = vor.u32 %v10752_v35, %v7804_v36  ;;  %v10653_v28 = vld [vmem:[%s11461_s8 + $0x3ec] sm:$0xf0] }
  0xa3   : > { %v7675_v60 = vor.u32 %v10724_v48, %v7674_v47  ;;  %v7260_v44 = vld [vmem:[%s11461_s8 + $0x2e8] sm:$0xf0]  ;;  %v10781_v35 = vld [vmem:[%s11461_s8 + $0x7ec] sm:$0xf0] }
  0xa4   : > { %1962 = vmatpush.bf16.msra.mxu3 %v7739_v30  ;;  %1935 = vmatpush.bf16.msra.mxu1 %v7195_v40  ;;  %v7839_v30 = vor.u32 %v10760_v21, %v7836_v22  ;;  %v10552_v40 = vld [vmem:[%s11461_s8 + $0xcc] sm:$0xf]  ;;  %v7263_v50 = vor.u32 %v10616_v42, %v7260_v44  ;;  %v7362_v42 = vld [vmem:[%s11461_s8 + $0x390] sm:$0xf] }
  0xa5   : > { %v7516_v46 = vld [vmem:[%s11461_s8 + $0x4e8] sm:$0xf0]  ;;  %v10645_v44 = vld [vmem:[%s11461_s8 + $0x3ac] sm:$0xf0] }
  0xa6   : > { %1949 = vmatpush.bf16.msra.mxu2 %v7451_v41  ;;  %1922 = vmatpush.bf16.msra.mxu0 %v6907_v52  ;;  %v7004_v41 = vld [vmem:[%s11461_s8 + $0xe8] sm:$0xf0] }
  0xa7   : > { %v10744_v47 = vld [vmem:[%s11461_s8 + $0x6cc] sm:$0xf]  ;;  %v7007_v49 = vor.u32 %v10552_v40, %v7004_v41  ;;  %v7106_v40 = vld [vmem:[%s11461_s8 + $0x190] sm:$0xf] }
  0xa8   : > { %1963 = vmatpush.bf16.msra.mxu3 %v7707_v45  ;;  %1936 = vmatpush.bf16.msra.mxu1 %v7163_v56  ;;  %v10680_v45 = vld [vmem:[%s11461_s8 + $0x4cc] sm:$0xf]  ;;  %v10581_v41 = vld [vmem:[%s11461_s8 + $0x1ac] sm:$0xf0] }
  0xa9   : > { %1923 = vmatmul.bf16.vlgmr.msra.gmra.mxu0 %v11574_v27  ;;  %v7772_v48 = vld [vmem:[%s11461_s8 + $0x6e8] sm:$0xf0]  ;;  %v7519_v51 = vor.u32 %v10680_v45, %v7516_v46  ;;  %v7618_v45 = vld [vmem:[%s11461_s8 + $0x590] sm:$0xf] }
  0xaa   : > { %1950 = vmatpush.bf16.msra.mxu2 %v7419_v57  ;;  %1971 = vmatpush.bf16.msrb.mxu0 %v7135_v61  ;;  %v10544_v52 = vld [vmem:[%s11461_s8 + $0x8c] sm:$0xf]  ;;  %v7775_v55 = vor.u32 %v10744_v47, %v7772_v48  ;;  %v10709_v46 = vld [vmem:[%s11461_s8 + $0x5ac] sm:$0xf0] }
  0xab   : > { %1937 = vmatmul.bf16.vlgmr.msra.gmra.mxu1 %v11581_v34  ;;  %v6972_v53 = vld [vmem:[%s11461_s8 + $0xa8] sm:$0xf0]  ;;  %v7874_v47 = vld [vmem:[%s11461_s8 + $0x790] sm:$0xf] }
  0xac   : > { %1964 = vmatpush.bf16.msra.mxu3 %v7675_v60  ;;  %1985 = vmatpush.bf16.msrb.mxu1 %v7391_v62  ;;  %v10608_v54 = vld [vmem:[%s11461_s8 + $0x28c] sm:$0xf]  ;;  %v6975_v61 = vor.u32 %v10544_v52, %v6972_v53  ;;  %v10773_v48 = vld [vmem:[%s11461_s8 + $0x7ac] sm:$0xf0] }
  0xad   : > { %1951 = vmatmul.bf16.vlgmr.msra.gmra.mxu2 %v11556_v9  ;;  %v7228_v56 = vld [vmem:[%s11461_s8 + $0x2a8] sm:$0xf0]  ;;  %v7074_v52 = vld [vmem:[%s11461_s8 + $0x150] sm:$0xf] }
  0xae   : > { %1999 = vmatpush.bf16.msrb.mxu2 %v7647_v63  ;;  %1972 = vmatpush.bf16.msrb.mxu0 %v7103_v10  ;;  %v10672_v57 = vld [vmem:[%s11461_s8 + $0x48c] sm:$0xf]  ;;  %v7231_v62 = vor.u32 %v10608_v54, %v7228_v56  ;;  %v10573_v53 = vld [vmem:[%s11461_s8 + $0x16c] sm:$0xf0] }
  0xaf   : > { %1965 = vmatmul.bf16.vlgmr.msra.gmra.mxu3 %v11563_v16  ;;  %v7484_v58 = vld [vmem:[%s11461_s8 + $0x4a8] sm:$0xf0]  ;;  %v7330_v54 = vld [vmem:[%s11461_s8 + $0x350] sm:$0xf] }
  0xb0   : > { %2013 = vmatpush.bf16.msrb.mxu3 %v7903_v3  ;;  %1986 = vmatpush.bf16.msrb.mxu1 %v7359_v11  ;;  %v10736_v59 = vld [vmem:[%s11461_s8 + $0x68c] sm:$0xf]  ;;  %v7487_v63 = vor.u32 %v10672_v57, %v7484_v58  ;;  %v10637_v56 = vld [vmem:[%s11461_s8 + $0x36c] sm:$0xf0] }
  0xb1   : > { %v7740_v60 = vld [vmem:[%s11461_s8 + $0x6a8] sm:$0xf0]  ;;  %v7586_v57 = vld [vmem:[%s11461_s8 + $0x550] sm:$0xf] }
  0xb2   : > { %2000 = vmatpush.bf16.msrb.mxu2 %v7615_v12  ;;  %1973 = vmatpush.bf16.msrb.mxu0 %v7071_v23  ;;  %v10536_v0 = vld [vmem:[%s11461_s8 + $0x4c] sm:$0xf]  ;;  %v7743_v3 = vor.u32 %v10736_v59, %v7740_v60  ;;  %v7138_v23 = vld [vmem:[%s11461_s8 + $0x1d0] sm:$0xf] }
  0xb3   : > { %v6940_v1 = vld [vmem:[%s11461_s8 + $0x68] sm:$0xf0]  ;;  %v10701_v58 = vld [vmem:[%s11461_s8 + $0x56c] sm:$0xf0] }
  0xb4   : > { %2014 = vmatpush.bf16.msrb.mxu3 %v7871_v17  ;;  %1987 = vmatpush.bf16.msrb.mxu1 %v7327_v24  ;;  %v10600_v2 = vld [vmem:[%s11461_s8 + $0x24c] sm:$0xf]  ;;  %v6943_v10 = vor.u32 %v10536_v0, %v6940_v1  ;;  %v10589_v24 = vld [vmem:[%s11461_s8 + $0x1ec] sm:$0xf0] }
  0xb5   : > { %v7196_v4 = vld [vmem:[%s11461_s8 + $0x268] sm:$0xf0]  ;;  %v7842_v59 = vld [vmem:[%s11461_s8 + $0x750] sm:$0xf] }
  0xb6   : > { %2001 = vmatpush.bf16.msrb.mxu2 %v7583_v25  ;;  %1974 = vmatpush.bf16.msrb.mxu0 %v7039_v37  ;;  %v10664_v5 = vld [vmem:[%s11461_s8 + $0x44c] sm:$0xf]  ;;  %v7199_v13 = vor.u32 %v10600_v2, %v7196_v4  ;;  %v7394_v25 = vld [vmem:[%s11461_s8 + $0x3d0] sm:$0xf]  ;;  %v7139_v37 = vor.u32 %v10589_v24, %v7138_v23 }
  0xb7   : > { %v7452_v6 = vld [vmem:[%s11461_s8 + $0x468] sm:$0xf0]  ;;  %v10765_v60 = vld [vmem:[%s11461_s8 + $0x76c] sm:$0xf0] }
  0xb8   : > { %2015 = vmatpush.bf16.msrb.mxu3 %v7839_v30  ;;  %1988 = vmatpush.bf16.msrb.mxu1 %v7295_v38  ;;  %v10728_v7 = vld [vmem:[%s11461_s8 + $0x64c] sm:$0xf]  ;;  %v7455_v14 = vor.u32 %v10664_v5, %v7452_v6  ;;  %v10717_v30 = vld [vmem:[%s11461_s8 + $0x5ec] sm:$0xf0]  ;;  %v7395_v38 = vor.u32 %v10653_v28, %v7394_v25 }
  0xb9   : > { %v7708_v8 = vld [vmem:[%s11461_s8 + $0x668] sm:$0xf0]  ;;  %v7042_v0 = vld [vmem:[%s11461_s8 + $0x110] sm:$0xf] }
  0xba   : > { %2002 = vmatpush.bf16.msrb.mxu2 %v7551_v39  ;;  %1975 = vmatpush.bf16.msrb.mxu0 %v7007_v49  ;;  %v10528_v11 = vld [vmem:[%s11461_s8 + $0xc] sm:$0xf]  ;;  %v7711_v19 = vor.u32 %v10728_v7, %v7708_v8  ;;  %v7651_v39 = vor.u32 %v10717_v30, %v7650_v29  ;;  %v7107_v49 = vor.u32 %v10581_v41, %v7106_v40  ;;  %v10565_v1 = vld [vmem:[%s11461_s8 + $0x12c] sm:$0xf0] }
  0xbb   : > { %v6908_v12 = vld [vmem:[%s11461_s8 + $0x28] sm:$0xf0]  ;;  %v7298_v2 = vld [vmem:[%s11461_s8 + $0x310] sm:$0xf] }
  0xbc   : > { %2016 = vmatpush.bf16.msrb.mxu3 %v7807_v43  ;;  %1989 = vmatpush.bf16.msrb.mxu1 %v7263_v50  ;;  %v10592_v15 = vld [vmem:[%s11461_s8 + $0x20c] sm:$0xf]  ;;  %v6911_v26 = vor.u32 %v10528_v11, %v6908_v12  ;;  %v7907_v43 = vor.u32 %v10781_v35, %v7906_v33  ;;  %v7363_v50 = vor.u32 %v10645_v44, %v7362_v42  ;;  %v10629_v4 = vld [vmem:[%s11461_s8 + $0x32c] sm:$0xf0] }
  0xbd   : > { %v7164_v17 = vld [vmem:[%s11461_s8 + $0x228] sm:$0xf0]  ;;  %v7554_v5 = vld [vmem:[%s11461_s8 + $0x510] sm:$0xf]  ;;  %v7299_v11 = vor.u32 %v10629_v4, %v7298_v2  ;;  %v10713_v2 = vld [vmem:[%s11461_s8 + $0x5d4] sm:$0xf] }
  0xbe   : > { %2003 = vmatpush.bf16.msrb.mxu2 %v7519_v51  ;;  %1976 = vmatpush.bf16.msrb.mxu0 %v6975_v61  ;;  %v10656_v18 = vld [vmem:[%s11461_s8 + $0x40c] sm:$0xf]  ;;  %v7167_v31 = vor.u32 %v10592_v15, %v7164_v17  ;;  %v7619_v51 = vor.u32 %v10709_v46, %v7618_v45  ;;  %v7075_v61 = vor.u32 %v10573_v53, %v7074_v52  ;;  %v10693_v6 = vld [vmem:[%s11461_s8 + $0x52c] sm:$0xf0] }
  0xbf   : > { %v7420_v20 = vld [vmem:[%s11461_s8 + $0x428] sm:$0xf0]  ;;  %v7810_v7 = vld [vmem:[%s11461_s8 + $0x710] sm:$0xf]  ;;  %v7555_v12 = vor.u32 %v10693_v6, %v7554_v5  ;;  %v10777_v6 = vld [vmem:[%s11461_s8 + $0x7d4] sm:$0xf] }
  0xc0   : > { %2017 = vmatpush.bf16.msrb.mxu3 %v7775_v55  ;;  %1990 = vmatpush.bf16.msrb.mxu1 %v7231_v62  ;;  %v10720_v21 = vld [vmem:[%s11461_s8 + $0x60c] sm:$0xf]  ;;  %v7423_v32 = vor.u32 %v10656_v18, %v7420_v20  ;;  %v7875_v55 = vor.u32 %v10773_v48, %v7874_v47  ;;  %v7331_v62 = vor.u32 %v10637_v56, %v7330_v54  ;;  %v10757_v8 = vld [vmem:[%s11461_s8 + $0x72c] sm:$0xf0] }
  0xc1   : > { %v7676_v22 = vld [vmem:[%s11461_s8 + $0x628] sm:$0xf0]  ;;  %v7266_v15 = vld [vmem:[%s11461_s8 + $0x2d0] sm:$0xf]  ;;  %v7811_v17 = vor.u32 %v10757_v8, %v7810_v7  ;;  %v7908_v7 = vld [vmem:[%s11461_s8 + $0x7f0] sm:$0xf0] }
  0xc2   : > { %2004 = vmatpush.bf16.msrb.mxu2 %v7487_v63  ;;  %1977 = vmatpush.bf16.msrb.mxu0 %v6943_v10  ;;  %v7679_v36 = vor.u32 %v10720_v21, %v7676_v22  ;;  %v7587_v63 = vor.u32 %v10701_v58, %v7586_v57  ;;  %v7043_v10 = vor.u32 %v10565_v1, %v7042_v0  ;;  %v10621_v18 = vld [vmem:[%s11461_s8 + $0x2ec] sm:$0xf0]  ;;  %v7396_v1 = vld [vmem:[%s11461_s8 + $0x3f0] sm:$0xf0] }
  0xc3   : > { %v10685_v20 = vld [vmem:[%s11461_s8 + $0x4ec] sm:$0xf0]  ;;  %v7267_v24 = vor.u32 %v10621_v18, %v7266_v15  ;;  %v10641_v15 = vld [vmem:[%s11461_s8 + $0x394] sm:$0xf] }
  0xc4   : > { %2018 = vmatpush.bf16.msrb.mxu3 %v7743_v3  ;;  %1991 = vmatpush.bf16.msrb.mxu1 %v7199_v13  ;;  %v7843_v3 = vor.u32 %v10765_v60, %v7842_v59  ;;  %v7010_v13 = vld [vmem:[%s11461_s8 + $0xd0] sm:$0xf]  ;;  %v7364_v18 = vld [vmem:[%s11461_s8 + $0x3b0] sm:$0xf0] }
  0xc5   : > { %v7778_v21 = vld [vmem:[%s11461_s8 + $0x6d0] sm:$0xf] }
  0xc6   : > { %2005 = vmatpush.bf16.msrb.mxu2 %v7455_v14  ;;  %1978 = vmatpush.bf16.msrb.mxu0 %v6911_v26  ;;  %v10557_v14 = vld [vmem:[%s11461_s8 + $0xec] sm:$0xf0] }
  0xc7   : > { %v10749_v22 = vld [vmem:[%s11461_s8 + $0x6ec] sm:$0xf0]  ;;  %v7011_v23 = vor.u32 %v10557_v14, %v7010_v13  ;;  %v10577_v13 = vld [vmem:[%s11461_s8 + $0x194] sm:$0xf] }
  0xc8   : > { %2019 = vmatpush.bf16.msrb.mxu3 %v7711_v19  ;;  %1992 = vmatpush.bf16.msrb.mxu1 %v7167_v31  ;;  %v7522_v19 = vld [vmem:[%s11461_s8 + $0x4d0] sm:$0xf]  ;;  %v7779_v30 = vor.u32 %v10749_v22, %v7778_v21  ;;  %v7108_v14 = vld [vmem:[%s11461_s8 + $0x1b0] sm:$0xf0] }
  0xc9   : > { %1979 = vmatmul.bf16.vlgmr.msrb.gmra.mxu0 %v11574_v27  ;;  %v7523_v25 = vor.u32 %v10685_v20, %v7522_v19  ;;  %v6978_v26 = vld [vmem:[%s11461_s8 + $0x90] sm:$0xf]  ;;  %v10705_v19 = vld [vmem:[%s11461_s8 + $0x594] sm:$0xf] }
  0xca   : > { %2006 = vmatpush.bf16.msrb.mxu2 %v7423_v32  ;;  %2027 = vmatpush.bf16.msra.mxu0 %v7139_v37  ;;  %v10549_v28 = vld [vmem:[%s11461_s8 + $0xac] sm:$0xf0]  ;;  %v7620_v20 = vld [vmem:[%s11461_s8 + $0x5b0] sm:$0xf0] }
  0xcb   : > { %1993 = vmatmul.bf16.vlgmr.msrb.gmra.mxu1 %v11581_v34  ;;  %v7234_v29 = vld [vmem:[%s11461_s8 + $0x290] sm:$0xf]  ;;  %v6979_v37 = vor.u32 %v10549_v28, %v6978_v26  ;;  %v10769_v21 = vld [vmem:[%s11461_s8 + $0x794] sm:$0xf] }
  0xcc   : > { %2020 = vmatpush.bf16.msrb.mxu3 %v7679_v36  ;;  %2041 = vmatpush.bf16.msra.mxu1 %v7395_v38  ;;  %v10613_v31 = vld [vmem:[%s11461_s8 + $0x2ac] sm:$0xf0]  ;;  %v7876_v22 = vld [vmem:[%s11461_s8 + $0x7b0] sm:$0xf0] }
  0xcd   : > { %2007 = vmatmul.bf16.vlgmr.msrb.gmra.mxu2 %v11556_v9  ;;  %v7490_v32 = vld [vmem:[%s11461_s8 + $0x490] sm:$0xf]  ;;  %v7235_v38 = vor.u32 %v10613_v31, %v7234_v29  ;;  %v10569_v26 = vld [vmem:[%s11461_s8 + $0x154] sm:$0xf] }
  0xce   : > { %2055 = vmatpush.bf16.msra.mxu2 %v7651_v39  ;;  %2028 = vmatpush.bf16.msra.mxu0 %v7107_v49  ;;  %v10677_v33 = vld [vmem:[%s11461_s8 + $0x4ac] sm:$0xf0]  ;;  %v7076_v28 = vld [vmem:[%s11461_s8 + $0x170] sm:$0xf0] }
  0xcf   : > { %2021 = vmatmul.bf16.vlgmr.msrb.gmra.mxu3 %v11563_v16  ;;  %v7746_v35 = vld [vmem:[%s11461_s8 + $0x690] sm:$0xf]  ;;  %v7491_v39 = vor.u32 %v10677_v33, %v7490_v32  ;;  %v10633_v29 = vld [vmem:[%s11461_s8 + $0x354] sm:$0xf] }
  0xd0   : > { %2069 = vmatpush.bf16.msra.mxu3 %v7907_v43  ;;  %2042 = vmatpush.bf16.msra.mxu1 %v7363_v50  ;;  %v10741_v36 = vld [vmem:[%s11461_s8 + $0x6ac] sm:$0xf0]  ;;  %v7332_v31 = vld [vmem:[%s11461_s8 + $0x370] sm:$0xf0] }
  0xd1   : > { %v6946_v40 = vld [vmem:[%s11461_s8 + $0x50] sm:$0xf]  ;;  %v7747_v43 = vor.u32 %v10741_v36, %v7746_v35  ;;  %v10697_v32 = vld [vmem:[%s11461_s8 + $0x554] sm:$0xf] }
  0xd2   : > { %2056 = vmatpush.bf16.msra.mxu2 %v7619_v51  ;;  %2029 = vmatpush.bf16.msra.mxu0 %v7075_v61  ;;  %v10541_v41 = vld [vmem:[%s11461_s8 + $0x6c] sm:$0xf0]  ;;  %v10585_v61 = vld [vmem:[%s11461_s8 + $0x1d4] sm:$0xf] }
  0xd3   : > { %v7202_v42 = vld [vmem:[%s11461_s8 + $0x250] sm:$0xf]  ;;  %v6947_v49 = vor.u32 %v10541_v41, %v6946_v40  ;;  %v7588_v33 = vld [vmem:[%s11461_s8 + $0x570] sm:$0xf0] }
  0xd4   : > { %2070 = vmatpush.bf16.msra.mxu3 %v7875_v55  ;;  %2043 = vmatpush.bf16.msra.mxu1 %v7331_v62  ;;  %v10605_v44 = vld [vmem:[%s11461_s8 + $0x26c] sm:$0xf0]  ;;  %v7140_v62 = vld [vmem:[%s11461_s8 + $0x1f0] sm:$0xf0] }
  0xd5   : > { %v7458_v45 = vld [vmem:[%s11461_s8 + $0x450] sm:$0xf]  ;;  %v7203_v52 = vor.u32 %v10605_v44, %v7202_v42  ;;  %v10761_v35 = vld [vmem:[%s11461_s8 + $0x754] sm:$0xf] }
  0xd6   : > { %2057 = vmatpush.bf16.msra.mxu2 %v7587_v63  ;;  %2030 = vmatpush.bf16.msra.mxu0 %v7043_v10  ;;  %v10669_v46 = vld [vmem:[%s11461_s8 + $0x46c] sm:$0xf0]  ;;  %v10649_v63 = vld [vmem:[%s11461_s8 + $0x3d4] sm:$0xf]  ;;  %v7143_v10 = vor.u32 %v10585_v61, %v7140_v62 }
  0xd7   : > { %v7714_v47 = vld [vmem:[%s11461_s8 + $0x650] sm:$0xf]  ;;  %v7459_v53 = vor.u32 %v10669_v46, %v7458_v45  ;;  %v7844_v36 = vld [vmem:[%s11461_s8 + $0x770] sm:$0xf0] }
  0xd8   : > { %2071 = vmatpush.bf16.msra.mxu3 %v7843_v3  ;;  %2044 = vmatpush.bf16.msra.mxu1 %v7299_v11  ;;  %v10733_v48 = vld [vmem:[%s11461_s8 + $0x66c] sm:$0xf0]  ;;  %v7652_v3 = vld [vmem:[%s11461_s8 + $0x5f0] sm:$0xf0]  ;;  %v7399_v11 = vor.u32 %v10649_v63, %v7396_v1 }
  0xd9   : > { %v6914_v50 = vld [vmem:[%s11461_s8 + $0x10] sm:$0xf]  ;;  %v7715_v57 = vor.u32 %v10733_v48, %v7714_v47  ;;  %v10561_v40 = vld [vmem:[%s11461_s8 + $0x114] sm:$0xf] }
  0xda   : > { %2058 = vmatpush.bf16.msra.mxu2 %v7555_v12  ;;  %2031 = vmatpush.bf16.msra.mxu0 %v7011_v23  ;;  %v10533_v51 = vld [vmem:[%s11461_s8 + $0x2c] sm:$0xf0]  ;;  %v7655_v12 = vor.u32 %v10713_v2, %v7652_v3  ;;  %v7111_v23 = vor.u32 %v10577_v13, %v7108_v14  ;;  %v7044_v41 = vld [vmem:[%s11461_s8 + $0x130] sm:$0xf0] }
  0xdb   : > { %v7170_v54 = vld [vmem:[%s11461_s8 + $0x210] sm:$0xf]  ;;  %v6915_v0 = vor.u32 %v10533_v51, %v6914_v50  ;;  %v10625_v42 = vld [vmem:[%s11461_s8 + $0x314] sm:$0xf] }
  0xdc   : > { %2072 = vmatpush.bf16.msra.mxu3 %v7811_v17  ;;  %2045 = vmatpush.bf16.msra.mxu1 %v7267_v24  ;;  %v10597_v55 = vld [vmem:[%s11461_s8 + $0x22c] sm:$0xf0]  ;;  %v7911_v17 = vor.u32 %v10777_v6, %v7908_v7  ;;  %v7367_v24 = vor.u32 %v10641_v15, %v7364_v18  ;;  %v7300_v44 = vld [vmem:[%s11461_s8 + $0x330] sm:$0xf0] }
  0xdd   : > { %v7426_v56 = vld [vmem:[%s11461_s8 + $0x410] sm:$0xf]  ;;  %v7171_v4 = vor.u32 %v10597_v55, %v7170_v54  ;;  %v10689_v45 = vld [vmem:[%s11461_s8 + $0x514] sm:$0xf]  ;;  %v7303_v50 = vor.u32 %v10625_v42, %v7300_v44 }
  0xde   : > { %2059 = vmatpush.bf16.msra.mxu2 %v7523_v25  ;;  %2032 = vmatpush.bf16.msra.mxu0 %v6979_v37  ;;  %v10661_v58 = vld [vmem:[%s11461_s8 + $0x42c] sm:$0xf0]  ;;  %v7623_v25 = vor.u32 %v10705_v19, %v7620_v20  ;;  %v7079_v37 = vor.u32 %v10569_v26, %v7076_v28  ;;  %v7556_v46 = vld [vmem:[%s11461_s8 + $0x530] sm:$0xf0] }
  0xdf   : > { %v7682_v59 = vld [vmem:[%s11461_s8 + $0x610] sm:$0xf]  ;;  %v7427_v5 = vor.u32 %v10661_v58, %v7426_v56  ;;  %v10753_v47 = vld [vmem:[%s11461_s8 + $0x714] sm:$0xf]  ;;  %v7559_v51 = vor.u32 %v10689_v45, %v7556_v46  ;;  %v7146_v45 = vld [vmem:[%s11461_s8 + $0x1d8] sm:$0xf] }
  0xe0   : > { %2073 = vmatpush.bf16.msra.mxu3 %v7779_v30  ;;  %2046 = vmatpush.bf16.msra.mxu1 %v7235_v38  ;;  %v10725_v60 = vld [vmem:[%s11461_s8 + $0x62c] sm:$0xf0]  ;;  %v7879_v30 = vor.u32 %v10769_v21, %v7876_v22  ;;  %v7335_v38 = vor.u32 %v10633_v29, %v7332_v31  ;;  %v7812_v48 = vld [vmem:[%s11461_s8 + $0x730] sm:$0xf0]  ;;  %v10590_v46 = vld [vmem:[%s11461_s8 + $0x1f4] sm:$0xf0] }
  0xe1   : > { %v7683_v8 = vor.u32 %v10725_v60, %v7682_v59  ;;  %v10617_v54 = vld [vmem:[%s11461_s8 + $0x2d4] sm:$0xf]  ;;  %v7815_v55 = vor.u32 %v10753_v47, %v7812_v48  ;;  %v7402_v47 = vld [vmem:[%s11461_s8 + $0x3d8] sm:$0xf] }
  0xe2   : > { %2060 = vmatpush.bf16.msra.mxu2 %v7491_v39  ;;  %2033 = vmatpush.bf16.msra.mxu0 %v6947_v49  ;;  %v7591_v39 = vor.u32 %v10697_v32, %v7588_v33  ;;  %v7047_v49 = vor.u32 %v10561_v40, %v7044_v41  ;;  %v7268_v56 = vld [vmem:[%s11461_s8 + $0x2f0] sm:$0xf0] }
  0xe3   : > { %v7524_v58 = vld [vmem:[%s11461_s8 + $0x4f0] sm:$0xf0]  ;;  %v7271_v62 = vor.u32 %v10617_v54, %v7268_v56  ;;  %v7914_v56 = vld [vmem:[%s11461_s8 + $0x7d8] sm:$0xf] }
  0xe4   : > { %2074 = vmatpush.bf16.msra.mxu3 %v7747_v43  ;;  %2047 = vmatpush.bf16.msra.mxu1 %v7203_v52  ;;  %v7847_v43 = vor.u32 %v10761_v35, %v7844_v36  ;;  %v10553_v52 = vld [vmem:[%s11461_s8 + $0xd4] sm:$0xf] }
  0xe5   : > { %v10745_v59 = vld [vmem:[%s11461_s8 + $0x6d4] sm:$0xf] }
  0xe6   : > { %2061 = vmatpush.bf16.msra.mxu2 %v7459_v53  ;;  %2034 = vmatpush.bf16.msra.mxu0 %v6915_v0  ;;  %v7012_v53 = vld [vmem:[%s11461_s8 + $0xf0] sm:$0xf0] }
  0xe7   : > { %v7780_v60 = vld [vmem:[%s11461_s8 + $0x6f0] sm:$0xf0]  ;;  %v7015_v61 = vor.u32 %v10553_v52, %v7012_v53 }
  0xe8   : > { %2075 = vmatpush.bf16.msra.mxu3 %v7715_v57  ;;  %2048 = vmatpush.bf16.msra.mxu1 %v7171_v4  ;;  %v10681_v57 = vld [vmem:[%s11461_s8 + $0x4d4] sm:$0xf]  ;;  %v7783_v3 = vor.u32 %v10745_v59, %v7780_v60  ;;  %v7147_v60 = vor.u32 %v10590_v46, %v7146_v45 }
  0xe9   : > { %2035 = vmatmul.bf16.vlgmr.msra.gmra.mxu0 %v11574_v27  ;;  %v7527_v63 = vor.u32 %v10681_v57, %v7524_v58  ;;  %v10545_v0 = vld [vmem:[%s11461_s8 + $0x94] sm:$0xf]  ;;  %v10782_v57 = vld [vmem:[%s11461_s8 + $0x7f4] sm:$0xf0] }
  0xea   : > { %2062 = vmatpush.bf16.msra.mxu2 %v7427_v5  ;;  %2083 = vmatpush.bf16.msrb.mxu0 %v7143_v10  ;;  %v6980_v1 = vld [vmem:[%s11461_s8 + $0xb0] sm:$0xf0] }
  0xeb   : > { %2049 = vmatmul.bf16.vlgmr.msra.gmra.mxu1 %v11581_v34  ;;  %v10609_v2 = vld [vmem:[%s11461_s8 + $0x294] sm:$0xf]  ;;  %v6983_v10 = vor.u32 %v10545_v0, %v6980_v1  ;;  %v7114_v1 = vld [vmem:[%s11461_s8 + $0x198] sm:$0xf] }
  0xec   : > { %2076 = vmatpush.bf16.msra.mxu3 %v7683_v8  ;;  %2097 = vmatpush.bf16.msrb.mxu1 %v7399_v11  ;;  %v7236_v4 = vld [vmem:[%s11461_s8 + $0x2b0] sm:$0xf0]  ;;  %v1812_v11 = vpop.f32.mrf.mxu0  ;;  %v1826_v18 = vpop.f32.mrf.mxu1 }
  0xed   : > { %2063 = vmatmul.bf16.vlgmr.msra.gmra.mxu2 %v11556_v9  ;;  %v10673_v5 = vld [vmem:[%s11461_s8 + $0x494] sm:$0xf] }
  0xee   : > { %2111 = vmatpush.bf16.msrb.mxu2 %v7655_v12  ;;  %2084 = vmatpush.bf16.msrb.mxu0 %v7111_v23  ;;  %v7492_v6 = vld [vmem:[%s11461_s8 + $0x4b0] sm:$0xf0]  ;;  %v7239_v12 = vor.u32 %v10609_v2, %v7236_v4  ;;  %v1827_v23 = vadd.f32 %v1826_v18, %v1812_v11  ;;  %v10582_v2 = vld [vmem:[%s11461_s8 + $0x1b4] sm:$0xf0] }
  0xef   : > { %2077 = vmatmul.bf16.vlgmr.msra.gmra.mxu3 %v11563_v16  ;;  %v10737_v7 = vld [vmem:[%s11461_s8 + $0x694] sm:$0xf]  ;;  %v7495_v13 = vor.u32 %v10673_v5, %v7492_v6  ;;  %v7915_v5 = vor.u32 %v10782_v57, %v7914_v56  ;;  %v10646_v6 = vld [vmem:[%s11461_s8 + $0x3b4] sm:$0xf0] }
  0xf0   : > { %2125 = vmatpush.bf16.msrb.mxu3 %v7911_v17  ;;  %2098 = vmatpush.bf16.msrb.mxu1 %v7367_v24  ;;  %v7748_v8 = vld [vmem:[%s11461_s8 + $0x6b0] sm:$0xf0]  ;;  %v1840_v24 = vpop.f32.mrf.mxu2  ;;  %v7882_v11 = vld [vmem:[%s11461_s8 + $0x798] sm:$0xf] }
  0xf1   : > { %v10537_v14 = vld [vmem:[%s11461_s8 + $0x54] sm:$0xf]  ;;  %v7751_v19 = vor.u32 %v10737_v7, %v7748_v8  ;;  %v1841_v33 = vadd.f32 %v1840_v24, %v1827_v23  ;;  %v7626_v7 = vld [vmem:[%s11461_s8 + $0x598] sm:$0xf] }
  0xf2   : > { %2112 = vmatpush.bf16.msrb.mxu2 %v7623_v25  ;;  %2085 = vmatpush.bf16.msrb.mxu0 %v7079_v37  ;;  %v6948_v15 = vld [vmem:[%s11461_s8 + $0x70] sm:$0xf0]  ;;  %v1854_v28 = vpop.f32.mrf.mxu3  ;;  %v10710_v8 = vld [vmem:[%s11461_s8 + $0x5b4] sm:$0xf0] }
  0xf3   : > { %v10601_v17 = vld [vmem:[%s11461_s8 + $0x254] sm:$0xf]  ;;  %v6951_v29 = vor.u32 %v10537_v14, %v6948_v15  ;;  %v1855_v44 = vadd.f32 %v1854_v28, %v1841_v33  ;;  %v7115_v14 = vor.u32 %v10582_v2, %v7114_v1  ;;  %v7627_v18 = vor.u32 %v10710_v8, %v7626_v7  ;;  %v10638_v23 = vld [vmem:[%s11461_s8 + $0x374] sm:$0xf0] }
  0xf4   : > { %2126 = vmatpush.bf16.msrb.mxu3 %v7879_v30  ;;  %2099 = vmatpush.bf16.msrb.mxu1 %v7335_v38  ;;  %v7204_v20 = vld [vmem:[%s11461_s8 + $0x270] sm:$0xf0]  ;;  %v1814_v53 = vpop.f32.mrf.mxu0  ;;  %v1828_v58 = vpop.f32.mrf.mxu1  ;;  %v7594_v24 = vld [vmem:[%s11461_s8 + $0x558] sm:$0xf] }
  0xf5   : > { %v10665_v21 = vld [vmem:[%s11461_s8 + $0x454] sm:$0xf]  ;;  %v7207_v35 = vor.u32 %v10601_v17, %v7204_v20  ;;  %v10574_v20 = vld [vmem:[%s11461_s8 + $0x174] sm:$0xf0] }
  0xf6   : > { %2113 = vmatpush.bf16.msrb.mxu2 %v7591_v39  ;;  %2086 = vmatpush.bf16.msrb.mxu0 %v7047_v49  ;;  %v7460_v22 = vld [vmem:[%s11461_s8 + $0x470] sm:$0xf0]  ;;  %v10654_v49 = vld [vmem:[%s11461_s8 + $0x3f4] sm:$0xf0] }
  0xf7   : > { %v10729_v25 = vld [vmem:[%s11461_s8 + $0x654] sm:$0xf]  ;;  %v7463_v36 = vor.u32 %v10665_v21, %v7460_v22  ;;  %v7338_v21 = vld [vmem:[%s11461_s8 + $0x358] sm:$0xf] }
  0xf8   : > { %2127 = vmatpush.bf16.msrb.mxu3 %v7847_v43  ;;  %2100 = vmatpush.bf16.msrb.mxu1 %v7303_v50  ;;  %v7716_v26 = vld [vmem:[%s11461_s8 + $0x670] sm:$0xf0]  ;;  %v7658_v50 = vld [vmem:[%s11461_s8 + $0x5d8] sm:$0xf] }
  0xf9   : > { %v10529_v30 = vld [vmem:[%s11461_s8 + $0x14] sm:$0xf]  ;;  %v7719_v40 = vor.u32 %v10729_v25, %v7716_v26  ;;  %v10702_v25 = vld [vmem:[%s11461_s8 + $0x574] sm:$0xf0] }
  0xfa   : > { %2114 = vmatpush.bf16.msrb.mxu2 %v7559_v51  ;;  %2087 = vmatpush.bf16.msrb.mxu0 %v7015_v61  ;;  %v6916_v31 = vld [vmem:[%s11461_s8 + $0x30] sm:$0xf0]  ;;  %v10718_v51 = vld [vmem:[%s11461_s8 + $0x5f4] sm:$0xf0]  ;;  %v1829_v61 = vadd.f32 %v1828_v58, %v1814_v53  ;;  %v1856_v4 = vpop.f32.mrf.mxu3 }
  0xfb   : > { %v10593_v32 = vld [vmem:[%s11461_s8 + $0x214] sm:$0xf]  ;;  %v6919_v48 = vor.u32 %v10529_v30, %v6916_v31  ;;  %v7659_v0 = vor.u32 %v10718_v51, %v7658_v50  ;;  %v7850_v28 = vld [vmem:[%s11461_s8 + $0x758] sm:$0xf]  ;;  %v7339_v31 = vor.u32 %v10638_v23, %v7338_v21 }
  0xfc   : > { %2128 = vmatpush.bf16.msrb.mxu3 %v7815_v55  ;;  %2101 = vmatpush.bf16.msrb.mxu1 %v7271_v62  ;;  %v7172_v37 = vld [vmem:[%s11461_s8 + $0x230] sm:$0xf0]  ;;  %v1842_v62 = vpop.f32.mrf.mxu2  ;;  %v7050_v33 = vld [vmem:[%s11461_s8 + $0x118] sm:$0xf] }
  0xfd   : > { %v10657_v38 = vld [vmem:[%s11461_s8 + $0x414] sm:$0xf]  ;;  %v7175_v54 = vor.u32 %v10593_v32, %v7172_v37  ;;  %v7595_v32 = vor.u32 %v10702_v25, %v7594_v24  ;;  %v7530_v53 = vld [vmem:[%s11461_s8 + $0x4d8] sm:$0xf] }
  0xfe   : > { %2115 = vmatpush.bf16.msrb.mxu2 %v7527_v63  ;;  %2088 = vmatpush.bf16.msrb.mxu0 %v6983_v10  ;;  %v227_v39 = vld [vmem:[#allocation2 + $0x30] sm:$0xff]  ;;  %v7403_v63 = vor.u32 %v10654_v49, %v7402_v47  ;;  %v1843_v10 = vadd.f32 %v1842_v62, %v1829_v61  ;;  %v7018_v47 = vld [vmem:[%s11461_s8 + $0xd8] sm:$0xf] }
  0xff   : > { %v7428_v41 = vld [vmem:[%s11461_s8 + $0x430] sm:$0xf0]  ;;  %v2251_v52 = vadd.f32 %v1855_v44, %v227_v39  ;;  %v7562_v39 = vld [vmem:[%s11461_s8 + $0x518] sm:$0xf] }
 0x100   : > { %2129 = vmatpush.bf16.msrb.mxu3 %v7783_v3  ;;  %2102 = vmatpush.bf16.msrb.mxu1 %v7239_v12  ;;  %v10721_v42 = vld [vmem:[%s11461_s8 + $0x614] sm:$0xf]  ;;  %v7431_v55 = vor.u32 %v10657_v38, %v7428_v41  ;;  %v7370_v3 = vld [vmem:[%s11461_s8 + $0x398] sm:$0xf]  ;;  %v1857_v15 = vadd.f32 %v1856_v4, %v1843_v10  ;;  %v228_v10 = vld [vmem:[#allocation2] sm:$0xff] }
 0x101   : > { %v7684_v43 = vld [vmem:[%s11461_s8 + $0x630] sm:$0xf0]  ;;  %2267 = vst [vmem:[#allocation2 + $0x30] sm:$0xff] %v2251_v52  ;;  %v10774_v12 = vld [vmem:[%s11461_s8 + $0x7b4] sm:$0xf0]  ;;  %v7371_v17 = vor.u32 %v10646_v6, %v7370_v3 }
 0x102   : > { %2116 = vmatpush.bf16.msrb.mxu2 %v7495_v13  ;;  %2089 = vmatpush.bf16.msrb.mxu0 %v6951_v29  ;;  %v7687_v59 = vor.u32 %v10721_v42, %v7684_v43  ;;  %v235_v13 = vld [vmem:[#allocation2 + $0x40] sm:$0xff]  ;;  %v7883_v22 = vor.u32 %v10774_v12, %v7882_v11  ;;  %v10766_v29 = vld [vmem:[%s11461_s8 + $0x774] sm:$0xf0] }
 0x103   : > { %v2259_v26 = vadd.f32 %v1857_v15, %v235_v13  ;;  %v7851_v37 = vor.u32 %v10766_v29, %v7850_v28  ;;  %v10630_v38 = vld [vmem:[%s11461_s8 + $0x334] sm:$0xf0] }
 0x104   : > { %2130 = vmatpush.bf16.msrb.mxu3 %v7751_v19  ;;  %2103 = vmatpush.bf16.msrb.mxu1 %v7207_v35  ;;  %v7082_v19 = vld [vmem:[%s11461_s8 + $0x158] sm:$0xf] }
 0x105   : > { %v7083_v30 = vor.u32 %v10574_v20, %v7082_v19  ;;  %2275 = vst [vmem:[#allocation2 + $0x40] sm:$0xff] %v2259_v26  ;;  %v10566_v35 = vld [vmem:[%s11461_s8 + $0x134] sm:$0xf0] }
 0x106   : > { %2117 = vmatpush.bf16.msrb.mxu2 %v7463_v36  ;;  %2090 = vmatpush.bf16.msrb.mxu0 %v6919_v48  ;;  %v7306_v36 = vld [vmem:[%s11461_s8 + $0x318] sm:$0xf]  ;;  %v7051_v43 = vor.u32 %v10566_v35, %v7050_v33  ;;  %v1868_v44 = vpop.f32.mrf.mxu0 }
 0x107   : > { %v7818_v41 = vld [vmem:[%s11461_s8 + $0x718] sm:$0xf]  ;;  %v7307_v45 = vor.u32 %v10630_v38, %v7306_v36 }
 0x108   : > { %2131 = vmatpush.bf16.msrb.mxu3 %v7719_v40  ;;  %2104 = vmatpush.bf16.msrb.mxu1 %v7175_v54  ;;  %v10694_v40 = vld [vmem:[%s11461_s8 + $0x534] sm:$0xf0]  ;;  %v1882_v50 = vpop.f32.mrf.mxu1 }
 0x109   : > { %2091 = vmatmul.bf16.vlgmr.msrb.gmra.mxu0 %v11574_v27  ;;  %v10758_v42 = vld [vmem:[%s11461_s8 + $0x734] sm:$0xf0]  ;;  %v7563_v46 = vor.u32 %v10694_v40, %v7562_v39 }
 0x10a   : > { %2118 = vmatpush.bf16.msrb.mxu2 %v7431_v55  ;;  %2139 = vmatpush.bf16.msra.mxu0 %v7147_v60  ;;  %v10558_v48 = vld [vmem:[%s11461_s8 + $0xf4] sm:$0xf0]  ;;  %v7819_v51 = vor.u32 %v10758_v42, %v7818_v41  ;;  %v1883_v55 = vadd.f32 %v1882_v50, %v1868_v44  ;;  %v10586_v44 = vld [vmem:[%s11461_s8 + $0x1dc] sm:$0xf] }
 0x10b   : > { %2105 = vmatmul.bf16.vlgmr.msrb.gmra.mxu1 %v11581_v34  ;;  %v7274_v49 = vld [vmem:[%s11461_s8 + $0x2d8] sm:$0xf]  ;;  %v7019_v58 = vor.u32 %v10558_v48, %v7018_v47  ;;  %v7148_v47 = vld [vmem:[%s11461_s8 + $0x1f8] sm:$0xf0] }
 0x10c   : > { %2132 = vmatpush.bf16.msrb.mxu3 %v7687_v59  ;;  %2153 = vmatpush.bf16.msra.mxu1 %v7403_v63  ;;  %v10622_v52 = vld [vmem:[%s11461_s8 + $0x2f4] sm:$0xf0]  ;;  %v10650_v48 = vld [vmem:[%s11461_s8 + $0x3dc] sm:$0xf] }
 0x10d   : > { %2119 = vmatmul.bf16.vlgmr.msrb.gmra.mxu2 %v11556_v9  ;;  %v10686_v54 = vld [vmem:[%s11461_s8 + $0x4f4] sm:$0xf0]  ;;  %v7275_v59 = vor.u32 %v10622_v52, %v7274_v49  ;;  %v236_v49 = vld [vmem:[#allocation2 + $0x20] sm:$0xff]  ;;  %v10714_v52 = vld [vmem:[%s11461_s8 + $0x5dc] sm:$0xf] }
 0x10e   : > { %2167 = vmatpush.bf16.msra.mxu2 %v7659_v0  ;;  %2140 = vmatpush.bf16.msra.mxu0 %v7115_v14  ;;  %v7786_v56 = vld [vmem:[%s11461_s8 + $0x6d8] sm:$0xf]  ;;  %v7531_v60 = vor.u32 %v10686_v54, %v7530_v53  ;;  %v1870_v13 = vpop.f32.mrf.mxu0  ;;  %v7660_v53 = vld [vmem:[%s11461_s8 + $0x5f8] sm:$0xf0] }
 0x10f   : > { %2133 = vmatmul.bf16.vlgmr.msrb.gmra.mxu3 %v11563_v16  ;;  %v10750_v57 = vld [vmem:[%s11461_s8 + $0x6f4] sm:$0xf0] }
 0x110   : > { %2181 = vmatpush.bf16.msra.mxu3 %v7915_v5  ;;  %2154 = vmatpush.bf16.msra.mxu1 %v7371_v17  ;;  %v6986_v61 = vld [vmem:[%s11461_s8 + $0x98] sm:$0xf]  ;;  %v1896_v0 = vpop.f32.mrf.mxu2  ;;  %v7787_v1 = vor.u32 %v10750_v57, %v7786_v56  ;;  %v1884_v20 = vpop.f32.mrf.mxu1  ;;  %v10778_v57 = vld [vmem:[%s11461_s8 + $0x7dc] sm:$0xf] }
 0x111   : > { %v10550_v62 = vld [vmem:[%s11461_s8 + $0xb4] sm:$0xf0]  ;;  %v1897_v5 = vadd.f32 %v1896_v0, %v1883_v55  ;;  %v1885_v26 = vadd.f32 %v1884_v20, %v1870_v13  ;;  %v7663_v0 = vor.u32 %v10714_v52, %v7660_v53  ;;  %v10570_v13 = vld [vmem:[%s11461_s8 + $0x15c] sm:$0xf] }
 0x112   : > { %2168 = vmatpush.bf16.msra.mxu2 %v7627_v18  ;;  %2141 = vmatpush.bf16.msra.mxu0 %v7083_v30  ;;  %v7242_v63 = vld [vmem:[%s11461_s8 + $0x298] sm:$0xf]  ;;  %v1910_v6 = vpop.f32.mrf.mxu3  ;;  %v6987_v11 = vor.u32 %v10550_v62, %v6986_v61  ;;  %v10578_v61 = vld [vmem:[%s11461_s8 + $0x19c] sm:$0xf] }
 0x113   : > { %v10614_v2 = vld [vmem:[%s11461_s8 + $0x2b4] sm:$0xf0]  ;;  %v1911_v12 = vadd.f32 %v1910_v6, %v1897_v5  ;;  %v10706_v5 = vld [vmem:[%s11461_s8 + $0x59c] sm:$0xf] }
 0x114   : > { %2182 = vmatpush.bf16.msra.mxu3 %v7883_v22  ;;  %2155 = vmatpush.bf16.msra.mxu1 %v7339_v31  ;;  %v7498_v3 = vld [vmem:[%s11461_s8 + $0x498] sm:$0xf]  ;;  %v7243_v14 = vor.u32 %v10614_v2, %v7242_v63  ;;  %v10642_v2 = vld [vmem:[%s11461_s8 + $0x39c] sm:$0xf] }
 0x115   : > { %v10678_v4 = vld [vmem:[%s11461_s8 + $0x4b4] sm:$0xf0]  ;;  %v2252_v25 = vadd.f32 %v1911_v12, %v228_v10  ;;  %v7628_v6 = vld [vmem:[%s11461_s8 + $0x5b8] sm:$0xf0] }
 0x116   : > { %2169 = vmatpush.bf16.msra.mxu2 %v7595_v32  ;;  %2142 = vmatpush.bf16.msra.mxu0 %v7051_v43  ;;  %v7754_v7 = vld [vmem:[%s11461_s8 + $0x698] sm:$0xf]  ;;  %v7499_v15 = vor.u32 %v10678_v4, %v7498_v3  ;;  %v7372_v3 = vld [vmem:[%s11461_s8 + $0x3b8] sm:$0xf0]  ;;  %v7631_v12 = vor.u32 %v10706_v5, %v7628_v6 }
 0x117   : > { %v10742_v8 = vld [vmem:[%s11461_s8 + $0x6b4] sm:$0xf0]  ;;  %2268 = vst [vmem:[#allocation2] sm:$0xff] %v2252_v25  ;;  %v7596_v20 = vld [vmem:[%s11461_s8 + $0x578] sm:$0xf0] }
 0x118   : > { %2183 = vmatpush.bf16.msra.mxu3 %v7851_v37  ;;  %2156 = vmatpush.bf16.msra.mxu1 %v7307_v45  ;;  %v6954_v17 = vld [vmem:[%s11461_s8 + $0x58] sm:$0xf]  ;;  %v7755_v21 = vor.u32 %v10742_v8, %v7754_v7  ;;  %v1898_v40 = vpop.f32.mrf.mxu2  ;;  %v10770_v7 = vld [vmem:[%s11461_s8 + $0x79c] sm:$0xf] }
 0x119   : > { %v10542_v18 = vld [vmem:[%s11461_s8 + $0x74] sm:$0xf0]  ;;  %v1899_v45 = vadd.f32 %v1898_v40, %v1885_v26  ;;  %v7884_v8 = vld [vmem:[%s11461_s8 + $0x7b8] sm:$0xf0] }
 0x11a   : > { %2170 = vmatpush.bf16.msra.mxu2 %v7563_v46  ;;  %2143 = vmatpush.bf16.msra.mxu0 %v7019_v58  ;;  %v7210_v19 = vld [vmem:[%s11461_s8 + $0x258] sm:$0xf]  ;;  %v6955_v31 = vor.u32 %v10542_v18, %v6954_v17  ;;  %v1912_v46 = vpop.f32.mrf.mxu3  ;;  %v7916_v58 = vld [vmem:[%s11461_s8 + $0x7f8] sm:$0xf0]  ;;  %v7887_v17 = vor.u32 %v10770_v7, %v7884_v8 }
 0x11b   : > { %v10606_v22 = vld [vmem:[%s11461_s8 + $0x274] sm:$0xf0]  ;;  %v1913_v54 = vadd.f32 %v1912_v46, %v1899_v45  ;;  %v7919_v4 = vor.u32 %v10778_v57, %v7916_v58  ;;  %v7340_v18 = vld [vmem:[%s11461_s8 + $0x378] sm:$0xf0] }
 0x11c   : > { %2184 = vmatpush.bf16.msra.mxu3 %v7819_v51  ;;  %2157 = vmatpush.bf16.msra.mxu1 %v7275_v59  ;;  %v7466_v23 = vld [vmem:[%s11461_s8 + $0x458] sm:$0xf]  ;;  %v7211_v35 = vor.u32 %v10606_v22, %v7210_v19  ;;  %v7404_v51 = vld [vmem:[%s11461_s8 + $0x3f8] sm:$0xf0] }
 0x11d   : > { %v10670_v24 = vld [vmem:[%s11461_s8 + $0x474] sm:$0xf0]  ;;  %v2260_v62 = vadd.f32 %v1913_v54, %v236_v49  ;;  %v7407_v63 = vor.u32 %v10650_v48, %v7404_v51  ;;  %v10698_v19 = vld [vmem:[%s11461_s8 + $0x55c] sm:$0xf] }
 0x11e   : > { %2171 = vmatpush.bf16.msra.mxu2 %v7531_v60  ;;  %v7722_v28 = vld [vmem:[%s11461_s8 + $0x658] sm:$0xf]  ;;  %2144 = vmatpush.bf16.msra.mxu0 %v6987_v11  ;;  %v7467_v36 = vor.u32 %v10670_v24, %v7466_v23  ;;  %v7151_v60 = vor.u32 %v10586_v44, %v7148_v47  ;;  %v7375_v11 = vor.u32 %v10642_v2, %v7372_v3  ;;  %v7852_v22 = vld [vmem:[%s11461_s8 + $0x778] sm:$0xf0] }
 0x11f   : > { %v10734_v29 = vld [vmem:[%s11461_s8 + $0x674] sm:$0xf0]  ;;  %2276 = vst [vmem:[#allocation2 + $0x20] sm:$0xff] %v2260_v62  ;;  %v7599_v25 = vor.u32 %v10698_v19, %v7596_v20  ;;  %v10562_v26 = vld [vmem:[%s11461_s8 + $0x11c] sm:$0xf] }
 0x120   : > { %2185 = vmatpush.bf16.msra.mxu3 %v7787_v1  ;;  %v6922_v30 = vld [vmem:[%s11461_s8 + $0x18] sm:$0xf]  ;;  %2158 = vmatpush.bf16.msra.mxu1 %v7243_v14  ;;  %v7723_v41 = vor.u32 %v10734_v29, %v7722_v28  ;;  %v7116_v1 = vld [vmem:[%s11461_s8 + $0x1b8] sm:$0xf0] }
 0x121   : > { %v10534_v32 = vld [vmem:[%s11461_s8 + $0x34] sm:$0xf0]  ;;  %v7119_v10 = vor.u32 %v10578_v61, %v7116_v1  ;;  %v7084_v14 = vld [vmem:[%s11461_s8 + $0x178] sm:$0xf0] }
 0x122   : > { %v7178_v33 = vld [vmem:[%s11461_s8 + $0x218] sm:$0xf]  ;;  %2172 = vmatpush.bf16.msra.mxu2 %v7499_v15  ;;  %2145 = vmatpush.bf16.msra.mxu0 %v6955_v31  ;;  %v6923_v50 = vor.u32 %v10534_v32, %v6922_v30  ;;  %v10634_v15 = vld [vmem:[%s11461_s8 + $0x35c] sm:$0xf]  ;;  %v7087_v23 = vor.u32 %v10570_v13, %v7084_v14 }
 0x123   : > { %v10598_v37 = vld [vmem:[%s11461_s8 + $0x234] sm:$0xf0]  ;;  %v7343_v24 = vor.u32 %v10634_v15, %v7340_v18  ;;  %v7052_v28 = vld [vmem:[%s11461_s8 + $0x138] sm:$0xf0] }
 0x124   : > { %v7434_v38 = vld [vmem:[%s11461_s8 + $0x418] sm:$0xf]  ;;  %2186 = vmatpush.bf16.msra.mxu3 %v7755_v21  ;;  %2159 = vmatpush.bf16.msra.mxu1 %v7211_v35  ;;  %v7179_v55 = vor.u32 %v10598_v37, %v7178_v33  ;;  %v10762_v21 = vld [vmem:[%s11461_s8 + $0x75c] sm:$0xf]  ;;  %v7055_v37 = vor.u32 %v10562_v26, %v7052_v28 }
 0x125   : > { %v10662_v39 = vld [vmem:[%s11461_s8 + $0x434] sm:$0xf0]  ;;  %v10626_v29 = vld [vmem:[%s11461_s8 + $0x31c] sm:$0xf]  ;;  %v7855_v30 = vor.u32 %v10762_v21, %v7852_v22 }
 0x126   : > { %v7690_v42 = vld [vmem:[%s11461_s8 + $0x618] sm:$0xf]  ;;  %2173 = vmatpush.bf16.msra.mxu2 %v7467_v36  ;;  %v7435_v56 = vor.u32 %v10662_v39, %v7434_v38  ;;  %2146 = vmatpush.bf16.msra.mxu0 %v6923_v50  ;;  %v7308_v31 = vld [vmem:[%s11461_s8 + $0x338] sm:$0xf0]  ;;  %v1924_v38 = vpop.f32.mrf.mxu0 }
 0x127   : > { %v10726_v43 = vld [vmem:[%s11461_s8 + $0x634] sm:$0xf0]  ;;  %v10690_v32 = vld [vmem:[%s11461_s8 + $0x51c] sm:$0xf]  ;;  %v7311_v39 = vor.u32 %v10626_v29, %v7308_v31 }
 0x128   : > { %2187 = vmatpush.bf16.msra.mxu3 %v7723_v41  ;;  %v7691_v59 = vor.u32 %v10726_v43, %v7690_v42  ;;  %2160 = vmatpush.bf16.msra.mxu1 %v7179_v55  ;;  %v7564_v33 = vld [vmem:[%s11461_s8 + $0x538] sm:$0xf0]  ;;  %v1938_v44 = vpop.f32.mrf.mxu1 }
 0x129   : > { %2147 = vmatmul.bf16.vlgmr.msra.gmra.mxu0 %v11574_v27  ;;  %v10754_v35 = vld [vmem:[%s11461_s8 + $0x71c] sm:$0xf]  ;;  %v7567_v40 = vor.u32 %v10690_v32, %v7564_v33  ;;  %v1939_v49 = vadd.f32 %v1938_v44, %v1924_v38  ;;  %v8419_v38 = vld [vmem:[%s11461_s8 + $0x9c0] sm:$0xf] }
 0x12a   : > { %2174 = vmatpush.bf16.msra.mxu2 %v7435_v56  ;;  %2195 = vmatpush.bf16.msrb.mxu0 %v7151_v60  ;;  %v7820_v36 = vld [vmem:[%s11461_s8 + $0x738] sm:$0xf0] }
 0x12b   : > { %2161 = vmatmul.bf16.vlgmr.msra.gmra.mxu1 %v11581_v34  ;;  %v10554_v41 = vld [vmem:[%s11461_s8 + $0xdc] sm:$0xf]  ;;  %v7823_v45 = vor.u32 %v10754_v35, %v7820_v36 }
 0x12c   : > { %2188 = vmatpush.bf16.msra.mxu3 %v7691_v59  ;;  %2209 = vmatpush.bf16.msrb.mxu1 %v7407_v63  ;;  %v7020_v42 = vld [vmem:[%s11461_s8 + $0xf8] sm:$0xf0] }
 0x12d   : > { %2175 = vmatmul.bf16.vlgmr.msra.gmra.mxu2 %v11556_v9  ;;  %v10618_v43 = vld [vmem:[%s11461_s8 + $0x2dc] sm:$0xf]  ;;  %v7023_v52 = vor.u32 %v10554_v41, %v7020_v42  ;;  %v10847_v41 = vld [vmem:[%s11461_s8 + $0x9dc] sm:$0xf0] }
 0x12e   : > { %2223 = vmatpush.bf16.msrb.mxu2 %v7663_v0  ;;  %2196 = vmatpush.bf16.msrb.mxu0 %v7119_v10  ;;  %v7276_v46 = vld [vmem:[%s11461_s8 + $0x2f8] sm:$0xf0]  ;;  %v1926_v6 = vpop.f32.mrf.mxu0  ;;  %v8675_v42 = vld [vmem:[%s11461_s8 + $0xbc0] sm:$0xf] }
 0x12f   : > { %2189 = vmatmul.bf16.vlgmr.msra.gmra.mxu3 %v11563_v16  ;;  %v10682_v47 = vld [vmem:[%s11461_s8 + $0x4dc] sm:$0xf]  ;;  %v7279_v53 = vor.u32 %v10618_v43, %v7276_v46  ;;  %v237_v43 = vld [vmem:[#allocation2 + $0x10] sm:$0xff]  ;;  %v8931_v46 = vld [vmem:[%s11461_s8 + $0xdc0] sm:$0xf] }
 0x130   : > { %2237 = vmatpush.bf16.msrb.mxu3 %v7919_v4  ;;  %2210 = vmatpush.bf16.msrb.mxu1 %v7375_v11  ;;  %v7532_v48 = vld [vmem:[%s11461_s8 + $0x4f8] sm:$0xf0]  ;;  %v1952_v58 = vpop.f32.mrf.mxu2  ;;  %v1940_v13 = vpop.f32.mrf.mxu1 }
 0x131   : > { %v10746_v50 = vld [vmem:[%s11461_s8 + $0x6dc] sm:$0xf]  ;;  %v7535_v54 = vor.u32 %v10682_v47, %v7532_v48  ;;  %v1953_v63 = vadd.f32 %v1952_v58, %v1939_v49  ;;  %v1941_v20 = vadd.f32 %v1940_v13, %v1926_v6  ;;  %v10975_v47 = vld [vmem:[%s11461_s8 + $0xddc] sm:$0xf0] }
 0x132   : > { %2224 = vmatpush.bf16.msrb.mxu2 %v7631_v12  ;;  %2197 = vmatpush.bf16.msrb.mxu0 %v7087_v23  ;;  %v7788_v51 = vld [vmem:[%s11461_s8 + $0x6f8] sm:$0xf0]  ;;  %v1966_v0 = vpop.f32.mrf.mxu3  ;;  %v8932_v58 = vor.u32 %v10975_v47, %v8931_v46  ;;  %v8355_v6 = vld [vmem:[%s11461_s8 + $0x940] sm:$0xf]  ;;  %v10786_v47 = vld [vmem:[%s11454_s4 + $0x14] sm:$0xf0] }
 0x133   : > { %v10546_v55 = vld [vmem:[%s11461_s8 + $0x9c] sm:$0xf]  ;;  %v7791_v59 = vor.u32 %v10746_v50, %v7788_v51  ;;  %v1967_v5 = vadd.f32 %v1966_v0, %v1953_v63  ;;  %v9187_v51 = vld [vmem:[%s11461_s8 + $0xfc0] sm:$0xf] }
 0x134   : > { %2238 = vmatpush.bf16.msrb.mxu3 %v7887_v17  ;;  %2211 = vmatpush.bf16.msrb.mxu1 %v7343_v24  ;;  %v6988_v56 = vld [vmem:[%s11461_s8 + $0xb8] sm:$0xf0]  ;;  %v8899_v63 = vld [vmem:[%s11461_s8 + $0xd80] sm:$0xf] }
 0x135   : > { %v10610_v57 = vld [vmem:[%s11461_s8 + $0x29c] sm:$0xf]  ;;  %v6991_v4 = vor.u32 %v10546_v55, %v6988_v56  ;;  %v8387_v55 = vld [vmem:[%s11461_s8 + $0x980] sm:$0xf] }
 0x136   : > { %2225 = vmatpush.bf16.msrb.mxu2 %v7599_v25  ;;  %2198 = vmatpush.bf16.msrb.mxu0 %v7055_v37  ;;  %v7244_v60 = vld [vmem:[%s11461_s8 + $0x2b8] sm:$0xf0]  ;;  %v10967_v0 = vld [vmem:[%s11461_s8 + $0xd9c] sm:$0xf0] }
 0x137   : > { %v10674_v61 = vld [vmem:[%s11461_s8 + $0x49c] sm:$0xf]  ;;  %v7247_v7 = vor.u32 %v10610_v57, %v7244_v60  ;;  %v8643_v60 = vld [vmem:[%s11461_s8 + $0xb80] sm:$0xf] }
 0x138   : > { %2239 = vmatpush.bf16.msrb.mxu3 %v7855_v30  ;;  %2212 = vmatpush.bf16.msrb.mxu1 %v7311_v39  ;;  %v7500_v62 = vld [vmem:[%s11461_s8 + $0x4b8] sm:$0xf0]  ;;  %v1954_v33 = vpop.f32.mrf.mxu2  ;;  %v10959_v13 = vld [vmem:[%s11461_s8 + $0xd5c] sm:$0xf0] }
 0x139   : > { %v10738_v1 = vld [vmem:[%s11461_s8 + $0x69c] sm:$0xf]  ;;  %v7503_v8 = vor.u32 %v10674_v61, %v7500_v62  ;;  %v1955_v39 = vadd.f32 %v1954_v33, %v1941_v20  ;;  %v10903_v61 = vld [vmem:[%s11461_s8 + $0xb9c] sm:$0xf0] }
 0x13a   : > { %2226 = vmatpush.bf16.msrb.mxu2 %v7567_v40  ;;  %v7756_v2 = vld [vmem:[%s11461_s8 + $0x6b8] sm:$0xf0]  ;;  %2199 = vmatpush.bf16.msrb.mxu0 %v7023_v52  ;;  %v1968_v40 = vpop.f32.mrf.mxu3  ;;  %v11039_v52 = vld [vmem:[%s11461_s8 + $0xfdc] sm:$0xf0] }
 0x13b   : > { %v229_v3 = vld [vmem:[#allocation2 + $0x58] sm:$0xff]  ;;  %v7759_v14 = vor.u32 %v10738_v1, %v7756_v2  ;;  %v1969_v48 = vadd.f32 %v1968_v40, %v1955_v39  ;;  %v9188_v62 = vor.u32 %v11039_v52, %v9187_v51  ;;  %v9155_v1 = vld [vmem:[%s11461_s8 + $0xf80] sm:$0xf]  ;;  %v8187_v39 = vld [vmem:[%s11454_s4 + $0x8] sm:$0xf] }
 0x13c   : > { %2240 = vmatpush.bf16.msrb.mxu3 %v7823_v45  ;;  %2213 = vmatpush.bf16.msrb.mxu1 %v7279_v53  ;;  %v10538_v10 = vld [vmem:[%s11461_s8 + $0x5c] sm:$0xf]  ;;  %v2253_v19 = vadd.f32 %v1967_v5, %v229_v3  ;;  %v10911_v45 = vld [vmem:[%s11461_s8 + $0xbdc] sm:$0xf0]  ;;  %v8900_v5 = vor.u32 %v10967_v0, %v8899_v63  ;;  %v12081_v40 = vld [vmem:[%s11454_s4 + $0x28] sm:$0x11]  ;;  %v12124_v0 = vor.u32 %v10786_v47, %v8187_v39 }
 0x13d   : > { %v6956_v11 = vld [vmem:[%s11461_s8 + $0x78] sm:$0xf0]  ;;  %v2261_v56 = vadd.f32 %v1969_v48, %v237_v43  ;;  %v8676_v57 = vor.u32 %v10911_v45, %v8675_v42  ;;  %v11031_v2 = vld [vmem:[%s11461_s8 + $0xf9c] sm:$0xf0]  ;;  %v10784_v48 = vld [vmem:[%s11454_s4 + $0xc] sm:$0xf] }
 0x13e   : > { %2227 = vmatpush.bf16.msrb.mxu2 %v7535_v54  ;;  %v10602_v12 = vld [vmem:[%s11461_s8 + $0x25c] sm:$0xf]  ;;  %2200 = vmatpush.bf16.msrb.mxu0 %v6991_v4  ;;  %v6959_v24 = vor.u32 %v10538_v10, %v6956_v11  ;;  %2269 = vst [vmem:[#allocation2 + $0x58] sm:$0xff] %v2253_v19  ;;  %v8420_v54 = vor.u32 %v10847_v41, %v8419_v38  ;;  %v10895_v11 = vld [vmem:[%s11461_s8 + $0xb5c] sm:$0xf0] }
 0x13f   : > { %v7212_v15 = vld [vmem:[%s11461_s8 + $0x278] sm:$0xf0]  ;;  %2277 = vst [vmem:[#allocation2 + $0x10] sm:$0xff] %v2261_v56  ;;  %v8644_v4 = vor.u32 %v10903_v61, %v8643_v60  ;;  %v9156_v10 = vor.u32 %v11031_v2, %v9155_v1  ;;  %v10823_v19 = vld [vmem:[%s11461_s8 + $0x91c] sm:$0xf0]  ;;  %v2582_v1 = vunpack.c.h.b16 %v12081_v40 }
 0x140   : > { %2241 = vmatpush.bf16.msrb.mxu3 %v7791_v59  ;;  %v10666_v17 = vld [vmem:[%s11461_s8 + $0x45c] sm:$0xf]  ;;  %2214 = vmatpush.bf16.msrb.mxu1 %v7247_v7  ;;  %v7215_v28 = vor.u32 %v10602_v12, %v7212_v15  ;;  %v10839_v59 = vld [vmem:[%s11461_s8 + $0x99c] sm:$0xf0]  ;;  %v10785_v52 = vld [vmem:[%s11454_s4 + $0xc] sm:$0xf0] }
 0x141   : > { %v7468_v18 = vld [vmem:[%s11461_s8 + $0x478] sm:$0xf0]  ;;  %v8388_v3 = vor.u32 %v10839_v59, %v8387_v55  ;;  %v10831_v7 = vld [vmem:[%s11461_s8 + $0x95c] sm:$0xf0]  ;;  %v8181_v59 = vld [vmem:[%s11454_s4 + $0x10] sm:$0xf0] }
 0x142   : > { %v10730_v21 = vld [vmem:[%s11461_s8 + $0x65c] sm:$0xf]  ;;  %2228 = vmatpush.bf16.msrb.mxu2 %v7503_v8  ;;  %v7471_v29 = vor.u32 %v10666_v17, %v7468_v18  ;;  %2201 = vmatpush.bf16.msrb.mxu0 %v6959_v24  ;;  %v8611_v8 = vld [vmem:[%s11461_s8 + $0xb40] sm:$0xf]  ;;  %v8356_v17 = vor.u32 %v10831_v7, %v8355_v6 }
 0x143   : > { %v7724_v22 = vld [vmem:[%s11461_s8 + $0x678] sm:$0xf0]  ;;  %v8867_v12 = vld [vmem:[%s11461_s8 + $0xd40] sm:$0xf] }
 0x144   : > { %v10530_v23 = vld [vmem:[%s11461_s8 + $0x1c] sm:$0xf]  ;;  %2242 = vmatpush.bf16.msrb.mxu3 %v7759_v14  ;;  %v7727_v35 = vor.u32 %v10730_v21, %v7724_v22  ;;  %2215 = vmatpush.bf16.msrb.mxu1 %v7215_v28  ;;  %v9123_v14 = vld [vmem:[%s11461_s8 + $0xf40] sm:$0xf] }
 0x145   : > { %v6924_v25 = vld [vmem:[%s11461_s8 + $0x38] sm:$0xf0]  ;;  %v11023_v15 = vld [vmem:[%s11461_s8 + $0xf5c] sm:$0xf0] }
 0x146   : > { %v10594_v26 = vld [vmem:[%s11461_s8 + $0x21c] sm:$0xf]  ;;  %v6927_v44 = vor.u32 %v10530_v23, %v6924_v25  ;;  %2229 = vmatpush.bf16.msrb.mxu2 %v7471_v29  ;;  %v8323_v18 = vld [vmem:[%s11461_s8 + $0x900] sm:$0xf]  ;;  %v9124_v22 = vor.u32 %v11023_v15, %v9123_v14  ;;  %v1980_v33 = vpop.f32.mrf.mxu0 }
 0x147   : > { %v7180_v30 = vld [vmem:[%s11461_s8 + $0x238] sm:$0xf0]  ;;  %v8579_v20 = vld [vmem:[%s11461_s8 + $0xb00] sm:$0xf]  ;;  %v8324_v29 = vor.u32 %v10823_v19, %v8323_v18 }
 0x148   : > { %v10658_v31 = vld [vmem:[%s11461_s8 + $0x41c] sm:$0xf]  ;;  %v7183_v49 = vor.u32 %v10594_v26, %v7180_v30  ;;  %2243 = vmatpush.bf16.msrb.mxu3 %v7727_v35  ;;  %2202 = vmatpush.bf16.msrb.mxu0 %v6927_v44  ;;  %v8835_v21 = vld [vmem:[%s11461_s8 + $0xd00] sm:$0xf]  ;;  %v1994_v41 = vpop.f32.mrf.mxu1 }
 0x149   : > { %v7436_v32 = vld [vmem:[%s11461_s8 + $0x438] sm:$0xf0]  ;;  %v10951_v23 = vld [vmem:[%s11461_s8 + $0xd1c] sm:$0xf0] }
 0x14a   : > { %v10722_v36 = vld [vmem:[%s11461_s8 + $0x61c] sm:$0xf]  ;;  %v7439_v50 = vor.u32 %v10658_v31, %v7436_v32  ;;  %2216 = vmatpush.bf16.msrb.mxu1 %v7183_v49  ;;  %v9091_v24 = vld [vmem:[%s11461_s8 + $0xf00] sm:$0xf] }
 0x14b   : > { %v7692_v37 = vld [vmem:[%s11461_s8 + $0x638] sm:$0xf0]  ;;  %2203 = vmatmul.bf16.vlgmr.msrb.gmra.mxu0 %v11574_v27  ;;  %v10887_v27 = vld [vmem:[%s11461_s8 + $0xb1c] sm:$0xf0] }
 0x14c   : > { %v7695_v53 = vor.u32 %v10722_v36, %v7692_v37  ;;  %2230 = vmatpush.bf16.msrb.mxu2 %v7439_v50  ;;  %3924 = vmatpush.bf16.msra.mxu0 %v8420_v54  ;;  %v11015_v25 = vld [vmem:[%s11461_s8 + $0xf1c] sm:$0xf0]  ;;  %v8580_v35 = vor.u32 %v10887_v27, %v8579_v20  ;;  %v8836_v36 = vor.u32 %v10951_v23, %v8835_v21  ;;  %v8189_v49 = vld [vmem:[%s11454_s4 + $0x18] sm:$0xf0] }
 0x14d   : > { %2217 = vmatmul.bf16.vlgmr.msrb.gmra.mxu1 %v11581_v34  ;;  %v12056_v26 = vld [vmem:[%s11461_s8 + $0x8c0] sm:$0xf]  ;;  %v9092_v42 = vor.u32 %v11015_v25, %v9091_v24  ;;  %v1995_v50 = vadd.f32 %v1994_v41, %v1980_v33  ;;  %v12127_v2 = vor.u32 %v10784_v48, %v8189_v49 }
 0x14e   : > { %2244 = vmatpush.bf16.msrb.mxu3 %v7695_v53  ;;  %3938 = vmatpush.bf16.msra.mxu1 %v8676_v57  ;;  %v12059_v34 = vld [vmem:[%s11461_s8 + $0x8dc] sm:$0xf0]  ;;  %v2581_v57 = vunpack.c.l.b16 %v12081_v40  ;;  %v1982_v25 = vpop.f32.mrf.mxu0 }
 0x14f   : > { %2231 = vmatmul.bf16.vlgmr.msrb.gmra.mxu2 %v11556_v9  ;;  %v8612_v9 = vor.u32 %v10895_v11, %v8611_v8  ;;  %v12062_v28 = vld [vmem:[%s11461_s8 + $0xac0] sm:$0xf]  ;;  %v8292_v54 = vor.u32 %v12059_v34, %v12056_v26 }
 0x150   : > { %3952 = vmatpush.bf16.msra.mxu2 %v8932_v58  ;;  %3925 = vmatpush.bf16.msra.mxu0 %v8388_v3  ;;  %v12065_v30 = vld [vmem:[%s11461_s8 + $0xadc] sm:$0xf0]  ;;  %v10783_v58 = vld [vmem:[%s11454_s4 + $0x4] sm:$0xf]  ;;  %v2008_v3 = vpop.f32.mrf.mxu2  ;;  %v12169_v23 = vpack.c.b16 %v2581_v57, %v2581_v57 }
 0x151   : > { %2245 = vmatmul.bf16.vlgmr.msrb.gmra.mxu3 %v11563_v16  ;;  %v8868_v16 = vor.u32 %v10959_v13, %v8867_v12  ;;  %v12068_v31 = vld [vmem:[%s11461_s8 + $0xcc0] sm:$0xf]  ;;  %v8548_v55 = vor.u32 %v12065_v30, %v12062_v28  ;;  %v2009_v11 = vadd.f32 %v2008_v3, %v1995_v50  ;;  %v12154_v19 = vor.u32 %v10783_v58, %v8181_v59  ;;  %v12210_v50 = vld [vmem:[%s11461_s8 + $0x9c4] sm:$0xf] }
 0x152   : > { %3966 = vmatpush.bf16.msra.mxu3 %v9188_v62  ;;  %3939 = vmatpush.bf16.msra.mxu1 %v8644_v4  ;;  %v12071_v32 = vld [vmem:[%s11461_s8 + $0xcdc] sm:$0xf0]  ;;  %v2022_v12 = vpop.f32.mrf.mxu3  ;;  %v2590_v30 = vpack.c.b16 %v2582_v1, %v2582_v1  ;;  %v10907_v59 = vld [vmem:[%s11461_s8 + $0xbc4] sm:$0xf] }
 0x153   : > { %v12074_v37 = vld [vmem:[%s11461_s8 + $0xec0] sm:$0xf]  ;;  %v8804_v60 = vor.u32 %v12071_v32, %v12068_v31  ;;  %v2023_v24 = vadd.f32 %v2022_v12, %v2009_v11  ;;  %v2631_v31 = vshll.u32 %v12127_v2, 16  ;;  %v1996_v32 = vpop.f32.mrf.mxu1  ;;  %v2607_v47 = vshll.u32 %v12154_v19, 16  ;;  %v8677_v3 = vld [vmem:[%s11461_s8 + $0xbe0] sm:$0xf0] }
 0x154   : > { %3953 = vmatpush.bf16.msra.mxu2 %v8900_v5  ;;  %3926 = vmatpush.bf16.msra.mxu0 %v8356_v17  ;;  %v12077_v38 = vld [vmem:[%s11461_s8 + $0xedc] sm:$0xf0]  ;;  %v1997_v39 = vadd.f32 %v1996_v32, %v1982_v25  ;;  %v2636_v57 = vshll.u32 %v2590_v30, 16  ;;  %v10971_v11 = vld [vmem:[%s11461_s8 + $0xdc4] sm:$0xf] }
 0x155   : > { %v12084_v43 = vld [vmem:[%s11461_s8 + $0x880] sm:$0xf]  ;;  %v9060_v4 = vor.u32 %v12077_v38, %v12074_v37  ;;  %v8933_v12 = vld [vmem:[%s11461_s8 + $0xde0] sm:$0xf0] }
 0x156   : > { %3967 = vmatpush.bf16.msra.mxu3 %v9156_v10  ;;  %3940 = vmatpush.bf16.msra.mxu1 %v8612_v9  ;;  %v12087_v44 = vld [vmem:[%s11461_s8 + $0x89c] sm:$0xf0]  ;;  %v230_v9 = vld [vmem:[#allocation2 + $0x18] sm:$0xff]  ;;  %v10899_v25 = vld [vmem:[%s11461_s8 + $0xb84] sm:$0xf] }
 0x157   : > { %v12090_v45 = vld [vmem:[%s11461_s8 + $0xa80] sm:$0xf]  ;;  %v8260_v13 = vor.u32 %v12087_v44, %v12084_v43  ;;  %v2254_v38 = vadd.f32 %v2023_v24, %v230_v9  ;;  %v8936_v24 = vor.u32 %v10971_v11, %v8933_v12  ;;  %v10963_v30 = vld [vmem:[%s11461_s8 + $0xd84] sm:$0xf] }
 0x158   : > { %3954 = vmatpush.bf16.msra.mxu2 %v8868_v16  ;;  %v12093_v46 = vld [vmem:[%s11461_s8 + $0xa9c] sm:$0xf0]  ;;  %3927 = vmatpush.bf16.msra.mxu0 %v8324_v29  ;;  %v2619_v29 = vshll.u32 %v12124_v0, 16  ;;  %v2010_v58 = vpop.f32.mrf.mxu2  ;;  %v8805_v11 = vld [vmem:[%s11461_s8 + $0xce0] sm:$0xf0] }
 0x159   : > { %v8179_v51 = vld [vmem:[%s11454_s4] sm:$0xf]  ;;  %v8516_v14 = vor.u32 %v12093_v46, %v12090_v45  ;;  %2270 = vst [vmem:[#allocation2 + $0x18] sm:$0xff] %v2254_v38 }
 0x15a   : > { %3968 = vmatpush.bf16.msra.mxu3 %v9124_v22  ;;  %v12101_v53 = vld [vmem:[%s11454_s4 + $0x20] sm:$0x11]  ;;  %3941 = vmatpush.bf16.msra.mxu1 %v8580_v35  ;;  %v12141_v10 = vor.u32 %v10785_v52, %v8179_v51  ;;  %v2617_v51 = vshrl.u32 %v12124_v0, 16  ;;  %v2624_v52 = vshll.u32 %v12169_v23, 16  ;;  %v2024_v0 = vpop.f32.mrf.mxu3  ;;  %v8680_v23 = vor.u32 %v10907_v59, %v8677_v3 }
 0x15b   : > { %v12108_v56 = vld [vmem:[%s11461_s8 + $0xc80] sm:$0xf]  ;;  %v2579_v8 = vunpack.c.l.b16 %v12101_v53  ;;  %v2580_v18 = vunpack.c.h.b16 %v12101_v53  ;;  %v8421_v53 = vld [vmem:[%s11461_s8 + $0x9e0] sm:$0xf0] }
 0x15c   : > { %3955 = vmatpush.bf16.msra.mxu2 %v8836_v36  ;;  %v12116_v61 = vld [vmem:[%s11461_s8 + $0xc9c] sm:$0xf0]  ;;  %3928 = vmatpush.bf16.msra.mxu0 %v8292_v54  ;;  %v2595_v37 = vshll.u32 %v12141_v10, 16  ;;  %v2621_v54 = vrot.slane %v2619_v29, 1  ;;  %v10947_v59 = vld [vmem:[%s11461_s8 + $0xd04] sm:$0xf] }
 0x15d   : > { %v12119_v62 = vld [vmem:[%s11461_s8 + $0xe80] sm:$0xf]  ;;  %v8772_v16 = vor.u32 %v12116_v61, %v12108_v56  ;;  %v2587_v36 = vpack.c.b16 %v2579_v8, %v2579_v8  ;;  %v2588_v46 = vpack.c.b16 %v2580_v18, %v2580_v18  ;;  %v2633_v56 = vrot.slane %v2631_v31, 1  ;;  %v8901_v31 = vld [vmem:[%s11461_s8 + $0xda0] sm:$0xf0] }
 0x15e   : > { %v12122_v63 = vld [vmem:[%s11461_s8 + $0xe9c] sm:$0xf0]  ;;  %3969 = vmatpush.bf16.msra.mxu3 %v9092_v42  ;;  %3942 = vmatpush.bf16.msra.mxu1 %v8548_v55  ;;  %v2629_v55 = vshrl.u32 %v12127_v2, 16  ;;  %v2597_v61 = vrot.slane %v2595_v37, 1  ;;  %v2605_v2 = vshrl.u32 %v12154_v19, 16  ;;  %v2626_v18 = vrot.slane %v2624_v52, 1 }
 0x15f   : > { %v12132_v5 = vld [vmem:[%s11461_s8 + $0x840] sm:$0xf]  ;;  %v9028_v20 = vor.u32 %v12122_v63, %v12119_v62  ;;  %v2600_v62 = vshll.u32 %v2587_v36, 16  ;;  %v2011_v63 = vadd.f32 %v2010_v58, %v1997_v39  ;;  %v2638_v19 = vrot.slane %v2636_v57, 1  ;;  %v8581_v58 = vld [vmem:[%s11461_s8 + $0xb20] sm:$0xf0] }
 0x160   : > { %v12135_v6 = vld [vmem:[%s11461_s8 + $0x85c] sm:$0xf0]  ;;  %3956 = vmatpush.bf16.msra.mxu2 %v8804_v60  ;;  %3929 = vmatpush.bf16.msra.mxu0 %v8260_v13  ;;  %v2593_v60 = vshrl.u32 %v12141_v10, 16  ;;  %v8424_v10 = vor.u32 %v12210_v50, %v8421_v53  ;;  %v11035_v13 = vld [vmem:[%s11461_s8 + $0xfc4] sm:$0xf]  ;;  %v2634_v9 = vor.u32 %v2633_v56, %v2629_v55 }
 0x161   : > { %v12138_v7 = vld [vmem:[%s11461_s8 + $0xa40] sm:$0xf]  ;;  %v8228_v26 = vor.u32 %v12135_v6, %v12132_v5  ;;  %v2612_v5 = vshll.u32 %v2588_v46, 16  ;;  %v238_v6 = vld [vmem:[#allocation2 + $0x38] sm:$0xff]  ;;  %v8613_v46 = vld [vmem:[%s11461_s8 + $0xb60] sm:$0xf0] }
 0x162   : > { %v12148_v15 = vld [vmem:[%s11461_s8 + $0xa5c] sm:$0xf0]  ;;  %3970 = vmatpush.bf16.msra.mxu3 %v9060_v4  ;;  %3943 = vmatpush.bf16.msra.mxu1 %v8516_v14  ;;  %v2609_v4 = vrot.slane %v2607_v47, 1  ;;  %v2025_v14 = vadd.f32 %v2024_v0, %v2011_v63  ;;  %v12243_v36 = vsel %vm2591_vm0, %v2634_v9, %v2638_v19  ;;  %v10955_v47 = vld [vmem:[%s11461_s8 + $0xd44] sm:$0xf] }
 0x163   : > { %v12151_v17 = vld [vmem:[%s11461_s8 + $0xc40] sm:$0xf]  ;;  %v8484_v40 = vor.u32 %v12148_v15, %v12138_v7  ;;  %v9189_v15 = vld [vmem:[%s11461_s8 + $0xfe0] sm:$0xf0] }
 0x164   : > { %v12161_v27 = vld [vmem:[%s11461_s8 + $0xc5c] sm:$0xf0]  ;;  %3957 = vmatpush.bf16.msra.mxu2 %v8772_v16  ;;  %3930 = vmatpush.bf16.msra.mxu0 %v8228_v26  ;;  %v10835_v16 = vld [vmem:[%s11461_s8 + $0x984] sm:$0xf]  ;;  %v9192_v29 = vor.u32 %v11035_v13, %v9189_v15 }
 0x165   : > { %v12164_v21 = vld [vmem:[%s11461_s8 + $0xe40] sm:$0xf]  ;;  %v8740_v41 = vor.u32 %v12161_v27, %v12151_v17  ;;  %v2622_v17 = vor.u32 %v2621_v54, %v2617_v51  ;;  %v2598_v27 = vor.u32 %v2597_v61, %v2593_v60  ;;  %v8645_v26 = vld [vmem:[%s11461_s8 + $0xba0] sm:$0xf0] }
 0x166   : > { %v12167_v22 = vld [vmem:[%s11461_s8 + $0xe5c] sm:$0xf0]  ;;  %3971 = vmatpush.bf16.msra.mxu3 %v9028_v20  ;;  %3944 = vmatpush.bf16.msra.mxu1 %v8484_v40  ;;  %v8389_v20 = vld [vmem:[%s11461_s8 + $0x9a0] sm:$0xf0]  ;;  %v8648_v39 = vor.u32 %v10899_v25, %v8645_v26  ;;  %v8904_v40 = vor.u32 %v10963_v30, %v8901_v31  ;;  %v2036_v0 = vpop.f32.mrf.mxu0 }
 0x167   : > { %v12174_v34 = vld [vmem:[%s11461_s8 + $0x800] sm:$0xf]  ;;  %v8996_v48 = vor.u32 %v12167_v22, %v12164_v21  ;;  %v2602_v21 = vrot.slane %v2600_v62, 1  ;;  %v2262_v22 = vadd.f32 %v2025_v14, %v238_v6  ;;  %v12238_v32 = vsel %vm2591_vm0, %v2622_v17, %v2626_v18  ;;  %v9125_v50 = vld [vmem:[%s11461_s8 + $0xf60] sm:$0xf0] }
 0x168   : > { %v12177_v28 = vld [vmem:[%s11461_s8 + $0x81c] sm:$0xf0]  ;;  %3958 = vmatpush.bf16.msra.mxu2 %v8740_v41  ;;  %v8392_v37 = vor.u32 %v10835_v16, %v8389_v20  ;;  %v10819_v54 = vld [vmem:[%s11461_s8 + $0x904] sm:$0xf]  ;;  %v2050_v6 = vpop.f32.mrf.mxu1 }
 0x169   : > { %v12182_v33 = vld [vmem:[%s11461_s8 + $0xa00] sm:$0xf]  ;;  %v8196_v49 = vor.u32 %v12177_v28, %v12174_v34  ;;  %v2610_v34 = vor.u32 %v2609_v4, %v2605_v2  ;;  %v2614_v28 = vrot.slane %v2612_v5, 1  ;;  %2278 = vst [vmem:[#allocation2 + $0x38] sm:$0xff] %v2262_v22  ;;  %v12246_v38 = vsel %vm2591_vm0, %v2598_v27, %v2602_v21  ;;  %v8325_v55 = vld [vmem:[%s11461_s8 + $0x920] sm:$0xf0] }
 0x16a   : > { %v12185_v35 = vld [vmem:[%s11461_s8 + $0xa1c] sm:$0xf0]  ;;  %3972 = vmatpush.bf16.msra.mxu3 %v8996_v48  ;;  %v8869_v48 = vld [vmem:[%s11461_s8 + $0xd60] sm:$0xf0]  ;;  %v8328_v63 = vor.u32 %v10819_v54, %v8325_v55  ;;  %v2051_v12 = vadd.f32 %v2050_v6, %v2036_v0  ;;  %v8427_v0 = vld [vmem:[%s11461_s8 + $0x9c8] sm:$0xf] }
 0x16b   : > { %v12193_v42 = vld [vmem:[%s11461_s8 + $0xc00] sm:$0xf]  ;;  %v8452_v1 = vor.u32 %v12185_v35, %v12182_v33  ;;  %3931 = vmatpush.bf16.msra.mxu0 %v8196_v49  ;;  %v11027_v33 = vld [vmem:[%s11461_s8 + $0xf84] sm:$0xf]  ;;  %v12249_v41 = vsel %vm2591_vm0, %v2610_v34, %v2614_v28  ;;  %v8872_v53 = vor.u32 %v10955_v47, %v8869_v48  ;;  %v231_v28 = vld [vmem:[#allocation2 + $0x50] sm:$0xff] }
 0x16c   : > { %v12196_v43 = vld [vmem:[%s11461_s8 + $0xc1c] sm:$0xf0]  ;;  %v9157_v35 = vld [vmem:[%s11461_s8 + $0xfa0] sm:$0xf0] }
 0x16d   : > { %v12199_v44 = vld [vmem:[%s11461_s8 + $0xe00] sm:$0xf]  ;;  %v8708_v7 = vor.u32 %v12196_v43, %v12193_v42  ;;  %3945 = vmatpush.bf16.msra.mxu1 %v8452_v1  ;;  %v10827_v42 = vld [vmem:[%s11461_s8 + $0x944] sm:$0xf] }
 0x16e   : > { %v12202_v45 = vld [vmem:[%s11461_s8 + $0xe1c] sm:$0xf0]  ;;  %v8357_v43 = vld [vmem:[%s11461_s8 + $0x960] sm:$0xf0]  ;;  %3932 = vmatmul.bf16.vlgmr.msra.gmra.mxu0 %v12246_v38  ;;  %v2038_v31 = vpop.f32.mrf.mxu0 }
 0x16f   : > { %v8964_v8 = vor.u32 %v12202_v45, %v12199_v44  ;;  %3959 = vmatpush.bf16.msra.mxu2 %v8708_v7  ;;  %3980 = vmatpush.bf16.msrb.mxu0 %v8424_v10  ;;  %v10891_v44 = vld [vmem:[%s11461_s8 + $0xb44] sm:$0xf]  ;;  %v9160_v45 = vor.u32 %v11027_v33, %v9157_v35  ;;  %v8360_v51 = vor.u32 %v10827_v42, %v8357_v43 }
 0x170   : > { %v11019_v49 = vld [vmem:[%s11461_s8 + $0xf44] sm:$0xf]  ;;  %3946 = vmatmul.bf16.vlgmr.msra.gmra.mxu1 %v12249_v41  ;;  %v8616_v52 = vor.u32 %v10891_v44, %v8613_v46  ;;  %v2064_v20 = vpop.f32.mrf.mxu2  ;;  %v2052_v42 = vpop.f32.mrf.mxu1 }
 0x171   : > { %3973 = vmatpush.bf16.msra.mxu3 %v8964_v8  ;;  %3994 = vmatpush.bf16.msrb.mxu1 %v8680_v23  ;;  %v10883_v56 = vld [vmem:[%s11461_s8 + $0xb04] sm:$0xf]  ;;  %v9128_v57 = vor.u32 %v11019_v49, %v9125_v50  ;;  %v2053_v48 = vadd.f32 %v2052_v42, %v2038_v31  ;;  %v8363_v31 = vld [vmem:[%s11461_s8 + $0x948] sm:$0xf] }
 0x172   : > { %3960 = vmatmul.bf16.vlgmr.msra.gmra.mxu2 %v12238_v32  ;;  %v8837_v60 = vld [vmem:[%s11461_s8 + $0xd20] sm:$0xf0]  ;;  %v8584_v1 = vor.u32 %v10883_v56, %v8581_v58  ;;  %v2078_v25 = vpop.f32.mrf.mxu3  ;;  %v10960_v42 = vld [vmem:[%s11461_s8 + $0xd64] sm:$0xf0] }
 0x173   : > { %4008 = vmatpush.bf16.msrb.mxu2 %v8936_v24  ;;  %3981 = vmatpush.bf16.msrb.mxu0 %v8392_v37  ;;  %v11011_v61 = vld [vmem:[%s11461_s8 + $0xf04] sm:$0xf]  ;;  %v8840_v3 = vor.u32 %v10947_v59, %v8837_v60  ;;  %v2065_v24 = vadd.f32 %v2064_v20, %v2051_v12 }
 0x174   : > { %3974 = vmatmul.bf16.vlgmr.msra.gmra.mxu3 %v12243_v36  ;;  %v9093_v62 = vld [vmem:[%s11461_s8 + $0xf20] sm:$0xf0] }
 0x175   : > { %4022 = vmatpush.bf16.msrb.mxu3 %v9192_v29  ;;  %3995 = vmatpush.bf16.msrb.mxu1 %v8648_v39  ;;  %v10811_v2 = vld [vmem:[%s11461_s8 + $0x8c4] sm:$0xf]  ;;  %v9096_v7 = vor.u32 %v11011_v61, %v9093_v62  ;;  %v2079_v30 = vadd.f32 %v2078_v25, %v2065_v24  ;;  %v8907_v24 = vld [vmem:[%s11461_s8 + $0xd88] sm:$0xf] }
 0x176   : > { %v8293_v4 = vld [vmem:[%s11461_s8 + $0x8e0] sm:$0xf0]  ;;  %v10968_v25 = vld [vmem:[%s11461_s8 + $0xda4] sm:$0xf0] }
 0x177   : > { %4009 = vmatpush.bf16.msrb.mxu2 %v8904_v40  ;;  %3982 = vmatpush.bf16.msrb.mxu0 %v8360_v51  ;;  %v10875_v5 = vld [vmem:[%s11461_s8 + $0xac4] sm:$0xf]  ;;  %v8296_v15 = vor.u32 %v10811_v2, %v8293_v4  ;;  %v2255_v47 = vadd.f32 %v2079_v30, %v231_v28  ;;  %v10848_v2 = vld [vmem:[%s11461_s8 + $0x9e4] sm:$0xf0]  ;;  %v8908_v30 = vor.u32 %v10968_v25, %v8907_v24 }
 0x178   : > { %v8549_v8 = vld [vmem:[%s11461_s8 + $0xae0] sm:$0xf0]  ;;  %v2066_v60 = vpop.f32.mrf.mxu2  ;;  %v8683_v4 = vld [vmem:[%s11461_s8 + $0xbc8] sm:$0xf] }
 0x179   : > { %4023 = vmatpush.bf16.msrb.mxu3 %v9160_v45  ;;  %3996 = vmatpush.bf16.msrb.mxu1 %v8616_v52  ;;  %v10939_v10 = vld [vmem:[%s11461_s8 + $0xcc4] sm:$0xf]  ;;  %v8552_v17 = vor.u32 %v10875_v5, %v8549_v8  ;;  %2271 = vst [vmem:[#allocation2 + $0x50] sm:$0xff] %v2255_v47  ;;  %v8939_v8 = vld [vmem:[%s11461_s8 + $0xdc8] sm:$0xf] }
 0x17a   : > { %v11003_v13 = vld [vmem:[%s11461_s8 + $0xec4] sm:$0xf]  ;;  %v8808_v18 = vor.u32 %v10939_v10, %v8805_v11  ;;  %v10976_v10 = vld [vmem:[%s11461_s8 + $0xde4] sm:$0xf0] }
 0x17b   : > { %4010 = vmatpush.bf16.msrb.mxu2 %v8872_v53  ;;  %v9061_v14 = vld [vmem:[%s11461_s8 + $0xee0] sm:$0xf0]  ;;  %3983 = vmatpush.bf16.msrb.mxu0 %v8328_v63  ;;  %v8940_v20 = vor.u32 %v10976_v10, %v8939_v8 }
 0x17c   : > { %v10803_v19 = vld [vmem:[%s11461_s8 + $0x884] sm:$0xf]  ;;  %v9064_v27 = vor.u32 %v11003_v13, %v9061_v14  ;;  %v9195_v14 = vld [vmem:[%s11461_s8 + $0xfc8] sm:$0xf] }
 0x17d   : > { %4024 = vmatpush.bf16.msrb.mxu3 %v9128_v57  ;;  %3997 = vmatpush.bf16.msrb.mxu1 %v8584_v1  ;;  %v8261_v9 = vld [vmem:[%s11461_s8 + $0x8a0] sm:$0xf0]  ;;  %v2067_v1 = vadd.f32 %v2066_v60, %v2053_v48  ;;  %v8331_v48 = vld [vmem:[%s11461_s8 + $0x908] sm:$0xf] }
 0x17e   : > { %v10867_v16 = vld [vmem:[%s11461_s8 + $0xa84] sm:$0xf]  ;;  %v8264_v29 = vor.u32 %v10803_v19, %v8261_v9  ;;  %v8395_v19 = vld [vmem:[%s11461_s8 + $0x988] sm:$0xf] }
 0x17f   : > { %4011 = vmatpush.bf16.msrb.mxu2 %v8840_v3  ;;  %v8517_v21 = vld [vmem:[%s11461_s8 + $0xaa0] sm:$0xf0]  ;;  %3984 = vmatpush.bf16.msrb.mxu0 %v8296_v15  ;;  %v2080_v3 = vpop.f32.mrf.mxu3  ;;  %v11040_v15 = vld [vmem:[%s11461_s8 + $0xfe4] sm:$0xf0] }
 0x180   : > { %v10931_v22 = vld [vmem:[%s11461_s8 + $0xc84] sm:$0xf]  ;;  %v8520_v33 = vor.u32 %v10867_v16, %v8517_v21  ;;  %v2081_v11 = vadd.f32 %v2080_v3, %v2067_v1  ;;  %v8651_v21 = vld [vmem:[%s11461_s8 + $0xb88] sm:$0xf] }
 0x181   : > { %4025 = vmatpush.bf16.msrb.mxu3 %v9096_v7  ;;  %v8773_v23 = vld [vmem:[%s11461_s8 + $0xca0] sm:$0xf0]  ;;  %3998 = vmatpush.bf16.msrb.mxu1 %v8552_v17  ;;  %v10912_v7 = vld [vmem:[%s11461_s8 + $0xbe4] sm:$0xf0] }
 0x182   : > { %v10995_v26 = vld [vmem:[%s11461_s8 + $0xe84] sm:$0xf]  ;;  %v8776_v35 = vor.u32 %v10931_v22, %v8773_v23  ;;  %v8684_v16 = vor.u32 %v10912_v7, %v8683_v4  ;;  %v10904_v22 = vld [vmem:[%s11461_s8 + $0xba4] sm:$0xf0]  ;;  %v9196_v23 = vor.u32 %v11040_v15, %v9195_v14 }
 0x183   : > { %v9029_v34 = vld [vmem:[%s11461_s8 + $0xea0] sm:$0xf0]  ;;  %4012 = vmatpush.bf16.msrb.mxu2 %v8808_v18  ;;  %3985 = vmatpush.bf16.msrb.mxu0 %v8264_v29  ;;  %v8428_v18 = vor.u32 %v10848_v2, %v8427_v0  ;;  %v8652_v29 = vor.u32 %v10904_v22, %v8651_v21  ;;  %v10880_v3 = vld [vmem:[%s11461_s8 + $0xae4] sm:$0xf0] }
 0x184   : > { %v10795_v37 = vld [vmem:[%s11461_s8 + $0x844] sm:$0xf]  ;;  %v9032_v43 = vor.u32 %v10995_v26, %v9029_v34  ;;  %v9163_v26 = vld [vmem:[%s11461_s8 + $0xf88] sm:$0xf] }
 0x185   : > { %v8229_v39 = vld [vmem:[%s11461_s8 + $0x860] sm:$0xf0]  ;;  %4026 = vmatpush.bf16.msrb.mxu3 %v9064_v27  ;;  %3999 = vmatpush.bf16.msrb.mxu1 %v8520_v33  ;;  %v10840_v27 = vld [vmem:[%s11461_s8 + $0x9a4] sm:$0xf0] }
 0x186   : > { %v10859_v40 = vld [vmem:[%s11461_s8 + $0xa44] sm:$0xf]  ;;  %v8232_v52 = vor.u32 %v10795_v37, %v8229_v39  ;;  %v11032_v34 = vld [vmem:[%s11461_s8 + $0xfa4] sm:$0xf0]  ;;  %v8396_v28 = vor.u32 %v10840_v27, %v8395_v19 }
 0x187   : > { %v8485_v44 = vld [vmem:[%s11461_s8 + $0xa60] sm:$0xf0]  ;;  %4013 = vmatpush.bf16.msrb.mxu2 %v8776_v35  ;;  %v10832_v33 = vld [vmem:[%s11461_s8 + $0x964] sm:$0xf0]  ;;  %v9164_v37 = vor.u32 %v11032_v34, %v9163_v26 }
 0x188   : > { %v10923_v45 = vld [vmem:[%s11461_s8 + $0xc44] sm:$0xf]  ;;  %v8488_v55 = vor.u32 %v10859_v40, %v8485_v44  ;;  %3986 = vmatpush.bf16.msrb.mxu0 %v8232_v52  ;;  %v8619_v35 = vld [vmem:[%s11461_s8 + $0xb48] sm:$0xf]  ;;  %v2106_v0 = vpop.f32.mrf.mxu1 }
 0x189   : > { %v8741_v46 = vld [vmem:[%s11461_s8 + $0xc60] sm:$0xf0]  ;;  %4027 = vmatpush.bf16.msrb.mxu3 %v9032_v43  ;;  %v10896_v39 = vld [vmem:[%s11461_s8 + $0xb64] sm:$0xf0] }
 0x18a   : > { %v10987_v49 = vld [vmem:[%s11461_s8 + $0xe44] sm:$0xf]  ;;  %v8744_v56 = vor.u32 %v10923_v45, %v8741_v46  ;;  %4000 = vmatpush.bf16.msrb.mxu1 %v8488_v55  ;;  %v8875_v40 = vld [vmem:[%s11461_s8 + $0xd48] sm:$0xf]  ;;  %v8364_v45 = vor.u32 %v10832_v33, %v8363_v31  ;;  %v8620_v46 = vor.u32 %v10896_v39, %v8619_v35 }
 0x18b   : > { %v8997_v50 = vld [vmem:[%s11461_s8 + $0xe60] sm:$0xf0]  ;;  %v9131_v43 = vld [vmem:[%s11461_s8 + $0xf48] sm:$0xf]  ;;  %v8876_v47 = vor.u32 %v10960_v42, %v8875_v40 }
 0x18c   : > { %v10787_v51 = vld [vmem:[%s11461_s8 + $0x804] sm:$0xf]  ;;  %v9000_v61 = vor.u32 %v10987_v49, %v8997_v50  ;;  %4014 = vmatpush.bf16.msrb.mxu2 %v8744_v56  ;;  %v11024_v44 = vld [vmem:[%s11461_s8 + $0xf64] sm:$0xf0] }
 0x18d   : > { %v8197_v53 = vld [vmem:[%s11461_s8 + $0x820] sm:$0xf0]  ;;  %v10824_v49 = vld [vmem:[%s11461_s8 + $0x924] sm:$0xf0] }
 0x18e   : > { %v10851_v54 = vld [vmem:[%s11461_s8 + $0xa04] sm:$0xf]  ;;  %v8200_v6 = vor.u32 %v10787_v51, %v8197_v53  ;;  %4028 = vmatpush.bf16.msrb.mxu3 %v9000_v61  ;;  %v8587_v50 = vld [vmem:[%s11461_s8 + $0xb08] sm:$0xf]  ;;  %v9132_v51 = vor.u32 %v11024_v44, %v9131_v43 }
 0x18f   : > { %v8453_v57 = vld [vmem:[%s11461_s8 + $0xa20] sm:$0xf0]  ;;  %v10888_v52 = vld [vmem:[%s11461_s8 + $0xb24] sm:$0xf0] }
 0x190   : > { %v10915_v58 = vld [vmem:[%s11461_s8 + $0xc04] sm:$0xf]  ;;  %v8456_v12 = vor.u32 %v10851_v54, %v8453_v57  ;;  %3987 = vmatpush.bf16.msrb.mxu0 %v8200_v6  ;;  %v8843_v53 = vld [vmem:[%s11461_s8 + $0xd08] sm:$0xf]  ;;  %v8332_v57 = vor.u32 %v10824_v49, %v8331_v48  ;;  %v2120_v15 = vpop.f32.mrf.mxu2  ;;  %v2108_v31 = vpop.f32.mrf.mxu1 }
 0x191   : > { %v8709_v59 = vld [vmem:[%s11461_s8 + $0xc20] sm:$0xf0]  ;;  %v10952_v54 = vld [vmem:[%s11461_s8 + $0xd24] sm:$0xf0] }
 0x192   : > { %v10979_v62 = vld [vmem:[%s11461_s8 + $0xe04] sm:$0xf]  ;;  %v8712_v13 = vor.u32 %v10915_v58, %v8709_v59  ;;  %4001 = vmatpush.bf16.msrb.mxu1 %v8456_v12  ;;  %v9099_v55 = vld [vmem:[%s11461_s8 + $0xf08] sm:$0xf]  ;;  %v2092_v58 = vpop.f32.mrf.mxu0  ;;  %v8588_v59 = vor.u32 %v10888_v52, %v8587_v50  ;;  %v8844_v60 = vor.u32 %v10952_v54, %v8843_v53 }
 0x193   : > { %v8965_v63 = vld [vmem:[%s11461_s8 + $0xe20] sm:$0xf0]  ;;  %3988 = vmatmul.bf16.vlgmr.msrb.gmra.mxu0 %v12246_v38  ;;  %v11016_v56 = vld [vmem:[%s11461_s8 + $0xf24] sm:$0xf0] }
 0x194   : > { %v239_v5 = vld [vmem:[#allocation2 + $0x60] sm:$0xff]  ;;  %v8968_v17 = vor.u32 %v10979_v62, %v8965_v63  ;;  %4015 = vmatpush.bf16.msrb.mxu2 %v8712_v13  ;;  %4036 = vmatpush.bf16.msra.mxu0 %v8428_v18  ;;  %v8299_v61 = vld [vmem:[%s11461_s8 + $0x8c8] sm:$0xf]  ;;  %v9100_v1 = vor.u32 %v11016_v56, %v9099_v55 }
 0x195   : > { %v2263_v9 = vadd.f32 %v2081_v11, %v239_v5  ;;  %4002 = vmatmul.bf16.vlgmr.msrb.gmra.mxu1 %v12249_v41  ;;  %v10816_v62 = vld [vmem:[%s11461_s8 + $0x8e4] sm:$0xf0]  ;;  %v2107_v5 = vadd.f32 %v2106_v0, %v2092_v58  ;;  %v10844_v58 = vld [vmem:[%s11461_s8 + $0x9cc] sm:$0xf] }
 0x196   : > { %4029 = vmatpush.bf16.msrb.mxu3 %v8968_v17  ;;  %4050 = vmatpush.bf16.msra.mxu1 %v8684_v16  ;;  %v8555_v63 = vld [vmem:[%s11461_s8 + $0xac8] sm:$0xf]  ;;  %v8300_v8 = vor.u32 %v10816_v62, %v8299_v61  ;;  %v8429_v61 = vld [vmem:[%s11461_s8 + $0x9e8] sm:$0xf0] }
 0x197   : > { %2279 = vst [vmem:[#allocation2 + $0x60] sm:$0xff] %v2263_v9  ;;  %4016 = vmatmul.bf16.vlgmr.msrb.gmra.mxu2 %v12238_v32  ;;  %v8811_v2 = vld [vmem:[%s11461_s8 + $0xcc8] sm:$0xf]  ;;  %v8556_v10 = vor.u32 %v10880_v3, %v8555_v63  ;;  %v2121_v16 = vadd.f32 %v2120_v15, %v2107_v5  ;;  %v10908_v62 = vld [vmem:[%s11461_s8 + $0xbcc] sm:$0xf]  ;;  %v240_v63 = vld [vmem:[#allocation2 + $0x70] sm:$0xff] }
 0x198   : > { %4064 = vmatpush.bf16.msra.mxu2 %v8940_v20  ;;  %4037 = vmatpush.bf16.msra.mxu0 %v8396_v28  ;;  %v10944_v4 = vld [vmem:[%s11461_s8 + $0xce4] sm:$0xf0]  ;;  %v2134_v20 = vpop.f32.mrf.mxu3  ;;  %v2122_v54 = vpop.f32.mrf.mxu2  ;;  %v10972_v3 = vld [vmem:[%s11461_s8 + $0xdcc] sm:$0xf] }
 0x199   : > { %4030 = vmatmul.bf16.vlgmr.msrb.gmra.mxu3 %v12243_v36  ;;  %v9067_v6 = vld [vmem:[%s11461_s8 + $0xec8] sm:$0xf]  ;;  %v8812_v11 = vor.u32 %v10944_v4, %v8811_v2  ;;  %v2135_v24 = vadd.f32 %v2134_v20, %v2121_v16  ;;  %v8941_v2 = vld [vmem:[%s11461_s8 + $0xde8] sm:$0xf0] }
 0x19a   : > { %4078 = vmatpush.bf16.msra.mxu3 %v9196_v23  ;;  %4051 = vmatpush.bf16.msra.mxu1 %v8652_v29  ;;  %v11008_v7 = vld [vmem:[%s11461_s8 + $0xee4] sm:$0xf0]  ;;  %v2094_v25 = vpop.f32.mrf.mxu0  ;;  %v8944_v15 = vor.u32 %v10972_v3, %v8941_v2  ;;  %v10964_v16 = vld [vmem:[%s11461_s8 + $0xd8c] sm:$0xf] }
 0x19b   : > { %v8267_v12 = vld [vmem:[%s11461_s8 + $0x888] sm:$0xf]  ;;  %v9068_v17 = vor.u32 %v11008_v7, %v9067_v6  ;;  %v2109_v42 = vadd.f32 %v2108_v31, %v2094_v25  ;;  %v11036_v7 = vld [vmem:[%s11461_s8 + $0xfcc] sm:$0xf] }
 0x19c   : > { %4065 = vmatpush.bf16.msra.mxu2 %v8908_v30  ;;  %4038 = vmatpush.bf16.msra.mxu0 %v8364_v45  ;;  %v10808_v13 = vld [vmem:[%s11461_s8 + $0x8a4] sm:$0xf0]  ;;  %v8909_v20 = vld [vmem:[%s11461_s8 + $0xda8] sm:$0xf0] }
 0x19d   : > { %v8523_v14 = vld [vmem:[%s11461_s8 + $0xa88] sm:$0xf]  ;;  %v8268_v23 = vor.u32 %v10808_v13, %v8267_v12  ;;  %v10836_v12 = vld [vmem:[%s11461_s8 + $0x98c] sm:$0xf] }
 0x19e   : > { %4079 = vmatpush.bf16.msra.mxu3 %v9164_v37  ;;  %4052 = vmatpush.bf16.msra.mxu1 %v8620_v46  ;;  %v10872_v18 = vld [vmem:[%s11461_s8 + $0xaa4] sm:$0xf0]  ;;  %v10828_v25 = vld [vmem:[%s11461_s8 + $0x94c] sm:$0xf] }
 0x19f   : > { %v8779_v19 = vld [vmem:[%s11461_s8 + $0xc88] sm:$0xf]  ;;  %v8524_v26 = vor.u32 %v10872_v18, %v8523_v14  ;;  %v10900_v18 = vld [vmem:[%s11461_s8 + $0xb8c] sm:$0xf] }
 0x1a0   : > { %4066 = vmatpush.bf16.msra.mxu2 %v8876_v47  ;;  %4039 = vmatpush.bf16.msra.mxu0 %v8332_v57  ;;  %v10936_v9 = vld [vmem:[%s11461_s8 + $0xca4] sm:$0xf0]  ;;  %v8877_v31 = vld [vmem:[%s11461_s8 + $0xd68] sm:$0xf0] }
 0x1a1   : > { %v9035_v27 = vld [vmem:[%s11461_s8 + $0xe88] sm:$0xf]  ;;  %v8780_v34 = vor.u32 %v10936_v9, %v8779_v19  ;;  %v8653_v19 = vld [vmem:[%s11461_s8 + $0xba8] sm:$0xf0] }
 0x1a2   : > { %4080 = vmatpush.bf16.msra.mxu3 %v9132_v51  ;;  %4053 = vmatpush.bf16.msra.mxu1 %v8588_v59  ;;  %v11000_v21 = vld [vmem:[%s11461_s8 + $0xea4] sm:$0xf0]  ;;  %v2123_v59 = vadd.f32 %v2122_v54, %v2109_v42  ;;  %v10820_v42 = vld [vmem:[%s11461_s8 + $0x90c] sm:$0xf] }
 0x1a3   : > { %v232_v22 = vld [vmem:[#allocation2 + $0x68] sm:$0xff]  ;;  %v9036_v33 = vor.u32 %v11000_v21, %v9035_v27 }
 0x1a4   : > { %4067 = vmatpush.bf16.msra.mxu2 %v8844_v60  ;;  %4040 = vmatpush.bf16.msra.mxu0 %v8300_v8  ;;  %v8235_v28 = vld [vmem:[%s11461_s8 + $0x848] sm:$0xf]  ;;  %v2256_v40 = vadd.f32 %v2135_v24, %v232_v22  ;;  %v2136_v60 = vpop.f32.mrf.mxu3  ;;  %v9197_v8 = vld [vmem:[%s11461_s8 + $0xfe8] sm:$0xf0]  ;;  %v8912_v24 = vor.u32 %v10964_v16, %v8909_v20 }
 0x1a5   : > { %v10800_v29 = vld [vmem:[%s11461_s8 + $0x864] sm:$0xf0]  ;;  %v2137_v4 = vadd.f32 %v2136_v60, %v2123_v59  ;;  %v9200_v9 = vor.u32 %v11036_v7, %v9197_v8  ;;  %v11028_v27 = vld [vmem:[%s11461_s8 + $0xf8c] sm:$0xf] }
 0x1a6   : > { %4081 = vmatpush.bf16.msra.mxu3 %v9100_v1  ;;  %4054 = vmatpush.bf16.msra.mxu1 %v8556_v10  ;;  %v8491_v30 = vld [vmem:[%s11461_s8 + $0xa48] sm:$0xf]  ;;  %v8236_v46 = vor.u32 %v10800_v29, %v8235_v28  ;;  %2272 = vst [vmem:[#allocation2 + $0x68] sm:$0xff] %v2256_v40  ;;  %v8685_v1 = vld [vmem:[%s11461_s8 + $0xbe8] sm:$0xf0] }
 0x1a7   : > { %v10864_v35 = vld [vmem:[%s11461_s8 + $0xa64] sm:$0xf0]  ;;  %v2264_v13 = vadd.f32 %v2137_v4, %v240_v63  ;;  %v8688_v14 = vor.u32 %v10908_v62, %v8685_v1  ;;  %v9165_v21 = vld [vmem:[%s11461_s8 + $0xfa8] sm:$0xf0] }
 0x1a8   : > { %4068 = vmatpush.bf16.msra.mxu2 %v8812_v11  ;;  %v8747_v37 = vld [vmem:[%s11461_s8 + $0xc48] sm:$0xf]  ;;  %4041 = vmatpush.bf16.msra.mxu0 %v8268_v23  ;;  %v8492_v49 = vor.u32 %v10864_v35, %v8491_v30  ;;  %v8432_v11 = vor.u32 %v10844_v58, %v8429_v61  ;;  %v8656_v23 = vor.u32 %v10900_v18, %v8653_v19  ;;  %v8621_v29 = vld [vmem:[%s11461_s8 + $0xb68] sm:$0xf0]  ;;  %v2162_v58 = vpop.f32.mrf.mxu1 }
 0x1a9   : > { %v10928_v39 = vld [vmem:[%s11461_s8 + $0xc64] sm:$0xf0]  ;;  %2280 = vst [vmem:[#allocation2 + $0x70] sm:$0xff] %v2264_v13  ;;  %v9168_v28 = vor.u32 %v11028_v27, %v9165_v21  ;;  %v10956_v30 = vld [vmem:[%s11461_s8 + $0xd4c] sm:$0xf] }
 0x1aa   : > { %4082 = vmatpush.bf16.msra.mxu3 %v9068_v17  ;;  %v9003_v43 = vld [vmem:[%s11461_s8 + $0xe48] sm:$0xf]  ;;  %4055 = vmatpush.bf16.msra.mxu1 %v8524_v26  ;;  %v8748_v50 = vor.u32 %v10928_v39, %v8747_v37  ;;  %v8397_v17 = vld [vmem:[%s11461_s8 + $0x9a8] sm:$0xf0]  ;;  %v8880_v40 = vor.u32 %v10956_v30, %v8877_v31 }
 0x1ab   : > { %v10992_v44 = vld [vmem:[%s11461_s8 + $0xe64] sm:$0xf0]  ;;  %v8400_v22 = vor.u32 %v10836_v12, %v8397_v17  ;;  %v8365_v26 = vld [vmem:[%s11461_s8 + $0x968] sm:$0xf0] }
 0x1ac   : > { %v8203_v45 = vld [vmem:[%s11461_s8 + $0x808] sm:$0xf]  ;;  %4069 = vmatpush.bf16.msra.mxu2 %v8780_v34  ;;  %v9004_v55 = vor.u32 %v10992_v44, %v9003_v43  ;;  %4042 = vmatpush.bf16.msra.mxu0 %v8236_v46  ;;  %v10892_v34 = vld [vmem:[%s11461_s8 + $0xb4c] sm:$0xf]  ;;  %v8368_v37 = vor.u32 %v10828_v25, %v8365_v26 }
 0x1ad   : > { %v10792_v47 = vld [vmem:[%s11461_s8 + $0x824] sm:$0xf0]  ;;  %v9133_v35 = vld [vmem:[%s11461_s8 + $0xf68] sm:$0xf0]  ;;  %v8624_v39 = vor.u32 %v10892_v34, %v8621_v29 }
 0x1ae   : > { %v8459_v48 = vld [vmem:[%s11461_s8 + $0xa08] sm:$0xf]  ;;  %4083 = vmatpush.bf16.msra.mxu3 %v9036_v33  ;;  %v8204_v0 = vor.u32 %v10792_v47, %v8203_v45  ;;  %4056 = vmatpush.bf16.msra.mxu1 %v8492_v49  ;;  %v11020_v33 = vld [vmem:[%s11461_s8 + $0xf4c] sm:$0xf] }
 0x1af   : > { %v10856_v51 = vld [vmem:[%s11461_s8 + $0xa24] sm:$0xf0]  ;;  %v8333_v43 = vld [vmem:[%s11461_s8 + $0x928] sm:$0xf0]  ;;  %v9136_v45 = vor.u32 %v11020_v33, %v9133_v35 }
 0x1b0   : > { %v8715_v52 = vld [vmem:[%s11461_s8 + $0xc08] sm:$0xf]  ;;  %4070 = vmatpush.bf16.msra.mxu2 %v8748_v50  ;;  %v8460_v5 = vor.u32 %v10856_v51, %v8459_v48  ;;  %4043 = vmatpush.bf16.msra.mxu0 %v8204_v0  ;;  %v10884_v44 = vld [vmem:[%s11461_s8 + $0xb0c] sm:$0xf]  ;;  %v8336_v51 = vor.u32 %v10820_v42, %v8333_v43  ;;  %v2176_v8 = vpop.f32.mrf.mxu2  ;;  %v2164_v25 = vpop.f32.mrf.mxu1 }
 0x1b1   : > { %v10920_v53 = vld [vmem:[%s11461_s8 + $0xc24] sm:$0xf0]  ;;  %v8589_v46 = vld [vmem:[%s11461_s8 + $0xb28] sm:$0xf0] }
 0x1b2   : > { %v8971_v56 = vld [vmem:[%s11461_s8 + $0xe08] sm:$0xf]  ;;  %v8716_v6 = vor.u32 %v10920_v53, %v8715_v52  ;;  %4084 = vmatpush.bf16.msra.mxu3 %v9004_v55  ;;  %4057 = vmatpush.bf16.msra.mxu1 %v8460_v5  ;;  %v10948_v47 = vld [vmem:[%s11461_s8 + $0xd0c] sm:$0xf]  ;;  %v2148_v52 = vpop.f32.mrf.mxu0  ;;  %v8592_v53 = vor.u32 %v10884_v44, %v8589_v46 }
 0x1b3   : > { %v10984_v57 = vld [vmem:[%s11461_s8 + $0xe24] sm:$0xf0]  ;;  %4044 = vmatmul.bf16.vlgmr.msra.gmra.mxu0 %v12246_v38  ;;  %v8845_v48 = vld [vmem:[%s11461_s8 + $0xd28] sm:$0xf0]  ;;  %v2163_v63 = vadd.f32 %v2162_v58, %v2148_v52  ;;  %v8435_v52 = vld [vmem:[%s11461_s8 + $0x9d0] sm:$0xf] }
 0x1b4   : > { %v8972_v10 = vor.u32 %v10984_v57, %v8971_v56  ;;  %4071 = vmatpush.bf16.msra.mxu2 %v8716_v6  ;;  %4092 = vmatpush.bf16.msrb.mxu0 %v8432_v11  ;;  %v11012_v49 = vld [vmem:[%s11461_s8 + $0xf0c] sm:$0xf]  ;;  %v8848_v54 = vor.u32 %v10948_v47, %v8845_v48 }
 0x1b5   : > { %4058 = vmatmul.bf16.vlgmr.msra.gmra.mxu1 %v12249_v41  ;;  %v9101_v50 = vld [vmem:[%s11461_s8 + $0xf28] sm:$0xf0] }
 0x1b6   : > { %4085 = vmatpush.bf16.msra.mxu3 %v8972_v10  ;;  %4106 = vmatpush.bf16.msrb.mxu1 %v8688_v14  ;;  %v10812_v55 = vld [vmem:[%s11461_s8 + $0x8cc] sm:$0xf]  ;;  %v9104_v59 = vor.u32 %v11012_v49, %v9101_v50  ;;  %v2177_v14 = vadd.f32 %v2176_v8, %v2163_v63 }
 0x1b7   : > { %4072 = vmatmul.bf16.vlgmr.msra.gmra.mxu2 %v12238_v32  ;;  %v8301_v56 = vld [vmem:[%s11461_s8 + $0x8e8] sm:$0xf0] }
 0x1b8   : > { %4120 = vmatpush.bf16.msrb.mxu2 %v8944_v15  ;;  %4093 = vmatpush.bf16.msrb.mxu0 %v8400_v22  ;;  %v10876_v57 = vld [vmem:[%s11461_s8 + $0xacc] sm:$0xf]  ;;  %v8304_v3 = vor.u32 %v10812_v55, %v8301_v56  ;;  %v2190_v15 = vpop.f32.mrf.mxu3  ;;  %v2178_v48 = vpop.f32.mrf.mxu2  ;;  %v10849_v55 = vld [vmem:[%s11461_s8 + $0x9ec] sm:$0xf0] }
 0x1b9   : > { %4086 = vmatmul.bf16.vlgmr.msra.gmra.mxu3 %v12243_v36  ;;  %v8557_v60 = vld [vmem:[%s11461_s8 + $0xae8] sm:$0xf0]  ;;  %v2191_v16 = vadd.f32 %v2190_v15, %v2177_v14  ;;  %v8691_v56 = vld [vmem:[%s11461_s8 + $0xbd0] sm:$0xf] }
 0x1ba   : > { %4134 = vmatpush.bf16.msrb.mxu3 %v9200_v9  ;;  %4107 = vmatpush.bf16.msrb.mxu1 %v8656_v23  ;;  %v10940_v61 = vld [vmem:[%s11461_s8 + $0xccc] sm:$0xf]  ;;  %v8560_v2 = vor.u32 %v10876_v57, %v8557_v60  ;;  %v2150_v20 = vpop.f32.mrf.mxu0  ;;  %v241_v57 = vld [vmem:[#allocation2 + $0x78] sm:$0xff]  ;;  %v8947_v60 = vld [vmem:[%s11461_s8 + $0xdd0] sm:$0xf] }
 0x1bb   : > { %v8813_v62 = vld [vmem:[%s11461_s8 + $0xce8] sm:$0xf0]  ;;  %v2165_v31 = vadd.f32 %v2164_v25, %v2150_v20  ;;  %v8915_v14 = vld [vmem:[%s11461_s8 + $0xd90] sm:$0xf] }
 0x1bc   : > { %4121 = vmatpush.bf16.msrb.mxu2 %v8912_v24  ;;  %4094 = vmatpush.bf16.msrb.mxu0 %v8368_v37  ;;  %v11004_v0 = vld [vmem:[%s11461_s8 + $0xecc] sm:$0xf]  ;;  %v8816_v4 = vor.u32 %v10940_v61, %v8813_v62  ;;  %v10977_v61 = vld [vmem:[%s11461_s8 + $0xdec] sm:$0xf0] }
 0x1bd   : > { %v9069_v1 = vld [vmem:[%s11461_s8 + $0xee8] sm:$0xf0]  ;;  %v8948_v8 = vor.u32 %v10977_v61, %v8947_v60  ;;  %v10969_v15 = vld [vmem:[%s11461_s8 + $0xdac] sm:$0xf0] }
 0x1be   : > { %4135 = vmatpush.bf16.msrb.mxu3 %v9168_v28  ;;  %4108 = vmatpush.bf16.msrb.mxu1 %v8624_v39  ;;  %v10804_v5 = vld [vmem:[%s11461_s8 + $0x88c] sm:$0xf]  ;;  %v9072_v10 = vor.u32 %v11004_v0, %v9069_v1  ;;  %v9203_v1 = vld [vmem:[%s11461_s8 + $0xfd0] sm:$0xf] }
 0x1bf   : > { %v8269_v6 = vld [vmem:[%s11461_s8 + $0x8a8] sm:$0xf0]  ;;  %v8371_v20 = vld [vmem:[%s11461_s8 + $0x950] sm:$0xf] }
 0x1c0   : > { %4122 = vmatpush.bf16.msrb.mxu2 %v8880_v40  ;;  %4095 = vmatpush.bf16.msrb.mxu0 %v8336_v51  ;;  %v10868_v7 = vld [vmem:[%s11461_s8 + $0xa8c] sm:$0xf]  ;;  %v8272_v9 = vor.u32 %v10804_v5, %v8269_v6  ;;  %v8403_v5 = vld [vmem:[%s11461_s8 + $0x990] sm:$0xf] }
 0x1c1   : > { %v8525_v11 = vld [vmem:[%s11461_s8 + $0xaa8] sm:$0xf0]  ;;  %v10961_v25 = vld [vmem:[%s11461_s8 + $0xd6c] sm:$0xf0] }
 0x1c2   : > { %4136 = vmatpush.bf16.msrb.mxu3 %v9136_v45  ;;  %4109 = vmatpush.bf16.msrb.mxu1 %v8592_v53  ;;  %v10932_v12 = vld [vmem:[%s11461_s8 + $0xc8c] sm:$0xf]  ;;  %v8528_v27 = vor.u32 %v10868_v7, %v8525_v11  ;;  %v2179_v53 = vadd.f32 %v2178_v48, %v2165_v31  ;;  %v8659_v11 = vld [vmem:[%s11461_s8 + $0xb90] sm:$0xf] }
 0x1c3   : > { %v8781_v13 = vld [vmem:[%s11461_s8 + $0xca8] sm:$0xf0]  ;;  %v8339_v31 = vld [vmem:[%s11461_s8 + $0x910] sm:$0xf] }
 0x1c4   : > { %4123 = vmatpush.bf16.msrb.mxu2 %v8848_v54  ;;  %v10996_v17 = vld [vmem:[%s11461_s8 + $0xe8c] sm:$0xf]  ;;  %4096 = vmatpush.bf16.msrb.mxu0 %v8304_v3  ;;  %v8784_v21 = vor.u32 %v10932_v12, %v8781_v13  ;;  %v2192_v54 = vpop.f32.mrf.mxu3  ;;  %v11041_v3 = vld [vmem:[%s11461_s8 + $0xfec] sm:$0xf0] }
 0x1c5   : > { %v9037_v18 = vld [vmem:[%s11461_s8 + $0xea8] sm:$0xf0]  ;;  %v2193_v62 = vadd.f32 %v2192_v54, %v2179_v53  ;;  %v10905_v12 = vld [vmem:[%s11461_s8 + $0xbac] sm:$0xf0]  ;;  %v9204_v13 = vor.u32 %v11041_v3, %v9203_v1 }
 0x1c6   : > { %4137 = vmatpush.bf16.msrb.mxu3 %v9104_v59  ;;  %v233_v19 = vld [vmem:[#allocation2 + $0x8] sm:$0xff]  ;;  %4110 = vmatpush.bf16.msrb.mxu1 %v8560_v2  ;;  %v9040_v26 = vor.u32 %v10996_v17, %v9037_v18  ;;  %v10913_v59 = vld [vmem:[%s11461_s8 + $0xbec] sm:$0xf0] }
 0x1c7   : > { %v10796_v22 = vld [vmem:[%s11461_s8 + $0x84c] sm:$0xf]  ;;  %v2257_v30 = vadd.f32 %v2191_v16, %v233_v19  ;;  %v2265_v6 = vadd.f32 %v2193_v62, %v241_v57  ;;  %v8692_v7 = vor.u32 %v10913_v59, %v8691_v56  ;;  %v9171_v17 = vld [vmem:[%s11461_s8 + $0xf90] sm:$0xf]  ;;  %v8916_v16 = vor.u32 %v10969_v15, %v8915_v14 }
 0x1c8   : > { %4124 = vmatpush.bf16.msrb.mxu2 %v8816_v4  ;;  %v8237_v23 = vld [vmem:[%s11461_s8 + $0x868] sm:$0xf0]  ;;  %4097 = vmatpush.bf16.msrb.mxu0 %v8272_v9  ;;  %v8436_v4 = vor.u32 %v10849_v55, %v8435_v52  ;;  %v11033_v18 = vld [vmem:[%s11461_s8 + $0xfac] sm:$0xf0]  ;;  %v8660_v9 = vor.u32 %v10905_v12, %v8659_v11 }
 0x1c9   : > { %v10860_v24 = vld [vmem:[%s11461_s8 + $0xa4c] sm:$0xf]  ;;  %v8240_v39 = vor.u32 %v10796_v22, %v8237_v23  ;;  %2273 = vst [vmem:[#allocation2 + $0x8] sm:$0xff] %v2257_v30  ;;  %v9172_v22 = vor.u32 %v11033_v18, %v9171_v17  ;;  %v10897_v23 = vld [vmem:[%s11461_s8 + $0xb6c] sm:$0xf0] }
 0x1ca   : > { %4138 = vmatpush.bf16.msrb.mxu3 %v9072_v10  ;;  %v8493_v34 = vld [vmem:[%s11461_s8 + $0xa68] sm:$0xf0]  ;;  %4111 = vmatpush.bf16.msrb.mxu1 %v8528_v27  ;;  %v10841_v10 = vld [vmem:[%s11461_s8 + $0x9ac] sm:$0xf0]  ;;  %2281 = vst [vmem:[#allocation2 + $0x78] sm:$0xff] %v2265_v6  ;;  %v2218_v52 = vpop.f32.mrf.mxu1 }
 0x1cb   : > { %v10924_v28 = vld [vmem:[%s11461_s8 + $0xc4c] sm:$0xf]  ;;  %v8496_v43 = vor.u32 %v10860_v24, %v8493_v34  ;;  %v8404_v19 = vor.u32 %v10841_v10, %v8403_v5  ;;  %v10833_v27 = vld [vmem:[%s11461_s8 + $0x96c] sm:$0xf0] }
 0x1cc   : > { %v8749_v29 = vld [vmem:[%s11461_s8 + $0xc68] sm:$0xf0]  ;;  %4125 = vmatpush.bf16.msrb.mxu2 %v8784_v21  ;;  %4098 = vmatpush.bf16.msrb.mxu0 %v8240_v39  ;;  %v8627_v21 = vld [vmem:[%s11461_s8 + $0xb50] sm:$0xf] }
 0x1cd   : > { %v10988_v33 = vld [vmem:[%s11461_s8 + $0xe4c] sm:$0xf]  ;;  %v8752_v44 = vor.u32 %v10924_v28, %v8749_v29  ;;  %v8883_v24 = vld [vmem:[%s11461_s8 + $0xd50] sm:$0xf]  ;;  %v8372_v28 = vor.u32 %v10833_v27, %v8371_v20  ;;  %v8628_v29 = vor.u32 %v10897_v23, %v8627_v21 }
 0x1ce   : > { %v9005_v35 = vld [vmem:[%s11461_s8 + $0xe68] sm:$0xf0]  ;;  %4139 = vmatpush.bf16.msrb.mxu3 %v9040_v26  ;;  %4112 = vmatpush.bf16.msrb.mxu1 %v8496_v43  ;;  %v9139_v26 = vld [vmem:[%s11461_s8 + $0xf50] sm:$0xf]  ;;  %v8884_v30 = vor.u32 %v10961_v25, %v8883_v24 }
 0x1cf   : > { %v10788_v37 = vld [vmem:[%s11461_s8 + $0x80c] sm:$0xf]  ;;  %v9008_v49 = vor.u32 %v10988_v33, %v9005_v35  ;;  %v11025_v34 = vld [vmem:[%s11461_s8 + $0xf6c] sm:$0xf0] }
 0x1d0   : > { %v8205_v40 = vld [vmem:[%s11461_s8 + $0x828] sm:$0xf0]  ;;  %4126 = vmatpush.bf16.msrb.mxu2 %v8752_v44  ;;  %v10825_v33 = vld [vmem:[%s11461_s8 + $0x92c] sm:$0xf0] }
 0x1d1   : > { %v10852_v42 = vld [vmem:[%s11461_s8 + $0xa0c] sm:$0xf]  ;;  %v8208_v58 = vor.u32 %v10788_v37, %v8205_v40  ;;  %v8595_v35 = vld [vmem:[%s11461_s8 + $0xb10] sm:$0xf]  ;;  %v9140_v37 = vor.u32 %v11025_v34, %v9139_v26 }
 0x1d2   : > { %v8461_v45 = vld [vmem:[%s11461_s8 + $0xa28] sm:$0xf0]  ;;  %4140 = vmatpush.bf16.msrb.mxu3 %v9008_v49  ;;  %v10889_v39 = vld [vmem:[%s11461_s8 + $0xb2c] sm:$0xf0]  ;;  %v2232_v3 = vpop.f32.mrf.mxu2  ;;  %v2220_v20 = vpop.f32.mrf.mxu1 }
 0x1d3   : > { %v10916_v46 = vld [vmem:[%s11461_s8 + $0xc0c] sm:$0xf]  ;;  %v8464_v63 = vor.u32 %v10852_v42, %v8461_v45  ;;  %4099 = vmatpush.bf16.msrb.mxu0 %v8208_v58  ;;  %v8851_v40 = vld [vmem:[%s11461_s8 + $0xd10] sm:$0xf]  ;;  %v8340_v45 = vor.u32 %v10825_v33, %v8339_v31 }
 0x1d4   : > { %v8717_v47 = vld [vmem:[%s11461_s8 + $0xc28] sm:$0xf0]  ;;  %v10953_v42 = vld [vmem:[%s11461_s8 + $0xd2c] sm:$0xf0] }
 0x1d5   : > { %v10980_v50 = vld [vmem:[%s11461_s8 + $0xe0c] sm:$0xf]  ;;  %v8720_v0 = vor.u32 %v10916_v46, %v8717_v47  ;;  %4113 = vmatpush.bf16.msrb.mxu1 %v8464_v63  ;;  %v9107_v43 = vld [vmem:[%s11461_s8 + $0xf10] sm:$0xf]  ;;  %v2204_v46 = vpop.f32.mrf.mxu0  ;;  %v8596_v47 = vor.u32 %v10889_v39, %v8595_v35  ;;  %v8852_v48 = vor.u32 %v10953_v42, %v8851_v40 }
 0x1d6   : > { %v8973_v51 = vld [vmem:[%s11461_s8 + $0xe28] sm:$0xf0]  ;;  %4100 = vmatmul.bf16.vlgmr.msrb.gmra.mxu0 %v12246_v38  ;;  %v11017_v44 = vld [vmem:[%s11461_s8 + $0xf2c] sm:$0xf0]  ;;  %v2219_v57 = vadd.f32 %v2218_v52, %v2204_v46  ;;  %v10845_v46 = vld [vmem:[%s11461_s8 + $0x9d4] sm:$0xf] }
 0x1d7   : > { %v8976_v2 = vor.u32 %v10980_v50, %v8973_v51  ;;  %4127 = vmatpush.bf16.msrb.mxu2 %v8720_v0  ;;  %4148 = vmatpush.bf16.msra.mxu0 %v8436_v4  ;;  %v8307_v49 = vld [vmem:[%s11461_s8 + $0x8d0] sm:$0xf]  ;;  %v9108_v53 = vor.u32 %v11017_v44, %v9107_v43  ;;  %v234_v12 = vld [vmem:[#allocation2 + $0x48] sm:$0xff] }
 0x1d8   : > { %4114 = vmatmul.bf16.vlgmr.msrb.gmra.mxu1 %v12249_v41  ;;  %v10817_v50 = vld [vmem:[%s11461_s8 + $0x8ec] sm:$0xf0] }
 0x1d9   : > { %4141 = vmatpush.bf16.msrb.mxu3 %v8976_v2  ;;  %4162 = vmatpush.bf16.msra.mxu1 %v8692_v7  ;;  %v8563_v51 = vld [vmem:[%s11461_s8 + $0xad0] sm:$0xf]  ;;  %v8308_v60 = vor.u32 %v10817_v50, %v8307_v49  ;;  %v2233_v7 = vadd.f32 %v2232_v3, %v2219_v57  ;;  %v10909_v49 = vld [vmem:[%s11461_s8 + $0xbd4] sm:$0xf]  ;;  %v242_v50 = vld [vmem:[#allocation2 + $0x28] sm:$0xff] }
 0x1da   : > { %4128 = vmatmul.bf16.vlgmr.msrb.gmra.mxu2 %v12238_v32  ;;  %v10881_v54 = vld [vmem:[%s11461_s8 + $0xaec] sm:$0xf0]  ;;  %v2234_v42 = vpop.f32.mrf.mxu2 }
 0x1db   : > { %4176 = vmatpush.bf16.msra.mxu2 %v8948_v8  ;;  %4149 = vmatpush.bf16.msra.mxu0 %v8404_v19  ;;  %v8819_v55 = vld [vmem:[%s11461_s8 + $0xcd0] sm:$0xf]  ;;  %v8564_v61 = vor.u32 %v10881_v54, %v8563_v51  ;;  %v2246_v8 = vpop.f32.mrf.mxu3  ;;  %v10973_v54 = vld [vmem:[%s11461_s8 + $0xdd4] sm:$0xf] }
 0x1dc   : > { %4142 = vmatmul.bf16.vlgmr.msrb.gmra.mxu3 %v12243_v36  ;;  %v10945_v56 = vld [vmem:[%s11461_s8 + $0xcec] sm:$0xf0]  ;;  %v2247_v14 = vadd.f32 %v2246_v8, %v2233_v7  ;;  %v10965_v7 = vld [vmem:[%s11461_s8 + $0xd94] sm:$0xf] }
 0x1dd   : > { %4190 = vmatpush.bf16.msra.mxu3 %v9204_v13  ;;  %4163 = vmatpush.bf16.msra.mxu1 %v8660_v9  ;;  %v9075_v58 = vld [vmem:[%s11461_s8 + $0xed0] sm:$0xf]  ;;  %v8820_v62 = vor.u32 %v10945_v56, %v8819_v55  ;;  %v8949_v55 = vld [vmem:[%s11461_s8 + $0xdf0] sm:$0xf0] }
 0x1de   : > { %v11009_v59 = vld [vmem:[%s11461_s8 + $0xeec] sm:$0xf0]  ;;  %v2258_v24 = vadd.f32 %v2247_v14, %v234_v12  ;;  %v8952_v3 = vor.u32 %v10973_v54, %v8949_v55  ;;  %v8917_v8 = vld [vmem:[%s11461_s8 + $0xdb0] sm:$0xf0] }
 0x1df   : > { %4177 = vmatpush.bf16.msra.mxu2 %v8916_v16  ;;  %4150 = vmatpush.bf16.msra.mxu0 %v8372_v28  ;;  %v8275_v63 = vld [vmem:[%s11461_s8 + $0x890] sm:$0xf]  ;;  %v9076_v2 = vor.u32 %v11009_v59, %v9075_v58  ;;  %v2206_v16 = vpop.f32.mrf.mxu0  ;;  %v11037_v59 = vld [vmem:[%s11461_s8 + $0xfd4] sm:$0xf]  ;;  %v8920_v14 = vor.u32 %v10965_v7, %v8917_v8 }
 0x1e0   : > { %v10809_v0 = vld [vmem:[%s11461_s8 + $0x8ac] sm:$0xf0]  ;;  %v2221_v25 = vadd.f32 %v2220_v20, %v2206_v16  ;;  %2274 = vst [vmem:[#allocation2 + $0x48] sm:$0xff] %v2258_v24  ;;  %v10957_v16 = vld [vmem:[%s11461_s8 + $0xd54] sm:$0xf] }
 0x1e1   : > { %4191 = vmatpush.bf16.msra.mxu3 %v9172_v22  ;;  %4164 = vmatpush.bf16.msra.mxu1 %v8628_v29  ;;  %v8531_v1 = vld [vmem:[%s11461_s8 + $0xa90] sm:$0xf]  ;;  %v8276_v13 = vor.u32 %v10809_v0, %v8275_v63  ;;  %v10837_v63 = vld [vmem:[%s11461_s8 + $0x994] sm:$0xf] }
 0x1e2   : > { %v10873_v4 = vld [vmem:[%s11461_s8 + $0xaac] sm:$0xf0]  ;;  %v8885_v20 = vld [vmem:[%s11461_s8 + $0xd70] sm:$0xf0] }
 0x1e3   : > { %4178 = vmatpush.bf16.msra.mxu2 %v8884_v30  ;;  %4151 = vmatpush.bf16.msra.mxu0 %v8340_v45  ;;  %v8787_v5 = vld [vmem:[%s11461_s8 + $0xc90] sm:$0xf]  ;;  %v8532_v15 = vor.u32 %v10873_v4, %v8531_v1  ;;  %v2248_v51 = vpop.f32.mrf.mxu3  ;;  %v10901_v4 = vld [vmem:[%s11461_s8 + $0xb94] sm:$0xf]  ;;  %v8888_v24 = vor.u32 %v10957_v16, %v8885_v20 }
 0x1e4   : > { %v10937_v6 = vld [vmem:[%s11461_s8 + $0xcac] sm:$0xf0]  ;;  %v10925_v16 = vld [vmem:[%s11461_s8 + $0xc54] sm:$0xf] }
 0x1e5   : > { %4192 = vmatpush.bf16.msra.mxu3 %v9140_v37  ;;  %4165 = vmatpush.bf16.msra.mxu1 %v8596_v47  ;;  %v9043_v10 = vld [vmem:[%s11461_s8 + $0xe90] sm:$0xf]  ;;  %v8788_v17 = vor.u32 %v10937_v6, %v8787_v5  ;;  %v2235_v47 = vadd.f32 %v2234_v42, %v2221_v25  ;;  %v8661_v5 = vld [vmem:[%s11461_s8 + $0xbb0] sm:$0xf0] }
 0x1e6   : > { %v11001_v11 = vld [vmem:[%s11461_s8 + $0xeac] sm:$0xf0]  ;;  %v10821_v25 = vld [vmem:[%s11461_s8 + $0x914] sm:$0xf] }
 0x1e7   : > { %4179 = vmatpush.bf16.msra.mxu2 %v8852_v48  ;;  %4152 = vmatpush.bf16.msra.mxu0 %v8308_v60  ;;  %v8243_v18 = vld [vmem:[%s11461_s8 + $0x850] sm:$0xf]  ;;  %v9044_v27 = vor.u32 %v11001_v11, %v9043_v10  ;;  %v8437_v48 = vld [vmem:[%s11461_s8 + $0x9f0] sm:$0xf0]  ;;  %v2249_v56 = vadd.f32 %v2248_v51, %v2235_v47 }
 0x1e8   : > { %v10801_v19 = vld [vmem:[%s11461_s8 + $0x86c] sm:$0xf0]  ;;  %v9205_v60 = vld [vmem:[%s11461_s8 + $0xff0] sm:$0xf0] }
 0x1e9   : > { %4193 = vmatpush.bf16.msra.mxu3 %v9108_v53  ;;  %4166 = vmatpush.bf16.msra.mxu1 %v8564_v61  ;;  %v8499_v9 = vld [vmem:[%s11461_s8 + $0xa50] sm:$0xf]  ;;  %v8244_v29 = vor.u32 %v10801_v19, %v8243_v18  ;;  %v8693_v53 = vld [vmem:[%s11461_s8 + $0xbf0] sm:$0xf0]  ;;  %v2266_v0 = vadd.f32 %v2249_v56, %v242_v50  ;;  %v9208_v6 = vor.u32 %v11037_v59, %v9205_v60 }
 0x1ea   : > { %v10865_v21 = vld [vmem:[%s11461_s8 + $0xa6c] sm:$0xf0]  ;;  %v8696_v1 = vor.u32 %v10909_v49, %v8693_v53  ;;  %v11029_v10 = vld [vmem:[%s11461_s8 + $0xf94] sm:$0xf] }
 0x1eb   : > { %4180 = vmatpush.bf16.msra.mxu2 %v8820_v62  ;;  %v8755_v22 = vld [vmem:[%s11461_s8 + $0xc50] sm:$0xf]  ;;  %4153 = vmatpush.bf16.msra.mxu0 %v8276_v13  ;;  %v8500_v33 = vor.u32 %v10865_v21, %v8499_v9  ;;  %v8440_v62 = vor.u32 %v10845_v46, %v8437_v48  ;;  %2282 = vst [vmem:[#allocation2 + $0x28] sm:$0xff] %v2266_v0  ;;  %v9173_v11 = vld [vmem:[%s11461_s8 + $0xfb0] sm:$0xf0] }
 0x1ec   : > { %v10929_v23 = vld [vmem:[%s11461_s8 + $0xc6c] sm:$0xf0]  ;;  %v8664_v13 = vor.u32 %v10901_v4, %v8661_v5  ;;  %v10893_v18 = vld [vmem:[%s11461_s8 + $0xb54] sm:$0xf]  ;;  %v9176_v19 = vor.u32 %v11029_v10, %v9173_v11 }
 0x1ed   : > { %4194 = vmatpush.bf16.msra.mxu3 %v9076_v2  ;;  %v9011_v26 = vld [vmem:[%s11461_s8 + $0xe50] sm:$0xf]  ;;  %4167 = vmatpush.bf16.msra.mxu1 %v8532_v15  ;;  %v8756_v35 = vor.u32 %v10929_v23, %v8755_v22  ;;  %v8405_v2 = vld [vmem:[%s11461_s8 + $0x9b0] sm:$0xf0] }
 0x1ee   : > { %v10993_v34 = vld [vmem:[%s11461_s8 + $0xe6c] sm:$0xf0]  ;;  %v8408_v12 = vor.u32 %v10837_v63, %v8405_v2  ;;  %v10829_v15 = vld [vmem:[%s11461_s8 + $0x954] sm:$0xf] }
 0x1ef   : > { %v8211_v28 = vld [vmem:[%s11461_s8 + $0x810] sm:$0xf]  ;;  %4181 = vmatpush.bf16.msra.mxu2 %v8788_v17  ;;  %v9012_v43 = vor.u32 %v10993_v34, %v9011_v26  ;;  %4154 = vmatpush.bf16.msra.mxu0 %v8244_v29  ;;  %v8373_v17 = vld [vmem:[%s11461_s8 + $0x970] sm:$0xf0] }
 0x1f0   : > { %v10793_v30 = vld [vmem:[%s11461_s8 + $0x82c] sm:$0xf0]  ;;  %v8629_v9 = vld [vmem:[%s11461_s8 + $0xb70] sm:$0xf0]  ;;  %v8376_v22 = vor.u32 %v10829_v15, %v8373_v17 }
 0x1f1   : > { %v8467_v31 = vld [vmem:[%s11461_s8 + $0xa10] sm:$0xf]  ;;  %4195 = vmatpush.bf16.msra.mxu3 %v9044_v27  ;;  %v8212_v52 = vor.u32 %v10793_v30, %v8211_v28  ;;  %4168 = vmatpush.bf16.msra.mxu1 %v8500_v33  ;;  %v11021_v27 = vld [vmem:[%s11461_s8 + $0xf54] sm:$0xf]  ;;  %v8632_v23 = vor.u32 %v10893_v18, %v8629_v9 }
 0x1f2   : > { %v10857_v37 = vld [vmem:[%s11461_s8 + $0xa2c] sm:$0xf0]  ;;  %v9141_v21 = vld [vmem:[%s11461_s8 + $0xf70] sm:$0xf0] }
 0x1f3   : > { %v8723_v39 = vld [vmem:[%s11461_s8 + $0xc10] sm:$0xf]  ;;  %4182 = vmatpush.bf16.msra.mxu2 %v8756_v35  ;;  %v8468_v57 = vor.u32 %v10857_v37, %v8467_v31  ;;  %4155 = vmatpush.bf16.msra.mxu0 %v8212_v52  ;;  %v8341_v26 = vld [vmem:[%s11461_s8 + $0x930] sm:$0xf0]  ;;  %v9144_v28 = vor.u32 %v11021_v27, %v9141_v21 }
 0x1f4   : > { %v10921_v40 = vld [vmem:[%s11461_s8 + $0xc2c] sm:$0xf0]  ;;  %v10885_v34 = vld [vmem:[%s11461_s8 + $0xb14] sm:$0xf]  ;;  %v8344_v37 = vor.u32 %v10821_v25, %v8341_v26 }
 0x1f5   : > { %v8979_v44 = vld [vmem:[%s11461_s8 + $0xe10] sm:$0xf]  ;;  %v8724_v58 = vor.u32 %v10921_v40, %v8723_v39  ;;  %4196 = vmatpush.bf16.msra.mxu3 %v9012_v43  ;;  %4169 = vmatpush.bf16.msra.mxu1 %v8468_v57  ;;  %v8597_v29 = vld [vmem:[%s11461_s8 + $0xb30] sm:$0xf0]  ;;  %v3933_v39 = vpop.f32.mrf.mxu0  ;;  %v3947_v43 = vpop.f32.mrf.mxu1 }
 0x1f6   : > { %v10985_v45 = vld [vmem:[%s11461_s8 + $0xe2c] sm:$0xf0]  ;;  %4156 = vmatmul.bf16.vlgmr.msra.gmra.mxu0 %v12246_v38  ;;  %v10949_v30 = vld [vmem:[%s11461_s8 + $0xd14] sm:$0xf]  ;;  %v8600_v40 = vor.u32 %v10885_v34, %v8597_v29  ;;  %v3948_v48 = vadd.f32 %v3947_v43, %v3933_v39  ;;  %v3961_v57 = vpop.f32.mrf.mxu2  ;;  %v10850_v43 = vld [vmem:[%s11461_s8 + $0x9f4] sm:$0xf0] }
 0x1f7   : > { %v8980_v61 = vor.u32 %v10985_v45, %v8979_v44  ;;  %4183 = vmatpush.bf16.msra.mxu2 %v8724_v58  ;;  %4204 = vmatpush.bf16.msrb.mxu0 %v8440_v62  ;;  %v8853_v31 = vld [vmem:[%s11461_s8 + $0xd30] sm:$0xf0]  ;;  %v3975_v63 = vpop.f32.mrf.mxu3 }
 0x1f8   : > { %4170 = vmatmul.bf16.vlgmr.msra.gmra.mxu1 %v12249_v41  ;;  %v11013_v33 = vld [vmem:[%s11461_s8 + $0xf14] sm:$0xf]  ;;  %v8856_v42 = vor.u32 %v10949_v30, %v8853_v31  ;;  %v3962_v62 = vadd.f32 %v3961_v57, %v3948_v48  ;;  %v8955_v48 = vld [vmem:[%s11461_s8 + $0xdd8] sm:$0xf] }
 0x1f9   : > { %4197 = vmatpush.bf16.msra.mxu3 %v8980_v61  ;;  %4218 = vmatpush.bf16.msrb.mxu1 %v8696_v1  ;;  %v9109_v35 = vld [vmem:[%s11461_s8 + $0xf30] sm:$0xf0] }
 0x1fa   : > { %4184 = vmatmul.bf16.vlgmr.msra.gmra.mxu2 %v12238_v32  ;;  %v10813_v44 = vld [vmem:[%s11461_s8 + $0x8d4] sm:$0xf]  ;;  %v9112_v47 = vor.u32 %v11013_v33, %v9109_v35 }
 0x1fb   : > { %4232 = vmatpush.bf16.msrb.mxu2 %v8952_v3  ;;  %4205 = vmatpush.bf16.msrb.mxu0 %v8408_v12  ;;  %v8309_v45 = vld [vmem:[%s11461_s8 + $0x8f0] sm:$0xf0] }
 0x1fc   : > { %4198 = vmatmul.bf16.vlgmr.msra.gmra.mxu3 %v12243_v36  ;;  %v10877_v46 = vld [vmem:[%s11461_s8 + $0xad4] sm:$0xf]  ;;  %v8312_v54 = vor.u32 %v10813_v44, %v8309_v45  ;;  %v8699_v44 = vld [vmem:[%s11461_s8 + $0xbd8] sm:$0xf] }
 0x1fd   : > { %4246 = vmatpush.bf16.msrb.mxu3 %v9208_v6  ;;  %4219 = vmatpush.bf16.msrb.mxu1 %v8664_v13  ;;  %v8565_v49 = vld [vmem:[%s11461_s8 + $0xaf0] sm:$0xf0]  ;;  %v3976_v6 = vadd.f32 %v3975_v63, %v3962_v62  ;;  %v3935_v8 = vpop.f32.mrf.mxu0  ;;  %v3949_v12 = vpop.f32.mrf.mxu1  ;;  %v8667_v62 = vld [vmem:[%s11461_s8 + $0xb98] sm:$0xf] }
 0x1fe   : > { %v10941_v50 = vld [vmem:[%s11461_s8 + $0xcd4] sm:$0xf]  ;;  %v8568_v55 = vor.u32 %v10877_v46, %v8565_v49  ;;  %v3963_v34 = vpop.f32.mrf.mxu2  ;;  %v10978_v49 = vld [vmem:[%s11461_s8 + $0xdf4] sm:$0xf0] }
 0x1ff   : > { %4233 = vmatpush.bf16.msrb.mxu2 %v8920_v14  ;;  %4206 = vmatpush.bf16.msrb.mxu0 %v8376_v22  ;;  %v8821_v51 = vld [vmem:[%s11461_s8 + $0xcf0] sm:$0xf0]  ;;  %v3977_v35 = vpop.f32.mrf.mxu3  ;;  %v10906_v63 = vld [vmem:[%s11461_s8 + $0xbb4] sm:$0xf0] }
 0x200   : > { %v11005_v52 = vld [vmem:[%s11461_s8 + $0xed4] sm:$0xf]  ;;  %v8824_v56 = vor.u32 %v10941_v50, %v8821_v51  ;;  %v2297_v50 = vld [vmem:[#allocation2 + $0x40] sm:$0xff] }
 0x201   : > { %4247 = vmatpush.bf16.msrb.mxu3 %v9176_v19  ;;  %4220 = vmatpush.bf16.msrb.mxu1 %v8632_v23  ;;  %v9077_v53 = vld [vmem:[%s11461_s8 + $0xef0] sm:$0xf0]  ;;  %v3950_v19 = vadd.f32 %v3949_v12, %v3935_v8  ;;  %v8379_v8 = vld [vmem:[%s11461_s8 + $0x958] sm:$0xf] }
 0x202   : > { %v10805_v58 = vld [vmem:[%s11461_s8 + $0x894] sm:$0xf]  ;;  %v9080_v61 = vor.u32 %v11005_v52, %v9077_v53  ;;  %v9211_v53 = vld [vmem:[%s11461_s8 + $0xfd8] sm:$0xf] }
 0x203   : > { %4234 = vmatpush.bf16.msrb.mxu2 %v8888_v24  ;;  %4207 = vmatpush.bf16.msrb.mxu0 %v8344_v37  ;;  %v8277_v59 = vld [vmem:[%s11461_s8 + $0x8b0] sm:$0xf0]  ;;  %v3964_v33 = vadd.f32 %v3963_v34, %v3950_v19  ;;  %v11018_v34 = vld [vmem:[%s11461_s8 + $0xf34] sm:$0xf0] }
 0x204   : > { %v10869_v60 = vld [vmem:[%s11461_s8 + $0xa94] sm:$0xf]  ;;  %v8280_v7 = vor.u32 %v10805_v58, %v8277_v59  ;;  %v8411_v58 = vld [vmem:[%s11461_s8 + $0x998] sm:$0xf] }
 0x205   : > { %4248 = vmatpush.bf16.msrb.mxu3 %v9144_v28  ;;  %4221 = vmatpush.bf16.msrb.mxu1 %v8600_v40  ;;  %v8533_v0 = vld [vmem:[%s11461_s8 + $0xab0] sm:$0xf0]  ;;  %v3978_v45 = vadd.f32 %v3977_v35, %v3964_v33  ;;  %v8315_v35 = vld [vmem:[%s11461_s8 + $0x8d8] sm:$0xf] }
 0x206   : > { %v10933_v1 = vld [vmem:[%s11461_s8 + $0xc94] sm:$0xf]  ;;  %v8536_v10 = vor.u32 %v10869_v60, %v8533_v0  ;;  %v8956_v60 = vor.u32 %v10978_v49, %v8955_v48 }
 0x207   : > { %4235 = vmatpush.bf16.msrb.mxu2 %v8856_v42  ;;  %v8789_v3 = vld [vmem:[%s11461_s8 + $0xcb0] sm:$0xf0]  ;;  %4208 = vmatpush.bf16.msrb.mxu0 %v8312_v54  ;;  %v8443_v42 = vld [vmem:[%s11461_s8 + $0x9d8] sm:$0xf] }
 0x208   : > { %v10997_v2 = vld [vmem:[%s11461_s8 + $0xe94] sm:$0xf]  ;;  %v8792_v11 = vor.u32 %v10933_v1, %v8789_v3  ;;  %v11042_v54 = vld [vmem:[%s11461_s8 + $0xff4] sm:$0xf0]  ;;  %v8444_v57 = vor.u32 %v10850_v43, %v8443_v42 }
 0x209   : > { %4249 = vmatpush.bf16.msrb.mxu3 %v9112_v47  ;;  %v9045_v4 = vld [vmem:[%s11461_s8 + $0xeb0] sm:$0xf0]  ;;  %4222 = vmatpush.bf16.msrb.mxu1 %v8568_v55  ;;  %v10914_v47 = vld [vmem:[%s11461_s8 + $0xbf4] sm:$0xf0]  ;;  %v4380_v55 = vadd.f32 %v3978_v45, %v2297_v50  ;;  %v9212_v0 = vor.u32 %v11042_v54, %v9211_v53 }
 0x20a   : > { %v2289_v5 = vld [vmem:[#allocation2 + $0x30] sm:$0xff]  ;;  %v9048_v18 = vor.u32 %v10997_v2, %v9045_v4  ;;  %v8700_v59 = vor.u32 %v10914_v47, %v8699_v44  ;;  %v8923_v1 = vld [vmem:[%s11461_s8 + $0xd98] sm:$0xf] }
 0x20b   : > { %4236 = vmatpush.bf16.msrb.mxu2 %v8824_v56  ;;  %v10797_v13 = vld [vmem:[%s11461_s8 + $0x854] sm:$0xf]  ;;  %v4372_v17 = vadd.f32 %v3976_v6, %v2289_v5  ;;  %4209 = vmatpush.bf16.msrb.mxu0 %v8280_v7  ;;  %4396 = vst [vmem:[#allocation2 + $0x40] sm:$0xff] %v4380_v55  ;;  %v10970_v3 = vld [vmem:[%s11461_s8 + $0xdb4] sm:$0xf0]  ;;  %v8668_v6 = vor.u32 %v10906_v63, %v8667_v62  ;;  %v2290_v63 = vld [vmem:[#allocation2] sm:$0xff] }
 0x20c   : > { %v8245_v14 = vld [vmem:[%s11461_s8 + $0x870] sm:$0xf0]  ;;  %v9179_v2 = vld [vmem:[%s11461_s8 + $0xf98] sm:$0xf]  ;;  %v8924_v7 = vor.u32 %v10970_v3, %v8923_v1 }
 0x20d   : > { %v10861_v15 = vld [vmem:[%s11461_s8 + $0xa54] sm:$0xf]  ;;  %4250 = vmatpush.bf16.msrb.mxu3 %v9080_v61  ;;  %4388 = vst [vmem:[#allocation2 + $0x30] sm:$0xff] %v4372_v17  ;;  %v8248_v22 = vor.u32 %v10797_v13, %v8245_v14  ;;  %4223 = vmatpush.bf16.msrb.mxu1 %v8536_v10  ;;  %v10842_v61 = vld [vmem:[%s11461_s8 + $0x9b4] sm:$0xf0] }
 0x20e   : > { %v8501_v9 = vld [vmem:[%s11461_s8 + $0xa70] sm:$0xf0]  ;;  %v11034_v4 = vld [vmem:[%s11461_s8 + $0xfb4] sm:$0xf0]  ;;  %v8412_v5 = vor.u32 %v10842_v61, %v8411_v58 }
 0x20f   : > { %v8757_v20 = vld [vmem:[%s11461_s8 + $0xc70] sm:$0xf0]  ;;  %4237 = vmatpush.bf16.msrb.mxu2 %v8792_v11  ;;  %v8504_v25 = vor.u32 %v10861_v15, %v8501_v9  ;;  %4210 = vmatpush.bf16.msrb.mxu0 %v8248_v22  ;;  %v10834_v10 = vld [vmem:[%s11461_s8 + $0x974] sm:$0xf0]  ;;  %v9180_v12 = vor.u32 %v11034_v4, %v9179_v2 }
 0x210   : > { %v10989_v27 = vld [vmem:[%s11461_s8 + $0xe54] sm:$0xf]  ;;  %v8760_v26 = vor.u32 %v10925_v16, %v8757_v20  ;;  %v8635_v11 = vld [vmem:[%s11461_s8 + $0xb58] sm:$0xf]  ;;  %v8380_v19 = vor.u32 %v10834_v10, %v8379_v8 }
 0x211   : > { %v9013_v21 = vld [vmem:[%s11461_s8 + $0xe70] sm:$0xf0]  ;;  %4251 = vmatpush.bf16.msrb.mxu3 %v9048_v18  ;;  %4224 = vmatpush.bf16.msrb.mxu1 %v8504_v25  ;;  %v10898_v13 = vld [vmem:[%s11461_s8 + $0xb74] sm:$0xf0] }
 0x212   : > { %v10789_v23 = vld [vmem:[%s11461_s8 + $0x814] sm:$0xf]  ;;  %v9016_v31 = vor.u32 %v10989_v27, %v9013_v21  ;;  %v8891_v14 = vld [vmem:[%s11461_s8 + $0xd58] sm:$0xf]  ;;  %v8636_v9 = vor.u32 %v10898_v13, %v8635_v11  ;;  %v4003_v33 = vpop.f32.mrf.mxu1 }
 0x213   : > { %v8213_v24 = vld [vmem:[%s11461_s8 + $0x830] sm:$0xf0]  ;;  %4238 = vmatpush.bf16.msrb.mxu2 %v8760_v26  ;;  %v10962_v15 = vld [vmem:[%s11461_s8 + $0xd74] sm:$0xf0] }
 0x214   : > { %v10853_v28 = vld [vmem:[%s11461_s8 + $0xa14] sm:$0xf]  ;;  %v8216_v46 = vor.u32 %v10789_v23, %v8213_v24  ;;  %v9147_v17 = vld [vmem:[%s11461_s8 + $0xf58] sm:$0xf]  ;;  %v8892_v16 = vor.u32 %v10962_v15, %v8891_v14 }
 0x215   : > { %v8469_v29 = vld [vmem:[%s11461_s8 + $0xa30] sm:$0xf0]  ;;  %4252 = vmatpush.bf16.msrb.mxu3 %v9016_v31  ;;  %v11026_v18 = vld [vmem:[%s11461_s8 + $0xf74] sm:$0xf0] }
 0x216   : > { %v10917_v30 = vld [vmem:[%s11461_s8 + $0xc14] sm:$0xf]  ;;  %v8472_v51 = vor.u32 %v10853_v28, %v8469_v29  ;;  %4211 = vmatpush.bf16.msrb.mxu0 %v8216_v46  ;;  %v8347_v20 = vld [vmem:[%s11461_s8 + $0x918] sm:$0xf]  ;;  %v9148_v22 = vor.u32 %v11026_v18, %v9147_v17  ;;  %v3989_v29 = vpop.f32.mrf.mxu0 }
 0x217   : > { %v8725_v37 = vld [vmem:[%s11461_s8 + $0xc30] sm:$0xf0]  ;;  %v10826_v27 = vld [vmem:[%s11461_s8 + $0x934] sm:$0xf0]  ;;  %v4004_v42 = vadd.f32 %v4003_v33, %v3989_v29  ;;  %v8445_v33 = vld [vmem:[%s11461_s8 + $0x9f8] sm:$0xf0] }
 0x218   : > { %v10981_v39 = vld [vmem:[%s11461_s8 + $0xe14] sm:$0xf]  ;;  %v8728_v52 = vor.u32 %v10917_v30, %v8725_v37  ;;  %4225 = vmatpush.bf16.msrb.mxu1 %v8472_v51  ;;  %v8603_v21 = vld [vmem:[%s11461_s8 + $0xb18] sm:$0xf]  ;;  %v8348_v28 = vor.u32 %v10826_v27, %v8347_v20 }
 0x219   : > { %v8981_v40 = vld [vmem:[%s11461_s8 + $0xe30] sm:$0xf0]  ;;  %4212 = vmatmul.bf16.vlgmr.msrb.gmra.mxu0 %v12246_v38  ;;  %v10890_v23 = vld [vmem:[%s11461_s8 + $0xb34] sm:$0xf0] }
 0x21a   : > { %v8984_v56 = vor.u32 %v10981_v39, %v8981_v40  ;;  %4239 = vmatpush.bf16.msrb.mxu2 %v8728_v52  ;;  %4260 = vmatpush.bf16.msra.mxu0 %v8444_v57  ;;  %v8859_v24 = vld [vmem:[%s11461_s8 + $0xd18] sm:$0xf]  ;;  %v8604_v30 = vor.u32 %v10890_v23, %v8603_v21  ;;  %v4017_v51 = vpop.f32.mrf.mxu2 }
 0x21b   : > { %4226 = vmatmul.bf16.vlgmr.msrb.gmra.mxu1 %v12249_v41  ;;  %v10954_v25 = vld [vmem:[%s11461_s8 + $0xd34] sm:$0xf0] }
 0x21c   : > { %4253 = vmatpush.bf16.msrb.mxu3 %v8984_v56  ;;  %4274 = vmatpush.bf16.msra.mxu1 %v8700_v59  ;;  %v9115_v26 = vld [vmem:[%s11461_s8 + $0xf18] sm:$0xf]  ;;  %v8860_v31 = vor.u32 %v10954_v25, %v8859_v24  ;;  %v4018_v56 = vadd.f32 %v4017_v51, %v4004_v42  ;;  %v4031_v57 = vpop.f32.mrf.mxu3  ;;  %v10974_v42 = vld [vmem:[%s11461_s8 + $0xddc] sm:$0xf] }
 0x21d   : > { %4240 = vmatmul.bf16.vlgmr.msrb.gmra.mxu2 %v12238_v32  ;;  %v10818_v37 = vld [vmem:[%s11461_s8 + $0x8f4] sm:$0xf0]  ;;  %v9116_v40 = vor.u32 %v11018_v34, %v9115_v26 }
 0x21e   : > { %4288 = vmatpush.bf16.msra.mxu2 %v8956_v60  ;;  %4261 = vmatpush.bf16.msra.mxu0 %v8412_v5  ;;  %v8571_v39 = vld [vmem:[%s11461_s8 + $0xad8] sm:$0xf]  ;;  %v8316_v48 = vor.u32 %v10818_v37, %v8315_v35  ;;  %v3991_v3 = vpop.f32.mrf.mxu0  ;;  %v4005_v5 = vpop.f32.mrf.mxu1  ;;  %v10910_v35 = vld [vmem:[%s11461_s8 + $0xbdc] sm:$0xf] }
 0x21f   : > { %4254 = vmatmul.bf16.vlgmr.msrb.gmra.mxu3 %v12243_v36  ;;  %v10882_v43 = vld [vmem:[%s11461_s8 + $0xaf4] sm:$0xf0] }
 0x220   : > { %4302 = vmatpush.bf16.msra.mxu3 %v9212_v0  ;;  %4275 = vmatpush.bf16.msra.mxu1 %v8668_v6  ;;  %v8827_v44 = vld [vmem:[%s11461_s8 + $0xcd8] sm:$0xf]  ;;  %v8572_v49 = vor.u32 %v10882_v43, %v8571_v39  ;;  %v4032_v0 = vadd.f32 %v4031_v57, %v4018_v56  ;;  %v8957_v43 = vld [vmem:[%s11461_s8 + $0xdf8] sm:$0xf0] }
 0x221   : > { %v10946_v45 = vld [vmem:[%s11461_s8 + $0xcf4] sm:$0xf0]  ;;  %v10902_v56 = vld [vmem:[%s11461_s8 + $0xb9c] sm:$0xf] }
 0x222   : > { %4289 = vmatpush.bf16.msra.mxu2 %v8924_v7  ;;  %4262 = vmatpush.bf16.msra.mxu0 %v8380_v19  ;;  %v9083_v46 = vld [vmem:[%s11461_s8 + $0xed8] sm:$0xf]  ;;  %v8828_v50 = vor.u32 %v10946_v45, %v8827_v44  ;;  %v4373_v10 = vadd.f32 %v4032_v0, %v2290_v63  ;;  %v4019_v21 = vpop.f32.mrf.mxu2  ;;  %v2298_v44 = vld [vmem:[#allocation2 + $0x20] sm:$0xff]  ;;  %v8669_v57 = vld [vmem:[%s11461_s8 + $0xbb8] sm:$0xf0] }
 0x223   : > { %v11010_v47 = vld [vmem:[%s11461_s8 + $0xef4] sm:$0xf0]  ;;  %v8672_v0 = vor.u32 %v10902_v56, %v8669_v57  ;;  %v9053_v56 = vld [vmem:[%s11461_s8 + $0xeb8] sm:$0xf0] }
 0x224   : > { %4303 = vmatpush.bf16.msra.mxu3 %v9180_v12  ;;  %4276 = vmatpush.bf16.msra.mxu1 %v8636_v9  ;;  %v8283_v52 = vld [vmem:[%s11461_s8 + $0x898] sm:$0xf]  ;;  %v9084_v55 = vor.u32 %v11010_v47, %v9083_v46  ;;  %v4006_v12 = vadd.f32 %v4005_v5, %v3991_v3  ;;  %4389 = vst [vmem:[#allocation2] sm:$0xff] %v4373_v10  ;;  %v4033_v34 = vpop.f32.mrf.mxu3  ;;  %v11038_v47 = vld [vmem:[%s11461_s8 + $0xfdc] sm:$0xf] }
 0x225   : > { %v10810_v53 = vld [vmem:[%s11461_s8 + $0x8b4] sm:$0xf0]  ;;  %v10830_v3 = vld [vmem:[%s11461_s8 + $0x95c] sm:$0xf] }
 0x226   : > { %4290 = vmatpush.bf16.msra.mxu2 %v8892_v16  ;;  %4263 = vmatpush.bf16.msra.mxu0 %v8348_v28  ;;  %v8539_v54 = vld [vmem:[%s11461_s8 + $0xa98] sm:$0xf]  ;;  %v8284_v1 = vor.u32 %v10810_v53, %v8283_v52  ;;  %v4020_v26 = vadd.f32 %v4019_v21, %v4006_v12  ;;  %v10838_v52 = vld [vmem:[%s11461_s8 + $0x99c] sm:$0xf] }
 0x227   : > { %v10874_v58 = vld [vmem:[%s11461_s8 + $0xab4] sm:$0xf0]  ;;  %v11022_v10 = vld [vmem:[%s11461_s8 + $0xf5c] sm:$0xf] }
 0x228   : > { %4304 = vmatpush.bf16.msra.mxu3 %v9148_v22  ;;  %4277 = vmatpush.bf16.msra.mxu1 %v8604_v30  ;;  %v8795_v59 = vld [vmem:[%s11461_s8 + $0xc98] sm:$0xf]  ;;  %v8540_v2 = vor.u32 %v10874_v58, %v8539_v54  ;;  %v4034_v37 = vadd.f32 %v4033_v34, %v4020_v26  ;;  %v8960_v54 = vor.u32 %v10974_v42, %v8957_v43  ;;  %v9117_v21 = vld [vmem:[%s11461_s8 + $0xf38] sm:$0xf0] }
 0x229   : > { %v10938_v60 = vld [vmem:[%s11461_s8 + $0xcb4] sm:$0xf0]  ;;  %v10814_v34 = vld [vmem:[%s11461_s8 + $0x8dc] sm:$0xf] }
 0x22a   : > { %4291 = vmatpush.bf16.msra.mxu2 %v8860_v31  ;;  %v9051_v61 = vld [vmem:[%s11461_s8 + $0xe98] sm:$0xf]  ;;  %4264 = vmatpush.bf16.msra.mxu0 %v8316_v48  ;;  %v8796_v4 = vor.u32 %v10938_v60, %v8795_v59  ;;  %v10846_v31 = vld [vmem:[%s11461_s8 + $0x9dc] sm:$0xf] }
 0x22b   : > { %v11002_v62 = vld [vmem:[%s11461_s8 + $0xeb4] sm:$0xf0]  ;;  %v9213_v48 = vld [vmem:[%s11461_s8 + $0xff8] sm:$0xf0]  ;;  %v8448_v51 = vor.u32 %v10846_v31, %v8445_v33 }
 0x22c   : > { %4305 = vmatpush.bf16.msra.mxu3 %v9116_v40  ;;  %4278 = vmatpush.bf16.msra.mxu1 %v8572_v49  ;;  %v8251_v6 = vld [vmem:[%s11461_s8 + $0x858] sm:$0xf]  ;;  %v9052_v11 = vor.u32 %v11002_v62, %v9051_v61  ;;  %v8701_v40 = vld [vmem:[%s11461_s8 + $0xbf8] sm:$0xf0]  ;;  %v4381_v49 = vadd.f32 %v4034_v37, %v2298_v44  ;;  %v9216_v58 = vor.u32 %v11038_v47, %v9213_v48 }
 0x22d   : > { %v10802_v7 = vld [vmem:[%s11461_s8 + $0x874] sm:$0xf0]  ;;  %v8704_v53 = vor.u32 %v10910_v35, %v8701_v40  ;;  %v10966_v59 = vld [vmem:[%s11461_s8 + $0xd9c] sm:$0xf] }
 0x22e   : > { %4292 = vmatpush.bf16.msra.mxu2 %v8828_v50  ;;  %v8507_v8 = vld [vmem:[%s11461_s8 + $0xa58] sm:$0xf]  ;;  %4265 = vmatpush.bf16.msra.mxu0 %v8284_v1  ;;  %v8252_v19 = vor.u32 %v10802_v7, %v8251_v6  ;;  %4397 = vst [vmem:[#allocation2 + $0x20] sm:$0xff] %v4381_v49  ;;  %v8925_v60 = vld [vmem:[%s11461_s8 + $0xdb8] sm:$0xf0] }
 0x22f   : > { %v10866_v13 = vld [vmem:[%s11461_s8 + $0xa74] sm:$0xf0]  ;;  %v11030_v61 = vld [vmem:[%s11461_s8 + $0xf9c] sm:$0xf]  ;;  %v8928_v1 = vor.u32 %v10966_v59, %v8925_v60 }
 0x230   : > { %4306 = vmatpush.bf16.msra.mxu3 %v9084_v55  ;;  %v8763_v14 = vld [vmem:[%s11461_s8 + $0xc58] sm:$0xf]  ;;  %4279 = vmatpush.bf16.msra.mxu1 %v8540_v2  ;;  %v8508_v20 = vor.u32 %v10866_v13, %v8507_v8  ;;  %v8413_v55 = vld [vmem:[%s11461_s8 + $0x9b8] sm:$0xf0] }
 0x231   : > { %v10930_v15 = vld [vmem:[%s11461_s8 + $0xc74] sm:$0xf0]  ;;  %v9181_v62 = vld [vmem:[%s11461_s8 + $0xfb8] sm:$0xf0]  ;;  %v8416_v63 = vor.u32 %v10838_v52, %v8413_v55 }
 0x232   : > { %v9019_v17 = vld [vmem:[%s11461_s8 + $0xe58] sm:$0xf]  ;;  %4293 = vmatpush.bf16.msra.mxu2 %v8796_v4  ;;  %v8764_v27 = vor.u32 %v10930_v15, %v8763_v14  ;;  %4266 = vmatpush.bf16.msra.mxu0 %v8252_v19  ;;  %v8381_v2 = vld [vmem:[%s11461_s8 + $0x978] sm:$0xf0]  ;;  %v9184_v5 = vor.u32 %v11030_v61, %v9181_v62  ;;  %v4059_v26 = vpop.f32.mrf.mxu1 }
 0x233   : > { %v10994_v18 = vld [vmem:[%s11461_s8 + $0xe74] sm:$0xf0]  ;;  %v10894_v4 = vld [vmem:[%s11461_s8 + $0xb5c] sm:$0xf]  ;;  %v8384_v12 = vor.u32 %v10830_v3, %v8381_v2 }
 0x234   : > { %v8219_v9 = vld [vmem:[%s11461_s8 + $0x818] sm:$0xf]  ;;  %4307 = vmatpush.bf16.msra.mxu3 %v9052_v11  ;;  %v9020_v25 = vor.u32 %v10994_v18, %v9019_v17  ;;  %4280 = vmatpush.bf16.msra.mxu1 %v8508_v20  ;;  %v8637_v6 = vld [vmem:[%s11461_s8 + $0xb78] sm:$0xf0] }
 0x235   : > { %v10794_v16 = vld [vmem:[%s11461_s8 + $0x834] sm:$0xf0]  ;;  %v10958_v7 = vld [vmem:[%s11461_s8 + $0xd5c] sm:$0xf]  ;;  %v8640_v13 = vor.u32 %v10894_v4, %v8637_v6 }
 0x236   : > { %v8475_v22 = vld [vmem:[%s11461_s8 + $0xa18] sm:$0xf]  ;;  %v8220_v39 = vor.u32 %v10794_v16, %v8219_v9  ;;  %4294 = vmatpush.bf16.msra.mxu2 %v8764_v27  ;;  %v8893_v8 = vld [vmem:[%s11461_s8 + $0xd78] sm:$0xf0] }
 0x237   : > { %v10858_v23 = vld [vmem:[%s11461_s8 + $0xa34] sm:$0xf0]  ;;  %v9149_v11 = vld [vmem:[%s11461_s8 + $0xf78] sm:$0xf0]  ;;  %v8896_v14 = vor.u32 %v10958_v7, %v8893_v8 }
 0x238   : > { %v8731_v24 = vld [vmem:[%s11461_s8 + $0xc18] sm:$0xf]  ;;  %v8476_v45 = vor.u32 %v10858_v23, %v8475_v22  ;;  %4308 = vmatpush.bf16.msra.mxu3 %v9020_v25  ;;  %4267 = vmatpush.bf16.msra.mxu0 %v8220_v39  ;;  %v10822_v15 = vld [vmem:[%s11461_s8 + $0x91c] sm:$0xf]  ;;  %v9152_v19 = vor.u32 %v11022_v10, %v9149_v11  ;;  %v4045_v23 = vpop.f32.mrf.mxu0 }
 0x239   : > { %v10922_v28 = vld [vmem:[%s11461_s8 + $0xc34] sm:$0xf0]  ;;  %v8349_v17 = vld [vmem:[%s11461_s8 + $0x938] sm:$0xf0]  ;;  %v4060_v31 = vadd.f32 %v4059_v26, %v4045_v23  ;;  %v11107_v26 = vld [vmem:[%s11461_s8 + $0x11dc] sm:$0xf0] }
 0x23a   : > { %v8987_v29 = vld [vmem:[%s11461_s8 + $0xe18] sm:$0xf]  ;;  %v8732_v46 = vor.u32 %v10922_v28, %v8731_v24  ;;  %4281 = vmatpush.bf16.msra.mxu1 %v8476_v45  ;;  %v10886_v18 = vld [vmem:[%s11461_s8 + $0xb1c] sm:$0xf]  ;;  %v8352_v22 = vor.u32 %v10822_v15, %v8349_v17  ;;  %v4073_v45 = vpop.f32.mrf.mxu2 }
 0x23b   : > { %v10986_v30 = vld [vmem:[%s11461_s8 + $0xe34] sm:$0xf0]  ;;  %4268 = vmatmul.bf16.vlgmr.msra.gmra.mxu0 %v12246_v38  ;;  %v8605_v9 = vld [vmem:[%s11461_s8 + $0xb38] sm:$0xf0] }
 0x23c   : > { %v8988_v50 = vor.u32 %v10986_v30, %v8987_v29  ;;  %4295 = vmatpush.bf16.msra.mxu2 %v8732_v46  ;;  %4316 = vmatpush.bf16.msrb.mxu0 %v8448_v51  ;;  %v10950_v16 = vld [vmem:[%s11461_s8 + $0xd1c] sm:$0xf]  ;;  %v8608_v24 = vor.u32 %v10886_v18, %v8605_v9  ;;  %v4087_v51 = vpop.f32.mrf.mxu3 }
 0x23d   : > { %4282 = vmatmul.bf16.vlgmr.msra.gmra.mxu1 %v12249_v41  ;;  %v8861_v20 = vld [vmem:[%s11461_s8 + $0xd38] sm:$0xf0] }
 0x23e   : > { %4309 = vmatpush.bf16.msra.mxu3 %v8988_v50  ;;  %4330 = vmatpush.bf16.msrb.mxu1 %v8704_v53  ;;  %v11014_v27 = vld [vmem:[%s11461_s8 + $0xf1c] sm:$0xf]  ;;  %v8864_v25 = vor.u32 %v10950_v16, %v8861_v20  ;;  %v4074_v50 = vadd.f32 %v4073_v45, %v4060_v31  ;;  %v10228_v31 = vld [vmem:[%s11461_s8 + $0x15c0] sm:$0xf] }
 0x23f   : > { %4296 = vmatmul.bf16.vlgmr.msra.gmra.mxu2 %v12238_v32  ;;  %v8317_v28 = vld [vmem:[%s11461_s8 + $0x8f8] sm:$0xf0]  ;;  %v9120_v30 = vor.u32 %v11014_v27, %v9117_v21 }
 0x240   : > { %4344 = vmatpush.bf16.msrb.mxu2 %v8960_v54  ;;  %4317 = vmatpush.bf16.msrb.mxu0 %v8416_v63  ;;  %v10878_v29 = vld [vmem:[%s11461_s8 + $0xadc] sm:$0xf]  ;;  %v8320_v42 = vor.u32 %v10814_v34, %v8317_v28  ;;  %v4047_v60 = vpop.f32.mrf.mxu0  ;;  %v4061_v63 = vpop.f32.mrf.mxu1  ;;  %v9972_v34 = vld [vmem:[%s11461_s8 + $0x13c0] sm:$0xf] }
 0x241   : > { %4310 = vmatmul.bf16.vlgmr.msra.gmra.mxu3 %v12243_v36  ;;  %v8573_v33 = vld [vmem:[%s11461_s8 + $0xaf8] sm:$0xf0] }
 0x242   : > { %4358 = vmatpush.bf16.msrb.mxu3 %v9216_v58  ;;  %4331 = vmatpush.bf16.msrb.mxu1 %v8672_v0  ;;  %v10942_v35 = vld [vmem:[%s11461_s8 + $0xcdc] sm:$0xf]  ;;  %v8576_v43 = vor.u32 %v10878_v29, %v8573_v33  ;;  %v4088_v58 = vadd.f32 %v4087_v51, %v4074_v50  ;;  %v4075_v18 = vpop.f32.mrf.mxu2  ;;  %v11235_v33 = vld [vmem:[%s11461_s8 + $0x15dc] sm:$0xf0] }
 0x243   : > { %v8829_v37 = vld [vmem:[%s11461_s8 + $0xcf8] sm:$0xf0]  ;;  %v9940_v50 = vld [vmem:[%s11461_s8 + $0x1380] sm:$0xf] }
 0x244   : > { %4345 = vmatpush.bf16.msrb.mxu2 %v8928_v1  ;;  %4318 = vmatpush.bf16.msrb.mxu0 %v8384_v12  ;;  %v11006_v39 = vld [vmem:[%s11461_s8 + $0xedc] sm:$0xf]  ;;  %v8832_v44 = vor.u32 %v10942_v35, %v8829_v37  ;;  %v4089_v21 = vpop.f32.mrf.mxu3  ;;  %v2299_v35 = vld [vmem:[#allocation2 + $0x10] sm:$0xff]  ;;  %v11163_v51 = vld [vmem:[%s11461_s8 + $0x139c] sm:$0xf0] }
 0x245   : > { %v9085_v40 = vld [vmem:[%s11461_s8 + $0xef8] sm:$0xf0] }
 0x246   : > { %4359 = vmatpush.bf16.msrb.mxu3 %v9184_v5  ;;  %4332 = vmatpush.bf16.msrb.mxu1 %v8640_v13  ;;  %v10806_v46 = vld [vmem:[%s11461_s8 + $0x89c] sm:$0xf]  ;;  %v9088_v49 = vor.u32 %v11006_v39, %v9085_v40  ;;  %v4062_v5 = vadd.f32 %v4061_v63, %v4047_v60  ;;  %v10484_v40 = vld [vmem:[%s11461_s8 + $0x17c0] sm:$0xf] }
 0x247   : > { %v8285_v47 = vld [vmem:[%s11461_s8 + $0x8b8] sm:$0xf0]  ;;  %v9652_v60 = vld [vmem:[%s11461_s8 + $0x1140] sm:$0xf] }
 0x248   : > { %4346 = vmatpush.bf16.msrb.mxu2 %v8896_v14  ;;  %4319 = vmatpush.bf16.msrb.mxu0 %v8352_v22  ;;  %v10870_v48 = vld [vmem:[%s11461_s8 + $0xa9c] sm:$0xf]  ;;  %v8288_v59 = vor.u32 %v10806_v46, %v8285_v47  ;;  %v4076_v27 = vadd.f32 %v4075_v18, %v4062_v5  ;;  %v9684_v46 = vld [vmem:[%s11461_s8 + $0x1180] sm:$0xf] }
 0x249   : > { %v8541_v52 = vld [vmem:[%s11461_s8 + $0xab8] sm:$0xf0] }
 0x24a   : > { %4360 = vmatpush.bf16.msrb.mxu3 %v9152_v19  ;;  %4333 = vmatpush.bf16.msrb.mxu1 %v8608_v24  ;;  %v10934_v53 = vld [vmem:[%s11461_s8 + $0xc9c] sm:$0xf]  ;;  %v8544_v61 = vor.u32 %v10870_v48, %v8541_v52  ;;  %v4090_v28 = vadd.f32 %v4089_v21, %v4076_v27  ;;  %v10229_v48 = vor.u32 %v11235_v33, %v10228_v31 }
 0x24b   : > { %v8797_v54 = vld [vmem:[%s11461_s8 + $0xcb8] sm:$0xf0] }
 0x24c   : > { %4347 = vmatpush.bf16.msrb.mxu2 %v8864_v25  ;;  %v10998_v55 = vld [vmem:[%s11461_s8 + $0xe9c] sm:$0xf]  ;;  %4320 = vmatpush.bf16.msrb.mxu0 %v8320_v42  ;;  %v8800_v62 = vor.u32 %v10934_v53, %v8797_v54  ;;  %v9716_v25 = vld [vmem:[%s11461_s8 + $0x11c0] sm:$0xf] }
 0x24d   : > { %v2291_v57 = vld [vmem:[#allocation2 + $0x58] sm:$0xff]  ;;  %v9056_v4 = vor.u32 %v10998_v55, %v9053_v56  ;;  %v11299_v42 = vld [vmem:[%s11461_s8 + $0x17dc] sm:$0xf0]  ;;  %v9717_v45 = vor.u32 %v11107_v26, %v9716_v25 }
 0x24e   : > { %4361 = vmatpush.bf16.msrb.mxu3 %v9120_v30  ;;  %4334 = vmatpush.bf16.msrb.mxu1 %v8576_v43  ;;  %v10798_v0 = vld [vmem:[%s11461_s8 + $0x85c] sm:$0xf]  ;;  %v4374_v2 = vadd.f32 %v4088_v58, %v2291_v57  ;;  %v11171_v30 = vld [vmem:[%s11461_s8 + $0x13dc] sm:$0xf0]  ;;  %v4382_v43 = vadd.f32 %v4090_v28, %v2299_v35  ;;  %v10485_v52 = vor.u32 %v11299_v42, %v10484_v40 }
 0x24f   : > { %v8253_v1 = vld [vmem:[%s11461_s8 + $0x878] sm:$0xf0]  ;;  %v9973_v47 = vor.u32 %v11171_v30, %v9972_v34  ;;  %v10196_v53 = vld [vmem:[%s11461_s8 + $0x1580] sm:$0xf]  ;;  %v9941_v58 = vor.u32 %v11163_v51, %v9940_v50 }
 0x250   : > { %4348 = vmatpush.bf16.msrb.mxu2 %v8832_v44  ;;  %v10862_v3 = vld [vmem:[%s11461_s8 + $0xa5c] sm:$0xf]  ;;  %4390 = vst [vmem:[#allocation2 + $0x58] sm:$0xff] %v4374_v2  ;;  %4321 = vmatpush.bf16.msrb.mxu0 %v8288_v59  ;;  %v8256_v12 = vor.u32 %v10798_v0, %v8253_v1  ;;  %v11227_v54 = vld [vmem:[%s11461_s8 + $0x159c] sm:$0xf0] }
 0x251   : > { %v8509_v6 = vld [vmem:[%s11461_s8 + $0xa78] sm:$0xf0]  ;;  %4398 = vst [vmem:[#allocation2 + $0x10] sm:$0xff] %v4382_v43  ;;  %v10452_v55 = vld [vmem:[%s11461_s8 + $0x1780] sm:$0xf]  ;;  %v10197_v59 = vor.u32 %v11227_v54, %v10196_v53 }
 0x252   : > { %4362 = vmatpush.bf16.msrb.mxu3 %v9088_v49  ;;  %v10926_v7 = vld [vmem:[%s11461_s8 + $0xc5c] sm:$0xf]  ;;  %4335 = vmatpush.bf16.msrb.mxu1 %v8544_v61  ;;  %v8512_v15 = vor.u32 %v10862_v3, %v8509_v6  ;;  %v11099_v49 = vld [vmem:[%s11461_s8 + $0x119c] sm:$0xf0] }
 0x253   : > { %v8765_v8 = vld [vmem:[%s11461_s8 + $0xc78] sm:$0xf0]  ;;  %v11291_v56 = vld [vmem:[%s11461_s8 + $0x179c] sm:$0xf0]  ;;  %v9685_v57 = vor.u32 %v11099_v49, %v9684_v46 }
 0x254   : > { %v10990_v10 = vld [vmem:[%s11461_s8 + $0xe5c] sm:$0xf]  ;;  %4349 = vmatpush.bf16.msrb.mxu2 %v8800_v62  ;;  %v8768_v17 = vor.u32 %v10926_v7, %v8765_v8  ;;  %4322 = vmatpush.bf16.msrb.mxu0 %v8256_v12  ;;  %v11091_v61 = vld [vmem:[%s11461_s8 + $0x115c] sm:$0xf0]  ;;  %v10453_v63 = vor.u32 %v11291_v56, %v10452_v55 }
 0x255   : > { %v9021_v11 = vld [vmem:[%s11461_s8 + $0xe78] sm:$0xf0]  ;;  %v9908_v62 = vld [vmem:[%s11461_s8 + $0x1340] sm:$0xf] }
 0x256   : > { %v10790_v13 = vld [vmem:[%s11461_s8 + $0x81c] sm:$0xf]  ;;  %4363 = vmatpush.bf16.msrb.mxu3 %v9056_v4  ;;  %v9024_v20 = vor.u32 %v10990_v10, %v9021_v11  ;;  %4336 = vmatpush.bf16.msrb.mxu1 %v8512_v15  ;;  %v11155_v0 = vld [vmem:[%s11461_s8 + $0x135c] sm:$0xf0]  ;;  %v4101_v15 = vpop.f32.mrf.mxu0 }
 0x257   : > { %v8221_v14 = vld [vmem:[%s11461_s8 + $0x838] sm:$0xf0]  ;;  %v10164_v1 = vld [vmem:[%s11461_s8 + $0x1540] sm:$0xf]  ;;  %v9909_v5 = vor.u32 %v11155_v0, %v9908_v62 }
 0x258   : > { %v10854_v19 = vld [vmem:[%s11461_s8 + $0xa1c] sm:$0xf]  ;;  %v8224_v29 = vor.u32 %v10790_v13, %v8221_v14  ;;  %4350 = vmatpush.bf16.msrb.mxu2 %v8768_v17  ;;  %v11219_v3 = vld [vmem:[%s11461_s8 + $0x155c] sm:$0xf0] }
 0x259   : > { %v8477_v9 = vld [vmem:[%s11461_s8 + $0xa38] sm:$0xf0]  ;;  %v10420_v2 = vld [vmem:[%s11461_s8 + $0x1740] sm:$0xf]  ;;  %v10165_v6 = vor.u32 %v11219_v3, %v10164_v1 }
 0x25a   : > { %v10918_v16 = vld [vmem:[%s11461_s8 + $0xc1c] sm:$0xf]  ;;  %v8480_v37 = vor.u32 %v10854_v19, %v8477_v9  ;;  %4364 = vmatpush.bf16.msrb.mxu3 %v9024_v20  ;;  %4323 = vmatpush.bf16.msrb.mxu0 %v8224_v29  ;;  %v11283_v4 = vld [vmem:[%s11461_s8 + $0x175c] sm:$0xf0]  ;;  %v4115_v19 = vpop.f32.mrf.mxu1 }
 0x25b   : > { %v8733_v22 = vld [vmem:[%s11461_s8 + $0xc38] sm:$0xf0]  ;;  %v9620_v7 = vld [vmem:[%s11461_s8 + $0x1100] sm:$0xf]  ;;  %v4116_v21 = vadd.f32 %v4115_v19, %v4101_v15 }
 0x25c   : > { %v10982_v23 = vld [vmem:[%s11461_s8 + $0xe1c] sm:$0xf]  ;;  %v8736_v39 = vor.u32 %v10918_v16, %v8733_v22  ;;  %4337 = vmatpush.bf16.msrb.mxu1 %v8480_v37  ;;  %v11083_v8 = vld [vmem:[%s11461_s8 + $0x111c] sm:$0xf0] }
 0x25d   : > { %v8989_v24 = vld [vmem:[%s11461_s8 + $0xe38] sm:$0xf0]  ;;  %4324 = vmatmul.bf16.vlgmr.msrb.gmra.mxu0 %v12246_v38  ;;  %v10421_v38 = vor.u32 %v11283_v4, %v10420_v2  ;;  %v11147_v10 = vld [vmem:[%s11461_s8 + $0x131c] sm:$0xf0]  ;;  %v4129_v35 = vpop.f32.mrf.mxu2 }
 0x25e   : > { %v8992_v44 = vor.u32 %v10982_v23, %v8989_v24  ;;  %4351 = vmatpush.bf16.msrb.mxu2 %v8736_v39  ;;  %6009 = vmatpush.bf16.msra.mxu0 %v9717_v45  ;;  %v10132_v11 = vld [vmem:[%s11461_s8 + $0x1500] sm:$0xf]  ;;  %v4130_v43 = vadd.f32 %v4129_v35, %v4116_v21  ;;  %v4103_v54 = vpop.f32.mrf.mxu0  ;;  %v2300_v35 = vld [vmem:[#allocation2 + $0x38] sm:$0xff] }
 0x25f   : > { %4338 = vmatmul.bf16.vlgmr.msrb.gmra.mxu1 %v12249_v41  ;;  %v11211_v12 = vld [vmem:[%s11461_s8 + $0x151c] sm:$0xf0]  ;;  %v9621_v41 = vor.u32 %v11083_v8, %v9620_v7  ;;  %v9484_v8 = vld [vmem:[%s11454_s4 + $0x8] sm:$0xe] }
 0x260   : > { %4365 = vmatpush.bf16.msrb.mxu3 %v8992_v44  ;;  %6023 = vmatpush.bf16.msra.mxu1 %v9973_v47  ;;  %v10388_v13 = vld [vmem:[%s11461_s8 + $0x1700] sm:$0xf]  ;;  %v10133_v18 = vor.u32 %v11211_v12, %v10132_v11  ;;  %v4143_v44 = vpop.f32.mrf.mxu3  ;;  %v4409_v47 = vld [vmem:[%s11454_s4 + $0x28] sm:$0x11] }
 0x261   : > { %4352 = vmatmul.bf16.vlgmr.msrb.gmra.mxu2 %v12238_v32  ;;  %v9653_v32 = vor.u32 %v11091_v61, %v9652_v60  ;;  %v11275_v14 = vld [vmem:[%s11461_s8 + $0x171c] sm:$0xf0]  ;;  %v4702_v0 = vunpack.c.l.b16 %v4409_v47  ;;  %v4703_v1 = vunpack.c.h.b16 %v4409_v47 }
 0x262   : > { %6037 = vmatpush.bf16.msra.mxu2 %v10229_v48  ;;  %6010 = vmatpush.bf16.msra.mxu0 %v9685_v57  ;;  %v9588_v9 = vld [vmem:[%s11461_s8 + $0x10c0] sm:$0xf]  ;;  %v10389_v27 = vor.u32 %v11275_v14, %v10388_v13  ;;  %v2292_v48 = vld [vmem:[#allocation2 + $0x18] sm:$0xff]  ;;  %v4117_v60 = vpop.f32.mrf.mxu1 }
 0x263   : > { %4366 = vmatmul.bf16.vlgmr.msrb.gmra.mxu3 %v12243_v36  ;;  %v9876_v36 = vld [vmem:[%s11461_s8 + $0x1300] sm:$0xf]  ;;  %v4118_v4 = vadd.f32 %v4117_v60, %v4103_v54 }
 0x264   : > { %6051 = vmatpush.bf16.msra.mxu3 %v10485_v52  ;;  %6024 = vmatpush.bf16.msra.mxu1 %v9941_v58  ;;  %v9877_v17 = vor.u32 %v11147_v10, %v9876_v36  ;;  %v11075_v16 = vld [vmem:[%s11461_s8 + $0x10dc] sm:$0xf0]  ;;  %v4144_v52 = vadd.f32 %v4143_v44, %v4130_v43  ;;  %v11046_v36 = vld [vmem:[%s11454_s4 + $0x14] sm:$0xf0]  ;;  %v11231_v43 = vld [vmem:[%s11461_s8 + $0x15c4] sm:$0xf] }
 0x265   : > { %v9844_v20 = vld [vmem:[%s11461_s8 + $0x12c0] sm:$0xf]  ;;  %v9589_v34 = vor.u32 %v11075_v16, %v9588_v9  ;;  %v4131_v21 = vpop.f32.mrf.mxu2 }
 0x266   : > { %6038 = vmatpush.bf16.msra.mxu2 %v10197_v59  ;;  %6011 = vmatpush.bf16.msra.mxu0 %v9653_v32  ;;  %v11139_v22 = vld [vmem:[%s11461_s8 + $0x12dc] sm:$0xf0]  ;;  %v4375_v3 = vadd.f32 %v4144_v52, %v2292_v48  ;;  %v10486_v52 = vld [vmem:[%s11461_s8 + $0x17e0] sm:$0xf0] }
 0x267   : > { %v10100_v23 = vld [vmem:[%s11461_s8 + $0x14c0] sm:$0xf]  ;;  %v9845_v31 = vor.u32 %v11139_v22, %v9844_v20  ;;  %v11043_v20 = vld [vmem:[%s11454_s4 + $0x4] sm:$0xe] }
 0x268   : > { %6052 = vmatpush.bf16.msra.mxu3 %v10453_v63  ;;  %6025 = vmatpush.bf16.msra.mxu1 %v9909_v5  ;;  %v11203_v24 = vld [vmem:[%s11461_s8 + $0x14dc] sm:$0xf0]  ;;  %4391 = vst [vmem:[#allocation2 + $0x18] sm:$0xff] %v4375_v3 }
 0x269   : > { %v10356_v25 = vld [vmem:[%s11461_s8 + $0x16c0] sm:$0xf]  ;;  %v10101_v33 = vor.u32 %v11203_v24, %v10100_v23  ;;  %v11103_v23 = vld [vmem:[%s11461_s8 + $0x11c4] sm:$0xf] }
 0x26a   : > { %6039 = vmatpush.bf16.msra.mxu2 %v10165_v6  ;;  %v11267_v26 = vld [vmem:[%s11461_s8 + $0x16dc] sm:$0xf0]  ;;  %6012 = vmatpush.bf16.msra.mxu0 %v9621_v41  ;;  %v9486_v41 = vld [vmem:[%s11454_s4 + $0x18] sm:$0xf0]  ;;  %v9718_v24 = vld [vmem:[%s11461_s8 + $0x11e0] sm:$0xf0] }
 0x26b   : > { %v9556_v28 = vld [vmem:[%s11461_s8 + $0x1080] sm:$0xf]  ;;  %v10357_v42 = vor.u32 %v11267_v26, %v10356_v25  ;;  %v9485_v25 = vor.u32 %v11046_v36, %v9484_v8  ;;  %v4710_v26 = vpack.c.b16 %v4702_v0, %v4702_v0  ;;  %v11159_v0 = vld [vmem:[%s11461_s8 + $0x1384] sm:$0xf] }
 0x26c   : > { %6053 = vmatpush.bf16.msra.mxu3 %v10421_v38  ;;  %v11067_v29 = vld [vmem:[%s11461_s8 + $0x109c] sm:$0xf0]  ;;  %6026 = vmatpush.bf16.msra.mxu1 %v9877_v17  ;;  %v11044_v38 = vld [vmem:[%s11454_s4 + $0xc] sm:$0xe]  ;;  %v11045_v17 = vld [vmem:[%s11454_s4 + $0xc] sm:$0xf0] }
 0x26d   : > { %v12758_v30 = vld [vmem:[%s11461_s8 + $0x1280] sm:$0xf]  ;;  %v9557_v53 = vor.u32 %v11067_v29, %v9556_v28  ;;  %v4132_v28 = vadd.f32 %v4131_v21, %v4118_v4  ;;  %v4145_v29 = vpop.f32.mrf.mxu3  ;;  %v4720_v54 = vrot.slane %v4710_v26, 1  ;;  %v10454_v8 = vld [vmem:[%s11461_s8 + $0x17a0] sm:$0xf0] }
 0x26e   : > { %6040 = vmatpush.bf16.msra.mxu2 %v10133_v18  ;;  %v11131_v37 = vld [vmem:[%s11461_s8 + $0x129c] sm:$0xf0]  ;;  %6013 = vmatpush.bf16.msra.mxu0 %v9589_v34  ;;  %v4711_v34 = vpack.c.b16 %v4703_v1, %v4703_v1  ;;  %v9942_v1 = vld [vmem:[%s11461_s8 + $0x13a0] sm:$0xf0] }
 0x26f   : > { %v10068_v39 = vld [vmem:[%s11461_s8 + $0x1480] sm:$0xf]  ;;  %v9813_v58 = vor.u32 %v11131_v37, %v12758_v30  ;;  %v9489_v30 = vor.u32 %v11044_v38, %v9486_v41  ;;  %v9654_v41 = vld [vmem:[%s11461_s8 + $0x1160] sm:$0xf0] }
 0x270   : > { %v11195_v40 = vld [vmem:[%s11461_s8 + $0x149c] sm:$0xf0]  ;;  %6054 = vmatpush.bf16.msra.mxu3 %v10389_v27  ;;  %6027 = vmatpush.bf16.msra.mxu1 %v9845_v31  ;;  %v9478_v27 = vld [vmem:[%s11454_s4 + $0x10] sm:$0xf0] }
 0x271   : > { %v10324_v45 = vld [vmem:[%s11461_s8 + $0x1680] sm:$0xf]  ;;  %v10069_v59 = vor.u32 %v11195_v40, %v10068_v39  ;;  %v11167_v40 = vld [vmem:[%s11461_s8 + $0x13c4] sm:$0xf]  ;;  %v9481_v44 = vor.u32 %v11043_v20, %v9478_v27 }
 0x272   : > { %v11259_v46 = vld [vmem:[%s11461_s8 + $0x169c] sm:$0xf0]  ;;  %6041 = vmatpush.bf16.msra.mxu2 %v10101_v33  ;;  %6014 = vmatpush.bf16.msra.mxu0 %v9557_v53  ;;  %v4719_v53 = vrot.slane %v9485_v25, 1  ;;  %v10422_v20 = vld [vmem:[%s11461_s8 + $0x1760] sm:$0xf0] }
 0x273   : > { %v12767_v49 = vld [vmem:[%s11461_s8 + $0x1040] sm:$0xf]  ;;  %v10325_v2 = vor.u32 %v11259_v46, %v10324_v45  ;;  %v4146_v46 = vadd.f32 %v4145_v29, %v4132_v28  ;;  %v4716_v3 = vrot.slane %v9481_v44, 1  ;;  %v11143_v25 = vld [vmem:[%s11461_s8 + $0x1304] sm:$0xf] }
 0x274   : > { %v12770_v50 = vld [vmem:[%s11461_s8 + $0x105c] sm:$0xf0]  ;;  %6055 = vmatpush.bf16.msra.mxu3 %v10357_v42  ;;  %6028 = vmatpush.bf16.msra.mxu1 %v9813_v58  ;;  %v9974_v42 = vld [vmem:[%s11461_s8 + $0x13e0] sm:$0xf0]  ;;  %v4722_v58 = vrot.slane %v9489_v30, 1 }
 0x275   : > { %v12773_v51 = vld [vmem:[%s11454_s4 + $0x20] sm:$0x11]  ;;  %v9525_v11 = vor.u32 %v12770_v50, %v12767_v49  ;;  %v9476_v15 = vld [vmem:[%s11454_s4] sm:$0xe]  ;;  %v9721_v49 = vor.u32 %v11103_v23, %v9718_v24 }
 0x276   : > { %v12776_v55 = vld [vmem:[%s11461_s8 + $0x1240] sm:$0xf]  ;;  %v4700_v10 = vunpack.c.l.b16 %v12773_v51  ;;  %v4701_v18 = vunpack.c.h.b16 %v12773_v51  ;;  %6042 = vmatpush.bf16.msra.mxu2 %v10069_v59  ;;  %v9477_v31 = vor.u32 %v11045_v17, %v9476_v15  ;;  %v10230_v50 = vld [vmem:[%s11461_s8 + $0x15e0] sm:$0xf0] }
 0x277   : > { %v12779_v56 = vld [vmem:[%s11461_s8 + $0x125c] sm:$0xf0]  ;;  %6015 = vmatpush.bf16.msra.mxu0 %v9525_v11  ;;  %v11295_v51 = vld [vmem:[%s11461_s8 + $0x17c4] sm:$0xf]  ;;  %v9945_v11 = vor.u32 %v11159_v0, %v9942_v1 }
 0x278   : > { %v12782_v57 = vld [vmem:[%s11461_s8 + $0x1440] sm:$0xf]  ;;  %v9781_v19 = vor.u32 %v12779_v56, %v12776_v55  ;;  %6056 = vmatpush.bf16.msra.mxu3 %v10325_v2  ;;  %v4708_v33 = vpack.c.b16 %v4700_v10, %v4700_v10  ;;  %v4709_v45 = vpack.c.b16 %v4701_v18, %v4701_v18  ;;  %v4723_v55 = vrot.slane %v4711_v34, 1  ;;  %v11095_v56 = vld [vmem:[%s11461_s8 + $0x1184] sm:$0xf] }
 0x279   : > { %v12786_v61 = vld [vmem:[%s11461_s8 + $0x145c] sm:$0xf0]  ;;  %v9686_v59 = vld [vmem:[%s11461_s8 + $0x11a0] sm:$0xf0]  ;;  %v4713_v60 = vrot.slane %v9477_v31, 1  ;;  %v10489_v4 = vor.u32 %v11295_v51, %v10486_v52 }
 0x27a   : > { %v12789_v62 = vld [vmem:[%s11461_s8 + $0x1640] sm:$0xf]  ;;  %v10037_v9 = vor.u32 %v12786_v61, %v12782_v57  ;;  %6029 = vmatpush.bf16.msra.mxu1 %v9781_v19  ;;  %v4383_v57 = vadd.f32 %v4146_v46, %v2300_v35  ;;  %v4714_v61 = vrot.slane %v4708_v33, 1  ;;  %v4717_v2 = vrot.slane %v4709_v45, 1  ;;  %v11151_v15 = vld [vmem:[%s11461_s8 + $0x1344] sm:$0xf]  ;;  %v4157_v35 = vpop.f32.mrf.mxu0 }
 0x27b   : > { %v12792_v63 = vld [vmem:[%s11461_s8 + $0x165c] sm:$0xf0]  ;;  %v12861_v36 = vsel %vm4712_vm1, %v4722_v58, %v4723_v55  ;;  %v9689_v38 = vor.u32 %v11095_v56, %v9686_v59  ;;  %v9910_v18 = vld [vmem:[%s11461_s8 + $0x1360] sm:$0xf0] }
 0x27c   : > { %v12795_v32 = vld [vmem:[%s11461_s8 + $0x1000] sm:$0xf]  ;;  %v10293_v16 = vor.u32 %v12792_v63, %v12789_v62  ;;  %6043 = vmatpush.bf16.msra.mxu2 %v10037_v9  ;;  %v9977_v62 = vor.u32 %v11167_v40, %v9974_v42  ;;  %v10233_v63 = vor.u32 %v11231_v43, %v10230_v50  ;;  %4399 = vst [vmem:[#allocation2 + $0x38] sm:$0xff] %v4383_v57  ;;  %v11215_v19 = vld [vmem:[%s11461_s8 + $0x1544] sm:$0xf]  ;;  %v4171_v40 = vpop.f32.mrf.mxu1 }
 0x27d   : > { %v12798_v5 = vld [vmem:[%s11461_s8 + $0x101c] sm:$0xf0]  ;;  %v12864_v10 = vsel %vm4712_vm1, %v4713_v60, %v4714_v61  ;;  %v10166_v9 = vld [vmem:[%s11461_s8 + $0x1560] sm:$0xf0]  ;;  %v9913_v21 = vor.u32 %v11151_v15, %v9910_v18  ;;  %v4172_v46 = vadd.f32 %v4171_v40, %v4157_v35  ;;  %v4185_v55 = vpop.f32.mrf.mxu2  ;;  %v11108_v40 = vld [vmem:[%s11461_s8 + $0x11e4] sm:$0xf0] }
 0x27e   : > { %v12801_v6 = vld [vmem:[%s11461_s8 + $0x1200] sm:$0xf]  ;;  %v9493_v37 = vor.u32 %v12798_v5, %v12795_v32  ;;  %6057 = vmatpush.bf16.msra.mxu3 %v10293_v16  ;;  %v11223_v32 = vld [vmem:[%s11461_s8 + $0x1584] sm:$0xf] }
 0x27f   : > { %v12804_v7 = vld [vmem:[%s11461_s8 + $0x121c] sm:$0xf0]  ;;  %v10198_v5 = vld [vmem:[%s11461_s8 + $0x15a0] sm:$0xf0]  ;;  %v4186_v60 = vadd.f32 %v4185_v55, %v4172_v46  ;;  %v4199_v61 = vpop.f32.mrf.mxu3  ;;  %v10236_v46 = vld [vmem:[%s11461_s8 + $0x15c8] sm:$0xf] }
 0x280   : > { %v12813_v12 = vld [vmem:[%s11461_s8 + $0x1400] sm:$0xf]  ;;  %v9749_v39 = vor.u32 %v12804_v7, %v12801_v6  ;;  %6016 = vmatpush.bf16.msra.mxu0 %v9493_v37  ;;  %v12856_v6 = vsel %vm4712_vm1, %v4719_v53, %v4720_v54  ;;  %v11287_v7 = vld [vmem:[%s11461_s8 + $0x1784] sm:$0xf] }
 0x281   : > { %v12816_v13 = vld [vmem:[%s11461_s8 + $0x141c] sm:$0xf0]  ;;  %v10457_v17 = vor.u32 %v11287_v7, %v10454_v8  ;;  %v11279_v16 = vld [vmem:[%s11461_s8 + $0x1744] sm:$0xf] }
 0x282   : > { %v12819_v14 = vld [vmem:[%s11461_s8 + $0x1600] sm:$0xf]  ;;  %v10005_v47 = vor.u32 %v12816_v13, %v12813_v12  ;;  %6030 = vmatpush.bf16.msra.mxu1 %v9749_v39  ;;  %v10201_v12 = vor.u32 %v11223_v32, %v10198_v5  ;;  %v12867_v13 = vsel %vm4712_vm1, %v4716_v3, %v4717_v2  ;;  %v11079_v23 = vld [vmem:[%s11461_s8 + $0x1104] sm:$0xf]  ;;  %v10425_v26 = vor.u32 %v11279_v16, %v10422_v20  ;;  %v2293_v2 = vld [vmem:[#allocation2 + $0x50] sm:$0xff]  ;;  %v4159_v5 = vpop.f32.mrf.mxu0 }
 0x283   : > { %v11243_v22 = vld [vmem:[%s11461_s8 + $0x161c] sm:$0xf0]  ;;  %6017 = vmatmul.bf16.vlgmr.msra.gmra.mxu0 %v12864_v10  ;;  %v9622_v24 = vld [vmem:[%s11461_s8 + $0x1120] sm:$0xf0] }
 0x284   : > { %v10261_v48 = vor.u32 %v11243_v22, %v12819_v14  ;;  %6044 = vmatpush.bf16.msra.mxu2 %v10005_v47  ;;  %6065 = vmatpush.bf16.msrb.mxu0 %v9721_v49  ;;  %v11087_v14 = vld [vmem:[%s11461_s8 + $0x1144] sm:$0xf]  ;;  %v10169_v22 = vor.u32 %v11215_v19, %v10166_v9  ;;  %v9625_v33 = vor.u32 %v11079_v23, %v9622_v24 }
 0x285   : > { %6031 = vmatmul.bf16.vlgmr.msra.gmra.mxu1 %v12867_v13  ;;  %v9657_v27 = vor.u32 %v11087_v14, %v9654_v41  ;;  %v9878_v34 = vld [vmem:[%s11461_s8 + $0x1320] sm:$0xf0] }
 0x286   : > { %6058 = vmatpush.bf16.msra.mxu3 %v10261_v48  ;;  %6079 = vmatpush.bf16.msrb.mxu1 %v9977_v62  ;;  %v11207_v28 = vld [vmem:[%s11461_s8 + $0x1504] sm:$0xf]  ;;  %v9881_v37 = vor.u32 %v11143_v25, %v9878_v34  ;;  %v4187_v25 = vpop.f32.mrf.mxu2 }
 0x287   : > { %6045 = vmatmul.bf16.vlgmr.msra.gmra.mxu2 %v12856_v6  ;;  %v10134_v29 = vld [vmem:[%s11461_s8 + $0x1520] sm:$0xf0] }
 0x288   : > { %6093 = vmatpush.bf16.msrb.mxu2 %v10233_v63  ;;  %6066 = vmatpush.bf16.msrb.mxu0 %v9689_v38  ;;  %v11271_v30 = vld [vmem:[%s11461_s8 + $0x1704] sm:$0xf]  ;;  %v10137_v39 = vor.u32 %v11207_v28, %v10134_v29  ;;  %v4173_v38 = vpop.f32.mrf.mxu1 }
 0x289   : > { %6059 = vmatmul.bf16.vlgmr.msra.gmra.mxu3 %v12861_v36  ;;  %v10390_v31 = vld [vmem:[%s11461_s8 + $0x1720] sm:$0xf0] }
 0x28a   : > { %6107 = vmatpush.bf16.msrb.mxu3 %v10489_v4  ;;  %6080 = vmatpush.bf16.msrb.mxu1 %v9945_v11  ;;  %v11071_v42 = vld [vmem:[%s11461_s8 + $0x10c4] sm:$0xf]  ;;  %v10393_v45 = vor.u32 %v11271_v30, %v10390_v31  ;;  %v4200_v4 = vadd.f32 %v4199_v61, %v4186_v60  ;;  %v4201_v31 = vpop.f32.mrf.mxu3  ;;  %v9948_v60 = vld [vmem:[%s11461_s8 + $0x1388] sm:$0xf] }
 0x28b   : > { %v9590_v43 = vld [vmem:[%s11461_s8 + $0x10e0] sm:$0xf0]  ;;  %v11164_v61 = vld [vmem:[%s11461_s8 + $0x13a4] sm:$0xf0] }
 0x28c   : > { %6094 = vmatpush.bf16.msrb.mxu2 %v10201_v12  ;;  %6067 = vmatpush.bf16.msrb.mxu0 %v9657_v27  ;;  %v11135_v44 = vld [vmem:[%s11461_s8 + $0x12c4] sm:$0xf]  ;;  %v9593_v52 = vor.u32 %v11071_v42, %v9590_v43  ;;  %v4376_v41 = vadd.f32 %v4200_v4, %v2293_v2  ;;  %v9980_v42 = vld [vmem:[%s11461_s8 + $0x13c8] sm:$0xf]  ;;  %v9949_v4 = vor.u32 %v11164_v61, %v9948_v60 }
 0x28d   : > { %v9846_v47 = vld [vmem:[%s11461_s8 + $0x12e0] sm:$0xf0]  ;;  %v11260_v60 = vld [vmem:[%s11461_s8 + $0x16a4] sm:$0xf0] }
 0x28e   : > { %6108 = vmatpush.bf16.msrb.mxu3 %v10457_v17  ;;  %6081 = vmatpush.bf16.msrb.mxu1 %v9913_v21  ;;  %v11199_v48 = vld [vmem:[%s11461_s8 + $0x14c4] sm:$0xf]  ;;  %v9849_v53 = vor.u32 %v11135_v44, %v9846_v47  ;;  %v4174_v17 = vadd.f32 %v4173_v38, %v4159_v5  ;;  %4392 = vst [vmem:[#allocation2 + $0x50] sm:$0xff] %v4376_v41  ;;  %v11236_v47 = vld [vmem:[%s11461_s8 + $0x15e4] sm:$0xf0] }
 0x28f   : > { %v10102_v49 = vld [vmem:[%s11461_s8 + $0x14e0] sm:$0xf0]  ;;  %v9660_v5 = vld [vmem:[%s11461_s8 + $0x1148] sm:$0xf] }
 0x290   : > { %6095 = vmatpush.bf16.msrb.mxu2 %v10169_v22  ;;  %v11263_v50 = vld [vmem:[%s11461_s8 + $0x16c4] sm:$0xf]  ;;  %6068 = vmatpush.bf16.msrb.mxu0 %v9625_v33  ;;  %v10105_v54 = vor.u32 %v11199_v48, %v10102_v49  ;;  %v4188_v30 = vadd.f32 %v4187_v25, %v4174_v17  ;;  %v10428_v41 = vld [vmem:[%s11461_s8 + $0x1748] sm:$0xf] }
 0x291   : > { %v10358_v51 = vld [vmem:[%s11461_s8 + $0x16e0] sm:$0xf0]  ;;  %v11276_v25 = vld [vmem:[%s11461_s8 + $0x1724] sm:$0xf0] }
 0x292   : > { %6109 = vmatpush.bf16.msrb.mxu3 %v10425_v26  ;;  %6082 = vmatpush.bf16.msrb.mxu1 %v9881_v37  ;;  %v11063_v56 = vld [vmem:[%s11461_s8 + $0x1084] sm:$0xf]  ;;  %v10361_v59 = vor.u32 %v11263_v50, %v10358_v51  ;;  %v4202_v43 = vadd.f32 %v4201_v31, %v4188_v30  ;;  %v10492_v51 = vld [vmem:[%s11461_s8 + $0x17c8] sm:$0xf] }
 0x293   : > { %v9558_v57 = vld [vmem:[%s11461_s8 + $0x10a0] sm:$0xf0]  ;;  %v9596_v31 = vld [vmem:[%s11461_s8 + $0x10c8] sm:$0xf] }
 0x294   : > { %6096 = vmatpush.bf16.msrb.mxu2 %v10137_v39  ;;  %v11127_v58 = vld [vmem:[%s11461_s8 + $0x1284] sm:$0xf]  ;;  %6069 = vmatpush.bf16.msrb.mxu0 %v9593_v52  ;;  %v9561_v32 = vor.u32 %v11063_v56, %v9558_v57  ;;  %v9724_v39 = vld [vmem:[%s11461_s8 + $0x11c8] sm:$0xf] }
 0x295   : > { %v9814_v62 = vld [vmem:[%s11461_s8 + $0x12a0] sm:$0xf0]  ;;  %v11300_v52 = vld [vmem:[%s11461_s8 + $0x17e4] sm:$0xf0]  ;;  %v9725_v55 = vor.u32 %v11108_v40, %v9724_v39 }
 0x296   : > { %6110 = vmatpush.bf16.msrb.mxu3 %v10393_v45  ;;  %v11191_v63 = vld [vmem:[%s11461_s8 + $0x1484] sm:$0xf]  ;;  %6083 = vmatpush.bf16.msrb.mxu1 %v9849_v53  ;;  %v9817_v7 = vor.u32 %v11127_v58, %v9814_v62  ;;  %v11172_v45 = vld [vmem:[%s11461_s8 + $0x13e4] sm:$0xf0]  ;;  %v10237_v58 = vor.u32 %v11236_v47, %v10236_v46  ;;  %v10493_v62 = vor.u32 %v11300_v52, %v10492_v51 }
 0x297   : > { %v10070_v0 = vld [vmem:[%s11461_s8 + $0x14a0] sm:$0xf0]  ;;  %v9692_v56 = vld [vmem:[%s11461_s8 + $0x1188] sm:$0xf]  ;;  %v9981_v57 = vor.u32 %v11172_v45, %v9980_v42 }
 0x298   : > { %v11255_v1 = vld [vmem:[%s11461_s8 + $0x1684] sm:$0xf]  ;;  %6097 = vmatpush.bf16.msrb.mxu2 %v10105_v54  ;;  %v10073_v8 = vor.u32 %v11191_v63, %v10070_v0  ;;  %6070 = vmatpush.bf16.msrb.mxu0 %v9561_v32  ;;  %v10204_v63 = vld [vmem:[%s11461_s8 + $0x1588] sm:$0xf]  ;;  %v4227_v30 = vpop.f32.mrf.mxu1 }
 0x299   : > { %v10326_v3 = vld [vmem:[%s11461_s8 + $0x16a0] sm:$0xf0]  ;;  %v11228_v0 = vld [vmem:[%s11461_s8 + $0x15a4] sm:$0xf0] }
 0x29a   : > { %v11055_v11 = vld [vmem:[%s11461_s8 + $0x1044] sm:$0xf]  ;;  %6111 = vmatpush.bf16.msrb.mxu3 %v10361_v59  ;;  %v10329_v15 = vor.u32 %v11255_v1, %v10326_v3  ;;  %6084 = vmatpush.bf16.msrb.mxu1 %v9817_v7  ;;  %v11100_v59 = vld [vmem:[%s11461_s8 + $0x11a4] sm:$0xf0]  ;;  %v10205_v32 = vor.u32 %v11228_v0, %v10204_v63 }
 0x29b   : > { %v9526_v12 = vld [vmem:[%s11461_s8 + $0x1060] sm:$0xf0]  ;;  %v10460_v1 = vld [vmem:[%s11461_s8 + $0x1788] sm:$0xf]  ;;  %v9693_v2 = vor.u32 %v11100_v59, %v9692_v56 }
 0x29c   : > { %v11119_v14 = vld [vmem:[%s11461_s8 + $0x1244] sm:$0xf]  ;;  %v9529_v27 = vor.u32 %v11055_v11, %v9526_v12  ;;  %6098 = vmatpush.bf16.msrb.mxu2 %v10073_v8  ;;  %v11292_v3 = vld [vmem:[%s11461_s8 + $0x17a4] sm:$0xf0] }
 0x29d   : > { %v9782_v18 = vld [vmem:[%s11461_s8 + $0x1260] sm:$0xf0]  ;;  %v11092_v7 = vld [vmem:[%s11461_s8 + $0x1164] sm:$0xf0]  ;;  %v10461_v38 = vor.u32 %v11292_v3, %v10460_v1 }
 0x29e   : > { %v11183_v19 = vld [vmem:[%s11461_s8 + $0x1444] sm:$0xf]  ;;  %v9785_v23 = vor.u32 %v11119_v14, %v9782_v18  ;;  %6112 = vmatpush.bf16.msrb.mxu3 %v10329_v15  ;;  %6071 = vmatpush.bf16.msrb.mxu0 %v9529_v27  ;;  %v9916_v8 = vld [vmem:[%s11461_s8 + $0x1348] sm:$0xf]  ;;  %v9661_v17 = vor.u32 %v11092_v7, %v9660_v5 }
 0x29f   : > { %v10038_v9 = vld [vmem:[%s11461_s8 + $0x1460] sm:$0xf0]  ;;  %v11156_v11 = vld [vmem:[%s11461_s8 + $0x1364] sm:$0xf0] }
 0x2a0   : > { %v11247_v16 = vld [vmem:[%s11461_s8 + $0x1644] sm:$0xf]  ;;  %v10041_v24 = vor.u32 %v11183_v19, %v10038_v9  ;;  %6085 = vmatpush.bf16.msrb.mxu1 %v9785_v23  ;;  %v10172_v12 = vld [vmem:[%s11461_s8 + $0x1548] sm:$0xf]  ;;  %v9917_v18 = vor.u32 %v11156_v11, %v9916_v8 }
 0x2a1   : > { %v10294_v20 = vld [vmem:[%s11461_s8 + $0x1660] sm:$0xf0]  ;;  %v11220_v14 = vld [vmem:[%s11461_s8 + $0x1564] sm:$0xf0] }
 0x2a2   : > { %v11047_v21 = vld [vmem:[%s11461_s8 + $0x1004] sm:$0xf]  ;;  %v10297_v29 = vor.u32 %v11247_v16, %v10294_v20  ;;  %6099 = vmatpush.bf16.msrb.mxu2 %v10041_v24  ;;  %v11284_v15 = vld [vmem:[%s11461_s8 + $0x1764] sm:$0xf0]  ;;  %v10173_v19 = vor.u32 %v11220_v14, %v10172_v12 }
 0x2a3   : > { %v9494_v22 = vld [vmem:[%s11461_s8 + $0x1020] sm:$0xf0]  ;;  %v9628_v9 = vld [vmem:[%s11461_s8 + $0x1108] sm:$0xf]  ;;  %v10429_v27 = vor.u32 %v11284_v15, %v10428_v41 }
 0x2a4   : > { %v11111_v26 = vld [vmem:[%s11461_s8 + $0x1204] sm:$0xf]  ;;  %v9497_v44 = vor.u32 %v11047_v21, %v9494_v22  ;;  %6113 = vmatpush.bf16.msrb.mxu3 %v10297_v29  ;;  %v11084_v16 = vld [vmem:[%s11461_s8 + $0x1124] sm:$0xf0] }
 0x2a5   : > { %v9750_v34 = vld [vmem:[%s11461_s8 + $0x1220] sm:$0xf0]  ;;  %v9884_v20 = vld [vmem:[%s11461_s8 + $0x1308] sm:$0xf] }
 0x2a6   : > { %v11175_v28 = vld [vmem:[%s11461_s8 + $0x1404] sm:$0xf]  ;;  %v9753_v49 = vor.u32 %v11111_v26, %v9750_v34  ;;  %6072 = vmatpush.bf16.msrb.mxu0 %v9497_v44  ;;  %v11148_v21 = vld [vmem:[%s11461_s8 + $0x1324] sm:$0xf0]  ;;  %v9629_v26 = vor.u32 %v11084_v16, %v9628_v9  ;;  %v4213_v34 = vpop.f32.mrf.mxu0 }
 0x2a7   : > { %v10006_v33 = vld [vmem:[%s11461_s8 + $0x1420] sm:$0xf0]  ;;  %v10140_v22 = vld [vmem:[%s11461_s8 + $0x1508] sm:$0xf]  ;;  %v4228_v39 = vadd.f32 %v4227_v30, %v4213_v34  ;;  %v9726_v30 = vld [vmem:[%s11461_s8 + $0x11e8] sm:$0xf0] }
 0x2a8   : > { %v11239_v35 = vld [vmem:[%s11461_s8 + $0x1604] sm:$0xf]  ;;  %v10009_v50 = vor.u32 %v11175_v28, %v10006_v33  ;;  %6086 = vmatpush.bf16.msrb.mxu1 %v9753_v49  ;;  %v11212_v23 = vld [vmem:[%s11461_s8 + $0x1524] sm:$0xf0]  ;;  %v9885_v28 = vor.u32 %v11148_v21, %v9884_v20  ;;  %v4241_v49 = vpop.f32.mrf.mxu2 }
 0x2a9   : > { %v10262_v37 = vld [vmem:[%s11461_s8 + $0x1620] sm:$0xf0]  ;;  %6073 = vmatmul.bf16.vlgmr.msrb.gmra.mxu0 %v12864_v10  ;;  %v10396_v24 = vld [vmem:[%s11461_s8 + $0x1708] sm:$0xf]  ;;  %v10141_v29 = vor.u32 %v11212_v23, %v10140_v22 }
 0x2aa   : > { %v2301_v48 = vld [vmem:[#allocation2 + $0x60] sm:$0xff]  ;;  %v10265_v54 = vor.u32 %v11239_v35, %v10262_v37  ;;  %6100 = vmatpush.bf16.msrb.mxu2 %v10009_v50  ;;  %6121 = vmatpush.bf16.msra.mxu0 %v9725_v55  ;;  %v11076_v33 = vld [vmem:[%s11461_s8 + $0x10e4] sm:$0xf0]  ;;  %v10397_v37 = vor.u32 %v11276_v25, %v10396_v24  ;;  %v4255_v55 = vpop.f32.mrf.mxu3 }
 0x2ab   : > { %v4384_v53 = vadd.f32 %v4202_v43, %v2301_v48  ;;  %6087 = vmatmul.bf16.vlgmr.msrb.gmra.mxu1 %v12867_v13  ;;  %v9852_v35 = vld [vmem:[%s11461_s8 + $0x12c8] sm:$0xf]  ;;  %v9597_v46 = vor.u32 %v11076_v33, %v9596_v31  ;;  %v11168_v31 = vld [vmem:[%s11461_s8 + $0x13cc] sm:$0xf] }
 0x2ac   : > { %6114 = vmatpush.bf16.msrb.mxu3 %v10265_v54  ;;  %6135 = vmatpush.bf16.msra.mxu1 %v9981_v57  ;;  %v11140_v40 = vld [vmem:[%s11461_s8 + $0x12e4] sm:$0xf0]  ;;  %v4242_v54 = vadd.f32 %v4241_v49, %v4228_v39  ;;  %v11232_v39 = vld [vmem:[%s11461_s8 + $0x15cc] sm:$0xf] }
 0x2ad   : > { %4400 = vst [vmem:[#allocation2 + $0x60] sm:$0xff] %v4384_v53  ;;  %6101 = vmatmul.bf16.vlgmr.msrb.gmra.mxu2 %v12856_v6  ;;  %v10108_v42 = vld [vmem:[%s11461_s8 + $0x14c8] sm:$0xf]  ;;  %v9853_v47 = vor.u32 %v11140_v40, %v9852_v35  ;;  %v10238_v40 = vld [vmem:[%s11461_s8 + $0x15e8] sm:$0xf0] }
 0x2ae   : > { %6149 = vmatpush.bf16.msra.mxu2 %v10237_v58  ;;  %6122 = vmatpush.bf16.msra.mxu0 %v9693_v2  ;;  %v11204_v43 = vld [vmem:[%s11461_s8 + $0x14e4] sm:$0xf0]  ;;  %v4215_v0 = vpop.f32.mrf.mxu0  ;;  %v4229_v2 = vpop.f32.mrf.mxu1 }
 0x2af   : > { %6115 = vmatmul.bf16.vlgmr.msrb.gmra.mxu3 %v12861_v36  ;;  %v10364_v44 = vld [vmem:[%s11461_s8 + $0x16c8] sm:$0xf]  ;;  %v10109_v48 = vor.u32 %v11204_v43, %v10108_v42  ;;  %v2302_v42 = vld [vmem:[#allocation2 + $0x70] sm:$0xff] }
 0x2b0   : > { %6163 = vmatpush.bf16.msra.mxu3 %v10493_v62  ;;  %6136 = vmatpush.bf16.msra.mxu1 %v9949_v4  ;;  %v11268_v45 = vld [vmem:[%s11461_s8 + $0x16e4] sm:$0xf0]  ;;  %v4256_v62 = vadd.f32 %v4255_v55, %v4242_v54  ;;  %v4243_v20 = vpop.f32.mrf.mxu2  ;;  %v11160_v54 = vld [vmem:[%s11461_s8 + $0x138c] sm:$0xf] }
 0x2b1   : > { %v9564_v50 = vld [vmem:[%s11461_s8 + $0x1088] sm:$0xf]  ;;  %v10365_v53 = vor.u32 %v11268_v45, %v10364_v44  ;;  %v11296_v45 = vld [vmem:[%s11461_s8 + $0x17cc] sm:$0xf] }
 0x2b2   : > { %6150 = vmatpush.bf16.msra.mxu2 %v10205_v32  ;;  %6123 = vmatpush.bf16.msra.mxu0 %v9661_v17  ;;  %v11068_v51 = vld [vmem:[%s11461_s8 + $0x10a4] sm:$0xf0]  ;;  %v4257_v25 = vpop.f32.mrf.mxu3  ;;  %v9950_v55 = vld [vmem:[%s11461_s8 + $0x13a8] sm:$0xf0] }
 0x2b3   : > { %v9820_v52 = vld [vmem:[%s11461_s8 + $0x1288] sm:$0xf]  ;;  %v9565_v63 = vor.u32 %v11068_v51, %v9564_v50  ;;  %v11096_v50 = vld [vmem:[%s11461_s8 + $0x118c] sm:$0xf] }
 0x2b4   : > { %6164 = vmatpush.bf16.msra.mxu3 %v10461_v38  ;;  %6137 = vmatpush.bf16.msra.mxu1 %v9917_v18  ;;  %v11132_v56 = vld [vmem:[%s11461_s8 + $0x12a4] sm:$0xf0]  ;;  %v4230_v38 = vadd.f32 %v4229_v2, %v4215_v0  ;;  %v11088_v0 = vld [vmem:[%s11461_s8 + $0x114c] sm:$0xf] }
 0x2b5   : > { %v10076_v57 = vld [vmem:[%s11461_s8 + $0x1488] sm:$0xf]  ;;  %v9821_v1 = vor.u32 %v11132_v56, %v9820_v52  ;;  %v10241_v52 = vor.u32 %v11232_v39, %v10238_v40 }
 0x2b6   : > { %6151 = vmatpush.bf16.msra.mxu2 %v10173_v19  ;;  %6124 = vmatpush.bf16.msra.mxu0 %v9629_v26  ;;  %v11196_v58 = vld [vmem:[%s11461_s8 + $0x14a4] sm:$0xf0]  ;;  %v4244_v24 = vadd.f32 %v4243_v20, %v4230_v38  ;;  %v10398_v20 = vld [vmem:[%s11461_s8 + $0x1728] sm:$0xf0] }
 0x2b7   : > { %v10332_v59 = vld [vmem:[%s11461_s8 + $0x1688] sm:$0xf]  ;;  %v10077_v3 = vor.u32 %v11196_v58, %v10076_v57  ;;  %v11224_v57 = vld [vmem:[%s11461_s8 + $0x158c] sm:$0xf] }
 0x2b8   : > { %6165 = vmatpush.bf16.msra.mxu3 %v10429_v27  ;;  %6138 = vmatpush.bf16.msra.mxu1 %v9885_v28  ;;  %v2294_v61 = vld [vmem:[#allocation2 + $0x68] sm:$0xff]  ;;  %v10333_v8 = vor.u32 %v11260_v60, %v10332_v59  ;;  %v4258_v33 = vadd.f32 %v4257_v25, %v4244_v24 }
 0x2b9   : > { %v9532_v4 = vld [vmem:[%s11461_s8 + $0x1048] sm:$0xf]  ;;  %v4377_v7 = vadd.f32 %v4256_v62, %v2294_v61  ;;  %v10206_v58 = vld [vmem:[%s11461_s8 + $0x15a8] sm:$0xf0]  ;;  %v9953_v62 = vor.u32 %v11160_v54, %v9950_v55 }
 0x2ba   : > { %6152 = vmatpush.bf16.msra.mxu2 %v10141_v29  ;;  %6125 = vmatpush.bf16.msra.mxu0 %v9597_v46  ;;  %v11060_v32 = vld [vmem:[%s11461_s8 + $0x1064] sm:$0xf0]  ;;  %v11104_v29 = vld [vmem:[%s11461_s8 + $0x11cc] sm:$0xf]  ;;  %v4283_v24 = vpop.f32.mrf.mxu1 }
 0x2bb   : > { %v9788_v5 = vld [vmem:[%s11461_s8 + $0x1248] sm:$0xf]  ;;  %4393 = vst [vmem:[#allocation2 + $0x68] sm:$0xff] %v4377_v7  ;;  %v9533_v17 = vor.u32 %v11060_v32, %v9532_v4  ;;  %v10494_v46 = vld [vmem:[%s11461_s8 + $0x17e8] sm:$0xf0]  ;;  %v9729_v49 = vor.u32 %v11104_v29, %v9726_v30 }
 0x2bc   : > { %6166 = vmatpush.bf16.msra.mxu3 %v10397_v37  ;;  %6139 = vmatpush.bf16.msra.mxu1 %v9853_v47  ;;  %v11124_v11 = vld [vmem:[%s11461_s8 + $0x1264] sm:$0xf0]  ;;  %v9982_v37 = vld [vmem:[%s11461_s8 + $0x13e8] sm:$0xf0]  ;;  %v4385_v47 = vadd.f32 %v4258_v33, %v2302_v42  ;;  %v10497_v56 = vor.u32 %v11296_v45, %v10494_v46 }
 0x2bd   : > { %v10044_v12 = vld [vmem:[%s11461_s8 + $0x1448] sm:$0xf]  ;;  %v9789_v9 = vor.u32 %v11124_v11, %v9788_v5  ;;  %v9985_v51 = vor.u32 %v11168_v31, %v9982_v37  ;;  %v11288_v59 = vld [vmem:[%s11461_s8 + $0x178c] sm:$0xf] }
 0x2be   : > { %6153 = vmatpush.bf16.msra.mxu2 %v10109_v48  ;;  %v11188_v14 = vld [vmem:[%s11461_s8 + $0x1464] sm:$0xf0]  ;;  %6126 = vmatpush.bf16.msra.mxu0 %v9565_v63  ;;  %4401 = vst [vmem:[#allocation2 + $0x70] sm:$0xff] %v4385_v47  ;;  %v10462_v60 = vld [vmem:[%s11461_s8 + $0x17a8] sm:$0xf0]  ;;  %v10209_v63 = vor.u32 %v11224_v57, %v10206_v58 }
 0x2bf   : > { %v10300_v41 = vld [vmem:[%s11461_s8 + $0x1648] sm:$0xf]  ;;  %v10045_v16 = vor.u32 %v11188_v14, %v10044_v12  ;;  %v10465_v2 = vor.u32 %v11288_v59, %v10462_v60  ;;  %v9918_v4 = vld [vmem:[%s11461_s8 + $0x1368] sm:$0xf0] }
 0x2c0   : > { %6167 = vmatpush.bf16.msra.mxu3 %v10365_v53  ;;  %v11252_v15 = vld [vmem:[%s11461_s8 + $0x1664] sm:$0xf0]  ;;  %6140 = vmatpush.bf16.msra.mxu1 %v9821_v1  ;;  %v9694_v53 = vld [vmem:[%s11461_s8 + $0x11a8] sm:$0xf0] }
 0x2c1   : > { %v9500_v18 = vld [vmem:[%s11461_s8 + $0x1008] sm:$0xf]  ;;  %v10301_v23 = vor.u32 %v11252_v15, %v10300_v41  ;;  %v9697_v61 = vor.u32 %v11096_v50, %v9694_v53  ;;  %v9662_v1 = vld [vmem:[%s11461_s8 + $0x1168] sm:$0xf0] }
 0x2c2   : > { %v11052_v19 = vld [vmem:[%s11461_s8 + $0x1024] sm:$0xf0]  ;;  %6154 = vmatpush.bf16.msra.mxu2 %v10077_v3  ;;  %6127 = vmatpush.bf16.msra.mxu0 %v9533_v17  ;;  %v11152_v3 = vld [vmem:[%s11461_s8 + $0x134c] sm:$0xf]  ;;  %v9665_v38 = vor.u32 %v11088_v0, %v9662_v1 }
 0x2c3   : > { %v9756_v27 = vld [vmem:[%s11461_s8 + $0x1208] sm:$0xf]  ;;  %v9501_v35 = vor.u32 %v11052_v19, %v9500_v18  ;;  %v11216_v32 = vld [vmem:[%s11461_s8 + $0x154c] sm:$0xf]  ;;  %v9921_v11 = vor.u32 %v11152_v3, %v9918_v4 }
 0x2c4   : > { %v11116_v21 = vld [vmem:[%s11461_s8 + $0x1224] sm:$0xf0]  ;;  %6168 = vmatpush.bf16.msra.mxu3 %v10333_v8  ;;  %6141 = vmatpush.bf16.msra.mxu1 %v9789_v9  ;;  %v10174_v5 = vld [vmem:[%s11461_s8 + $0x1568] sm:$0xf0] }
 0x2c5   : > { %v10012_v22 = vld [vmem:[%s11461_s8 + $0x1408] sm:$0xf]  ;;  %v9757_v43 = vor.u32 %v11116_v21, %v9756_v27  ;;  %v11280_v7 = vld [vmem:[%s11461_s8 + $0x174c] sm:$0xf]  ;;  %v10177_v12 = vor.u32 %v11216_v32, %v10174_v5  ;;  %v4269_v21 = vpop.f32.mrf.mxu0 }
 0x2c6   : > { %v11180_v26 = vld [vmem:[%s11461_s8 + $0x1424] sm:$0xf0]  ;;  %6155 = vmatpush.bf16.msra.mxu2 %v10045_v16  ;;  %6128 = vmatpush.bf16.msra.mxu0 %v9501_v35  ;;  %v10430_v8 = vld [vmem:[%s11461_s8 + $0x1768] sm:$0xf0]  ;;  %v4284_v29 = vadd.f32 %v4283_v24, %v4269_v21  ;;  %v11109_v24 = vld [vmem:[%s11461_s8 + $0x11ec] sm:$0xf0] }
 0x2c7   : > { %v10268_v34 = vld [vmem:[%s11461_s8 + $0x1608] sm:$0xf]  ;;  %v10013_v44 = vor.u32 %v11180_v26, %v10012_v22  ;;  %v11080_v14 = vld [vmem:[%s11461_s8 + $0x110c] sm:$0xf]  ;;  %v10433_v17 = vor.u32 %v11280_v7, %v10430_v8 }
 0x2c8   : > { %v11244_v28 = vld [vmem:[%s11461_s8 + $0x1624] sm:$0xf0]  ;;  %6169 = vmatpush.bf16.msra.mxu3 %v10301_v23  ;;  %6142 = vmatpush.bf16.msra.mxu1 %v9757_v43  ;;  %v9630_v41 = vld [vmem:[%s11461_s8 + $0x1128] sm:$0xf0]  ;;  %v4297_v43 = vpop.f32.mrf.mxu2 }
 0x2c9   : > { %v10269_v48 = vor.u32 %v11244_v28, %v10268_v34  ;;  %6129 = vmatmul.bf16.vlgmr.msra.gmra.mxu0 %v12864_v10  ;;  %v11144_v15 = vld [vmem:[%s11461_s8 + $0x130c] sm:$0xf]  ;;  %v9633_v27 = vor.u32 %v11080_v14, %v9630_v41 }
 0x2ca   : > { %6156 = vmatpush.bf16.msra.mxu2 %v10013_v44  ;;  %6177 = vmatpush.bf16.msrb.mxu0 %v9729_v49  ;;  %v9886_v18 = vld [vmem:[%s11461_s8 + $0x1328] sm:$0xf0]  ;;  %v4311_v49 = vpop.f32.mrf.mxu3 }
 0x2cb   : > { %6143 = vmatmul.bf16.vlgmr.msra.gmra.mxu1 %v12867_v13  ;;  %v11208_v19 = vld [vmem:[%s11461_s8 + $0x150c] sm:$0xf]  ;;  %v9889_v22 = vor.u32 %v11144_v15, %v9886_v18 }
 0x2cc   : > { %6170 = vmatpush.bf16.msra.mxu3 %v10269_v48  ;;  %6191 = vmatpush.bf16.msrb.mxu1 %v9985_v51  ;;  %v10142_v9 = vld [vmem:[%s11461_s8 + $0x1528] sm:$0xf0]  ;;  %v4298_v48 = vadd.f32 %v4297_v43, %v4284_v29  ;;  %v10244_v29 = vld [vmem:[%s11461_s8 + $0x15d0] sm:$0xf] }
 0x2cd   : > { %6157 = vmatmul.bf16.vlgmr.msra.gmra.mxu2 %v12856_v6  ;;  %v11272_v16 = vld [vmem:[%s11461_s8 + $0x170c] sm:$0xf]  ;;  %v10145_v23 = vor.u32 %v11208_v19, %v10142_v9  ;;  %v4271_v58 = vpop.f32.mrf.mxu0 }
 0x2ce   : > { %6205 = vmatpush.bf16.msrb.mxu2 %v10241_v52  ;;  %6178 = vmatpush.bf16.msrb.mxu0 %v9697_v61  ;;  %v11072_v25 = vld [vmem:[%s11461_s8 + $0x10cc] sm:$0xf]  ;;  %v10401_v28 = vor.u32 %v11272_v16, %v10398_v20  ;;  %v4285_v61 = vpop.f32.mrf.mxu1 }
 0x2cf   : > { %6171 = vmatmul.bf16.vlgmr.msra.gmra.mxu3 %v12861_v36  ;;  %v9598_v26 = vld [vmem:[%s11461_s8 + $0x10e8] sm:$0xf0] }
 0x2d0   : > { %6219 = vmatpush.bf16.msrb.mxu3 %v10497_v56  ;;  %6192 = vmatpush.bf16.msrb.mxu1 %v9953_v62  ;;  %v11136_v34 = vld [vmem:[%s11461_s8 + $0x12cc] sm:$0xf]  ;;  %v9601_v39 = vor.u32 %v11072_v25, %v9598_v26  ;;  %v4312_v56 = vadd.f32 %v4311_v49, %v4298_v48  ;;  %v4299_v15 = vpop.f32.mrf.mxu2  ;;  %v9988_v25 = vld [vmem:[%s11461_s8 + $0x13d0] sm:$0xf] }
 0x2d1   : > { %v9854_v30 = vld [vmem:[%s11461_s8 + $0x12e8] sm:$0xf0]  ;;  %v9956_v48 = vld [vmem:[%s11461_s8 + $0x1390] sm:$0xf] }
 0x2d2   : > { %6206 = vmatpush.bf16.msrb.mxu2 %v10209_v63  ;;  %6179 = vmatpush.bf16.msrb.mxu0 %v9665_v38  ;;  %v11200_v31 = vld [vmem:[%s11461_s8 + $0x14cc] sm:$0xf]  ;;  %v9857_v40 = vor.u32 %v11136_v34, %v9854_v30  ;;  %v4313_v20 = vpop.f32.mrf.mxu3  ;;  %v11237_v30 = vld [vmem:[%s11461_s8 + $0x15ec] sm:$0xf0] }
 0x2d3   : > { %v10110_v33 = vld [vmem:[%s11461_s8 + $0x14e8] sm:$0xf0]  ;;  %v11165_v49 = vld [vmem:[%s11461_s8 + $0x13ac] sm:$0xf0] }
 0x2d4   : > { %6220 = vmatpush.bf16.msrb.mxu3 %v10465_v2  ;;  %6193 = vmatpush.bf16.msrb.mxu1 %v9921_v11  ;;  %v11264_v35 = vld [vmem:[%s11461_s8 + $0x16cc] sm:$0xf]  ;;  %v10113_v42 = vor.u32 %v11200_v31, %v10110_v33  ;;  %v4286_v2 = vadd.f32 %v4285_v61, %v4271_v58  ;;  %v2303_v31 = vld [vmem:[#allocation2 + $0x78] sm:$0xff]  ;;  %v9668_v58 = vld [vmem:[%s11461_s8 + $0x1150] sm:$0xf] }
 0x2d5   : > { %v10366_v37 = vld [vmem:[%s11461_s8 + $0x16e8] sm:$0xf0] }
 0x2d6   : > { %6207 = vmatpush.bf16.msrb.mxu2 %v10177_v12  ;;  %6180 = vmatpush.bf16.msrb.mxu0 %v9633_v27  ;;  %v11064_v44 = vld [vmem:[%s11461_s8 + $0x108c] sm:$0xf]  ;;  %v10369_v47 = vor.u32 %v11264_v35, %v10366_v37  ;;  %v4300_v16 = vadd.f32 %v4299_v15, %v4286_v2  ;;  %v10500_v37 = vld [vmem:[%s11461_s8 + $0x17d0] sm:$0xf] }
 0x2d7   : > { %v9566_v45 = vld [vmem:[%s11461_s8 + $0x10a8] sm:$0xf0]  ;;  %v11277_v15 = vld [vmem:[%s11461_s8 + $0x172c] sm:$0xf0] }
 0x2d8   : > { %6221 = vmatpush.bf16.msrb.mxu3 %v10433_v17  ;;  %6194 = vmatpush.bf16.msrb.mxu1 %v9889_v22  ;;  %v11128_v46 = vld [vmem:[%s11461_s8 + $0x128c] sm:$0xf]  ;;  %v9569_v57 = vor.u32 %v11064_v44, %v9566_v45  ;;  %v4314_v26 = vadd.f32 %v4313_v20, %v4300_v16  ;;  %v9700_v44 = vld [vmem:[%s11461_s8 + $0x1190] sm:$0xf] }
 0x2d9   : > { %v9822_v50 = vld [vmem:[%s11461_s8 + $0x12a8] sm:$0xf0]  ;;  %v9604_v20 = vld [vmem:[%s11461_s8 + $0x10d0] sm:$0xf] }
 0x2da   : > { %6208 = vmatpush.bf16.msrb.mxu2 %v10145_v23  ;;  %v11192_v51 = vld [vmem:[%s11461_s8 + $0x148c] sm:$0xf]  ;;  %6181 = vmatpush.bf16.msrb.mxu0 %v9601_v39  ;;  %v9825_v59 = vor.u32 %v11128_v46, %v9822_v50  ;;  %v9732_v23 = vld [vmem:[%s11461_s8 + $0x11d0] sm:$0xf]  ;;  %v10245_v46 = vor.u32 %v11237_v30, %v10244_v29 }
 0x2db   : > { %v10078_v52 = vld [vmem:[%s11461_s8 + $0x14a8] sm:$0xf0]  ;;  %v11301_v39 = vld [vmem:[%s11461_s8 + $0x17ec] sm:$0xf0]  ;;  %v9733_v43 = vor.u32 %v11109_v24, %v9732_v23 }
 0x2dc   : > { %6222 = vmatpush.bf16.msrb.mxu3 %v10401_v28  ;;  %v11256_v53 = vld [vmem:[%s11461_s8 + $0x168c] sm:$0xf]  ;;  %6195 = vmatpush.bf16.msrb.mxu1 %v9857_v40  ;;  %v10081_v60 = vor.u32 %v11192_v51, %v10078_v52  ;;  %v11173_v28 = vld [vmem:[%s11461_s8 + $0x13ec] sm:$0xf0]  ;;  %v4386_v40 = vadd.f32 %v4314_v26, %v2303_v31  ;;  %v10501_v50 = vor.u32 %v11301_v39, %v10500_v37  ;;  %v4339_v16 = vpop.f32.mrf.mxu1 }
 0x2dd   : > { %v10334_v54 = vld [vmem:[%s11461_s8 + $0x16a8] sm:$0xf0]  ;;  %v9989_v45 = vor.u32 %v11173_v28, %v9988_v25  ;;  %v10212_v51 = vld [vmem:[%s11461_s8 + $0x1590] sm:$0xf] }
 0x2de   : > { %v2295_v55 = vld [vmem:[#allocation2 + $0x8] sm:$0xff]  ;;  %6209 = vmatpush.bf16.msrb.mxu2 %v10113_v42  ;;  %v10337_v3 = vor.u32 %v11256_v53, %v10334_v54  ;;  %6182 = vmatpush.bf16.msrb.mxu0 %v9569_v57  ;;  %4402 = vst [vmem:[#allocation2 + $0x78] sm:$0xff] %v4386_v40  ;;  %v11229_v52 = vld [vmem:[%s11461_s8 + $0x15ac] sm:$0xf0] }
 0x2df   : > { %v11056_v62 = vld [vmem:[%s11461_s8 + $0x104c] sm:$0xf]  ;;  %v4378_v1 = vadd.f32 %v4312_v56, %v2295_v55  ;;  %v10468_v53 = vld [vmem:[%s11461_s8 + $0x1790] sm:$0xf]  ;;  %v9957_v56 = vor.u32 %v11165_v49, %v9956_v48  ;;  %v10213_v57 = vor.u32 %v11229_v52, %v10212_v51 }
 0x2e0   : > { %v9534_v63 = vld [vmem:[%s11461_s8 + $0x1068] sm:$0xf0]  ;;  %6223 = vmatpush.bf16.msrb.mxu3 %v10369_v47  ;;  %6196 = vmatpush.bf16.msrb.mxu1 %v9825_v59  ;;  %v11101_v47 = vld [vmem:[%s11461_s8 + $0x11ac] sm:$0xf0] }
 0x2e1   : > { %v11120_v0 = vld [vmem:[%s11461_s8 + $0x124c] sm:$0xf]  ;;  %4394 = vst [vmem:[#allocation2 + $0x8] sm:$0xff] %v4378_v1  ;;  %v9537_v38 = vor.u32 %v11056_v62, %v9534_v63  ;;  %v11293_v54 = vld [vmem:[%s11461_s8 + $0x17ac] sm:$0xf0]  ;;  %v9701_v55 = vor.u32 %v11101_v47, %v9700_v44 }
 0x2e2   : > { %v9790_v4 = vld [vmem:[%s11461_s8 + $0x1268] sm:$0xf0]  ;;  %6210 = vmatpush.bf16.msrb.mxu2 %v10081_v60  ;;  %v11093_v59 = vld [vmem:[%s11461_s8 + $0x116c] sm:$0xf0]  ;;  %v10469_v61 = vor.u32 %v11293_v54, %v10468_v53 }
 0x2e3   : > { %v11184_v32 = vld [vmem:[%s11461_s8 + $0x144c] sm:$0xf]  ;;  %v9793_v14 = vor.u32 %v11120_v0, %v9790_v4  ;;  %6183 = vmatpush.bf16.msrb.mxu0 %v9537_v38  ;;  %v9924_v60 = vld [vmem:[%s11461_s8 + $0x1350] sm:$0xf]  ;;  %v9669_v2 = vor.u32 %v11093_v59, %v9668_v58 }
 0x2e4   : > { %v10046_v5 = vld [vmem:[%s11461_s8 + $0x1468] sm:$0xf0]  ;;  %6224 = vmatpush.bf16.msrb.mxu3 %v10337_v3  ;;  %v11157_v62 = vld [vmem:[%s11461_s8 + $0x136c] sm:$0xf0] }
 0x2e5   : > { %v11248_v7 = vld [vmem:[%s11461_s8 + $0x164c] sm:$0xf]  ;;  %v10049_v41 = vor.u32 %v11184_v32, %v10046_v5  ;;  %6197 = vmatpush.bf16.msrb.mxu1 %v9793_v14  ;;  %v10180_v63 = vld [vmem:[%s11461_s8 + $0x1550] sm:$0xf]  ;;  %v9925_v4 = vor.u32 %v11157_v62, %v9924_v60 }
 0x2e6   : > { %v10302_v8 = vld [vmem:[%s11461_s8 + $0x1668] sm:$0xf0]  ;;  %v11221_v0 = vld [vmem:[%s11461_s8 + $0x156c] sm:$0xf0] }
 0x2e7   : > { %v11048_v11 = vld [vmem:[%s11461_s8 + $0x100c] sm:$0xf]  ;;  %v10305_v9 = vor.u32 %v11248_v7, %v10302_v8  ;;  %6211 = vmatpush.bf16.msrb.mxu2 %v10049_v41  ;;  %v10436_v1 = vld [vmem:[%s11461_s8 + $0x1750] sm:$0xf]  ;;  %v10181_v32 = vor.u32 %v11221_v0, %v10180_v63 }
 0x2e8   : > { %v9502_v12 = vld [vmem:[%s11461_s8 + $0x1028] sm:$0xf0]  ;;  %v11285_v3 = vld [vmem:[%s11461_s8 + $0x176c] sm:$0xf0] }
 0x2e9   : > { %v11112_v17 = vld [vmem:[%s11461_s8 + $0x120c] sm:$0xf]  ;;  %v9505_v34 = vor.u32 %v11048_v11, %v9502_v12  ;;  %6225 = vmatpush.bf16.msrb.mxu3 %v10305_v9  ;;  %v9636_v5 = vld [vmem:[%s11461_s8 + $0x1110] sm:$0xf]  ;;  %v10437_v38 = vor.u32 %v11285_v3, %v10436_v1 }
 0x2ea   : > { %v9758_v18 = vld [vmem:[%s11461_s8 + $0x1228] sm:$0xf0]  ;;  %v11085_v7 = vld [vmem:[%s11461_s8 + $0x112c] sm:$0xf0] }
 0x2eb   : > { %v11176_v19 = vld [vmem:[%s11461_s8 + $0x140c] sm:$0xf]  ;;  %v9761_v33 = vor.u32 %v11112_v17, %v9758_v18  ;;  %6184 = vmatpush.bf16.msrb.mxu0 %v9505_v34  ;;  %v9892_v8 = vld [vmem:[%s11461_s8 + $0x1310] sm:$0xf]  ;;  %v9637_v17 = vor.u32 %v11085_v7, %v9636_v5  ;;  %v4325_v18 = vpop.f32.mrf.mxu0 }
 0x2ec   : > { %v10014_v27 = vld [vmem:[%s11461_s8 + $0x1428] sm:$0xf0]  ;;  %v11149_v11 = vld [vmem:[%s11461_s8 + $0x132c] sm:$0xf0]  ;;  %v4340_v23 = vadd.f32 %v4339_v16, %v4325_v18  ;;  %v9734_v16 = vld [vmem:[%s11461_s8 + $0x11f0] sm:$0xf0] }
 0x2ed   : > { %v11240_v21 = vld [vmem:[%s11461_s8 + $0x160c] sm:$0xf]  ;;  %v10017_v35 = vor.u32 %v11176_v19, %v10014_v27  ;;  %6198 = vmatpush.bf16.msrb.mxu1 %v9761_v33  ;;  %v10148_v12 = vld [vmem:[%s11461_s8 + $0x1510] sm:$0xf]  ;;  %v9893_v19 = vor.u32 %v11149_v11, %v9892_v8  ;;  %v4353_v33 = vpop.f32.mrf.mxu2 }
 0x2ee   : > { %v10270_v22 = vld [vmem:[%s11461_s8 + $0x1628] sm:$0xf0]  ;;  %6185 = vmatmul.bf16.vlgmr.msrb.gmra.mxu0 %v12864_v10  ;;  %v11213_v14 = vld [vmem:[%s11461_s8 + $0x152c] sm:$0xf0] }
 0x2ef   : > { %v10273_v42 = vor.u32 %v11240_v21, %v10270_v22  ;;  %6212 = vmatpush.bf16.msrb.mxu2 %v10017_v35  ;;  %6233 = vmatpush.bf16.msra.mxu0 %v9733_v43  ;;  %v10404_v41 = vld [vmem:[%s11461_s8 + $0x1710] sm:$0xf]  ;;  %v10149_v9 = vor.u32 %v11213_v14, %v10148_v12  ;;  %v4367_v43 = vpop.f32.mrf.mxu3  ;;  %v2296_v49 = vld [vmem:[#allocation2 + $0x48] sm:$0xff] }
 0x2f0   : > { %6199 = vmatmul.bf16.vlgmr.msrb.gmra.mxu1 %v12867_v13  ;;  %v11077_v27 = vld [vmem:[%s11461_s8 + $0x10ec] sm:$0xf0]  ;;  %v10405_v22 = vor.u32 %v11277_v15, %v10404_v41 }
 0x2f1   : > { %6226 = vmatpush.bf16.msrb.mxu3 %v10273_v42  ;;  %6247 = vmatpush.bf16.msra.mxu1 %v9989_v45  ;;  %v9860_v21 = vld [vmem:[%s11461_s8 + $0x12d0] sm:$0xf]  ;;  %v9605_v29 = vor.u32 %v11077_v27, %v9604_v20  ;;  %v4354_v42 = vadd.f32 %v4353_v33, %v4340_v23  ;;  %v11169_v20 = vld [vmem:[%s11461_s8 + $0x13d4] sm:$0xf] }
 0x2f2   : > { %6213 = vmatmul.bf16.vlgmr.msrb.gmra.mxu2 %v12856_v6  ;;  %v11141_v24 = vld [vmem:[%s11461_s8 + $0x12ec] sm:$0xf0]  ;;  %v11233_v23 = vld [vmem:[%s11461_s8 + $0x15d4] sm:$0xf] }
 0x2f3   : > { %6261 = vmatpush.bf16.msra.mxu2 %v10245_v46  ;;  %6234 = vmatpush.bf16.msra.mxu0 %v9701_v55  ;;  %v10116_v25 = vld [vmem:[%s11461_s8 + $0x14d0] sm:$0xf]  ;;  %v9861_v30 = vor.u32 %v11141_v24, %v9860_v21  ;;  %v4327_v52 = vpop.f32.mrf.mxu0  ;;  %v4341_v55 = vpop.f32.mrf.mxu1  ;;  %v10246_v24 = vld [vmem:[%s11461_s8 + $0x15f0] sm:$0xf0] }
 0x2f4   : > { %6227 = vmatmul.bf16.vlgmr.msrb.gmra.mxu3 %v12861_v36  ;;  %v11205_v26 = vld [vmem:[%s11461_s8 + $0x14ec] sm:$0xf0] }
 0x2f5   : > { %6275 = vmatpush.bf16.msra.mxu3 %v10501_v50  ;;  %6248 = vmatpush.bf16.msra.mxu1 %v9957_v56  ;;  %v10372_v34 = vld [vmem:[%s11461_s8 + $0x16d0] sm:$0xf]  ;;  %v10117_v31 = vor.u32 %v11205_v26, %v10116_v25  ;;  %v4368_v50 = vadd.f32 %v4367_v43, %v4354_v42  ;;  %v4355_v8 = vpop.f32.mrf.mxu2  ;;  %v2304_v25 = vld [vmem:[#allocation2 + $0x28] sm:$0xff]  ;;  %v11161_v42 = vld [vmem:[%s11461_s8 + $0x1394] sm:$0xf] }
 0x2f6   : > { %v11269_v28 = vld [vmem:[%s11461_s8 + $0x16ec] sm:$0xf0]  ;;  %v9958_v43 = vld [vmem:[%s11461_s8 + $0x13b0] sm:$0xf0] }
 0x2f7   : > { %6262 = vmatpush.bf16.msra.mxu2 %v10213_v57  ;;  %6235 = vmatpush.bf16.msra.mxu0 %v9669_v2  ;;  %v9572_v35 = vld [vmem:[%s11461_s8 + $0x1090] sm:$0xf]  ;;  %v10373_v40 = vor.u32 %v11269_v28, %v10372_v34  ;;  %v4379_v59 = vadd.f32 %v4368_v50, %v2296_v49  ;;  %v4369_v15 = vpop.f32.mrf.mxu3  ;;  %v11297_v28 = vld [vmem:[%s11461_s8 + $0x17d4] sm:$0xf]  ;;  %v9961_v50 = vor.u32 %v11161_v42, %v9958_v43 }
 0x2f8   : > { %v11069_v37 = vld [vmem:[%s11461_s8 + $0x10ac] sm:$0xf0]  ;;  %v10342_v42 = vld [vmem:[%s11461_s8 + $0x16b0] sm:$0xf0] }
 0x2f9   : > { %6276 = vmatpush.bf16.msra.mxu3 %v10469_v61  ;;  %6249 = vmatpush.bf16.msra.mxu1 %v9925_v4  ;;  %v9828_v39 = vld [vmem:[%s11461_s8 + $0x1290] sm:$0xf]  ;;  %v9573_v51 = vor.u32 %v11069_v37, %v9572_v35  ;;  %v4342_v61 = vadd.f32 %v4341_v55, %v4327_v52  ;;  %4395 = vst [vmem:[#allocation2 + $0x48] sm:$0xff] %v4379_v59  ;;  %v11097_v35 = vld [vmem:[%s11461_s8 + $0x1194] sm:$0xf] }
 0x2fa   : > { %v11133_v44 = vld [vmem:[%s11461_s8 + $0x12ac] sm:$0xf0]  ;;  %v11089_v52 = vld [vmem:[%s11461_s8 + $0x1154] sm:$0xf] }
 0x2fb   : > { %6263 = vmatpush.bf16.msra.mxu2 %v10181_v32  ;;  %6236 = vmatpush.bf16.msra.mxu0 %v9637_v17  ;;  %v10084_v45 = vld [vmem:[%s11461_s8 + $0x1490] sm:$0xf]  ;;  %v9829_v53 = vor.u32 %v11133_v44, %v9828_v39  ;;  %v4356_v41 = vadd.f32 %v4355_v8, %v4342_v61  ;;  %v10249_v39 = vor.u32 %v11233_v23, %v10246_v24  ;;  %v11281_v59 = vld [vmem:[%s11461_s8 + $0x1754] sm:$0xf] }
 0x2fc   : > { %v11197_v46 = vld [vmem:[%s11461_s8 + $0x14ac] sm:$0xf0]  ;;  %v10406_v8 = vld [vmem:[%s11461_s8 + $0x1730] sm:$0xf0] }
 0x2fd   : > { %6277 = vmatpush.bf16.msra.mxu3 %v10437_v38  ;;  %6250 = vmatpush.bf16.msra.mxu1 %v9893_v19  ;;  %v10340_v47 = vld [vmem:[%s11461_s8 + $0x1690] sm:$0xf]  ;;  %v10085_v54 = vor.u32 %v11197_v46, %v10084_v45  ;;  %v4370_v27 = vadd.f32 %v4369_v15, %v4356_v41  ;;  %v11225_v45 = vld [vmem:[%s11461_s8 + $0x1594] sm:$0xf] }
 0x2fe   : > { %v11261_v48 = vld [vmem:[%s11461_s8 + $0x16ac] sm:$0xf0]  ;;  %v10214_v46 = vld [vmem:[%s11461_s8 + $0x15b0] sm:$0xf0] }
 0x2ff   : > { %6264 = vmatpush.bf16.msra.mxu2 %v10149_v9  ;;  %6237 = vmatpush.bf16.msra.mxu0 %v9605_v29  ;;  %v9540_v56 = vld [vmem:[%s11461_s8 + $0x1050] sm:$0xf]  ;;  %v10341_v60 = vor.u32 %v11261_v48, %v10340_v47  ;;  %v11105_v9 = vld [vmem:[%s11461_s8 + $0x11d4] sm:$0xf] }
 0x300   : > { %v11061_v57 = vld [vmem:[%s11461_s8 + $0x106c] sm:$0xf0]  ;;  %v10502_v29 = vld [vmem:[%s11461_s8 + $0x17f0] sm:$0xf0]  ;;  %v9737_v33 = vor.u32 %v11105_v9, %v9734_v16 }
 0x301   : > { %6278 = vmatpush.bf16.msra.mxu3 %v10405_v22  ;;  %6251 = vmatpush.bf16.msra.mxu1 %v9861_v30  ;;  %v9796_v58 = vld [vmem:[%s11461_s8 + $0x1250] sm:$0xf]  ;;  %v9541_v2 = vor.u32 %v11061_v57, %v9540_v56  ;;  %v9990_v22 = vld [vmem:[%s11461_s8 + $0x13f0] sm:$0xf0]  ;;  %v4387_v30 = vadd.f32 %v4370_v27, %v2304_v25  ;;  %v10505_v44 = vor.u32 %v11297_v28, %v10502_v29 }
 0x302   : > { %v11125_v62 = vld [vmem:[%s11461_s8 + $0x126c] sm:$0xf0]  ;;  %v9993_v37 = vor.u32 %v11169_v20, %v9990_v22  ;;  %v11289_v47 = vld [vmem:[%s11461_s8 + $0x1794] sm:$0xf]  ;;  %v6032_v41 = vpop.f32.mrf.mxu1 }
 0x303   : > { %6265 = vmatpush.bf16.msra.mxu2 %v10117_v31  ;;  %v10052_v63 = vld [vmem:[%s11461_s8 + $0x1450] sm:$0xf]  ;;  %6238 = vmatpush.bf16.msra.mxu0 %v9573_v51  ;;  %v9797_v5 = vor.u32 %v11125_v62, %v9796_v58  ;;  %4403 = vst [vmem:[#allocation2 + $0x28] sm:$0xff] %v4387_v30  ;;  %v10470_v48 = vld [vmem:[%s11461_s8 + $0x17b0] sm:$0xf0]  ;;  %v10217_v51 = vor.u32 %v11225_v45, %v10214_v46 }
 0x304   : > { %v11189_v0 = vld [vmem:[%s11461_s8 + $0x146c] sm:$0xf0]  ;;  %v10473_v55 = vor.u32 %v11289_v47, %v10470_v48  ;;  %v9926_v56 = vld [vmem:[%s11461_s8 + $0x1370] sm:$0xf0] }
 0x305   : > { %6279 = vmatpush.bf16.msra.mxu3 %v10373_v40  ;;  %v10308_v1 = vld [vmem:[%s11461_s8 + $0x1650] sm:$0xf]  ;;  %6252 = vmatpush.bf16.msra.mxu1 %v9829_v53  ;;  %v10053_v7 = vor.u32 %v11189_v0, %v10052_v63  ;;  %v9702_v40 = vld [vmem:[%s11461_s8 + $0x11b0] sm:$0xf0] }
 0x306   : > { %v11253_v3 = vld [vmem:[%s11461_s8 + $0x166c] sm:$0xf0]  ;;  %v9705_v49 = vor.u32 %v11097_v35, %v9702_v40  ;;  %v9670_v53 = vld [vmem:[%s11461_s8 + $0x1170] sm:$0xf0] }
 0x307   : > { %v9508_v4 = vld [vmem:[%s11461_s8 + $0x1010] sm:$0xf]  ;;  %6266 = vmatpush.bf16.msra.mxu2 %v10085_v54  ;;  %v10309_v14 = vor.u32 %v11253_v3, %v10308_v1  ;;  %6239 = vmatpush.bf16.msra.mxu0 %v9541_v2  ;;  %v11153_v54 = vld [vmem:[%s11461_s8 + $0x1354] sm:$0xf]  ;;  %v9673_v61 = vor.u32 %v11089_v52, %v9670_v53 }
 0x308   : > { %v11053_v32 = vld [vmem:[%s11461_s8 + $0x102c] sm:$0xf0]  ;;  %v11217_v57 = vld [vmem:[%s11461_s8 + $0x1554] sm:$0xf]  ;;  %v9929_v62 = vor.u32 %v11153_v54, %v9926_v56 }
 0x309   : > { %v9764_v38 = vld [vmem:[%s11461_s8 + $0x1210] sm:$0xf]  ;;  %6280 = vmatpush.bf16.msra.mxu3 %v10341_v60  ;;  %v9509_v21 = vor.u32 %v11053_v32, %v9508_v4  ;;  %6253 = vmatpush.bf16.msra.mxu1 %v9797_v5  ;;  %v10182_v58 = vld [vmem:[%s11461_s8 + $0x1570] sm:$0xf0] }
 0x30a   : > { %v11117_v11 = vld [vmem:[%s11461_s8 + $0x122c] sm:$0xf0]  ;;  %v10438_v60 = vld [vmem:[%s11461_s8 + $0x1770] sm:$0xf0]  ;;  %v10185_v63 = vor.u32 %v11217_v57, %v10182_v58 }
 0x30b   : > { %v10020_v12 = vld [vmem:[%s11461_s8 + $0x1410] sm:$0xf]  ;;  %6267 = vmatpush.bf16.msra.mxu2 %v10053_v7  ;;  %v9765_v26 = vor.u32 %v11117_v11, %v9764_v38  ;;  %6240 = vmatpush.bf16.msra.mxu0 %v9509_v21  ;;  %v11081_v0 = vld [vmem:[%s11461_s8 + $0x1114] sm:$0xf]  ;;  %v10441_v2 = vor.u32 %v11281_v59, %v10438_v60  ;;  %v6018_v11 = vpop.f32.mrf.mxu0 }
 0x30c   : > { %v11181_v17 = vld [vmem:[%s11461_s8 + $0x142c] sm:$0xf0]  ;;  %v9638_v1 = vld [vmem:[%s11461_s8 + $0x1130] sm:$0xf0]  ;;  %v6033_v9 = vadd.f32 %v6032_v41, %v6018_v11  ;;  %v11110_v41 = vld [vmem:[%s11461_s8 + $0x11f4] sm:$0xf0] }
 0x30d   : > { %v10276_v18 = vld [vmem:[%s11461_s8 + $0x1610] sm:$0xf]  ;;  %v10021_v34 = vor.u32 %v11181_v17, %v10020_v12  ;;  %6281 = vmatpush.bf16.msra.mxu3 %v10309_v14  ;;  %6254 = vmatpush.bf16.msra.mxu1 %v9765_v26  ;;  %v11145_v3 = vld [vmem:[%s11461_s8 + $0x1314] sm:$0xf]  ;;  %v9641_v38 = vor.u32 %v11081_v0, %v9638_v1  ;;  %v6046_v26 = vpop.f32.mrf.mxu2 }
 0x30e   : > { %v11245_v19 = vld [vmem:[%s11461_s8 + $0x162c] sm:$0xf0]  ;;  %6241 = vmatmul.bf16.vlgmr.msra.gmra.mxu0 %v12864_v10  ;;  %v9894_v4 = vld [vmem:[%s11461_s8 + $0x1330] sm:$0xf0] }
 0x30f   : > { %v10277_v31 = vor.u32 %v11245_v19, %v10276_v18  ;;  %6268 = vmatpush.bf16.msra.mxu2 %v10021_v34  ;;  %6289 = vmatpush.bf16.msrb.mxu0 %v9737_v33  ;;  %v11209_v32 = vld [vmem:[%s11461_s8 + $0x1514] sm:$0xf]  ;;  %v9897_v12 = vor.u32 %v11145_v3, %v9894_v4  ;;  %v6060_v33 = vpop.f32.mrf.mxu3 }
 0x310   : > { %6255 = vmatmul.bf16.vlgmr.msra.gmra.mxu1 %v12867_v13  ;;  %v10150_v5 = vld [vmem:[%s11461_s8 + $0x1530] sm:$0xf0] }
 0x311   : > { %6282 = vmatpush.bf16.msra.mxu3 %v10277_v31  ;;  %6303 = vmatpush.bf16.msrb.mxu1 %v9993_v37  ;;  %v11273_v7 = vld [vmem:[%s11461_s8 + $0x1714] sm:$0xf]  ;;  %v10153_v14 = vor.u32 %v11209_v32, %v10150_v5  ;;  %v6047_v31 = vadd.f32 %v6046_v26, %v6033_v9  ;;  %v10252_v9 = vld [vmem:[%s11461_s8 + $0x15d8] sm:$0xf] }
 0x312   : > { %6269 = vmatmul.bf16.vlgmr.msra.gmra.mxu2 %v12856_v6  ;;  %v11073_v15 = vld [vmem:[%s11461_s8 + $0x10d4] sm:$0xf]  ;;  %v10409_v19 = vor.u32 %v11273_v7, %v10406_v8 }
 0x313   : > { %6317 = vmatpush.bf16.msrb.mxu2 %v10249_v39  ;;  %6290 = vmatpush.bf16.msrb.mxu0 %v9705_v49  ;;  %v9606_v17 = vld [vmem:[%s11461_s8 + $0x10f0] sm:$0xf0]  ;;  %v6020_v46 = vpop.f32.mrf.mxu0  ;;  %v6034_v49 = vpop.f32.mrf.mxu1 }
 0x314   : > { %6283 = vmatmul.bf16.vlgmr.msra.gmra.mxu3 %v12861_v36  ;;  %v11137_v18 = vld [vmem:[%s11461_s8 + $0x12d4] sm:$0xf]  ;;  %v9609_v23 = vor.u32 %v11073_v15, %v9606_v17  ;;  %v9996_v15 = vld [vmem:[%s11461_s8 + $0x13d8] sm:$0xf] }
 0x315   : > { %6331 = vmatpush.bf16.msrb.mxu3 %v10505_v44  ;;  %6304 = vmatpush.bf16.msrb.mxu1 %v9961_v50  ;;  %v9862_v16 = vld [vmem:[%s11461_s8 + $0x12f0] sm:$0xf0]  ;;  %v6061_v44 = vadd.f32 %v6060_v33, %v6047_v31  ;;  %v6048_v3 = vpop.f32.mrf.mxu2  ;;  %v9964_v31 = vld [vmem:[%s11461_s8 + $0x1398] sm:$0xf] }
 0x316   : > { %v11201_v20 = vld [vmem:[%s11461_s8 + $0x14d4] sm:$0xf]  ;;  %v9865_v24 = vor.u32 %v11137_v18, %v9862_v16  ;;  %v11238_v16 = vld [vmem:[%s11461_s8 + $0x15f4] sm:$0xf0] }
 0x317   : > { %6318 = vmatpush.bf16.msrb.mxu2 %v10217_v51  ;;  %6291 = vmatpush.bf16.msrb.mxu0 %v9673_v61  ;;  %v10118_v27 = vld [vmem:[%s11461_s8 + $0x14f0] sm:$0xf0]  ;;  %v6062_v8 = vpop.f32.mrf.mxu3  ;;  %v11166_v33 = vld [vmem:[%s11461_s8 + $0x13b4] sm:$0xf0] }
 0x318   : > { %v11265_v21 = vld [vmem:[%s11461_s8 + $0x16d4] sm:$0xf]  ;;  %v10121_v25 = vor.u32 %v11201_v20, %v10118_v27  ;;  %v4418_v20 = vld [vmem:[#allocation2 + $0x40] sm:$0xff] }
 0x319   : > { %6332 = vmatpush.bf16.msrb.mxu3 %v10473_v55  ;;  %6305 = vmatpush.bf16.msrb.mxu1 %v9929_v62  ;;  %v10374_v22 = vld [vmem:[%s11461_s8 + $0x16f0] sm:$0xf0]  ;;  %v6035_v55 = vadd.f32 %v6034_v49, %v6020_v46  ;;  %v9676_v46 = vld [vmem:[%s11461_s8 + $0x1158] sm:$0xf] }
 0x31a   : > { %v11065_v34 = vld [vmem:[%s11461_s8 + $0x1094] sm:$0xf]  ;;  %v10377_v30 = vor.u32 %v11265_v21, %v10374_v22  ;;  %v10508_v22 = vld [vmem:[%s11461_s8 + $0x17d8] sm:$0xf] }
 0x31b   : > { %6319 = vmatpush.bf16.msrb.mxu2 %v10185_v63  ;;  %6292 = vmatpush.bf16.msrb.mxu0 %v9641_v38  ;;  %v9574_v28 = vld [vmem:[%s11461_s8 + $0x10b0] sm:$0xf0]  ;;  %v6049_v7 = vadd.f32 %v6048_v3, %v6035_v55  ;;  %v11278_v3 = vld [vmem:[%s11461_s8 + $0x1734] sm:$0xf0] }
 0x31c   : > { %v11129_v29 = vld [vmem:[%s11461_s8 + $0x1294] sm:$0xf]  ;;  %v9577_v45 = vor.u32 %v11065_v34, %v9574_v28  ;;  %v9708_v34 = vld [vmem:[%s11461_s8 + $0x1198] sm:$0xf] }
 0x31d   : > { %6333 = vmatpush.bf16.msrb.mxu3 %v10441_v2  ;;  %6306 = vmatpush.bf16.msrb.mxu1 %v9897_v12  ;;  %v9830_v35 = vld [vmem:[%s11461_s8 + $0x12b0] sm:$0xf0]  ;;  %v6063_v17 = vadd.f32 %v6062_v8, %v6049_v7  ;;  %v9612_v8 = vld [vmem:[%s11461_s8 + $0x10d8] sm:$0xf] }
 0x31e   : > { %v11193_v37 = vld [vmem:[%s11461_s8 + $0x1494] sm:$0xf]  ;;  %v9833_v47 = vor.u32 %v11129_v29, %v9830_v35  ;;  %v10253_v29 = vor.u32 %v11238_v16, %v10252_v9 }
 0x31f   : > { %6320 = vmatpush.bf16.msrb.mxu2 %v10153_v14  ;;  %v10086_v39 = vld [vmem:[%s11461_s8 + $0x14b0] sm:$0xf0]  ;;  %6293 = vmatpush.bf16.msrb.mxu0 %v9609_v23  ;;  %v9740_v14 = vld [vmem:[%s11461_s8 + $0x11d8] sm:$0xf] }
 0x320   : > { %v11257_v40 = vld [vmem:[%s11461_s8 + $0x1694] sm:$0xf]  ;;  %v10089_v48 = vor.u32 %v11193_v37, %v10086_v39  ;;  %v11302_v23 = vld [vmem:[%s11461_s8 + $0x17f4] sm:$0xf0]  ;;  %v9741_v26 = vor.u32 %v11110_v41, %v9740_v14 }
 0x321   : > { %6334 = vmatpush.bf16.msrb.mxu3 %v10409_v19  ;;  %v4410_v43 = vld [vmem:[#allocation2 + $0x30] sm:$0xff]  ;;  %6307 = vmatpush.bf16.msrb.mxu1 %v9865_v24  ;;  %v10345_v54 = vor.u32 %v11257_v40, %v10342_v42  ;;  %v11174_v19 = vld [vmem:[%s11461_s8 + $0x13f4] sm:$0xf0]  ;;  %v6465_v24 = vadd.f32 %v6063_v17, %v4418_v20  ;;  %v10509_v35 = vor.u32 %v11302_v23, %v10508_v22 }
 0x322   : > { %v11057_v50 = vld [vmem:[%s11461_s8 + $0x1054] sm:$0xf]  ;;  %v6457_v53 = vadd.f32 %v6061_v44, %v4410_v43  ;;  %v9997_v28 = vor.u32 %v11174_v19, %v9996_v15  ;;  %v10220_v37 = vld [vmem:[%s11461_s8 + $0x1598] sm:$0xf]  ;;  %v9965_v44 = vor.u32 %v11166_v33, %v9964_v31  ;;  %v4411_v33 = vld [vmem:[#allocation2] sm:$0xff] }
 0x323   : > { %6321 = vmatpush.bf16.msrb.mxu2 %v10121_v25  ;;  %v9542_v51 = vld [vmem:[%s11461_s8 + $0x1070] sm:$0xf0]  ;;  %6294 = vmatpush.bf16.msrb.mxu0 %v9577_v45  ;;  %6481 = vst [vmem:[#allocation2 + $0x40] sm:$0xff] %v6465_v24  ;;  %v11230_v39 = vld [vmem:[%s11461_s8 + $0x15b4] sm:$0xf0] }
 0x324   : > { %v11121_v52 = vld [vmem:[%s11461_s8 + $0x1254] sm:$0xf]  ;;  %6473 = vst [vmem:[#allocation2 + $0x30] sm:$0xff] %v6457_v53  ;;  %v9545_v61 = vor.u32 %v11057_v50, %v9542_v51  ;;  %v10476_v40 = vld [vmem:[%s11461_s8 + $0x1798] sm:$0xf]  ;;  %v10221_v45 = vor.u32 %v11230_v39, %v10220_v37 }
 0x325   : > { %6335 = vmatpush.bf16.msrb.mxu3 %v10377_v30  ;;  %v9798_v56 = vld [vmem:[%s11461_s8 + $0x1270] sm:$0xf0]  ;;  %6308 = vmatpush.bf16.msrb.mxu1 %v9833_v47  ;;  %v11102_v30 = vld [vmem:[%s11461_s8 + $0x11b4] sm:$0xf0] }
 0x326   : > { %v11185_v57 = vld [vmem:[%s11461_s8 + $0x1454] sm:$0xf]  ;;  %v9801_v0 = vor.u32 %v11121_v52, %v9798_v56  ;;  %v11294_v42 = vld [vmem:[%s11461_s8 + $0x17b4] sm:$0xf0]  ;;  %v9709_v43 = vor.u32 %v11102_v30, %v9708_v34 }
 0x327   : > { %v10054_v58 = vld [vmem:[%s11461_s8 + $0x1470] sm:$0xf0]  ;;  %6322 = vmatpush.bf16.msrb.mxu2 %v10089_v48  ;;  %6295 = vmatpush.bf16.msrb.mxu0 %v9545_v61  ;;  %v11094_v47 = vld [vmem:[%s11461_s8 + $0x1174] sm:$0xf0]  ;;  %v10477_v49 = vor.u32 %v11294_v42, %v10476_v40 }
 0x328   : > { %v11249_v59 = vld [vmem:[%s11461_s8 + $0x1654] sm:$0xf]  ;;  %v10057_v1 = vor.u32 %v11185_v57, %v10054_v58  ;;  %v9932_v48 = vld [vmem:[%s11461_s8 + $0x1358] sm:$0xf]  ;;  %v9677_v55 = vor.u32 %v11094_v47, %v9676_v46  ;;  %v6088_v7 = vpop.f32.mrf.mxu1 }
 0x329   : > { %v10310_v60 = vld [vmem:[%s11461_s8 + $0x1670] sm:$0xf0]  ;;  %6336 = vmatpush.bf16.msrb.mxu3 %v10345_v54  ;;  %6309 = vmatpush.bf16.msrb.mxu1 %v9801_v0  ;;  %v11158_v50 = vld [vmem:[%s11461_s8 + $0x1374] sm:$0xf0] }
 0x32a   : > { %v11049_v62 = vld [vmem:[%s11461_s8 + $0x1014] sm:$0xf]  ;;  %v10313_v5 = vor.u32 %v11249_v59, %v10310_v60  ;;  %v10188_v51 = vld [vmem:[%s11461_s8 + $0x1558] sm:$0xf]  ;;  %v9933_v56 = vor.u32 %v11158_v50, %v9932_v48 }
 0x32b   : > { %v9510_v63 = vld [vmem:[%s11461_s8 + $0x1030] sm:$0xf0]  ;;  %6323 = vmatpush.bf16.msrb.mxu2 %v10057_v1  ;;  %v11222_v52 = vld [vmem:[%s11461_s8 + $0x1574] sm:$0xf0] }
 0x32c   : > { %v11113_v2 = vld [vmem:[%s11461_s8 + $0x1214] sm:$0xf]  ;;  %v9513_v18 = vor.u32 %v11049_v62, %v9510_v63  ;;  %v10444_v53 = vld [vmem:[%s11461_s8 + $0x1758] sm:$0xf]  ;;  %v10189_v57 = vor.u32 %v11222_v52, %v10188_v51 }
 0x32d   : > { %v9766_v4 = vld [vmem:[%s11461_s8 + $0x1230] sm:$0xf0]  ;;  %6337 = vmatpush.bf16.msrb.mxu3 %v10313_v5  ;;  %v11286_v54 = vld [vmem:[%s11461_s8 + $0x1774] sm:$0xf0] }
 0x32e   : > { %v11177_v32 = vld [vmem:[%s11461_s8 + $0x1414] sm:$0xf]  ;;  %v9769_v27 = vor.u32 %v11113_v2, %v9766_v4  ;;  %6296 = vmatpush.bf16.msrb.mxu0 %v9513_v18  ;;  %v9644_v58 = vld [vmem:[%s11461_s8 + $0x1118] sm:$0xf]  ;;  %v10445_v61 = vor.u32 %v11286_v54, %v10444_v53  ;;  %v6074_v4 = vpop.f32.mrf.mxu0 }
 0x32f   : > { %v10022_v38 = vld [vmem:[%s11461_s8 + $0x1430] sm:$0xf0]  ;;  %v11086_v59 = vld [vmem:[%s11461_s8 + $0x1134] sm:$0xf0]  ;;  %v6089_v14 = vadd.f32 %v6088_v7, %v6074_v4  ;;  %v9742_v7 = vld [vmem:[%s11461_s8 + $0x11f8] sm:$0xf0] }
 0x330   : > { %v11241_v11 = vld [vmem:[%s11461_s8 + $0x1614] sm:$0xf]  ;;  %v10025_v21 = vor.u32 %v11177_v32, %v10022_v38  ;;  %6310 = vmatpush.bf16.msrb.mxu1 %v9769_v27  ;;  %v9900_v60 = vld [vmem:[%s11461_s8 + $0x1318] sm:$0xf]  ;;  %v9645_v2 = vor.u32 %v11086_v59, %v9644_v58  ;;  %v6102_v27 = vpop.f32.mrf.mxu2 }
 0x331   : > { %v10278_v12 = vld [vmem:[%s11461_s8 + $0x1630] sm:$0xf0]  ;;  %6297 = vmatmul.bf16.vlgmr.msrb.gmra.mxu0 %v12864_v10  ;;  %v11150_v62 = vld [vmem:[%s11461_s8 + $0x1334] sm:$0xf0] }
 0x332   : > { %v10281_v25 = vor.u32 %v11241_v11, %v10278_v12  ;;  %6324 = vmatpush.bf16.msrb.mxu2 %v10025_v21  ;;  %6345 = vmatpush.bf16.msra.mxu0 %v9741_v26  ;;  %v10156_v63 = vld [vmem:[%s11461_s8 + $0x1518] sm:$0xf]  ;;  %v9901_v32 = vor.u32 %v11150_v62, %v9900_v60  ;;  %v6116_v26 = vpop.f32.mrf.mxu3 }
 0x333   : > { %6311 = vmatmul.bf16.vlgmr.msrb.gmra.mxu1 %v12867_v13  ;;  %v11214_v0 = vld [vmem:[%s11461_s8 + $0x1534] sm:$0xf0] }
 0x334   : > { %6338 = vmatpush.bf16.msrb.mxu3 %v10281_v25  ;;  %6359 = vmatpush.bf16.msra.mxu1 %v9997_v28  ;;  %v10412_v1 = vld [vmem:[%s11461_s8 + $0x1718] sm:$0xf]  ;;  %v10157_v5 = vor.u32 %v11214_v0, %v10156_v63  ;;  %v6103_v25 = vadd.f32 %v6102_v27, %v6089_v14  ;;  %v11234_v14 = vld [vmem:[%s11461_s8 + $0x15dc] sm:$0xf] }
 0x335   : > { %6325 = vmatmul.bf16.vlgmr.msrb.gmra.mxu2 %v12856_v6  ;;  %v11078_v38 = vld [vmem:[%s11461_s8 + $0x10f4] sm:$0xf0]  ;;  %v10413_v12 = vor.u32 %v11278_v3, %v10412_v1 }
 0x336   : > { %6373 = vmatpush.bf16.msra.mxu2 %v10253_v29  ;;  %6346 = vmatpush.bf16.msra.mxu0 %v9709_v43  ;;  %v9868_v11 = vld [vmem:[%s11461_s8 + $0x12d8] sm:$0xf]  ;;  %v9613_v9 = vor.u32 %v11078_v38, %v9612_v8  ;;  %v6076_v39 = vpop.f32.mrf.mxu0  ;;  %v6090_v43 = vpop.f32.mrf.mxu1  ;;  %v11170_v8 = vld [vmem:[%s11461_s8 + $0x13dc] sm:$0xf] }
 0x337   : > { %6339 = vmatmul.bf16.vlgmr.msrb.gmra.mxu3 %v12861_v36  ;;  %v11142_v41 = vld [vmem:[%s11461_s8 + $0x12f4] sm:$0xf0] }
 0x338   : > { %6387 = vmatpush.bf16.msra.mxu3 %v10509_v35  ;;  %6360 = vmatpush.bf16.msra.mxu1 %v9965_v44  ;;  %v10124_v15 = vld [vmem:[%s11461_s8 + $0x14d8] sm:$0xf]  ;;  %v9869_v16 = vor.u32 %v11142_v41, %v9868_v11  ;;  %v6117_v35 = vadd.f32 %v6116_v26, %v6103_v25  ;;  %v6104_v60 = vpop.f32.mrf.mxu2  ;;  %v10254_v41 = vld [vmem:[%s11461_s8 + $0x15f8] sm:$0xf0] }
 0x339   : > { %v11206_v17 = vld [vmem:[%s11461_s8 + $0x14f4] sm:$0xf0]  ;;  %v11162_v25 = vld [vmem:[%s11461_s8 + $0x139c] sm:$0xf] }
 0x33a   : > { %6374 = vmatpush.bf16.msra.mxu2 %v10221_v45  ;;  %6347 = vmatpush.bf16.msra.mxu0 %v9677_v55  ;;  %v10380_v18 = vld [vmem:[%s11461_s8 + $0x16d8] sm:$0xf]  ;;  %v10125_v20 = vor.u32 %v11206_v17, %v10124_v15  ;;  %v6458_v47 = vadd.f32 %v6117_v35, %v4411_v33  ;;  %v6118_v3 = vpop.f32.mrf.mxu3  ;;  %v4419_v15 = vld [vmem:[#allocation2 + $0x20] sm:$0xff]  ;;  %v9966_v26 = vld [vmem:[%s11461_s8 + $0x13b8] sm:$0xf0] }
 0x33b   : > { %v11270_v19 = vld [vmem:[%s11461_s8 + $0x16f4] sm:$0xf0]  ;;  %v9969_v35 = vor.u32 %v11162_v25, %v9966_v26  ;;  %v10350_v25 = vld [vmem:[%s11461_s8 + $0x16b8] sm:$0xf0] }
 0x33c   : > { %6388 = vmatpush.bf16.msra.mxu3 %v10477_v49  ;;  %6361 = vmatpush.bf16.msra.mxu1 %v9933_v56  ;;  %v9580_v21 = vld [vmem:[%s11461_s8 + $0x1098] sm:$0xf]  ;;  %v10381_v24 = vor.u32 %v11270_v19, %v10380_v18  ;;  %v6091_v49 = vadd.f32 %v6090_v43, %v6076_v39  ;;  %6474 = vst [vmem:[#allocation2] sm:$0xff] %v6458_v47  ;;  %v11298_v19 = vld [vmem:[%s11461_s8 + $0x17dc] sm:$0xf] }
 0x33d   : > { %v11070_v22 = vld [vmem:[%s11461_s8 + $0x10b4] sm:$0xf0]  ;;  %v11090_v39 = vld [vmem:[%s11461_s8 + $0x115c] sm:$0xf] }
 0x33e   : > { %6375 = vmatpush.bf16.msra.mxu2 %v10189_v57  ;;  %6348 = vmatpush.bf16.msra.mxu0 %v9645_v2  ;;  %v9836_v23 = vld [vmem:[%s11461_s8 + $0x1298] sm:$0xf]  ;;  %v9581_v37 = vor.u32 %v11070_v22, %v9580_v21  ;;  %v6105_v1 = vadd.f32 %v6104_v60, %v6091_v49  ;;  %v11098_v21 = vld [vmem:[%s11461_s8 + $0x119c] sm:$0xf] }
 0x33f   : > { %v11134_v34 = vld [vmem:[%s11461_s8 + $0x12b4] sm:$0xf0]  ;;  %v11282_v47 = vld [vmem:[%s11461_s8 + $0x175c] sm:$0xf] }
 0x340   : > { %6389 = vmatpush.bf16.msra.mxu3 %v10445_v61  ;;  %6362 = vmatpush.bf16.msra.mxu1 %v9901_v32  ;;  %v10092_v28 = vld [vmem:[%s11461_s8 + $0x1498] sm:$0xf]  ;;  %v9837_v40 = vor.u32 %v11134_v34, %v9836_v23  ;;  %v6119_v38 = vadd.f32 %v6118_v3, %v6105_v1  ;;  %v10257_v23 = vor.u32 %v11234_v14, %v10254_v41  ;;  %v10414_v60 = vld [vmem:[%s11461_s8 + $0x1738] sm:$0xf0] }
 0x341   : > { %v11198_v29 = vld [vmem:[%s11461_s8 + $0x14b4] sm:$0xf0]  ;;  %v11074_v3 = vld [vmem:[%s11461_s8 + $0x10dc] sm:$0xf] }
 0x342   : > { %6376 = vmatpush.bf16.msra.mxu2 %v10157_v5  ;;  %v10348_v30 = vld [vmem:[%s11461_s8 + $0x1698] sm:$0xf]  ;;  %6349 = vmatpush.bf16.msra.mxu0 %v9613_v9  ;;  %v10093_v42 = vor.u32 %v11198_v29, %v10092_v28  ;;  %v11106_v5 = vld [vmem:[%s11461_s8 + $0x11dc] sm:$0xf] }
 0x343   : > { %v11262_v31 = vld [vmem:[%s11461_s8 + $0x16b4] sm:$0xf0]  ;;  %v10510_v9 = vld [vmem:[%s11461_s8 + $0x17f8] sm:$0xf0]  ;;  %v9745_v27 = vor.u32 %v11106_v5, %v9742_v7 }
 0x344   : > { %6390 = vmatpush.bf16.msra.mxu3 %v10413_v12  ;;  %6363 = vmatpush.bf16.msra.mxu1 %v9869_v16  ;;  %v9548_v44 = vld [vmem:[%s11461_s8 + $0x1058] sm:$0xf]  ;;  %v10349_v48 = vor.u32 %v11262_v31, %v10348_v30  ;;  %v9998_v12 = vld [vmem:[%s11461_s8 + $0x13f8] sm:$0xf0]  ;;  %v6466_v16 = vadd.f32 %v6119_v38, %v4419_v15  ;;  %v10513_v34 = vor.u32 %v11298_v19, %v10510_v9 }
 0x345   : > { %v11062_v45 = vld [vmem:[%s11461_s8 + $0x1074] sm:$0xf0]  ;;  %v10001_v22 = vor.u32 %v11170_v8, %v9998_v12  ;;  %v11226_v28 = vld [vmem:[%s11461_s8 + $0x159c] sm:$0xf] }
 0x346   : > { %6377 = vmatpush.bf16.msra.mxu2 %v10125_v20  ;;  %v9804_v46 = vld [vmem:[%s11461_s8 + $0x1258] sm:$0xf]  ;;  %6350 = vmatpush.bf16.msra.mxu0 %v9581_v37  ;;  %v9549_v55 = vor.u32 %v11062_v45, %v9548_v44  ;;  %6482 = vst [vmem:[#allocation2 + $0x20] sm:$0xff] %v6466_v16  ;;  %v10222_v29 = vld [vmem:[%s11461_s8 + $0x15b8] sm:$0xf0] }
 0x347   : > { %v11126_v50 = vld [vmem:[%s11461_s8 + $0x1274] sm:$0xf0]  ;;  %v11290_v30 = vld [vmem:[%s11461_s8 + $0x179c] sm:$0xf]  ;;  %v10225_v37 = vor.u32 %v11226_v28, %v10222_v29 }
 0x348   : > { %6391 = vmatpush.bf16.msra.mxu3 %v10381_v24  ;;  %v10060_v51 = vld [vmem:[%s11461_s8 + $0x1458] sm:$0xf]  ;;  %6364 = vmatpush.bf16.msra.mxu1 %v9837_v40  ;;  %v9805_v58 = vor.u32 %v11126_v50, %v9804_v46  ;;  %v9710_v24 = vld [vmem:[%s11461_s8 + $0x11b8] sm:$0xf0]  ;;  %v6144_v1 = vpop.f32.mrf.mxu1 }
 0x349   : > { %v11190_v52 = vld [vmem:[%s11461_s8 + $0x1474] sm:$0xf0]  ;;  %v10478_v31 = vld [vmem:[%s11461_s8 + $0x17b8] sm:$0xf0]  ;;  %v9713_v33 = vor.u32 %v11098_v21, %v9710_v24 }
 0x34a   : > { %v10316_v53 = vld [vmem:[%s11461_s8 + $0x1658] sm:$0xf]  ;;  %6378 = vmatpush.bf16.msra.mxu2 %v10093_v42  ;;  %v10061_v59 = vor.u32 %v11190_v52, %v10060_v51  ;;  %6351 = vmatpush.bf16.msra.mxu0 %v9549_v55  ;;  %v9678_v40 = vld [vmem:[%s11461_s8 + $0x1178] sm:$0xf0]  ;;  %v10481_v43 = vor.u32 %v11290_v30, %v10478_v31 }
 0x34b   : > { %v11254_v54 = vld [vmem:[%s11461_s8 + $0x1674] sm:$0xf0]  ;;  %v11154_v42 = vld [vmem:[%s11461_s8 + $0x135c] sm:$0xf]  ;;  %v9681_v49 = vor.u32 %v11090_v39, %v9678_v40 }
 0x34c   : > { %v9516_v56 = vld [vmem:[%s11461_s8 + $0x1018] sm:$0xf]  ;;  %6392 = vmatpush.bf16.msra.mxu3 %v10349_v48  ;;  %v10317_v0 = vor.u32 %v11254_v54, %v10316_v53  ;;  %6365 = vmatpush.bf16.msra.mxu1 %v9805_v58  ;;  %v9934_v44 = vld [vmem:[%s11461_s8 + $0x1378] sm:$0xf0] }
 0x34d   : > { %v11054_v57 = vld [vmem:[%s11461_s8 + $0x1034] sm:$0xf0]  ;;  %v11218_v45 = vld [vmem:[%s11461_s8 + $0x155c] sm:$0xf]  ;;  %v9937_v50 = vor.u32 %v11154_v42, %v9934_v44 }
 0x34e   : > { %v9772_v61 = vld [vmem:[%s11461_s8 + $0x1218] sm:$0xf]  ;;  %v9517_v11 = vor.u32 %v11054_v57, %v9516_v56  ;;  %6379 = vmatpush.bf16.msra.mxu2 %v10061_v59  ;;  %v10190_v46 = vld [vmem:[%s11461_s8 + $0x1578] sm:$0xf0] }
 0x34f   : > { %v11118_v62 = vld [vmem:[%s11461_s8 + $0x1234] sm:$0xf0]  ;;  %v10446_v48 = vld [vmem:[%s11461_s8 + $0x1778] sm:$0xf0]  ;;  %v10193_v51 = vor.u32 %v11218_v45, %v10190_v46 }
 0x350   : > { %v10028_v63 = vld [vmem:[%s11461_s8 + $0x1418] sm:$0xf]  ;;  %v9773_v17 = vor.u32 %v11118_v62, %v9772_v61  ;;  %6393 = vmatpush.bf16.msra.mxu3 %v10317_v0  ;;  %6352 = vmatpush.bf16.msra.mxu0 %v9517_v11  ;;  %v11082_v52 = vld [vmem:[%s11461_s8 + $0x111c] sm:$0xf]  ;;  %v10449_v55 = vor.u32 %v11282_v47, %v10446_v48  ;;  %v6130_v62 = vpop.f32.mrf.mxu0 }
 0x351   : > { %v11182_v2 = vld [vmem:[%s11461_s8 + $0x1434] sm:$0xf0]  ;;  %v9646_v53 = vld [vmem:[%s11461_s8 + $0x1138] sm:$0xf0]  ;;  %v6145_v5 = vadd.f32 %v6144_v1, %v6130_v62 }
 0x352   : > { %v10284_v4 = vld [vmem:[%s11461_s8 + $0x1618] sm:$0xf]  ;;  %v10029_v18 = vor.u32 %v11182_v2, %v10028_v63  ;;  %6366 = vmatpush.bf16.msra.mxu1 %v9773_v17  ;;  %v11146_v54 = vld [vmem:[%s11461_s8 + $0x131c] sm:$0xf]  ;;  %v9649_v61 = vor.u32 %v11082_v52, %v9646_v53  ;;  %v6158_v17 = vpop.f32.mrf.mxu2 }
 0x353   : > { %v11246_v32 = vld [vmem:[%s11461_s8 + $0x1634] sm:$0xf0]  ;;  %6353 = vmatmul.bf16.vlgmr.msra.gmra.mxu0 %v12864_v10  ;;  %v9902_v56 = vld [vmem:[%s11461_s8 + $0x1338] sm:$0xf0] }
 0x354   : > { %v10285_v20 = vor.u32 %v11246_v32, %v10284_v4  ;;  %6380 = vmatpush.bf16.msra.mxu2 %v10029_v18  ;;  %6401 = vmatpush.bf16.msrb.mxu0 %v9745_v27  ;;  %v11210_v57 = vld [vmem:[%s11461_s8 + $0x151c] sm:$0xf]  ;;  %v9905_v63 = vor.u32 %v11146_v54, %v9902_v56  ;;  %v6172_v27 = vpop.f32.mrf.mxu3 }
 0x355   : > { %6367 = vmatmul.bf16.vlgmr.msra.gmra.mxu1 %v12867_v13  ;;  %v10158_v58 = vld [vmem:[%s11461_s8 + $0x1538] sm:$0xf0] }
 0x356   : > { %6394 = vmatpush.bf16.msra.mxu3 %v10285_v20  ;;  %6415 = vmatpush.bf16.msrb.mxu1 %v10001_v22  ;;  %v11274_v59 = vld [vmem:[%s11461_s8 + $0x171c] sm:$0xf]  ;;  %v10161_v0 = vor.u32 %v11210_v57, %v10158_v58  ;;  %v6159_v20 = vadd.f32 %v6158_v17, %v6145_v5 }
 0x357   : > { %6381 = vmatmul.bf16.vlgmr.msra.gmra.mxu2 %v12856_v6  ;;  %v9614_v2 = vld [vmem:[%s11461_s8 + $0x10f8] sm:$0xf0]  ;;  %v10417_v32 = vor.u32 %v11274_v59, %v10414_v60 }
 0x358   : > { %6429 = vmatpush.bf16.msrb.mxu2 %v10257_v23  ;;  %6402 = vmatpush.bf16.msrb.mxu0 %v9713_v33  ;;  %v11138_v4 = vld [vmem:[%s11461_s8 + $0x12dc] sm:$0xf]  ;;  %v9617_v14 = vor.u32 %v11074_v3, %v9614_v2  ;;  %v6132_v29 = vpop.f32.mrf.mxu0  ;;  %v6146_v33 = vpop.f32.mrf.mxu1  ;;  %v4420_v3 = vld [vmem:[#allocation2 + $0x10] sm:$0xff] }
 0x359   : > { %6395 = vmatmul.bf16.vlgmr.msra.gmra.mxu3 %v12861_v36  ;;  %v9870_v7 = vld [vmem:[%s11461_s8 + $0x12f8] sm:$0xf0] }
 0x35a   : > { %6443 = vmatpush.bf16.msrb.mxu3 %v10513_v34  ;;  %6416 = vmatpush.bf16.msrb.mxu1 %v9969_v35  ;;  %v11202_v8 = vld [vmem:[%s11461_s8 + $0x14dc] sm:$0xf]  ;;  %v9873_v41 = vor.u32 %v11138_v4, %v9870_v7  ;;  %v6173_v34 = vadd.f32 %v6172_v27, %v6159_v20  ;;  %v6160_v52 = vpop.f32.mrf.mxu2 }
 0x35b   : > { %v10126_v38 = vld [vmem:[%s11461_s8 + $0x14f8] sm:$0xf0] }
 0x35c   : > { %6430 = vmatpush.bf16.msrb.mxu2 %v10225_v37  ;;  %6403 = vmatpush.bf16.msrb.mxu0 %v9681_v49  ;;  %v11266_v11 = vld [vmem:[%s11461_s8 + $0x16dc] sm:$0xf]  ;;  %v10129_v15 = vor.u32 %v11202_v8, %v10126_v38  ;;  %v6174_v58 = vpop.f32.mrf.mxu3 }
 0x35d   : > { %v10382_v12 = vld [vmem:[%s11461_s8 + $0x16f8] sm:$0xf0] }
 0x35e   : > { %6444 = vmatpush.bf16.msrb.mxu3 %v10481_v43  ;;  %6417 = vmatpush.bf16.msrb.mxu1 %v9937_v50  ;;  %v11066_v18 = vld [vmem:[%s11461_s8 + $0x109c] sm:$0xf]  ;;  %v10385_v16 = vor.u32 %v11266_v11, %v10382_v12  ;;  %v6147_v43 = vadd.f32 %v6146_v33, %v6132_v29 }
 0x35f   : > { %v9582_v19 = vld [vmem:[%s11461_s8 + $0x10b8] sm:$0xf0] }
 0x360   : > { %6431 = vmatpush.bf16.msrb.mxu2 %v10193_v51  ;;  %6404 = vmatpush.bf16.msrb.mxu0 %v9649_v61  ;;  %v11130_v9 = vld [vmem:[%s11461_s8 + $0x129c] sm:$0xf]  ;;  %v9585_v28 = vor.u32 %v11066_v18, %v9582_v19  ;;  %v6161_v57 = vadd.f32 %v6160_v52, %v6147_v43 }
 0x361   : > { %v9838_v21 = vld [vmem:[%s11461_s8 + $0x12b8] sm:$0xf0] }
 0x362   : > { %6445 = vmatpush.bf16.msrb.mxu3 %v10449_v55  ;;  %6418 = vmatpush.bf16.msrb.mxu1 %v9905_v63  ;;  %v11194_v22 = vld [vmem:[%s11461_s8 + $0x149c] sm:$0xf]  ;;  %v9841_v30 = vor.u32 %v11130_v9, %v9838_v21 }
 0x363   : > { %v10094_v23 = vld [vmem:[%s11461_s8 + $0x14b8] sm:$0xf0] }
 0x364   : > { %6432 = vmatpush.bf16.msrb.mxu2 %v10161_v0  ;;  %v11258_v24 = vld [vmem:[%s11461_s8 + $0x169c] sm:$0xf]  ;;  %6405 = vmatpush.bf16.msrb.mxu0 %v9617_v14  ;;  %v10097_v31 = vor.u32 %v11194_v22, %v10094_v23  ;;  %v6175_v0 = vadd.f32 %v6174_v58, %v6161_v57 }
 0x365   : > { %v4412_v26 = vld [vmem:[#allocation2 + $0x58] sm:$0xff]  ;;  %v10353_v42 = vor.u32 %v11258_v24, %v10350_v25 }
 0x366   : > { %6446 = vmatpush.bf16.msrb.mxu3 %v10417_v32  ;;  %6419 = vmatpush.bf16.msrb.mxu1 %v9873_v41  ;;  %v11058_v35 = vld [vmem:[%s11461_s8 + $0x105c] sm:$0xf]  ;;  %v6459_v40 = vadd.f32 %v6173_v34, %v4412_v26  ;;  %v6467_v32 = vadd.f32 %v6175_v0, %v4420_v3 }
 0x367   : > { %v9550_v37 = vld [vmem:[%s11461_s8 + $0x1078] sm:$0xf0] }
 0x368   : > { %6433 = vmatpush.bf16.msrb.mxu2 %v10129_v15  ;;  %v11122_v39 = vld [vmem:[%s11461_s8 + $0x125c] sm:$0xf]  ;;  %6475 = vst [vmem:[#allocation2 + $0x58] sm:$0xff] %v6459_v40  ;;  %6406 = vmatpush.bf16.msrb.mxu0 %v9585_v28  ;;  %v9553_v49 = vor.u32 %v11058_v35, %v9550_v37  ;;  %v4414_v28 = vld [vmem:[#allocation2 + $0x50] sm:$0xff]  ;;  %v4422_v40 = vld [vmem:[#allocation2 + $0x60] sm:$0xff] }
 0x369   : > { %v9806_v44 = vld [vmem:[%s11461_s8 + $0x1278] sm:$0xf0]  ;;  %6483 = vst [vmem:[#allocation2 + $0x10] sm:$0xff] %v6467_v32  ;;  %v4416_v32 = vld [vmem:[#allocation2 + $0x8] sm:$0xff] }
 0x36a   : > { %6447 = vmatpush.bf16.msrb.mxu3 %v10385_v16  ;;  %v11186_v45 = vld [vmem:[%s11461_s8 + $0x145c] sm:$0xf]  ;;  %6420 = vmatpush.bf16.msrb.mxu1 %v9841_v30  ;;  %v9809_v50 = vor.u32 %v11122_v39, %v9806_v44 }
 0x36b   : > { %v10062_v46 = vld [vmem:[%s11461_s8 + $0x1478] sm:$0xf0]  ;;  %v6186_v7 = vpop.f32.mrf.mxu0 }
 0x36c   : > { %v11250_v47 = vld [vmem:[%s11461_s8 + $0x165c] sm:$0xf]  ;;  %6434 = vmatpush.bf16.msrb.mxu2 %v10097_v31  ;;  %v10065_v51 = vor.u32 %v11186_v45, %v10062_v46  ;;  %6407 = vmatpush.bf16.msrb.mxu0 %v9553_v49 }
 0x36d   : > { %v10318_v48 = vld [vmem:[%s11461_s8 + $0x1678] sm:$0xf0]  ;;  %v6200_v8 = vpop.f32.mrf.mxu1 }
 0x36e   : > { %v11050_v53 = vld [vmem:[%s11461_s8 + $0x101c] sm:$0xf]  ;;  %6448 = vmatpush.bf16.msrb.mxu3 %v10353_v42  ;;  %v10321_v56 = vor.u32 %v11250_v47, %v10318_v48  ;;  %6421 = vmatpush.bf16.msrb.mxu1 %v9809_v50  ;;  %v6201_v38 = vadd.f32 %v6200_v8, %v6186_v7 }
 0x36f   : > { %v9518_v54 = vld [vmem:[%s11461_s8 + $0x1038] sm:$0xf0] }
 0x370   : > { %v11114_v55 = vld [vmem:[%s11461_s8 + $0x121c] sm:$0xf]  ;;  %v9521_v1 = vor.u32 %v11050_v53, %v9518_v54  ;;  %6435 = vmatpush.bf16.msrb.mxu2 %v10065_v51  ;;  %v4415_v51 = vld [vmem:[#allocation2 + $0x68] sm:$0xff] }
 0x371   : > { %v9774_v59 = vld [vmem:[%s11461_s8 + $0x1238] sm:$0xf0] }
 0x372   : > { %v11178_v60 = vld [vmem:[%s11461_s8 + $0x141c] sm:$0xf]  ;;  %v9777_v2 = vor.u32 %v11114_v55, %v9774_v59  ;;  %6449 = vmatpush.bf16.msrb.mxu3 %v10321_v56  ;;  %6408 = vmatpush.bf16.msrb.mxu0 %v9521_v1  ;;  %v4423_v59 = vld [vmem:[#allocation2 + $0x70] sm:$0xff] }
 0x373   : > { %v10030_v61 = vld [vmem:[%s11461_s8 + $0x1438] sm:$0xf0]  ;;  %v6188_v15 = vpop.f32.mrf.mxu0 }
 0x374   : > { %v11242_v62 = vld [vmem:[%s11461_s8 + $0x161c] sm:$0xf]  ;;  %v10033_v4 = vor.u32 %v11178_v60, %v10030_v61  ;;  %6422 = vmatpush.bf16.msrb.mxu1 %v9777_v2 }
 0x375   : > { %v10286_v63 = vld [vmem:[%s11461_s8 + $0x1638] sm:$0xf0]  ;;  %6409 = vmatmul.bf16.vlgmr.msrb.gmra.mxu0 %v12864_v10  ;;  %v6214_v11 = vpop.f32.mrf.mxu2  ;;  %v6202_v18 = vpop.f32.mrf.mxu1 }
 0x376   : > { %v10289_v5 = vor.u32 %v11242_v62, %v10286_v63  ;;  %6436 = vmatpush.bf16.msrb.mxu2 %v10033_v4  ;;  %v6215_v12 = vadd.f32 %v6214_v11, %v6201_v38  ;;  %v4413_v17 = vld [vmem:[#allocation2 + $0x18] sm:$0xff]  ;;  %v6203_v9 = vadd.f32 %v6202_v18, %v6188_v15 }
 0x377   : > { %6423 = vmatmul.bf16.vlgmr.msrb.gmra.mxu1 %v12867_v13  ;;  %v6228_v14 = vpop.f32.mrf.mxu3 }
 0x378   : > { %6450 = vmatpush.bf16.msrb.mxu3 %v10289_v5  ;;  %v6229_v41 = vadd.f32 %v6228_v14, %v6215_v12 }
 0x379   : > { %6437 = vmatmul.bf16.vlgmr.msrb.gmra.mxu2 %v12856_v6  ;;  %v4421_v6 = vld [vmem:[#allocation2 + $0x38] sm:$0xff] }
 0x37a   : > { %v6460_v19 = vadd.f32 %v6229_v41, %v4413_v17  ;;  %v4424_v41 = vld [vmem:[#allocation2 + $0x78] sm:$0xff] }
 0x37b   : > { %6451 = vmatmul.bf16.vlgmr.msrb.gmra.mxu3 %v12861_v36 }
 0x37c   : > { %6476 = vst [vmem:[#allocation2 + $0x18] sm:$0xff] %v6460_v19 }
 0x37d   : > { %v6216_v10 = vpop.f32.mrf.mxu2 }
 0x37e   : > { %v6217_v16 = vadd.f32 %v6216_v10, %v6203_v9 }
 0x37f   : > { %v6230_v13 = vpop.f32.mrf.mxu3 }
 0x380   : > { %v6231_v20 = vadd.f32 %v6230_v13, %v6217_v16 }
 0x382   : > { %v6468_v27 = vadd.f32 %v6231_v20, %v4421_v6  ;;  %v4417_v20 = vld [vmem:[#allocation2 + $0x48] sm:$0xff] }
 0x384   : > { %6484 = vst [vmem:[#allocation2 + $0x38] sm:$0xff] %v6468_v27 }
 0x38b   : > { %v6242_v36 = vpop.f32.mrf.mxu0 }
 0x38d   : > { %v6256_v21 = vpop.f32.mrf.mxu1 }
 0x38e   : > { %v6257_v22 = vadd.f32 %v6256_v21, %v6242_v36 }
 0x393   : > { %v6244_v34 = vpop.f32.mrf.mxu0 }
 0x395   : > { %v6270_v23 = vpop.f32.mrf.mxu2  ;;  %v6258_v29 = vpop.f32.mrf.mxu1 }
 0x396   : > { %v6271_v24 = vadd.f32 %v6270_v23, %v6257_v22  ;;  %v6259_v31 = vadd.f32 %v6258_v29, %v6244_v34 }
 0x397   : > { %v6284_v25 = vpop.f32.mrf.mxu3 }
 0x398   : > { %v6285_v26 = vadd.f32 %v6284_v25, %v6271_v24 }
 0x39a   : > { %v6461_v30 = vadd.f32 %v6285_v26, %v4414_v28  ;;  %v4425_v26 = vld [vmem:[#allocation2 + $0x28] sm:$0xff] }
 0x39c   : > { %6477 = vst [vmem:[#allocation2 + $0x50] sm:$0xff] %v6461_v30 }
 0x39d   : > { %v6272_v33 = vpop.f32.mrf.mxu2 }
 0x39e   : > { %v6273_v35 = vadd.f32 %v6272_v33, %v6259_v31 }
 0x39f   : > { %v6286_v37 = vpop.f32.mrf.mxu3 }
 0x3a0   : > { %v6287_v39 = vadd.f32 %v6286_v37, %v6273_v35 }
 0x3a2   : > { %v6469_v42 = vadd.f32 %v6287_v39, %v4422_v40 }
 0x3a4   : > { %6485 = vst [vmem:[#allocation2 + $0x60] sm:$0xff] %v6469_v42 }
 0x3ae   : > { %v6298_v43 = vpop.f32.mrf.mxu0 }
 0x3b0   : > { %v6312_v44 = vpop.f32.mrf.mxu1 }
 0x3b1   : > { %v6313_v45 = vadd.f32 %v6312_v44, %v6298_v43 }
 0x3b6   : > { %v6300_v50 = vpop.f32.mrf.mxu0 }
 0x3b8   : > { %v6326_v46 = vpop.f32.mrf.mxu2  ;;  %v6314_v52 = vpop.f32.mrf.mxu1 }
 0x3b9   : > { %v6327_v47 = vadd.f32 %v6326_v46, %v6313_v45  ;;  %v6315_v54 = vadd.f32 %v6314_v52, %v6300_v50 }
 0x3ba   : > { %v6340_v48 = vpop.f32.mrf.mxu3 }
 0x3bb   : > { %v6341_v49 = vadd.f32 %v6340_v48, %v6327_v47 }
 0x3bd   : > { %v6462_v53 = vadd.f32 %v6341_v49, %v4415_v51 }
 0x3bf   : > { %6478 = vst [vmem:[#allocation2 + $0x68] sm:$0xff] %v6462_v53 }
 0x3c0   : > { %v6328_v55 = vpop.f32.mrf.mxu2 }
 0x3c1   : > { %v6329_v56 = vadd.f32 %v6328_v55, %v6315_v54 }
 0x3c2   : > { %v6342_v57 = vpop.f32.mrf.mxu3 }
 0x3c3   : > { %v6343_v58 = vadd.f32 %v6342_v57, %v6329_v56 }
 0x3c5   : > { %v6470_v60 = vadd.f32 %v6343_v58, %v4423_v59 }
 0x3c7   : > { %6486 = vst [vmem:[#allocation2 + $0x70] sm:$0xff] %v6470_v60 }
 0x3d0   : > { %v6354_v61 = vpop.f32.mrf.mxu0 }
 0x3d2   : > { %v6368_v62 = vpop.f32.mrf.mxu1 }
 0x3d3   : > { %v6369_v63 = vadd.f32 %v6368_v62, %v6354_v61 }
 0x3d8   : > { %v6356_v4 = vpop.f32.mrf.mxu0 }
 0x3da   : > { %v6382_v0 = vpop.f32.mrf.mxu2  ;;  %v6370_v5 = vpop.f32.mrf.mxu1 }
 0x3db   : > { %v6383_v1 = vadd.f32 %v6382_v0, %v6369_v63  ;;  %v6371_v8 = vadd.f32 %v6370_v5, %v6356_v4 }
 0x3dc   : > { %v6396_v3 = vpop.f32.mrf.mxu3 }
 0x3dd   : > { %v6397_v2 = vadd.f32 %v6396_v3, %v6383_v1 }
 0x3df   : > { %v6463_v7 = vadd.f32 %v6397_v2, %v4416_v32 }
 0x3e1   : > { %6479 = vst [vmem:[#allocation2 + $0x8] sm:$0xff] %v6463_v7 }
 0x3e2   : > { %v6384_v38 = vpop.f32.mrf.mxu2 }
 0x3e3   : > { %v6385_v11 = vadd.f32 %v6384_v38, %v6371_v8 }
 0x3e4   : > { %v6398_v12 = vpop.f32.mrf.mxu3 }
 0x3e5   : > { %v6399_v14 = vadd.f32 %v6398_v12, %v6385_v11 }
 0x3e7   : > { %v6471_v15 = vadd.f32 %v6399_v14, %v4424_v41 }
 0x3e9   : > { %6487 = vst [vmem:[#allocation2 + $0x78] sm:$0xff] %v6471_v15 }
 0x3f2   : > { %v6410_v17 = vpop.f32.mrf.mxu0 }
 0x3f4   : > { %v6424_v18 = vpop.f32.mrf.mxu1 }
 0x3f5   : > { %v6425_v19 = vadd.f32 %v6424_v18, %v6410_v17 }
 0x3fa   : > { %v6412_v6 = vpop.f32.mrf.mxu0 }
 0x3fc   : > { %v6438_v9 = vpop.f32.mrf.mxu2  ;;  %v6426_v27 = vpop.f32.mrf.mxu1 }
 0x3fd   : > { %v6439_v10 = vadd.f32 %v6438_v9, %v6425_v19  ;;  %v6427_v21 = vadd.f32 %v6426_v27, %v6412_v6 }
 0x3fe   : > { %v6452_v16 = vpop.f32.mrf.mxu3 }
 0x3ff   : > { %v6453_v13 = vadd.f32 %v6452_v16, %v6439_v10 }
 0x401   : > { %v6464_v36 = vadd.f32 %v6453_v13, %v4417_v20 }
 0x403   : > { %6480 = vst [vmem:[#allocation2 + $0x48] sm:$0xff] %v6464_v36 }
 0x404   : > { %v6440_v22 = vpop.f32.mrf.mxu2 }
 0x405   : > { %v6441_v23 = vadd.f32 %v6440_v22, %v6427_v21 }
 0x406   : > { %v6454_v24 = vpop.f32.mrf.mxu3 }
 0x407   : > { %v6455_v25 = vadd.f32 %v6454_v24, %v6441_v23  ;;  %6492 = sbr.rel (%p10514_p8) target bundleno = 1093 (0x445), region = 36 }
 0x409   : > { %v6472_v34 = vadd.f32 %v6455_v25, %v4425_v26 }
 0x40b   : > { %6488 = vst [vmem:[#allocation2 + $0x28] sm:$0xff] %v6472_v34 }
 0x40c   : > { %v6493_v28 = vld [vmem:[#allocation2 + $0x30] sm:$0xff]  ;;  %v6525_v29 = vlaneseq  ;;  %v6494_v30 = vld [vmem:[#allocation2] sm:$0xff]  ;;  %v6495_v33 = vld [vmem:[#allocation2 + $0x58] sm:$0xff]  ;;  %v11387_v45 = vmov 0.0   ;;  %vm6645_vm4 = vcmask 1040384   ;;  %vm6647_vm5 = vcmask 1042434  }
 0x40d   : > { %6509 = vst [vmem:[%s11444_s25] sm:$0xff] %v6493_v28  ;;  %v6496_v35 = vld [vmem:[#allocation2 + $0x18] sm:$0xff]  ;;  %v6497_v39 = vld [vmem:[#allocation2 + $0x50] sm:$0xff]  ;;  %v6498_v42 = vld [vmem:[#allocation2 + $0x68] sm:$0xff]  ;;  %vm6649_vm6 = vcmask 1041408   ;;  %vm6651_vm7 = vcmask 1044484   ;;  %vm6653_vm8 = vcmask 1046534  }
 0x40e   : > { %v6526_v31 = vshrl.u32 %v6525_v29, 7  ;;  %6510 = vst [vmem:[%s11444_s25 + $0x8] sm:$0xff] %v6494_v30  ;;  %v6499_v43 = vld [vmem:[#allocation2 + $0x8] sm:$0xff]  ;;  %v6501_v52 = vld [vmem:[#allocation2 + $0x40] sm:$0xff]  ;;  %v6503_v58 = vld [vmem:[#allocation2 + $0x10] sm:$0xff]  ;;  %vm6655_vm9 = vcmask 1045508  }
 0x40f   : > { %6511 = vst [vmem:[%s11444_s25 + $0x10] sm:$0xff] %v6495_v33  ;;  %v6500_v44 = vld [vmem:[#allocation2 + $0x48] sm:$0xff]  ;;  %v6502_v57 = vld [vmem:[#allocation2 + $0x20] sm:$0xff]  ;;  %v6504_v61 = vld [vmem:[#allocation2 + $0x38] sm:$0xff]  ;;  %vm6657_vm10 = vcmask 1043456  }
 0x410   : > { %v6532_v37 = vand.u32 7, %v6526_v31  ;;  %6512 = vst [vmem:[%s11444_s25 + $0x18] sm:$0xff] %v6496_v35  ;;  %v6527_v40 = vadd.s32 8, %v6526_v31  ;;  %v6505_v62 = vld [vmem:[#allocation2 + $0x60] sm:$0xff]  ;;  %v6506_v3 = vld [vmem:[#allocation2 + $0x70] sm:$0xff]  ;;  %v6507_v2 = vld [vmem:[#allocation2 + $0x78] sm:$0xff] }
 0x411   : > { %6513 = vst [vmem:[%s11444_s25 + $0x20] sm:$0xff] %v6497_v39 }
 0x412   : > { %vm6552_vm2 = vcmp.lt.s32.totalorder %v6532_v37, 6  ;;  %6514 = vst [vmem:[%s11444_s25 + $0x28] sm:$0xff] %v6498_v42  ;;  %v6539_v47 = vand.u32 7, %v6527_v40  ;;  %v6508_v4 = vld [vmem:[#allocation2 + $0x28] sm:$0xff] }
 0x413   : > { %v10515_v46 = vsel %vm6552_vm2, 1.0, %v11387_v45  ;;  %6515 = vst [vmem:[%s11444_s25 + $0x30] sm:$0xff] %v6499_v43 }
 0x414   : > { %v6558_v48 = vmul.f32 %v10515_v46, %v6493_v28  ;;  %v6559_v49 = vmul.f32 %v10515_v46, %v6494_v30  ;;  %v6560_v50 = vmul.f32 %v10515_v46, %v6495_v33  ;;  %v6561_v51 = vmul.f32 %v10515_v46, %v6496_v35  ;;  %6516 = vst [vmem:[%s11444_s25 + $0x38] sm:$0xff] %v6500_v44 }
 0x415   : > { %v13342_v53 = vmul.f32 %v10515_v46, %v6497_v39  ;;  %v13344_v54 = vmul.f32 %v10515_v46, %v6498_v42  ;;  %v13346_v55 = vmul.f32 %v10515_v46, %v6499_v43  ;;  %v13348_v56 = vmul.f32 %v10515_v46, %v6500_v44  ;;  %6517 = vst [vmem:[%s11444_s25 + $0x40] sm:$0xff] %v6501_v52 }
 0x416   : > { %6518 = vst [vmem:[%s11444_s25 + $0x48] sm:$0xff] %v6502_v57  ;;  %v6661_v59 = vmul.f32 %v6558_v48, %v6558_v48  ;;  %v6662_v60 = vmul.f32 %v6559_v49, %v6559_v49  ;;  %v6663_v63 = vmul.f32 %v6560_v50, %v6560_v50  ;;  %v6664_v0 = vmul.f32 %v6561_v51, %v6561_v51 }
 0x417   : > { %6519 = vst [vmem:[%s11444_s25 + $0x50] sm:$0xff] %v6503_v58  ;;  %v13355_v1 = vmul.f32 %v13342_v53, %v13342_v53  ;;  %vm6553_vm3 = vcmp.lt.s32.totalorder %v6539_v47, 6  ;;  %v13360_v32 = vmul.f32 %v13344_v54, %v13344_v54  ;;  %v13364_v5 = vmul.f32 %v13346_v55, %v13346_v55 }
 0x418   : > { %6520 = vst [vmem:[%s11444_s25 + $0x58] sm:$0xff] %v6504_v61  ;;  %v13368_v7 = vmul.f32 %v13348_v56, %v13348_v56  ;;  %v10516_v8 = vsel %vm6553_vm3, 1.0, %v11387_v45 }
 0x419   : > { %6521 = vst [vmem:[%s11444_s25 + $0x60] sm:$0xff] %v6505_v62  ;;  %v6566_v38 = vmul.f32 %v10516_v8, %v6501_v52  ;;  %v6567_v11 = vmul.f32 %v10516_v8, %v6502_v57  ;;  %v6568_v12 = vmul.f32 %v10516_v8, %v6503_v58  ;;  %v6569_v14 = vmul.f32 %v10516_v8, %v6504_v61 }
 0x41a   : > { %6522 = vst [vmem:[%s11444_s25 + $0x68] sm:$0xff] %v6506_v3  ;;  %v6570_v41 = vmul.f32 %v10516_v8, %v6505_v62  ;;  %v6571_v15 = vmul.f32 %v10516_v8, %v6506_v3  ;;  %v6572_v17 = vmul.f32 %v10516_v8, %v6507_v2  ;;  %v6573_v18 = vmul.f32 %v10516_v8, %v6508_v4 }
 0x41b   : > { %6523 = vst [vmem:[%s11444_s25 + $0x70] sm:$0xff] %v6507_v2  ;;  %v6574_v19 = vadd.f32 %v6566_v38, %v6558_v48  ;;  %v6669_v9 = vmul.f32 %v6566_v38, %v6566_v38  ;;  %v6581_v10 = vadd.f32 %v6567_v11, %v6559_v49  ;;  %v6670_v16 = vmul.f32 %v6567_v11, %v6567_v11 }
 0x41c   : > { %6524 = vst [vmem:[%s11444_s25 + $0x78] sm:$0xff] %v6508_v4  ;;  %v6588_v13 = vadd.f32 %v6568_v12, %v6560_v50  ;;  %v6671_v20 = vmul.f32 %v6568_v12, %v6568_v12  ;;  %v6595_v6 = vadd.f32 %v6569_v14, %v6561_v51  ;;  %v6672_v27 = vmul.f32 %v6569_v14, %v6569_v14 }
 0x41d   : > { %v6575_v36 = vrot.slane %v6574_v19, 4  ;;  %v6677_v21 = vadd.f32 %v6669_v9, %v6661_v59  ;;  %v6582_v22 = vrot.slane %v6581_v10, 4  ;;  %v6684_v23 = vadd.f32 %v6670_v16, %v6662_v60 }
 0x41e   : > { %v6589_v24 = vrot.slane %v6588_v13, 4  ;;  %v6691_v25 = vadd.f32 %v6671_v20, %v6663_v63  ;;  %v6596_v26 = vrot.slane %v6595_v6, 4  ;;  %v6698_v34 = vadd.f32 %v6672_v27, %v6664_v0 }
 0x41f   : > { %v6576_v28 = vadd.f32 %v6575_v36, %v6574_v19  ;;  %v6678_v29 = vrot.slane %v6677_v21, 4  ;;  %v6583_v30 = vadd.f32 %v6582_v22, %v6581_v10  ;;  %v6685_v31 = vrot.slane %v6684_v23, 4 }
 0x420   : > { %v6590_v33 = vadd.f32 %v6589_v24, %v6588_v13  ;;  %v6692_v35 = vrot.slane %v6691_v25, 4  ;;  %v6597_v37 = vadd.f32 %v6596_v26, %v6595_v6  ;;  %v6699_v39 = vrot.slane %v6698_v34, 4 }
 0x421   : > { %v6577_v40 = vrot.slane %v6576_v28, 2  ;;  %v6679_v42 = vadd.f32 %v6678_v29, %v6677_v21  ;;  %v6584_v43 = vrot.slane %v6583_v30, 2  ;;  %v6686_v44 = vadd.f32 %v6685_v31, %v6684_v23 }
 0x422   : > { %v6591_v45 = vrot.slane %v6590_v33, 2  ;;  %v6693_v46 = vadd.f32 %v6692_v35, %v6691_v25  ;;  %v6598_v47 = vrot.slane %v6597_v37, 2  ;;  %v6700_v48 = vadd.f32 %v6699_v39, %v6698_v34 }
 0x423   : > { %v13374_v49 = vadd.f32 %v6577_v40, %v6576_v28  ;;  %v6680_v50 = vrot.slane %v6679_v42, 2  ;;  %v13376_v51 = vadd.f32 %v6584_v43, %v6583_v30  ;;  %v6687_v52 = vrot.slane %v6686_v44, 2 }
 0x424   : > { %v13378_v57 = vadd.f32 %v6591_v45, %v6590_v33  ;;  %v6694_v58 = vrot.slane %v6693_v46, 2  ;;  %v13380_v59 = vadd.f32 %v6598_v47, %v6597_v37  ;;  %v6701_v60 = vrot.slane %v6700_v48, 2 }
 0x425   : > { %v6579_v61 = vrot.slane %v13374_v49, 1  ;;  %v13383_v62 = vadd.f32 %v6680_v50, %v6679_v42  ;;  %v6586_v63 = vrot.slane %v13376_v51, 1  ;;  %v13386_v0 = vadd.f32 %v6687_v52, %v6686_v44 }
 0x426   : > { %v6593_v3 = vrot.slane %v13378_v57, 1  ;;  %v13389_v2 = vadd.f32 %v6694_v58, %v6693_v46  ;;  %v6600_v4 = vrot.slane %v13380_v59, 1  ;;  %v13392_v8 = vadd.f32 %v6701_v60, %v6700_v48 }
 0x427   : > { %v6602_v38 = vadd.f32 %v6570_v41, %v13342_v53  ;;  %v6673_v11 = vmul.f32 %v6570_v41, %v6570_v41  ;;  %v6609_v12 = vadd.f32 %v6571_v15, %v13344_v54  ;;  %v6674_v14 = vmul.f32 %v6571_v15, %v6571_v15 }
 0x428   : > { %v6616_v19 = vadd.f32 %v6572_v17, %v13346_v55  ;;  %v6675_v9 = vmul.f32 %v6572_v17, %v6572_v17  ;;  %v6623_v10 = vadd.f32 %v6573_v18, %v13348_v56  ;;  %v6676_v16 = vmul.f32 %v6573_v18, %v6573_v18 }
 0x429   : > { %v6603_v13 = vrot.slane %v6602_v38, 4  ;;  %v6705_v20 = vadd.f32 %v6673_v11, %v13355_v1  ;;  %v6610_v6 = vrot.slane %v6609_v12, 4  ;;  %v6712_v27 = vadd.f32 %v6674_v14, %v13360_v32 }
 0x42a   : > { %v6617_v36 = vrot.slane %v6616_v19, 4  ;;  %v6719_v21 = vadd.f32 %v6675_v9, %v13364_v5  ;;  %v6624_v53 = vrot.slane %v6623_v10, 4  ;;  %v6726_v41 = vadd.f32 %v6676_v16, %v13368_v7 }
 0x42b   : > { %v6604_v54 = vadd.f32 %v6603_v13, %v6602_v38  ;;  %v6706_v15 = vrot.slane %v6705_v20, 4  ;;  %v6611_v22 = vadd.f32 %v6610_v6, %v6609_v12  ;;  %v6713_v55 = vrot.slane %v6712_v27, 4 }
 0x42c   : > { %v6618_v17 = vadd.f32 %v6617_v36, %v6616_v19  ;;  %v6720_v23 = vrot.slane %v6719_v21, 4  ;;  %v6625_v56 = vadd.f32 %v6624_v53, %v6623_v10  ;;  %v6727_v18 = vrot.slane %v6726_v41, 4 }
 0x42d   : > { %v6605_v1 = vrot.slane %v6604_v54, 2  ;;  %v6707_v24 = vadd.f32 %v6706_v15, %v6705_v20  ;;  %v6612_v25 = vrot.slane %v6611_v22, 2  ;;  %v6714_v32 = vadd.f32 %v6713_v55, %v6712_v27 }
 0x42e   : > { %v6619_v5 = vrot.slane %v6618_v17, 2  ;;  %v6721_v26 = vadd.f32 %v6720_v23, %v6719_v21  ;;  %v6626_v7 = vrot.slane %v6625_v56, 2  ;;  %v6728_v34 = vadd.f32 %v6727_v18, %v6726_v41 }
 0x42f   : > { %v6606_v28 = vadd.f32 %v6605_v1, %v6604_v54  ;;  %v6708_v29 = vrot.slane %v6707_v24, 2  ;;  %v6613_v30 = vadd.f32 %v6612_v25, %v6611_v22  ;;  %v6715_v31 = vrot.slane %v6714_v32, 2 }
 0x430   : > { %v6620_v33 = vadd.f32 %v6619_v5, %v6618_v17  ;;  %v6722_v35 = vrot.slane %v6721_v26, 2  ;;  %v6627_v37 = vadd.f32 %v6626_v7, %v6625_v56  ;;  %v6729_v39 = vrot.slane %v6728_v34, 2 }
 0x431   : > { %v6607_v40 = vrot.slane %v6606_v28, 1  ;;  %v6709_v42 = vadd.f32 %v6708_v29, %v6707_v24  ;;  %v6614_v43 = vrot.slane %v6613_v30, 1  ;;  %v6716_v44 = vadd.f32 %v6715_v31, %v6714_v32 }
 0x432   : > { %v6621_v45 = vrot.slane %v6620_v33, 1  ;;  %v6723_v46 = vadd.f32 %v6722_v35, %v6721_v26  ;;  %v6628_v47 = vrot.slane %v6627_v37, 1  ;;  %v6730_v48 = vadd.f32 %v6729_v39, %v6728_v34 }
 0x433   : > { %v6580_v50 = vadd.f32 %v6579_v61, %v13374_v49  ;;  %v6587_v52 = vadd.f32 %v6586_v63, %v13376_v51  ;;  %v6594_v58 = vadd.f32 %v6593_v3, %v13378_v57  ;;  %v6601_v60 = vadd.f32 %v6600_v4, %v13380_v59 }
 0x434   : > { %v6608_v38 = vadd.f32 %v6607_v40, %v6606_v28  ;;  %v6615_v11 = vadd.f32 %v6614_v43, %v6613_v30  ;;  %v6622_v12 = vadd.f32 %v6621_v45, %v6620_v33  ;;  %v6629_v14 = vadd.f32 %v6628_v47, %v6627_v37 }
 0x435   : > { %v6638_v19 = vrot.slane %v6587_v52, 7  ;;  %v6639_v9 = vrot.slane %v6594_v58, 6  ;;  %v6640_v10 = vrot.slane %v6601_v60, 5  ;;  %v6682_v57 = vrot.slane %v13383_v62, 1 }
 0x436   : > { %v6641_v16 = vrot.slane %v6608_v38, 4  ;;  %v6642_v13 = vrot.slane %v6615_v11, 3  ;;  %v6643_v20 = vrot.slane %v6622_v12, 2  ;;  %v6644_v6 = vrot.slane %v6629_v14, 1 }
 0x437   : > { %v6646_v49 = vsel %vm6645_vm4, %v6580_v50, %v6638_v19  ;;  %v6648_v51 = vsel %vm6647_vm5, %v6639_v9, %v6640_v10  ;;  %v6689_v59 = vrot.slane %v13386_v0, 1  ;;  %v6696_v4 = vrot.slane %v13389_v2, 1 }
 0x438   : > { %v6650_v61 = vsel %vm6649_vm6, %v6646_v49, %v6648_v51  ;;  %v6652_v63 = vsel %vm6651_vm7, %v6641_v16, %v6642_v13  ;;  %v6654_v3 = vsel %vm6653_vm8, %v6643_v20, %v6644_v6  ;;  %v6683_v36 = vadd.f32 %v6682_v57, %v13383_v62 }
 0x439   : > { %v6656_v27 = vsel %vm6655_vm9, %v6652_v63, %v6654_v3  ;;  %v6690_v21 = vadd.f32 %v6689_v59, %v13386_v0  ;;  %v6703_v53 = vrot.slane %v13392_v8, 1  ;;  %v6697_v54 = vadd.f32 %v6696_v4, %v13389_v2 }
 0x43a   : > { %v6658_v41 = vsel %vm6657_vm10, %v6650_v61, %v6656_v27  ;;  %v6710_v15 = vrot.slane %v6709_v42, 1  ;;  %v6717_v22 = vrot.slane %v6716_v44, 1  ;;  %v6724_v17 = vrot.slane %v6723_v46, 1 }
 0x43b   : > { %6660 = vst [vmem:[%s11449_s28] ss:$2 sm:$0xff] %v6658_v41  ;;  %v6704_v55 = vadd.f32 %v6703_v53, %v13392_v8  ;;  %v6731_v23 = vrot.slane %v6730_v48, 1  ;;  %v6741_v56 = vrot.slane %v6690_v21, 7  ;;  %v6742_v62 = vrot.slane %v6697_v54, 6 }
 0x43c   : > { %v6711_v18 = vadd.f32 %v6710_v15, %v6709_v42  ;;  %v6718_v1 = vadd.f32 %v6717_v22, %v6716_v44  ;;  %v6725_v24 = vadd.f32 %v6724_v17, %v6723_v46 }
 0x43d   : > { %v6732_v0 = vadd.f32 %v6731_v23, %v6730_v48  ;;  %v6743_v25 = vrot.slane %v6704_v55, 5  ;;  %v6748_v32 = vsel %vm6645_vm4, %v6683_v36, %v6741_v56 }
 0x43e   : > { %v6744_v5 = vrot.slane %v6711_v18, 4  ;;  %v6745_v26 = vrot.slane %v6718_v1, 3  ;;  %v6746_v2 = vrot.slane %v6725_v24, 2 }
 0x43f   : > { %v6747_v7 = vrot.slane %v6732_v0, 1  ;;  %v6749_v34 = vsel %vm6647_vm5, %v6742_v62, %v6743_v25 }
 0x440   : > { %v6750_v8 = vsel %vm6649_vm6, %v6748_v32, %v6749_v34  ;;  %v6751_v28 = vsel %vm6651_vm7, %v6744_v5, %v6745_v26 }
 0x441   : > { %v6752_v29 = vsel %vm6653_vm8, %v6746_v2, %v6747_v7 }
 0x442   : > { %v6753_v30 = vsel %vm6655_vm9, %v6751_v28, %v6752_v29 }
 0x443   : > { %v6754_v31 = vsel %vm6657_vm10, %v6750_v8, %v6753_v30 }
 0x444   : > { %10517 = vst [vmem:[%s11449_s28 + $0x1] ss:$2 sm:$0xff] %v6754_v31 }
 0x445 PF: > { %s14_s16 = sadd.s32 1, %s11384_s16   ;;  %s13449_s12 = smov %s11376_s14 }
 0x446   : > { %p11_p9 = scmp.ge.s32.totalorder %s14_s16, 20   ;;  %s13450_s13 = smov %s11380_s15 }
 0x447   : > { %s13451_s14 = smov %s13454_s17  ;;  %s13452_s15 = smov %s13458_s18 }
 0x448   :  { %13 = sbr.rel (!%p11_p9) target bundleno = 3 (0x3), region = 82 }

// kernel: patch_generator_forward.5
= control target key start
LH: loop header
LB: loop body
LE: loop exit
PB: predicated region body
PF: predicated region fallthrough
CT: control target
= control target key end

     0   :  { %s953_s9 = smov 0   ;;  %s1232_s0 = inlined_call_operand.vmem [shape: f32[2,192,64], index: 0, kind: input, shape index: {}]   ;;  %s1233_s1 = inlined_call_operand.vmem [shape: f32[2,64,512], index: 1, kind: input, shape index: {}]   ;;  %s1234_s2 = inlined_call_operand.vmem [shape: f32[2,192,512], index: 2, kind: output, shape index: {}]  }
   0x1 LB: > { %s812_s10 = sadd.s32 4294967295, %s936_s9   ;;  %p816_p0 = scmp.ge.s32.totalorder %s936_s9, 1  ;;  %s936_s9 = sphi %s953_s9, %s12_s9  }
   0x2   : > { %p122_p1 = scmp.lt.s32.totalorder %s936_s9, 3 }
   0x4   : > { %p123_p2 = pnand %p816_p0, %p122_p1 }
   0x5   : > { %p149_p3 = scmp.lt.s32.totalorder (!%p123_p2), %s812_s10, 1 }
   0x6   : > { %126 = sbr.rel (%p123_p2) target bundleno = 348 (0x15c), region = 28 }
   0xb   : > { %s1236_s10 = smov (!%p149_p3, %s812_s10), 1  ;;  %vm220_vm0 = vcmask 523264  }
   0xc   : > { %s919_s11 = sshll.u32 %s1236_s10, 8  ;;  %s920_s15 = smul.u32 192, %s1236_s10 }
   0xd   : > { %s967_s14 = scalar_lea.vmem %s1233_s1, %s919_s11  ;;  %s921_s19 = smul.u32 768, %s1236_s10 }
   0xe   : > { %v218_v0 = vld [vmem:[%s967_s14 + $0xf0] sm:$0xff]  ;;  %v219_v1 = vld [vmem:[%s967_s14 + $0xf8] sm:$0xff]  ;;  %v216_v6 = vld [vmem:[%s967_s14 + $0xe0] sm:$0xff]  ;;  %s997_s18 = scalar_lea.vmem %s1232_s0, %s920_s15 }
   0xf   : > { %v214_v2 = vld [vmem:[%s967_s14 + $0xd0] sm:$0xff]  ;;  %479 = vmatpush.msra.mxu2 %v218_v0  ;;  %568 = vmatpush.msra.mxu3 %v219_v1  ;;  %v215_v3 = vld [vmem:[%s967_s14 + $0xd8] sm:$0xff]  ;;  %v217_v7 = vld [vmem:[%s967_s14 + $0xe8] sm:$0xff]  ;;  %s1092_s22 = scalar_lea.vmem %s1234_s2, %s921_s19 }
  0x10   : > { %v210_v4 = vld [vmem:[%s967_s14 + $0xb0] sm:$0xff]  ;;  %v211_v5 = vld [vmem:[%s967_s14 + $0xb8] sm:$0xff]  ;;  %v212_v8 = vld [vmem:[%s967_s14 + $0xc0] sm:$0xff]  ;;  %301 = vmatpush.msra.mxu0 %v216_v6  ;;  %390 = vmatpush.msra.mxu1 %v217_v7 }
  0x11   : > { %480 = vmatpush.msra.mxu2 %v214_v2  ;;  %569 = vmatpush.msra.mxu3 %v215_v3  ;;  %v213_v9 = vld [vmem:[%s967_s14 + $0xc8] sm:$0xff]  ;;  %v206_v10 = vld [vmem:[%s967_s14 + $0x90] sm:$0xff]  ;;  %v207_v11 = vld [vmem:[%s967_s14 + $0x98] sm:$0xff] }
  0x12   : > { %v208_v12 = vld [vmem:[%s967_s14 + $0xa0] sm:$0xff]  ;;  %v209_v13 = vld [vmem:[%s967_s14 + $0xa8] sm:$0xff]  ;;  %302 = vmatpush.msra.mxu0 %v212_v8  ;;  %391 = vmatpush.msra.mxu1 %v213_v9  ;;  %v202_v14 = vld [vmem:[%s967_s14 + $0x70] sm:$0xff] }
  0x13   : > { %481 = vmatpush.msra.mxu2 %v210_v4  ;;  %570 = vmatpush.msra.mxu3 %v211_v5  ;;  %v203_v15 = vld [vmem:[%s967_s14 + $0x78] sm:$0xff]  ;;  %v204_v16 = vld [vmem:[%s967_s14 + $0x80] sm:$0xff]  ;;  %v205_v17 = vld [vmem:[%s967_s14 + $0x88] sm:$0xff] }
  0x14   : > { %303 = vmatpush.msra.mxu0 %v208_v12  ;;  %392 = vmatpush.msra.mxu1 %v209_v13  ;;  %v198_v18 = vld [vmem:[%s967_s14 + $0x50] sm:$0xff]  ;;  %v199_v19 = vld [vmem:[%s967_s14 + $0x58] sm:$0xff]  ;;  %v200_v20 = vld [vmem:[%s967_s14 + $0x60] sm:$0xff] }
  0x15   : > { %482 = vmatpush.msra.mxu2 %v206_v10  ;;  %571 = vmatpush.msra.mxu3 %v207_v11  ;;  %v201_v21 = vld [vmem:[%s967_s14 + $0x68] sm:$0xff]  ;;  %v194_v22 = vld [vmem:[%s967_s14 + $0x30] sm:$0xff]  ;;  %v195_v23 = vld [vmem:[%s967_s14 + $0x38] sm:$0xff] }
  0x16   : > { %304 = vmatpush.msra.mxu0 %v204_v16  ;;  %393 = vmatpush.msra.mxu1 %v205_v17  ;;  %v196_v24 = vld [vmem:[%s967_s14 + $0x40] sm:$0xff]  ;;  %v197_v25 = vld [vmem:[%s967_s14 + $0x48] sm:$0xff]  ;;  %v190_v26 = vld [vmem:[%s967_s14 + $0x10] sm:$0xff] }
  0x17   : > { %483 = vmatpush.msra.mxu2 %v202_v14  ;;  %572 = vmatpush.msra.mxu3 %v203_v15  ;;  %v191_v27 = vld [vmem:[%s967_s14 + $0x18] sm:$0xff]  ;;  %v164_v28 = vld [vmem:[%s997_s18] sm:$0xff]  ;;  %v193_v30 = vld [vmem:[%s967_s14 + $0x28] sm:$0xff] }
  0x18   : > { %305 = vmatpush.msra.mxu0 %v200_v20  ;;  %394 = vmatpush.msra.mxu1 %v201_v21  ;;  %v192_v29 = vld [vmem:[%s967_s14 + $0x20] sm:$0xff]  ;;  %v189_v32 = vld [vmem:[%s967_s14 + $0x8] sm:$0xff]  ;;  %v166_v34 = vld [vmem:[%s997_s18 + $0x10] sm:$0xff] }
  0x19   : > { %484 = vmatpush.msra.mxu2 %v198_v18  ;;  %573 = vmatpush.msra.mxu3 %v199_v19  ;;  %v188_v31 = vld [vmem:[%s967_s14] sm:$0xff]  ;;  %v165_v33 = vld [vmem:[%s997_s18 + $0x8] sm:$0xff]  ;;  %v167_v35 = vld [vmem:[%s997_s18 + $0x18] sm:$0xff] }
  0x1a   : > { %306 = vmatpush.msra.mxu0 %v196_v24  ;;  %395 = vmatpush.msra.mxu1 %v197_v25  ;;  %v168_v36 = vld [vmem:[%s997_s18 + $0x20] sm:$0xff]  ;;  %v169_v37 = vld [vmem:[%s997_s18 + $0x28] sm:$0xff]  ;;  %v170_v38 = vld [vmem:[%s997_s18 + $0x30] sm:$0xff] }
  0x1b   : > { %485 = vmatpush.msra.mxu2 %v194_v22  ;;  %574 = vmatpush.msra.mxu3 %v195_v23  ;;  %v171_v39 = vld [vmem:[%s997_s18 + $0x38] sm:$0xff]  ;;  %v172_v40 = vld [vmem:[%s997_s18 + $0x40] sm:$0xff]  ;;  %v173_v41 = vld [vmem:[%s997_s18 + $0x48] sm:$0xff] }
  0x1c   : > { %307 = vmatpush.msra.mxu0 %v192_v29  ;;  %396 = vmatpush.msra.mxu1 %v193_v30  ;;  %v174_v42 = vld [vmem:[%s997_s18 + $0x50] sm:$0xff]  ;;  %v175_v43 = vld [vmem:[%s997_s18 + $0x58] sm:$0xff]  ;;  %v176_v44 = vld [vmem:[%s997_s18 + $0x60] sm:$0xff] }
  0x1d   : > { %486 = vmatpush.msra.mxu2 %v190_v26  ;;  %575 = vmatpush.msra.mxu3 %v191_v27  ;;  %v177_v45 = vld [vmem:[%s997_s18 + $0x68] sm:$0xff]  ;;  %v178_v46 = vld [vmem:[%s997_s18 + $0x70] sm:$0xff]  ;;  %v179_v47 = vld [vmem:[%s997_s18 + $0x78] sm:$0xff] }
  0x1e   : > { %869 = vmatmul.msk.f32.vlgmr.msra.gmra.mxu2 %vm220_vm0, %v164_v28  ;;  %893 = vmatmul.msk.f32.vlgmr.msra.gmra.mxu3 %vm220_vm0, %v164_v28  ;;  %v180_v48 = vld [vmem:[%s997_s18 + $0x80] sm:$0xff]  ;;  %v181_v53 = vld [vmem:[%s997_s18 + $0x88] sm:$0xff]  ;;  %v182_v58 = vld [vmem:[%s997_s18 + $0x90] sm:$0xff] }
  0x1f   : > { %308 = vmatpush.msra.mxu0 %v188_v31  ;;  %397 = vmatpush.msra.mxu1 %v189_v32  ;;  %v183_v63 = vld [vmem:[%s997_s18 + $0x98] sm:$0xff]  ;;  %v184_v4 = vld [vmem:[%s997_s18 + $0xa0] sm:$0xff]  ;;  %v185_v9 = vld [vmem:[%s997_s18 + $0xa8] sm:$0xff] }
  0x20   : > { %821 = vmatmul.msk.f32.vlgmr.msra.gmra.mxu0 %vm220_vm0, %v164_v28  ;;  %845 = vmatmul.msk.f32.vlgmr.msra.gmra.mxu1 %vm220_vm0, %v164_v28  ;;  %v186_v14 = vld [vmem:[%s997_s18 + $0xb0] sm:$0xff]  ;;  %v187_v19 = vld [vmem:[%s997_s18 + $0xb8] sm:$0xff] }
  0x26   : > { %870 = vmatmul.msk.f32.gmra.mxu2 %vm220_vm0, %v165_v33  ;;  %894 = vmatmul.msk.f32.gmra.mxu3 %vm220_vm0, %v165_v33 }
  0x28   : > { %822 = vmatmul.msk.f32.gmra.mxu0 %vm220_vm0, %v165_v33  ;;  %846 = vmatmul.msk.f32.gmra.mxu1 %vm220_vm0, %v165_v33 }
  0x2e   : > { %871 = vmatmul.msk.f32.gmra.mxu2 %vm220_vm0, %v166_v34  ;;  %895 = vmatmul.msk.f32.gmra.mxu3 %vm220_vm0, %v166_v34 }
  0x30   : > { %823 = vmatmul.msk.f32.gmra.mxu0 %vm220_vm0, %v166_v34  ;;  %847 = vmatmul.msk.f32.gmra.mxu1 %vm220_vm0, %v166_v34 }
  0x36   : > { %872 = vmatmul.msk.f32.gmra.mxu2 %vm220_vm0, %v167_v35  ;;  %896 = vmatmul.msk.f32.gmra.mxu3 %vm220_vm0, %v167_v35 }
  0x38   : > { %824 = vmatmul.msk.f32.gmra.mxu0 %vm220_vm0, %v167_v35  ;;  %848 = vmatmul.msk.f32.gmra.mxu1 %vm220_vm0, %v167_v35 }
  0x3e   : > { %873 = vmatmul.msk.f32.gmra.mxu2 %vm220_vm0, %v168_v36  ;;  %897 = vmatmul.msk.f32.gmra.mxu3 %vm220_vm0, %v168_v36 }
  0x40   : > { %825 = vmatmul.msk.f32.gmra.mxu0 %vm220_vm0, %v168_v36  ;;  %849 = vmatmul.msk.f32.gmra.mxu1 %vm220_vm0, %v168_v36 }
  0x46   : > { %874 = vmatmul.msk.f32.gmra.mxu2 %vm220_vm0, %v169_v37  ;;  %898 = vmatmul.msk.f32.gmra.mxu3 %vm220_vm0, %v169_v37 }
  0x48   : > { %826 = vmatmul.msk.f32.gmra.mxu0 %vm220_vm0, %v169_v37  ;;  %850 = vmatmul.msk.f32.gmra.mxu1 %vm220_vm0, %v169_v37 }
  0x4e   : > { %875 = vmatmul.msk.f32.gmra.mxu2 %vm220_vm0, %v170_v38  ;;  %899 = vmatmul.msk.f32.gmra.mxu3 %vm220_vm0, %v170_v38 }
  0x50   : > { %827 = vmatmul.msk.f32.gmra.mxu0 %vm220_vm0, %v170_v38  ;;  %851 = vmatmul.msk.f32.gmra.mxu1 %vm220_vm0, %v170_v38 }
  0x56   : > { %876 = vmatmul.msk.f32.gmra.mxu2 %vm220_vm0, %v171_v39  ;;  %900 = vmatmul.msk.f32.gmra.mxu3 %vm220_vm0, %v171_v39 }
  0x58   : > { %828 = vmatmul.msk.f32.gmra.mxu0 %vm220_vm0, %v171_v39  ;;  %852 = vmatmul.msk.f32.gmra.mxu1 %vm220_vm0, %v171_v39 }
  0x5e   : > { %877 = vmatmul.msk.f32.gmra.mxu2 %vm220_vm0, %v172_v40  ;;  %901 = vmatmul.msk.f32.gmra.mxu3 %vm220_vm0, %v172_v40 }
  0x60   : > { %829 = vmatmul.msk.f32.gmra.mxu0 %vm220_vm0, %v172_v40  ;;  %853 = vmatmul.msk.f32.gmra.mxu1 %vm220_vm0, %v172_v40 }
  0x66   : > { %878 = vmatmul.msk.f32.gmra.mxu2 %vm220_vm0, %v173_v41  ;;  %902 = vmatmul.msk.f32.gmra.mxu3 %vm220_vm0, %v173_v41 }
  0x68   : > { %830 = vmatmul.msk.f32.gmra.mxu0 %vm220_vm0, %v173_v41  ;;  %854 = vmatmul.msk.f32.gmra.mxu1 %vm220_vm0, %v173_v41 }
  0x6e   : > { %879 = vmatmul.msk.f32.gmra.mxu2 %vm220_vm0, %v174_v42  ;;  %903 = vmatmul.msk.f32.gmra.mxu3 %vm220_vm0, %v174_v42 }
  0x70   : > { %831 = vmatmul.msk.f32.gmra.mxu0 %vm220_vm0, %v174_v42  ;;  %855 = vmatmul.msk.f32.gmra.mxu1 %vm220_vm0, %v174_v42 }
  0x76   : > { %880 = vmatmul.msk.f32.gmra.mxu2 %vm220_vm0, %v175_v43  ;;  %904 = vmatmul.msk.f32.gmra.mxu3 %vm220_vm0, %v175_v43 }
  0x78   : > { %832 = vmatmul.msk.f32.gmra.mxu0 %vm220_vm0, %v175_v43  ;;  %856 = vmatmul.msk.f32.gmra.mxu1 %vm220_vm0, %v175_v43 }
  0x7e   : > { %881 = vmatmul.msk.f32.gmra.mxu2 %vm220_vm0, %v176_v44  ;;  %905 = vmatmul.msk.f32.gmra.mxu3 %vm220_vm0, %v176_v44 }
  0x80   : > { %833 = vmatmul.msk.f32.gmra.mxu0 %vm220_vm0, %v176_v44  ;;  %857 = vmatmul.msk.f32.gmra.mxu1 %vm220_vm0, %v176_v44 }
  0x86   : > { %882 = vmatmul.msk.f32.gmra.mxu2 %vm220_vm0, %v177_v45  ;;  %906 = vmatmul.msk.f32.gmra.mxu3 %vm220_vm0, %v177_v45 }
  0x88   : > { %834 = vmatmul.msk.f32.gmra.mxu0 %vm220_vm0, %v177_v45  ;;  %858 = vmatmul.msk.f32.gmra.mxu1 %vm220_vm0, %v177_v45 }
  0x8e   : > { %883 = vmatmul.msk.f32.gmra.mxu2 %vm220_vm0, %v178_v46  ;;  %907 = vmatmul.msk.f32.gmra.mxu3 %vm220_vm0, %v178_v46 }
  0x90   : > { %835 = vmatmul.msk.f32.gmra.mxu0 %vm220_vm0, %v178_v46  ;;  %859 = vmatmul.msk.f32.gmra.mxu1 %vm220_vm0, %v178_v46 }
  0x96   : > { %884 = vmatmul.msk.f32.gmra.mxu2 %vm220_vm0, %v179_v47  ;;  %908 = vmatmul.msk.f32.gmra.mxu3 %vm220_vm0, %v179_v47 }
  0x98   : > { %836 = vmatmul.msk.f32.gmra.mxu0 %vm220_vm0, %v179_v47  ;;  %860 = vmatmul.msk.f32.gmra.mxu1 %vm220_vm0, %v179_v47 }
  0x9d   : > { %v310_v49 = vpop.f32.mrf.mxu0  ;;  %v399_v50 = vpop.f32.mrf.mxu1 }
  0x9e   : > { %885 = vmatmul.msk.f32.gmra.mxu2 %vm220_vm0, %v180_v48  ;;  %909 = vmatmul.msk.f32.gmra.mxu3 %vm220_vm0, %v180_v48  ;;  %649 = vst [vmem:[%s1092_s22] sm:$0xff] %v310_v49 }
  0x9f   : > { %650 = vst [vmem:[%s1092_s22 + $0x8] sm:$0xff] %v399_v50 }
  0xa0   : > { %837 = vmatmul.msk.f32.gmra.mxu0 %vm220_vm0, %v180_v48  ;;  %861 = vmatmul.msk.f32.gmra.mxu1 %vm220_vm0, %v180_v48 }
  0xa1   : > { %v488_v51 = vpop.f32.mrf.mxu2  ;;  %v577_v52 = vpop.f32.mrf.mxu3 }
  0xa2   : > { %651 = vst [vmem:[%s1092_s22 + $0x10] sm:$0xff] %v488_v51 }
  0xa3   : > { %652 = vst [vmem:[%s1092_s22 + $0x18] sm:$0xff] %v577_v52 }
  0xa5   : > { %v313_v54 = vpop.f32.mrf.mxu0  ;;  %v402_v55 = vpop.f32.mrf.mxu1 }
  0xa6   : > { %886 = vmatmul.msk.f32.gmra.mxu2 %vm220_vm0, %v181_v53  ;;  %910 = vmatmul.msk.f32.gmra.mxu3 %vm220_vm0, %v181_v53  ;;  %653 = vst [vmem:[%s1092_s22 + $0x20] sm:$0xff] %v313_v54 }
  0xa7   : > { %654 = vst [vmem:[%s1092_s22 + $0x28] sm:$0xff] %v402_v55 }
  0xa8   : > { %838 = vmatmul.msk.f32.gmra.mxu0 %vm220_vm0, %v181_v53  ;;  %862 = vmatmul.msk.f32.gmra.mxu1 %vm220_vm0, %v181_v53 }
  0xa9   : > { %v491_v56 = vpop.f32.mrf.mxu2  ;;  %v580_v57 = vpop.f32.mrf.mxu3 }
  0xaa   : > { %655 = vst [vmem:[%s1092_s22 + $0x30] sm:$0xff] %v491_v56 }
  0xab   : > { %656 = vst [vmem:[%s1092_s22 + $0x38] sm:$0xff] %v580_v57 }
  0xad   : > { %v316_v59 = vpop.f32.mrf.mxu0  ;;  %v405_v60 = vpop.f32.mrf.mxu1 }
  0xae   : > { %887 = vmatmul.msk.f32.gmra.mxu2 %vm220_vm0, %v182_v58  ;;  %911 = vmatmul.msk.f32.gmra.mxu3 %vm220_vm0, %v182_v58  ;;  %657 = vst [vmem:[%s1092_s22 + $0x40] sm:$0xff] %v316_v59 }
  0xaf   : > { %658 = vst [vmem:[%s1092_s22 + $0x48] sm:$0xff] %v405_v60 }
  0xb0   : > { %839 = vmatmul.msk.f32.gmra.mxu0 %vm220_vm0, %v182_v58  ;;  %863 = vmatmul.msk.f32.gmra.mxu1 %vm220_vm0, %v182_v58 }
  0xb1   : > { %v494_v61 = vpop.f32.mrf.mxu2  ;;  %v583_v62 = vpop.f32.mrf.mxu3 }
  0xb2   : > { %659 = vst [vmem:[%s1092_s22 + $0x50] sm:$0xff] %v494_v61 }
  0xb3   : > { %660 = vst [vmem:[%s1092_s22 + $0x58] sm:$0xff] %v583_v62 }
  0xb5   : > { %v319_v0 = vpop.f32.mrf.mxu0  ;;  %v408_v1 = vpop.f32.mrf.mxu1 }
  0xb6   : > { %888 = vmatmul.msk.f32.gmra.mxu2 %vm220_vm0, %v183_v63  ;;  %912 = vmatmul.msk.f32.gmra.mxu3 %vm220_vm0, %v183_v63  ;;  %661 = vst [vmem:[%s1092_s22 + $0x60] sm:$0xff] %v319_v0 }
  0xb7   : > { %662 = vst [vmem:[%s1092_s22 + $0x68] sm:$0xff] %v408_v1 }
  0xb8   : > { %840 = vmatmul.msk.f32.gmra.mxu0 %vm220_vm0, %v183_v63  ;;  %864 = vmatmul.msk.f32.gmra.mxu1 %vm220_vm0, %v183_v63 }
  0xb9   : > { %v497_v2 = vpop.f32.mrf.mxu2  ;;  %v586_v3 = vpop.f32.mrf.mxu3 }
  0xba   : > { %663 = vst [vmem:[%s1092_s22 + $0x70] sm:$0xff] %v497_v2 }
  0xbb   : > { %664 = vst [vmem:[%s1092_s22 + $0x78] sm:$0xff] %v586_v3 }
  0xbd   : > { %v322_v5 = vpop.f32.mrf.mxu0  ;;  %v411_v6 = vpop.f32.mrf.mxu1 }
  0xbe   : > { %889 = vmatmul.msk.f32.gmra.mxu2 %vm220_vm0, %v184_v4  ;;  %913 = vmatmul.msk.f32.gmra.mxu3 %vm220_vm0, %v184_v4  ;;  %665 = vst [vmem:[%s1092_s22 + $0x80] sm:$0xff] %v322_v5 }
  0xbf   : > { %666 = vst [vmem:[%s1092_s22 + $0x88] sm:$0xff] %v411_v6 }
  0xc0   : > { %841 = vmatmul.msk.f32.gmra.mxu0 %vm220_vm0, %v184_v4  ;;  %865 = vmatmul.msk.f32.gmra.mxu1 %vm220_vm0, %v184_v4 }
  0xc1   : > { %v500_v7 = vpop.f32.mrf.mxu2  ;;  %v589_v8 = vpop.f32.mrf.mxu3 }
  0xc2   : > { %667 = vst [vmem:[%s1092_s22 + $0x90] sm:$0xff] %v500_v7 }
  0xc3   : > { %668 = vst [vmem:[%s1092_s22 + $0x98] sm:$0xff] %v589_v8 }
  0xc5   : > { %v325_v10 = vpop.f32.mrf.mxu0  ;;  %v414_v11 = vpop.f32.mrf.mxu1 }
  0xc6   : > { %890 = vmatmul.msk.f32.gmra.mxu2 %vm220_vm0, %v185_v9  ;;  %914 = vmatmul.msk.f32.gmra.mxu3 %vm220_vm0, %v185_v9  ;;  %669 = vst [vmem:[%s1092_s22 + $0xa0] sm:$0xff] %v325_v10 }
  0xc7   : > { %670 = vst [vmem:[%s1092_s22 + $0xa8] sm:$0xff] %v414_v11 }
  0xc8   : > { %842 = vmatmul.msk.f32.gmra.mxu0 %vm220_vm0, %v185_v9  ;;  %866 = vmatmul.msk.f32.gmra.mxu1 %vm220_vm0, %v185_v9 }
  0xc9   : > { %v503_v12 = vpop.f32.mrf.mxu2  ;;  %v592_v13 = vpop.f32.mrf.mxu3 }
  0xca   : > { %671 = vst [vmem:[%s1092_s22 + $0xb0] sm:$0xff] %v503_v12 }
  0xcb   : > { %672 = vst [vmem:[%s1092_s22 + $0xb8] sm:$0xff] %v592_v13 }
  0xcd   : > { %v328_v15 = vpop.f32.mrf.mxu0  ;;  %v417_v16 = vpop.f32.mrf.mxu1 }
  0xce   : > { %891 = vmatmul.msk.f32.gmra.mxu2 %vm220_vm0, %v186_v14  ;;  %915 = vmatmul.msk.f32.gmra.mxu3 %vm220_vm0, %v186_v14  ;;  %673 = vst [vmem:[%s1092_s22 + $0xc0] sm:$0xff] %v328_v15 }
  0xcf   : > { %674 = vst [vmem:[%s1092_s22 + $0xc8] sm:$0xff] %v417_v16 }
  0xd0   : > { %843 = vmatmul.msk.f32.gmra.mxu0 %vm220_vm0, %v186_v14  ;;  %867 = vmatmul.msk.f32.gmra.mxu1 %vm220_vm0, %v186_v14 }
  0xd1   : > { %v506_v17 = vpop.f32.mrf.mxu2  ;;  %v595_v18 = vpop.f32.mrf.mxu3 }
  0xd2   : > { %675 = vst [vmem:[%s1092_s22 + $0xd0] sm:$0xff] %v506_v17 }
  0xd3   : > { %676 = vst [vmem:[%s1092_s22 + $0xd8] sm:$0xff] %v595_v18 }
  0xd5   : > { %v331_v20 = vpop.f32.mrf.mxu0  ;;  %v420_v21 = vpop.f32.mrf.mxu1 }
  0xd6   : > { %892 = vmatmul.msk.f32.gmra.mxu2 %vm220_vm0, %v187_v19  ;;  %916 = vmatmul.msk.f32.gmra.mxu3 %vm220_vm0, %v187_v19  ;;  %677 = vst [vmem:[%s1092_s22 + $0xe0] sm:$0xff] %v331_v20 }
  0xd7   : > { %678 = vst [vmem:[%s1092_s22 + $0xe8] sm:$0xff] %v420_v21 }
  0xd8   : > { %844 = vmatmul.msk.f32.gmra.mxu0 %vm220_vm0, %v187_v19  ;;  %868 = vmatmul.msk.f32.gmra.mxu1 %vm220_vm0, %v187_v19 }
  0xd9   : > { %v509_v22 = vpop.f32.mrf.mxu2  ;;  %v598_v23 = vpop.f32.mrf.mxu3 }
  0xda   : > { %679 = vst [vmem:[%s1092_s22 + $0xf0] sm:$0xff] %v509_v22 }
  0xdb   : > { %680 = vst [vmem:[%s1092_s22 + $0xf8] sm:$0xff] %v598_v23 }
  0xdd   : > { %v334_v24 = vpop.f32.mrf.mxu0  ;;  %v423_v25 = vpop.f32.mrf.mxu1 }
  0xde   : > { %681 = vst [vmem:[%s1092_s22 + $0x100] sm:$0xff] %v334_v24 }
  0xdf   : > { %682 = vst [vmem:[%s1092_s22 + $0x108] sm:$0xff] %v423_v25 }
  0xe1   : > { %v512_v26 = vpop.f32.mrf.mxu2  ;;  %v601_v27 = vpop.f32.mrf.mxu3 }
  0xe2   : > { %683 = vst [vmem:[%s1092_s22 + $0x110] sm:$0xff] %v512_v26 }
  0xe3   : > { %684 = vst [vmem:[%s1092_s22 + $0x118] sm:$0xff] %v601_v27 }
  0xe5   : > { %v337_v28 = vpop.f32.mrf.mxu0  ;;  %v426_v29 = vpop.f32.mrf.mxu1 }
  0xe6   : > { %685 = vst [vmem:[%s1092_s22 + $0x120] sm:$0xff] %v337_v28 }
  0xe7   : > { %686 = vst [vmem:[%s1092_s22 + $0x128] sm:$0xff] %v426_v29 }
  0xe9   : > { %v515_v30 = vpop.f32.mrf.mxu2  ;;  %v604_v31 = vpop.f32.mrf.mxu3 }
  0xea   : > { %687 = vst [vmem:[%s1092_s22 + $0x130] sm:$0xff] %v515_v30 }
  0xeb   : > { %688 = vst [vmem:[%s1092_s22 + $0x138] sm:$0xff] %v604_v31 }
  0xed   : > { %v340_v32 = vpop.f32.mrf.mxu0  ;;  %v429_v33 = vpop.f32.mrf.mxu1 }
  0xee   : > { %689 = vst [vmem:[%s1092_s22 + $0x140] sm:$0xff] %v340_v32 }
  0xef   : > { %690 = vst [vmem:[%s1092_s22 + $0x148] sm:$0xff] %v429_v33 }
  0xf1   : > { %v518_v34 = vpop.f32.mrf.mxu2  ;;  %v607_v35 = vpop.f32.mrf.mxu3 }
  0xf2   : > { %691 = vst [vmem:[%s1092_s22 + $0x150] sm:$0xff] %v518_v34 }
  0xf3   : > { %692 = vst [vmem:[%s1092_s22 + $0x158] sm:$0xff] %v607_v35 }
  0xf5   : > { %v343_v36 = vpop.f32.mrf.mxu0  ;;  %v432_v37 = vpop.f32.mrf.mxu1 }
  0xf6   : > { %693 = vst [vmem:[%s1092_s22 + $0x160] sm:$0xff] %v343_v36 }
  0xf7   : > { %694 = vst [vmem:[%s1092_s22 + $0x168] sm:$0xff] %v432_v37 }
  0xf9   : > { %v521_v38 = vpop.f32.mrf.mxu2  ;;  %v610_v39 = vpop.f32.mrf.mxu3 }
  0xfa   : > { %695 = vst [vmem:[%s1092_s22 + $0x170] sm:$0xff] %v521_v38 }
  0xfb   : > { %696 = vst [vmem:[%s1092_s22 + $0x178] sm:$0xff] %v610_v39 }
  0xfd   : > { %v346_v40 = vpop.f32.mrf.mxu0  ;;  %v435_v41 = vpop.f32.mrf.mxu1 }
  0xfe   : > { %697 = vst [vmem:[%s1092_s22 + $0x180] sm:$0xff] %v346_v40 }
  0xff   : > { %698 = vst [vmem:[%s1092_s22 + $0x188] sm:$0xff] %v435_v41 }
 0x101   : > { %v524_v42 = vpop.f32.mrf.mxu2  ;;  %v613_v43 = vpop.f32.mrf.mxu3 }
 0x102   : > { %699 = vst [vmem:[%s1092_s22 + $0x190] sm:$0xff] %v524_v42 }
 0x103   : > { %700 = vst [vmem:[%s1092_s22 + $0x198] sm:$0xff] %v613_v43 }
 0x105   : > { %v349_v44 = vpop.f32.mrf.mxu0  ;;  %v438_v45 = vpop.f32.mrf.mxu1 }
 0x106   : > { %701 = vst [vmem:[%s1092_s22 + $0x1a0] sm:$0xff] %v349_v44 }
 0x107   : > { %702 = vst [vmem:[%s1092_s22 + $0x1a8] sm:$0xff] %v438_v45 }
 0x109   : > { %v527_v46 = vpop.f32.mrf.mxu2  ;;  %v616_v47 = vpop.f32.mrf.mxu3 }
 0x10a   : > { %703 = vst [vmem:[%s1092_s22 + $0x1b0] sm:$0xff] %v527_v46 }
 0x10b   : > { %704 = vst [vmem:[%s1092_s22 + $0x1b8] sm:$0xff] %v616_v47 }
 0x10d   : > { %v352_v48 = vpop.f32.mrf.mxu0  ;;  %v441_v49 = vpop.f32.mrf.mxu1 }
 0x10e   : > { %705 = vst [vmem:[%s1092_s22 + $0x1c0] sm:$0xff] %v352_v48 }
 0x10f   : > { %706 = vst [vmem:[%s1092_s22 + $0x1c8] sm:$0xff] %v441_v49 }
 0x111   : > { %v530_v50 = vpop.f32.mrf.mxu2  ;;  %v619_v51 = vpop.f32.mrf.mxu3 }
 0x112   : > { %707 = vst [vmem:[%s1092_s22 + $0x1d0] sm:$0xff] %v530_v50 }
 0x113   : > { %708 = vst [vmem:[%s1092_s22 + $0x1d8] sm:$0xff] %v619_v51 }
 0x115   : > { %v355_v52 = vpop.f32.mrf.mxu0  ;;  %v444_v53 = vpop.f32.mrf.mxu1 }
 0x116   : > { %709 = vst [vmem:[%s1092_s22 + $0x1e0] sm:$0xff] %v355_v52 }
 0x117   : > { %710 = vst [vmem:[%s1092_s22 + $0x1e8] sm:$0xff] %v444_v53 }
 0x119   : > { %v533_v54 = vpop.f32.mrf.mxu2  ;;  %v622_v55 = vpop.f32.mrf.mxu3 }
 0x11a   : > { %711 = vst [vmem:[%s1092_s22 + $0x1f0] sm:$0xff] %v533_v54 }
 0x11b   : > { %712 = vst [vmem:[%s1092_s22 + $0x1f8] sm:$0xff] %v622_v55 }
 0x11d   : > { %v358_v56 = vpop.f32.mrf.mxu0  ;;  %v447_v57 = vpop.f32.mrf.mxu1 }
 0x11e   : > { %713 = vst [vmem:[%s1092_s22 + $0x200] sm:$0xff] %v358_v56 }
 0x11f   : > { %714 = vst [vmem:[%s1092_s22 + $0x208] sm:$0xff] %v447_v57 }
 0x121   : > { %v536_v58 = vpop.f32.mrf.mxu2  ;;  %v625_v59 = vpop.f32.mrf.mxu3 }
 0x122   : > { %715 = vst [vmem:[%s1092_s22 + $0x210] sm:$0xff] %v536_v58 }
 0x123   : > { %716 = vst [vmem:[%s1092_s22 + $0x218] sm:$0xff] %v625_v59 }
 0x125   : > { %v361_v60 = vpop.f32.mrf.mxu0  ;;  %v450_v61 = vpop.f32.mrf.mxu1 }
 0x126   : > { %717 = vst [vmem:[%s1092_s22 + $0x220] sm:$0xff] %v361_v60 }
 0x127   : > { %718 = vst [vmem:[%s1092_s22 + $0x228] sm:$0xff] %v450_v61 }
 0x129   : > { %v539_v62 = vpop.f32.mrf.mxu2  ;;  %v628_v63 = vpop.f32.mrf.mxu3 }
 0x12a   : > { %719 = vst [vmem:[%s1092_s22 + $0x230] sm:$0xff] %v539_v62 }
 0x12b   : > { %720 = vst [vmem:[%s1092_s22 + $0x238] sm:$0xff] %v628_v63 }
 0x12d   : > { %v364_v0 = vpop.f32.mrf.mxu0  ;;  %v453_v1 = vpop.f32.mrf.mxu1 }
 0x12e   : > { %721 = vst [vmem:[%s1092_s22 + $0x240] sm:$0xff] %v364_v0 }
 0x12f   : > { %722 = vst [vmem:[%s1092_s22 + $0x248] sm:$0xff] %v453_v1 }
 0x131   : > { %v542_v2 = vpop.f32.mrf.mxu2  ;;  %v631_v3 = vpop.f32.mrf.mxu3 }
 0x132   : > { %723 = vst [vmem:[%s1092_s22 + $0x250] sm:$0xff] %v542_v2 }
 0x133   : > { %724 = vst [vmem:[%s1092_s22 + $0x258] sm:$0xff] %v631_v3 }
 0x135   : > { %v367_v4 = vpop.f32.mrf.mxu0  ;;  %v456_v5 = vpop.f32.mrf.mxu1 }
 0x136   : > { %725 = vst [vmem:[%s1092_s22 + $0x260] sm:$0xff] %v367_v4 }
 0x137   : > { %726 = vst [vmem:[%s1092_s22 + $0x268] sm:$0xff] %v456_v5 }
 0x139   : > { %v545_v6 = vpop.f32.mrf.mxu2  ;;  %v634_v7 = vpop.f32.mrf.mxu3 }
 0x13a   : > { %727 = vst [vmem:[%s1092_s22 + $0x270] sm:$0xff] %v545_v6 }
 0x13b   : > { %728 = vst [vmem:[%s1092_s22 + $0x278] sm:$0xff] %v634_v7 }
 0x13d   : > { %v370_v8 = vpop.f32.mrf.mxu0  ;;  %v459_v9 = vpop.f32.mrf.mxu1 }
 0x13e   : > { %729 = vst [vmem:[%s1092_s22 + $0x280] sm:$0xff] %v370_v8 }
 0x13f   : > { %730 = vst [vmem:[%s1092_s22 + $0x288] sm:$0xff] %v459_v9 }
 0x141   : > { %v548_v10 = vpop.f32.mrf.mxu2  ;;  %v637_v11 = vpop.f32.mrf.mxu3 }
 0x142   : > { %731 = vst [vmem:[%s1092_s22 + $0x290] sm:$0xff] %v548_v10 }
 0x143   : > { %732 = vst [vmem:[%s1092_s22 + $0x298] sm:$0xff] %v637_v11 }
 0x145   : > { %v373_v12 = vpop.f32.mrf.mxu0  ;;  %v462_v13 = vpop.f32.mrf.mxu1 }
 0x146   : > { %733 = vst [vmem:[%s1092_s22 + $0x2a0] sm:$0xff] %v373_v12 }
 0x147   : > { %734 = vst [vmem:[%s1092_s22 + $0x2a8] sm:$0xff] %v462_v13 }
 0x149   : > { %v551_v14 = vpop.f32.mrf.mxu2  ;;  %v640_v15 = vpop.f32.mrf.mxu3 }
 0x14a   : > { %735 = vst [vmem:[%s1092_s22 + $0x2b0] sm:$0xff] %v551_v14 }
 0x14b   : > { %736 = vst [vmem:[%s1092_s22 + $0x2b8] sm:$0xff] %v640_v15 }
 0x14d   : > { %v376_v16 = vpop.f32.mrf.mxu0  ;;  %v465_v17 = vpop.f32.mrf.mxu1 }
 0x14e   : > { %737 = vst [vmem:[%s1092_s22 + $0x2c0] sm:$0xff] %v376_v16 }
 0x14f   : > { %738 = vst [vmem:[%s1092_s22 + $0x2c8] sm:$0xff] %v465_v17 }
 0x151   : > { %v554_v18 = vpop.f32.mrf.mxu2  ;;  %v643_v19 = vpop.f32.mrf.mxu3 }
 0x152   : > { %739 = vst [vmem:[%s1092_s22 + $0x2d0] sm:$0xff] %v554_v18 }
 0x153   : > { %740 = vst [vmem:[%s1092_s22 + $0x2d8] sm:$0xff] %v643_v19 }
 0x155   : > { %v379_v20 = vpop.f32.mrf.mxu0  ;;  %v468_v21 = vpop.f32.mrf.mxu1 }
 0x156   : > { %741 = vst [vmem:[%s1092_s22 + $0x2e0] sm:$0xff] %v379_v20 }
 0x157   : > { %742 = vst [vmem:[%s1092_s22 + $0x2e8] sm:$0xff] %v468_v21 }
 0x159   : > { %v557_v22 = vpop.f32.mrf.mxu2  ;;  %v646_v23 = vpop.f32.mrf.mxu3 }
 0x15a   : > { %743 = vst [vmem:[%s1092_s22 + $0x2f0] sm:$0xff] %v557_v22 }
 0x15b   : > { %744 = vst [vmem:[%s1092_s22 + $0x2f8] sm:$0xff] %v646_v23 }
 0x15c PF: > { %s12_s9 = sadd.s32 1, %s936_s9  }
 0x15d   : > { %p9_p4 = scmp.ge.s32.totalorder %s12_s9, 4  }
 0x15f   :  { %11 = sbr.rel (!%p9_p4) target bundleno = 1 (0x1), region = 61 }

</bundles_post_ra>
